<compile_context>
chip_gen: v7x
topology: tpu7x:2x2x1
jax: 0.10.0
libtpu: 0.0.40
codegen_flags: <defaults>
</compile_context>

<pallas_src>
import functools

import jax
import jax.numpy as jnp
from jax.experimental import pallas as pl
from jax.experimental.pallas import tpu as pltpu


PARAM_ORDER = (
    "emb_w", "emb_b", "in_proj_w", "in_proj_b", "out_proj_w", "out_proj_b",
    "lin1_w", "lin1_b", "lin2_w", "lin2_b",
    "ln1_w", "ln1_b", "ln2_w", "ln2_b", "fc_w", "fc_b",
)
_NP = len(PARAM_ORDER)


# ----------------------------------------------------------------------------- stage
def _transformer_stage(x, tb, seq, num_heads, p):
    """One TransformerModel forward on `tb` sequences of length `seq`.

    x : (tb*seq, d_in) f32 — flattened sequences.
    p : tuple of 16 VMEM refs, in PARAM_ORDER order.
    returns (tb, d_out) f32.
    """
    (emb_w, emb_b, in_proj_w, in_proj_b, out_proj_w, out_proj_b,
     lin1_w, lin1_b, lin2_w, lin2_b,
     ln1_w, ln1_b, ln2_w, ln2_b, fc_w, fc_b) = p

    f32 = jnp.float32
    m = tb * seq
    hidden = emb_w.shape[1]
    hd = hidden // num_heads
    scale = 1.0 / float(hd) ** 0.5
    eps = 1e-5

    # --- embedding Linear (M = tb*seq rows through the MXU) ---------------------
    emb = jnp.dot(x, emb_w[...], preferred_element_type=f32) + emb_b[...]      # (m, H)

    # --- key padding mask (on embedded features, matching the PyTorch module;
    #     position 0 is never padded) ---------------------------------------------
    emb3 = emb.reshape(tb, seq, hidden)
    row_sum = jnp.sum(emb3, axis=-1)                                           # (tb, seq)
    pos = jax.lax.broadcasted_iota(jnp.int32, (tb, seq), 1)                    # (tb, seq)
    key_pad = jnp.logical_and(row_sum == 0.0, pos != 0)                        # True = pad
    bias = jnp.where(key_pad, f32(-1e30), f32(0.0))[:, None, :]                # (tb, 1, seq)

    # --- multi-head self-attention ------------------------------------------------
    qkv = jnp.dot(emb, in_proj_w[...], preferred_element_type=f32) + in_proj_b[...]
    q = qkv[:, 0:hidden].reshape(tb, seq, hidden)
    k = qkv[:, hidden:2 * hidden].reshape(tb, seq, hidden)
    v = qkv[:, 2 * hidden:3 * hidden].reshape(tb, seq, hidden)

    ctx_heads = []
    for h in range(num_heads):                       # static unrolled head loop
        sl = slice(h * hd, (h + 1) * hd)
        qh, kh, vh = q[:, :, sl], k[:, :, sl], v[:, :, sl]                     # (tb, seq, hd)
        scores = jnp.einsum("bqd,bkd->bqk", qh, kh,
                            preferred_element_type=f32) * scale + bias         # (tb, seq, seq)
        mx = jnp.max(scores, axis=-1, keepdims=True)
        e = jnp.exp(scores - mx)
        probs = e / jnp.sum(e, axis=-1, keepdims=True)
        ctx_heads.append(jnp.einsum("bqk,bkd->bqd", probs, vh,
                                    preferred_element_type=f32))               # (tb, seq, hd)
    # concat-of-heads then ONE output projection matmul
    ctx = jnp.concatenate(ctx_heads, axis=-1).reshape(m, hidden)               # (m, H)
    attn = jnp.dot(ctx, out_proj_w[...], preferred_element_type=f32) + out_proj_b[...]

    # --- post-norm encoder layer (LN -> FFN(relu) -> LN) ---------------------------
    def layer_norm(t, w, b):
        mu = jnp.mean(t, axis=-1, keepdims=True)
        var = jnp.mean((t - mu) ** 2, axis=-1, keepdims=True)
        return (t - mu) / jnp.sqrt(var + eps) * w + b

    x1 = layer_norm(emb + attn, ln1_w[...], ln1_b[...])                        # (m, H)
    h1 = jnp.maximum(
        jnp.dot(x1, lin1_w[...], preferred_element_type=f32) + lin1_b[...], 0.0)
    h2 = jnp.dot(h1, lin2_w[...], preferred_element_type=f32) + lin2_b[...]
    x2 = layer_norm(x1 + h2, ln2_w[...], ln2_b[...])                           # (m, H)

    # --- select last non-padded position per sequence (one-hot selection matmul) --
    valid = jnp.logical_not(key_pad)                                           # (tb, seq)
    last_idx = jnp.max(jnp.where(valid, pos, -1), axis=1, keepdims=True)       # (tb, 1)
    col = jax.lax.broadcasted_iota(jnp.int32, (tb, m), 1)                      # (tb, m)
    row = jax.lax.broadcasted_iota(jnp.int32, (tb, m), 0)                      # (tb, m)
    sel = (col == row * seq + last_idx).astype(f32)                            # (tb, m)
    last_out = jnp.dot(sel, x2, preferred_element_type=f32)                    # (tb, H)

    # --- final Linear ---------------------------------------------------------------
    return jnp.dot(last_out, fc_w[...], preferred_element_type=f32) + fc_b[...]


# ----------------------------------------------------------------------------- kernel
def memory_module_kernel(mem_ref, *refs, s1, s2, obs_heads, mem_heads):
    obs_p = refs[:_NP]
    mem_p = refs[_NP:2 * _NP]
    out_ref = refs[2 * _NP]

    x_obs = mem_ref[0]                                                         # (s1*s2, Din)
    obstacle_feature = _transformer_stage(x_obs, s1, s2, obs_heads, obs_p)     # (s1, obs_out)
    # memory stage on the on-chip intermediate (tb=1 sequence of length s1)
    out_ref[0] = _transformer_stage(obstacle_feature, 1, s1, mem_heads, mem_p)  # (1, mem_out)


# ----------------------------------------------------------------------------- wrapper
def memory_module_forward(memory, obstacle_params, memory_params,
                          obstacle_heads, memory_heads):
    """memory: (B, S1, S2, Din) -> (B, out_dim).  Mirrors Memory_Module.forward."""
    B, S1, S2, Din = memory.shape
    Dout = memory_params["fc_w"].shape[1]
    obs_w = [obstacle_params[n] for n in PARAM_ORDER]
    mem_w = [memory_params[n] for n in PARAM_ORDER]

    def weight_spec(arr):
        return pl.BlockSpec(arr.shape, lambda b: (0, 0))

    # flatten (S1, S2) outside the kernel (free layout plumbing in XLA)
    mem_flat = memory.reshape(B, S1 * S2, Din)

    out = pl.pallas_call(
        functools.partial(memory_module_kernel, s1=S1, s2=S2,
                          obs_heads=obstacle_heads, mem_heads=memory_heads),
        out_shape=jax.ShapeDtypeStruct((B, 1, Dout), jnp.float32),
        grid=(B,),
        in_specs=[pl.BlockSpec((1, S1 * S2, Din), lambda b: (b, 0, 0))]
                 + [weight_spec(w) for w in obs_w]
                 + [weight_spec(w) for w in mem_w],
        out_specs=pl.BlockSpec((1, 1, Dout), lambda b: (b, 0, 0)),
        compiler_params=pltpu.CompilerParams(dimension_semantics=("parallel",)),
    )(mem_flat, *obs_w, *mem_w)
    return out.reshape(B, Dout)


# ----------------------------------------------------------------------------- params
def init_transformer_params(key, input_size, hidden_size, output_size, ff_size=2048):
    ks = jax.random.split(key, 12)

    def lin_w(k, fan_in, fan_out):
        return (jax.random.normal(k, (fan_in, fan_out), jnp.float32)
                / jnp.sqrt(jnp.float32(fan_in)))

    def lin_b(k, fan_out):
        return jax.random.normal(k, (1, fan_out), jnp.float32) * 0.01

    return dict(
        emb_w=lin_w(ks[0], input_size, hidden_size),
        emb_b=lin_b(ks[1], hidden_size),
        in_proj_w=lin_w(ks[2], hidden_size, 3 * hidden_size),
        in_proj_b=lin_b(ks[3], 3 * hidden_size),
        out_proj_w=lin_w(ks[4], hidden_size, hidden_size),
        out_proj_b=lin_b(ks[5], hidden_size),
        lin1_w=lin_w(ks[6], hidden_size, ff_size),
        lin1_b=lin_b(ks[7], ff_size),
        lin2_w=lin_w(ks[8], ff_size, hidden_size),
        lin2_b=lin_b(ks[9], hidden_size),
        ln1_w=jnp.ones((1, hidden_size), jnp.float32),
        ln1_b=jnp.zeros((1, hidden_size), jnp.float32),
        ln2_w=jnp.ones((1, hidden_size), jnp.float32),
        ln2_b=jnp.zeros((1, hidden_size), jnp.float32),
        fc_w=lin_w(ks[10], hidden_size, output_size),
        fc_b=lin_b(ks[11], output_size),
    )


# ----------------------------------------------------------------------------- reference
def transformer_model_ref(x, p, nh):
    emb = x @ p["emb_w"] + p["emb_b"][0]
    mask = (emb.sum(-1) == 0)
    mask = mask.at[:, 0].set(False)
    N, L, H = emb.shape
    hd = H // nh
    qkv = emb @ p["in_proj_w"] + p["in_proj_b"][0]
    q, k, v = qkv[..., :H], qkv[..., H:2 * H], qkv[..., 2 * H:]

    def heads(t):
        return t.reshape(N, L, nh, hd).transpose(0, 2, 1, 3)

    qh, kh, vh = heads(q), heads(k), heads(v)
    scores = jnp.einsum("bhqd,bhkd->bhqk", qh, kh) * (1.0 / (hd ** 0.5))
    scores = jnp.where(mask[:, None, None, :], -1e30, scores)
    probs = jax.nn.softmax(scores, axis=-1)
    ctx = jnp.einsum("bhqk,bhkd->bhqd", probs, vh).transpose(0, 2, 1, 3).reshape(N, L, H)
    attn = ctx @ p["out_proj_w"] + p["out_proj_b"][0]

    def layer_norm(t, w, b):
        mu = t.mean(-1, keepdims=True)
        var = ((t - mu) ** 2).mean(-1, keepdims=True)
        return (t - mu) / jnp.sqrt(var + 1e-5) * w + b

    x1 = layer_norm(emb + attn, p["ln1_w"][0], p["ln1_b"][0])
    ff = jnp.maximum(x1 @ p["lin1_w"] + p["lin1_b"][0], 0.0) @ p["lin2_w"] + p["lin2_b"][0]
    x2 = layer_norm(x1 + ff, p["ln2_w"][0], p["ln2_b"][0])

    valid = ~mask
    idx = jnp.arange(L)
    last_idx = jnp.max(jnp.where(valid, idx[None, :], -1), axis=1)
    last_out = x2[jnp.arange(N), last_idx]
    return last_out @ p["fc_w"] + p["fc_b"][0]


def memory_module_ref(memory, op, mp, oh, mh):
    B, S1, S2, D = memory.shape
    of = transformer_model_ref(memory.reshape(B * S1, S2, D), op, oh)
    of = of.reshape(B, S1, -1)
    return transformer_model_ref(of, mp, mh)


# ----------------------------------------------------------------------------- main
if __name__ == "__main__":
    B, S1, S2 = 2, 8, 8
    INPUT_DIM = 4          # per-obstacle feature dim
    OBS_HIDDEN, OBS_OUT, OBS_HEADS = 32, 16, 8
    MEM_HIDDEN, MEM_OUT, MEM_HEADS = 32, 8, 8
    FF = 2048              # nn.TransformerEncoderLayer default dim_feedforward

    root = jax.random.PRNGKey(0)
    k_mem, k_obs, k_mmod = jax.random.split(root, 3)

    memory = jax.random.normal(k_mem, (B, S1, S2, INPUT_DIM), jnp.float32)

    obstacle_params = init_transformer_params(k_obs, INPUT_DIM, OBS_HIDDEN, OBS_OUT, FF)
    memory_params = init_transformer_params(k_mmod, OBS_OUT, MEM_HIDDEN, MEM_OUT, FF)

    out = memory_module_forward(memory, obstacle_params, memory_params,
                                OBS_HEADS, MEM_HEADS)
    out = jax.block_until_ready(out)

    ref = memory_module_ref(memory, obstacle_params, memory_params,
                            OBS_HEADS, MEM_HEADS)
    assert out.shape == (B, MEM_OUT), out.shape
    assert jnp.allclose(out, ref, rtol=1e-2, atol=1e-3), \
        f"max abs err {jnp.max(jnp.abs(out - ref))}"

    print("KERNEL_OK")
</pallas_src>

<mosaic_0001>
module attributes {stable_mosaic.version = 11 : i64} {
  func.func @memory_module_kernel(%arg0: i32, %arg1: memref<1x64x4xf32, #tpu.memory_space<vmem>>, %arg2: memref<4x32xf32, #tpu.memory_space<vmem>>, %arg3: memref<1x32xf32, #tpu.memory_space<vmem>>, %arg4: memref<32x96xf32, #tpu.memory_space<vmem>>, %arg5: memref<1x96xf32, #tpu.memory_space<vmem>>, %arg6: memref<32x32xf32, #tpu.memory_space<vmem>>, %arg7: memref<1x32xf32, #tpu.memory_space<vmem>>, %arg8: memref<32x2048xf32, #tpu.memory_space<vmem>>, %arg9: memref<1x2048xf32, #tpu.memory_space<vmem>>, %arg10: memref<2048x32xf32, #tpu.memory_space<vmem>>, %arg11: memref<1x32xf32, #tpu.memory_space<vmem>>, %arg12: memref<1x32xf32, #tpu.memory_space<vmem>>, %arg13: memref<1x32xf32, #tpu.memory_space<vmem>>, %arg14: memref<1x32xf32, #tpu.memory_space<vmem>>, %arg15: memref<1x32xf32, #tpu.memory_space<vmem>>, %arg16: memref<32x16xf32, #tpu.memory_space<vmem>>, %arg17: memref<1x16xf32, #tpu.memory_space<vmem>>, %arg18: memref<16x32xf32, #tpu.memory_space<vmem>>, %arg19: memref<1x32xf32, #tpu.memory_space<vmem>>, %arg20: memref<32x96xf32, #tpu.memory_space<vmem>>, %arg21: memref<1x96xf32, #tpu.memory_space<vmem>>, %arg22: memref<32x32xf32, #tpu.memory_space<vmem>>, %arg23: memref<1x32xf32, #tpu.memory_space<vmem>>, %arg24: memref<32x2048xf32, #tpu.memory_space<vmem>>, %arg25: memref<1x2048xf32, #tpu.memory_space<vmem>>, %arg26: memref<2048x32xf32, #tpu.memory_space<vmem>>, %arg27: memref<1x32xf32, #tpu.memory_space<vmem>>, %arg28: memref<1x32xf32, #tpu.memory_space<vmem>>, %arg29: memref<1x32xf32, #tpu.memory_space<vmem>>, %arg30: memref<1x32xf32, #tpu.memory_space<vmem>>, %arg31: memref<1x32xf32, #tpu.memory_space<vmem>>, %arg32: memref<32x8xf32, #tpu.memory_space<vmem>>, %arg33: memref<1x8xf32, #tpu.memory_space<vmem>>, %arg34: memref<1x1x8xf32, #tpu.memory_space<vmem>>) attributes {dimension_semantics = [#tpu.dimension_semantics<parallel>], iteration_bounds = array<i64: 2>, scalar_prefetch = 0 : i64, scratch_operands = 0 : i64, tpu.core_type = #tpu.core_type<tc>, window_params = [{transform_indices = @transform_0, window_bounds = array<i64: 1, 64, 4>}, {pipeline_mode = #tpu.pipeline_mode<synchronous>, transform_indices = @transform_1, window_bounds = array<i64: 4, 32>}, {pipeline_mode = #tpu.pipeline_mode<synchronous>, transform_indices = @transform_2, window_bounds = array<i64: 1, 32>}, {pipeline_mode = #tpu.pipeline_mode<synchronous>, transform_indices = @transform_3, window_bounds = array<i64: 32, 96>}, {pipeline_mode = #tpu.pipeline_mode<synchronous>, transform_indices = @transform_4, window_bounds = array<i64: 1, 96>}, {pipeline_mode = #tpu.pipeline_mode<synchronous>, transform_indices = @transform_5, window_bounds = array<i64: 32, 32>}, {pipeline_mode = #tpu.pipeline_mode<synchronous>, transform_indices = @transform_6, window_bounds = array<i64: 1, 32>}, {pipeline_mode = #tpu.pipeline_mode<synchronous>, transform_indices = @transform_7, window_bounds = array<i64: 32, 2048>}, {pipeline_mode = #tpu.pipeline_mode<synchronous>, transform_indices = @transform_8, window_bounds = array<i64: 1, 2048>}, {pipeline_mode = #tpu.pipeline_mode<synchronous>, transform_indices = @transform_9, window_bounds = array<i64: 2048, 32>}, {pipeline_mode = #tpu.pipeline_mode<synchronous>, transform_indices = @transform_10, window_bounds = array<i64: 1, 32>}, {pipeline_mode = #tpu.pipeline_mode<synchronous>, transform_indices = @transform_11, window_bounds = array<i64: 1, 32>}, {pipeline_mode = #tpu.pipeline_mode<synchronous>, transform_indices = @transform_12, window_bounds = array<i64: 1, 32>}, {pipeline_mode = #tpu.pipeline_mode<synchronous>, transform_indices = @transform_13, window_bounds = array<i64: 1, 32>}, {pipeline_mode = #tpu.pipeline_mode<synchronous>, transform_indices = @transform_14, window_bounds = array<i64: 1, 32>}, {pipeline_mode = #tpu.pipeline_mode<synchronous>, transform_indices = @transform_15, window_bounds = array<i64: 32, 16>}, {pipeline_mode = #tpu.pipeline_mode<synchronous>, transform_indices = @transform_16, window_bounds = array<i64: 1, 16>}, {pipeline_mode = #tpu.pipeline_mode<synchronous>, transform_indices = @transform_17, window_bounds = array<i64: 16, 32>}, {pipeline_mode = #tpu.pipeline_mode<synchronous>, transform_indices = @transform_18, window_bounds = array<i64: 1, 32>}, {pipeline_mode = #tpu.pipeline_mode<synchronous>, transform_indices = @transform_19, window_bounds = array<i64: 32, 96>}, {pipeline_mode = #tpu.pipeline_mode<synchronous>, transform_indices = @transform_20, window_bounds = array<i64: 1, 96>}, {pipeline_mode = #tpu.pipeline_mode<synchronous>, transform_indices = @transform_21, window_bounds = array<i64: 32, 32>}, {pipeline_mode = #tpu.pipeline_mode<synchronous>, transform_indices = @transform_22, window_bounds = array<i64: 1, 32>}, {pipeline_mode = #tpu.pipeline_mode<synchronous>, transform_indices = @transform_23, window_bounds = array<i64: 32, 2048>}, {pipeline_mode = #tpu.pipeline_mode<synchronous>, transform_indices = @transform_24, window_bounds = array<i64: 1, 2048>}, {pipeline_mode = #tpu.pipeline_mode<synchronous>, transform_indices = @transform_25, window_bounds = array<i64: 2048, 32>}, {pipeline_mode = #tpu.pipeline_mode<synchronous>, transform_indices = @transform_26, window_bounds = array<i64: 1, 32>}, {pipeline_mode = #tpu.pipeline_mode<synchronous>, transform_indices = @transform_27, window_bounds = array<i64: 1, 32>}, {pipeline_mode = #tpu.pipeline_mode<synchronous>, transform_indices = @transform_28, window_bounds = array<i64: 1, 32>}, {pipeline_mode = #tpu.pipeline_mode<synchronous>, transform_indices = @transform_29, window_bounds = array<i64: 1, 32>}, {pipeline_mode = #tpu.pipeline_mode<synchronous>, transform_indices = @transform_30, window_bounds = array<i64: 1, 32>}, {pipeline_mode = #tpu.pipeline_mode<synchronous>, transform_indices = @transform_31, window_bounds = array<i64: 32, 8>}, {pipeline_mode = #tpu.pipeline_mode<synchronous>, transform_indices = @transform_32, window_bounds = array<i64: 1, 8>}, {transform_indices = @transform_33, window_bounds = array<i64: 1, 1, 8>}]} {
    %c0 = arith.constant 0 : index
    %c0_0 = arith.constant 0 : index
    %c0_1 = arith.constant 0 : index
    %0 = vector.load %arg1[%c0, %c0_0, %c0_1] : memref<1x64x4xf32, #tpu.memory_space<vmem>>, vector<1x64x4xf32>
    %1 = vector.shape_cast %0 : vector<1x64x4xf32> to vector<64x4xf32>
    %c0_2 = arith.constant 0 : index
    %c0_3 = arith.constant 0 : index
    %2 = vector.load %arg2[%c0_2, %c0_3] : memref<4x32xf32, #tpu.memory_space<vmem>>, vector<4x32xf32>
    %cst = arith.constant dense<0.000000e+00> : vector<64x32xf32>
    %3 = tpu.matmul %1, %2, %cst {dimension_numbers = #tpu.dot_dimension_numbers<[1], [0], [0], [1], [0, 0, 1, 1], [], []>} : vector<64x4xf32>, vector<4x32xf32>, vector<64x32xf32> -> vector<64x32xf32>
    %c0_4 = arith.constant 0 : index
    %c0_5 = arith.constant 0 : index
    %4 = vector.load %arg3[%c0_4, %c0_5] : memref<1x32xf32, #tpu.memory_space<vmem>>, vector<1x32xf32>
    %5 = vector.broadcast %4 : vector<1x32xf32> to vector<64x32xf32>
    %6 = arith.addf %3, %5 : vector<64x32xf32>
    %7 = vector.shape_cast %6 : vector<64x32xf32> to vector<8x8x32xf32>
    %cst_6 = arith.constant dense<0.000000e+00> : vector<8x8xf32>
    %8 = vector.multi_reduction <add>, %7, %cst_6 [2] : vector<8x8x32xf32> to vector<8x8xf32>
    %9 = tpu.iota {dimensions = array<i32: 1>} : vector<8x8xi32>
    %cst_7 = arith.constant 0.000000e+00 : f32
    %10 = vector.broadcast %cst_7 : f32 to vector<8x8xf32>
    %11 = arith.cmpf oeq, %8, %10 : vector<8x8xf32>
    %c0_i32 = arith.constant 0 : i32
    %12 = vector.broadcast %c0_i32 : i32 to vector<8x8xi32>
    %13 = arith.cmpi ne, %9, %12 : vector<8x8xi32>
    %14 = arith.andi %11, %13 : vector<8x8xi1>
    %cst_8 = arith.constant -1.000000e+30 : f32
    %cst_9 = arith.constant 0.000000e+00 : f32
    %15 = vector.broadcast %cst_8 : f32 to vector<8x8xf32>
    %16 = vector.broadcast %cst_9 : f32 to vector<8x8xf32>
    %17 = arith.select %14, %15, %16 : vector<8x8xi1>, vector<8x8xf32>
    %18 = vector.shape_cast %17 : vector<8x8xf32> to vector<8x1x8xf32>
    %c0_10 = arith.constant 0 : index
    %c0_11 = arith.constant 0 : index
    %19 = vector.load %arg4[%c0_10, %c0_11] : memref<32x96xf32, #tpu.memory_space<vmem>>, vector<32x96xf32>
    %cst_12 = arith.constant dense<0.000000e+00> : vector<64x96xf32>
    %20 = tpu.matmul %6, %19, %cst_12 {dimension_numbers = #tpu.dot_dimension_numbers<[1], [0], [0], [1], [0, 0, 1, 1], [], []>} : vector<64x32xf32>, vector<32x96xf32>, vector<64x96xf32> -> vector<64x96xf32>
    %c0_13 = arith.constant 0 : index
    %c0_14 = arith.constant 0 : index
    %21 = vector.load %arg5[%c0_13, %c0_14] : memref<1x96xf32, #tpu.memory_space<vmem>>, vector<1x96xf32>
    %22 = vector.broadcast %21 : vector<1x96xf32> to vector<64x96xf32>
    %23 = arith.addf %20, %22 : vector<64x96xf32>
    %24 = vector.extract_strided_slice %23 {offsets = [0, 0], sizes = [64, 32], strides = [1, 1]} : vector<64x96xf32> to vector<64x32xf32>
    %25 = vector.shape_cast %24 : vector<64x32xf32> to vector<8x8x32xf32>
    %26 = vector.extract_strided_slice %23 {offsets = [0, 32], sizes = [64, 32], strides = [1, 1]} : vector<64x96xf32> to vector<64x32xf32>
    %27 = vector.shape_cast %26 : vector<64x32xf32> to vector<8x8x32xf32>
    %28 = vector.extract_strided_slice %23 {offsets = [0, 64], sizes = [64, 32], strides = [1, 1]} : vector<64x96xf32> to vector<64x32xf32>
    %29 = vector.shape_cast %28 : vector<64x32xf32> to vector<8x8x32xf32>
    %30 = vector.extract_strided_slice %25 {offsets = [0, 0, 0], sizes = [8, 8, 4], strides = [1, 1, 1]} : vector<8x8x32xf32> to vector<8x8x4xf32>
    %31 = vector.extract_strided_slice %27 {offsets = [0, 0, 0], sizes = [8, 8, 4], strides = [1, 1, 1]} : vector<8x8x32xf32> to vector<8x8x4xf32>
    %32 = vector.extract_strided_slice %29 {offsets = [0, 0, 0], sizes = [8, 8, 4], strides = [1, 1, 1]} : vector<8x8x32xf32> to vector<8x8x4xf32>
    "tpu.trace_start"() <{level = 10 : i32, message = "bqd,bkd->bqk"}> : () -> ()
    %cst_15 = arith.constant dense<0.000000e+00> : vector<8x8x8xf32>
    %33 = tpu.matmul %30, %31, %cst_15 {dimension_numbers = #tpu.dot_dimension_numbers<[2], [2], [1], [1], [0, 0, 0, 1, 1, 1], [0], [0]>} : vector<8x8x4xf32>, vector<8x8x4xf32>, vector<8x8x8xf32> -> vector<8x8x8xf32>
    "tpu.trace_stop"() : () -> ()
    %cst_16 = arith.constant 5.000000e-01 : f32
    %34 = vector.broadcast %cst_16 : f32 to vector<8x8x8xf32>
    %35 = arith.mulf %33, %34 : vector<8x8x8xf32>
    %36 = vector.broadcast %18 : vector<8x1x8xf32> to vector<8x8x8xf32>
    %37 = arith.addf %35, %36 : vector<8x8x8xf32>
    %cst_17 = arith.constant dense<0xFF800000> : vector<8x8xf32>
    %38 = vector.multi_reduction <maximumf>, %37, %cst_17 [2] : vector<8x8x8xf32> to vector<8x8xf32>
    %39 = vector.shape_cast %38 : vector<8x8xf32> to vector<8x8x1xf32>
    %40 = vector.broadcast %39 : vector<8x8x1xf32> to vector<8x8x8xf32>
    %41 = arith.subf %37, %40 : vector<8x8x8xf32>
    %42 = math.exp %41 : vector<8x8x8xf32>
    %cst_18 = arith.constant dense<0.000000e+00> : vector<8x8xf32>
    %43 = vector.multi_reduction <add>, %42, %cst_18 [2] : vector<8x8x8xf32> to vector<8x8xf32>
    %44 = vector.shape_cast %43 : vector<8x8xf32> to vector<8x8x1xf32>
    %45 = vector.broadcast %44 : vector<8x8x1xf32> to vector<8x8x8xf32>
    %46 = arith.divf %42, %45 : vector<8x8x8xf32>
    "tpu.trace_start"() <{level = 10 : i32, message = "bqk,bkd->bqd"}> : () -> ()
    %cst_19 = arith.constant dense<0.000000e+00> : vector<8x8x4xf32>
    %47 = tpu.matmul %46, %32, %cst_19 {dimension_numbers = #tpu.dot_dimension_numbers<[2], [1], [1], [2], [0, 0, 0, 1, 1, 2], [0], [0]>} : vector<8x8x8xf32>, vector<8x8x4xf32>, vector<8x8x4xf32> -> vector<8x8x4xf32>
    "tpu.trace_stop"() : () -> ()
    %48 = vector.extract_strided_slice %25 {offsets = [0, 0, 4], sizes = [8, 8, 4], strides = [1, 1, 1]} : vector<8x8x32xf32> to vector<8x8x4xf32>
    %49 = vector.extract_strided_slice %27 {offsets = [0, 0, 4], sizes = [8, 8, 4], strides = [1, 1, 1]} : vector<8x8x32xf32> to vector<8x8x4xf32>
    %50 = vector.extract_strided_slice %29 {offsets = [0, 0, 4], sizes = [8, 8, 4], strides = [1, 1, 1]} : vector<8x8x32xf32> to vector<8x8x4xf32>
    "tpu.trace_start"() <{level = 10 : i32, message = "bqd,bkd->bqk"}> : () -> ()
    %cst_20 = arith.constant dense<0.000000e+00> : vector<8x8x8xf32>
    %51 = tpu.matmul %48, %49, %cst_20 {dimension_numbers = #tpu.dot_dimension_numbers<[2], [2], [1], [1], [0, 0, 0, 1, 1, 1], [0], [0]>} : vector<8x8x4xf32>, vector<8x8x4xf32>, vector<8x8x8xf32> -> vector<8x8x8xf32>
    "tpu.trace_stop"() : () -> ()
    %cst_21 = arith.constant 5.000000e-01 : f32
    %52 = vector.broadcast %cst_21 : f32 to vector<8x8x8xf32>
    %53 = arith.mulf %51, %52 : vector<8x8x8xf32>
    %54 = vector.broadcast %18 : vector<8x1x8xf32> to vector<8x8x8xf32>
    %55 = arith.addf %53, %54 : vector<8x8x8xf32>
    %cst_22 = arith.constant dense<0xFF800000> : vector<8x8xf32>
    %56 = vector.multi_reduction <maximumf>, %55, %cst_22 [2] : vector<8x8x8xf32> to vector<8x8xf32>
    %57 = vector.shape_cast %56 : vector<8x8xf32> to vector<8x8x1xf32>
    %58 = vector.broadcast %57 : vector<8x8x1xf32> to vector<8x8x8xf32>
    %59 = arith.subf %55, %58 : vector<8x8x8xf32>
    %60 = math.exp %59 : vector<8x8x8xf32>
    %cst_23 = arith.constant dense<0.000000e+00> : vector<8x8xf32>
    %61 = vector.multi_reduction <add>, %60, %cst_23 [2] : vector<8x8x8xf32> to vector<8x8xf32>
    %62 = vector.shape_cast %61 : vector<8x8xf32> to vector<8x8x1xf32>
    %63 = vector.broadcast %62 : vector<8x8x1xf32> to vector<8x8x8xf32>
    %64 = arith.divf %60, %63 : vector<8x8x8xf32>
    "tpu.trace_start"() <{level = 10 : i32, message = "bqk,bkd->bqd"}> : () -> ()
    %cst_24 = arith.constant dense<0.000000e+00> : vector<8x8x4xf32>
    %65 = tpu.matmul %64, %50, %cst_24 {dimension_numbers = #tpu.dot_dimension_numbers<[2], [1], [1], [2], [0, 0, 0, 1, 1, 2], [0], [0]>} : vector<8x8x8xf32>, vector<8x8x4xf32>, vector<8x8x4xf32> -> vector<8x8x4xf32>
    "tpu.trace_stop"() : () -> ()
    %66 = vector.extract_strided_slice %25 {offsets = [0, 0, 8], sizes = [8, 8, 4], strides = [1, 1, 1]} : vector<8x8x32xf32> to vector<8x8x4xf32>
    %67 = vector.extract_strided_slice %27 {offsets = [0, 0, 8], sizes = [8, 8, 4], strides = [1, 1, 1]} : vector<8x8x32xf32> to vector<8x8x4xf32>
    %68 = vector.extract_strided_slice %29 {offsets = [0, 0, 8], sizes = [8, 8, 4], strides = [1, 1, 1]} : vector<8x8x32xf32> to vector<8x8x4xf32>
    "tpu.trace_start"() <{level = 10 : i32, message = "bqd,bkd->bqk"}> : () -> ()
    %cst_25 = arith.constant dense<0.000000e+00> : vector<8x8x8xf32>
    %69 = tpu.matmul %66, %67, %cst_25 {dimension_numbers = #tpu.dot_dimension_numbers<[2], [2], [1], [1], [0, 0, 0, 1, 1, 1], [0], [0]>} : vector<8x8x4xf32>, vector<8x8x4xf32>, vector<8x8x8xf32> -> vector<8x8x8xf32>
    "tpu.trace_stop"() : () -> ()
    %cst_26 = arith.constant 5.000000e-01 : f32
    %70 = vector.broadcast %cst_26 : f32 to vector<8x8x8xf32>
    %71 = arith.mulf %69, %70 : vector<8x8x8xf32>
    %72 = vector.broadcast %18 : vector<8x1x8xf32> to vector<8x8x8xf32>
    %73 = arith.addf %71, %72 : vector<8x8x8xf32>
    %cst_27 = arith.constant dense<0xFF800000> : vector<8x8xf32>
    %74 = vector.multi_reduction <maximumf>, %73, %cst_27 [2] : vector<8x8x8xf32> to vector<8x8xf32>
    %75 = vector.shape_cast %74 : vector<8x8xf32> to vector<8x8x1xf32>
    %76 = vector.broadcast %75 : vector<8x8x1xf32> to vector<8x8x8xf32>
    %77 = arith.subf %73, %76 : vector<8x8x8xf32>
    %78 = math.exp %77 : vector<8x8x8xf32>
    %cst_28 = arith.constant dense<0.000000e+00> : vector<8x8xf32>
    %79 = vector.multi_reduction <add>, %78, %cst_28 [2] : vector<8x8x8xf32> to vector<8x8xf32>
    %80 = vector.shape_cast %79 : vector<8x8xf32> to vector<8x8x1xf32>
    %81 = vector.broadcast %80 : vector<8x8x1xf32> to vector<8x8x8xf32>
    %82 = arith.divf %78, %81 : vector<8x8x8xf32>
    "tpu.trace_start"() <{level = 10 : i32, message = "bqk,bkd->bqd"}> : () -> ()
    %cst_29 = arith.constant dense<0.000000e+00> : vector<8x8x4xf32>
    %83 = tpu.matmul %82, %68, %cst_29 {dimension_numbers = #tpu.dot_dimension_numbers<[2], [1], [1], [2], [0, 0, 0, 1, 1, 2], [0], [0]>} : vector<8x8x8xf32>, vector<8x8x4xf32>, vector<8x8x4xf32> -> vector<8x8x4xf32>
    "tpu.trace_stop"() : () -> ()
    %84 = vector.extract_strided_slice %25 {offsets = [0, 0, 12], sizes = [8, 8, 4], strides = [1, 1, 1]} : vector<8x8x32xf32> to vector<8x8x4xf32>
    %85 = vector.extract_strided_slice %27 {offsets = [0, 0, 12], sizes = [8, 8, 4], strides = [1, 1, 1]} : vector<8x8x32xf32> to vector<8x8x4xf32>
    %86 = vector.extract_strided_slice %29 {offsets = [0, 0, 12], sizes = [8, 8, 4], strides = [1, 1, 1]} : vector<8x8x32xf32> to vector<8x8x4xf32>
    "tpu.trace_start"() <{level = 10 : i32, message = "bqd,bkd->bqk"}> : () -> ()
    %cst_30 = arith.constant dense<0.000000e+00> : vector<8x8x8xf32>
    %87 = tpu.matmul %84, %85, %cst_30 {dimension_numbers = #tpu.dot_dimension_numbers<[2], [2], [1], [1], [0, 0, 0, 1, 1, 1], [0], [0]>} : vector<8x8x4xf32>, vector<8x8x4xf32>, vector<8x8x8xf32> -> vector<8x8x8xf32>
    "tpu.trace_stop"() : () -> ()
    %cst_31 = arith.constant 5.000000e-01 : f32
    %88 = vector.broadcast %cst_31 : f32 to vector<8x8x8xf32>
    %89 = arith.mulf %87, %88 : vector<8x8x8xf32>
    %90 = vector.broadcast %18 : vector<8x1x8xf32> to vector<8x8x8xf32>
    %91 = arith.addf %89, %90 : vector<8x8x8xf32>
    %cst_32 = arith.constant dense<0xFF800000> : vector<8x8xf32>
    %92 = vector.multi_reduction <maximumf>, %91, %cst_32 [2] : vector<8x8x8xf32> to vector<8x8xf32>
    %93 = vector.shape_cast %92 : vector<8x8xf32> to vector<8x8x1xf32>
    %94 = vector.broadcast %93 : vector<8x8x1xf32> to vector<8x8x8xf32>
    %95 = arith.subf %91, %94 : vector<8x8x8xf32>
    %96 = math.exp %95 : vector<8x8x8xf32>
    %cst_33 = arith.constant dense<0.000000e+00> : vector<8x8xf32>
    %97 = vector.multi_reduction <add>, %96, %cst_33 [2] : vector<8x8x8xf32> to vector<8x8xf32>
    %98 = vector.shape_cast %97 : vector<8x8xf32> to vector<8x8x1xf32>
    %99 = vector.broadcast %98 : vector<8x8x1xf32> to vector<8x8x8xf32>
    %100 = arith.divf %96, %99 : vector<8x8x8xf32>
    "tpu.trace_start"() <{level = 10 : i32, message = "bqk,bkd->bqd"}> : () -> ()
    %cst_34 = arith.constant dense<0.000000e+00> : vector<8x8x4xf32>
    %101 = tpu.matmul %100, %86, %cst_34 {dimension_numbers = #tpu.dot_dimension_numbers<[2], [1], [1], [2], [0, 0, 0, 1, 1, 2], [0], [0]>} : vector<8x8x8xf32>, vector<8x8x4xf32>, vector<8x8x4xf32> -> vector<8x8x4xf32>
    "tpu.trace_stop"() : () -> ()
    %102 = vector.extract_strided_slice %25 {offsets = [0, 0, 16], sizes = [8, 8, 4], strides = [1, 1, 1]} : vector<8x8x32xf32> to vector<8x8x4xf32>
    %103 = vector.extract_strided_slice %27 {offsets = [0, 0, 16], sizes = [8, 8, 4], strides = [1, 1, 1]} : vector<8x8x32xf32> to vector<8x8x4xf32>
    %104 = vector.extract_strided_slice %29 {offsets = [0, 0, 16], sizes = [8, 8, 4], strides = [1, 1, 1]} : vector<8x8x32xf32> to vector<8x8x4xf32>
    "tpu.trace_start"() <{level = 10 : i32, message = "bqd,bkd->bqk"}> : () -> ()
    %cst_35 = arith.constant dense<0.000000e+00> : vector<8x8x8xf32>
    %105 = tpu.matmul %102, %103, %cst_35 {dimension_numbers = #tpu.dot_dimension_numbers<[2], [2], [1], [1], [0, 0, 0, 1, 1, 1], [0], [0]>} : vector<8x8x4xf32>, vector<8x8x4xf32>, vector<8x8x8xf32> -> vector<8x8x8xf32>
    "tpu.trace_stop"() : () -> ()
    %cst_36 = arith.constant 5.000000e-01 : f32
    %106 = vector.broadcast %cst_36 : f32 to vector<8x8x8xf32>
    %107 = arith.mulf %105, %106 : vector<8x8x8xf32>
    %108 = vector.broadcast %18 : vector<8x1x8xf32> to vector<8x8x8xf32>
    %109 = arith.addf %107, %108 : vector<8x8x8xf32>
    %cst_37 = arith.constant dense<0xFF800000> : vector<8x8xf32>
    %110 = vector.multi_reduction <maximumf>, %109, %cst_37 [2] : vector<8x8x8xf32> to vector<8x8xf32>
    %111 = vector.shape_cast %110 : vector<8x8xf32> to vector<8x8x1xf32>
    %112 = vector.broadcast %111 : vector<8x8x1xf32> to vector<8x8x8xf32>
    %113 = arith.subf %109, %112 : vector<8x8x8xf32>
    %114 = math.exp %113 : vector<8x8x8xf32>
    %cst_38 = arith.constant dense<0.000000e+00> : vector<8x8xf32>
    %115 = vector.multi_reduction <add>, %114, %cst_38 [2] : vector<8x8x8xf32> to vector<8x8xf32>
    %116 = vector.shape_cast %115 : vector<8x8xf32> to vector<8x8x1xf32>
    %117 = vector.broadcast %116 : vector<8x8x1xf32> to vector<8x8x8xf32>
    %118 = arith.divf %114, %117 : vector<8x8x8xf32>
    "tpu.trace_start"() <{level = 10 : i32, message = "bqk,bkd->bqd"}> : () -> ()
    %cst_39 = arith.constant dense<0.000000e+00> : vector<8x8x4xf32>
    %119 = tpu.matmul %118, %104, %cst_39 {dimension_numbers = #tpu.dot_dimension_numbers<[2], [1], [1], [2], [0, 0, 0, 1, 1, 2], [0], [0]>} : vector<8x8x8xf32>, vector<8x8x4xf32>, vector<8x8x4xf32> -> vector<8x8x4xf32>
    "tpu.trace_stop"() : () -> ()
    %120 = vector.extract_strided_slice %25 {offsets = [0, 0, 20], sizes = [8, 8, 4], strides = [1, 1, 1]} : vector<8x8x32xf32> to vector<8x8x4xf32>
    %121 = vector.extract_strided_slice %27 {offsets = [0, 0, 20], sizes = [8, 8, 4], strides = [1, 1, 1]} : vector<8x8x32xf32> to vector<8x8x4xf32>
    %122 = vector.extract_strided_slice %29 {offsets = [0, 0, 20], sizes = [8, 8, 4], strides = [1, 1, 1]} : vector<8x8x32xf32> to vector<8x8x4xf32>
    "tpu.trace_start"() <{level = 10 : i32, message = "bqd,bkd->bqk"}> : () -> ()
    %cst_40 = arith.constant dense<0.000000e+00> : vector<8x8x8xf32>
    %123 = tpu.matmul %120, %121, %cst_40 {dimension_numbers = #tpu.dot_dimension_numbers<[2], [2], [1], [1], [0, 0, 0, 1, 1, 1], [0], [0]>} : vector<8x8x4xf32>, vector<8x8x4xf32>, vector<8x8x8xf32> -> vector<8x8x8xf32>
    "tpu.trace_stop"() : () -> ()
    %cst_41 = arith.constant 5.000000e-01 : f32
    %124 = vector.broadcast %cst_41 : f32 to vector<8x8x8xf32>
    %125 = arith.mulf %123, %124 : vector<8x8x8xf32>
    %126 = vector.broadcast %18 : vector<8x1x8xf32> to vector<8x8x8xf32>
    %127 = arith.addf %125, %126 : vector<8x8x8xf32>
    %cst_42 = arith.constant dense<0xFF800000> : vector<8x8xf32>
    %128 = vector.multi_reduction <maximumf>, %127, %cst_42 [2] : vector<8x8x8xf32> to vector<8x8xf32>
    %129 = vector.shape_cast %128 : vector<8x8xf32> to vector<8x8x1xf32>
    %130 = vector.broadcast %129 : vector<8x8x1xf32> to vector<8x8x8xf32>
    %131 = arith.subf %127, %130 : vector<8x8x8xf32>
    %132 = math.exp %131 : vector<8x8x8xf32>
    %cst_43 = arith.constant dense<0.000000e+00> : vector<8x8xf32>
    %133 = vector.multi_reduction <add>, %132, %cst_43 [2] : vector<8x8x8xf32> to vector<8x8xf32>
    %134 = vector.shape_cast %133 : vector<8x8xf32> to vector<8x8x1xf32>
    %135 = vector.broadcast %134 : vector<8x8x1xf32> to vector<8x8x8xf32>
    %136 = arith.divf %132, %135 : vector<8x8x8xf32>
    "tpu.trace_start"() <{level = 10 : i32, message = "bqk,bkd->bqd"}> : () -> ()
    %cst_44 = arith.constant dense<0.000000e+00> : vector<8x8x4xf32>
    %137 = tpu.matmul %136, %122, %cst_44 {dimension_numbers = #tpu.dot_dimension_numbers<[2], [1], [1], [2], [0, 0, 0, 1, 1, 2], [0], [0]>} : vector<8x8x8xf32>, vector<8x8x4xf32>, vector<8x8x4xf32> -> vector<8x8x4xf32>
    "tpu.trace_stop"() : () -> ()
    %138 = vector.extract_strided_slice %25 {offsets = [0, 0, 24], sizes = [8, 8, 4], strides = [1, 1, 1]} : vector<8x8x32xf32> to vector<8x8x4xf32>
    %139 = vector.extract_strided_slice %27 {offsets = [0, 0, 24], sizes = [8, 8, 4], strides = [1, 1, 1]} : vector<8x8x32xf32> to vector<8x8x4xf32>
    %140 = vector.extract_strided_slice %29 {offsets = [0, 0, 24], sizes = [8, 8, 4], strides = [1, 1, 1]} : vector<8x8x32xf32> to vector<8x8x4xf32>
    "tpu.trace_start"() <{level = 10 : i32, message = "bqd,bkd->bqk"}> : () -> ()
    %cst_45 = arith.constant dense<0.000000e+00> : vector<8x8x8xf32>
    %141 = tpu.matmul %138, %139, %cst_45 {dimension_numbers = #tpu.dot_dimension_numbers<[2], [2], [1], [1], [0, 0, 0, 1, 1, 1], [0], [0]>} : vector<8x8x4xf32>, vector<8x8x4xf32>, vector<8x8x8xf32> -> vector<8x8x8xf32>
    "tpu.trace_stop"() : () -> ()
    %cst_46 = arith.constant 5.000000e-01 : f32
    %142 = vector.broadcast %cst_46 : f32 to vector<8x8x8xf32>
    %143 = arith.mulf %141, %142 : vector<8x8x8xf32>
    %144 = vector.broadcast %18 : vector<8x1x8xf32> to vector<8x8x8xf32>
    %145 = arith.addf %143, %144 : vector<8x8x8xf32>
    %cst_47 = arith.constant dense<0xFF800000> : vector<8x8xf32>
    %146 = vector.multi_reduction <maximumf>, %145, %cst_47 [2] : vector<8x8x8xf32> to vector<8x8xf32>
    %147 = vector.shape_cast %146 : vector<8x8xf32> to vector<8x8x1xf32>
    %148 = vector.broadcast %147 : vector<8x8x1xf32> to vector<8x8x8xf32>
    %149 = arith.subf %145, %148 : vector<8x8x8xf32>
    %150 = math.exp %149 : vector<8x8x8xf32>
    %cst_48 = arith.constant dense<0.000000e+00> : vector<8x8xf32>
    %151 = vector.multi_reduction <add>, %150, %cst_48 [2] : vector<8x8x8xf32> to vector<8x8xf32>
    %152 = vector.shape_cast %151 : vector<8x8xf32> to vector<8x8x1xf32>
    %153 = vector.broadcast %152 : vector<8x8x1xf32> to vector<8x8x8xf32>
    %154 = arith.divf %150, %153 : vector<8x8x8xf32>
    "tpu.trace_start"() <{level = 10 : i32, message = "bqk,bkd->bqd"}> : () -> ()
    %cst_49 = arith.constant dense<0.000000e+00> : vector<8x8x4xf32>
    %155 = tpu.matmul %154, %140, %cst_49 {dimension_numbers = #tpu.dot_dimension_numbers<[2], [1], [1], [2], [0, 0, 0, 1, 1, 2], [0], [0]>} : vector<8x8x8xf32>, vector<8x8x4xf32>, vector<8x8x4xf32> -> vector<8x8x4xf32>
    "tpu.trace_stop"() : () -> ()
    %156 = vector.extract_strided_slice %25 {offsets = [0, 0, 28], sizes = [8, 8, 4], strides = [1, 1, 1]} : vector<8x8x32xf32> to vector<8x8x4xf32>
    %157 = vector.extract_strided_slice %27 {offsets = [0, 0, 28], sizes = [8, 8, 4], strides = [1, 1, 1]} : vector<8x8x32xf32> to vector<8x8x4xf32>
    %158 = vector.extract_strided_slice %29 {offsets = [0, 0, 28], sizes = [8, 8, 4], strides = [1, 1, 1]} : vector<8x8x32xf32> to vector<8x8x4xf32>
    "tpu.trace_start"() <{level = 10 : i32, message = "bqd,bkd->bqk"}> : () -> ()
    %cst_50 = arith.constant dense<0.000000e+00> : vector<8x8x8xf32>
    %159 = tpu.matmul %156, %157, %cst_50 {dimension_numbers = #tpu.dot_dimension_numbers<[2], [2], [1], [1], [0, 0, 0, 1, 1, 1], [0], [0]>} : vector<8x8x4xf32>, vector<8x8x4xf32>, vector<8x8x8xf32> -> vector<8x8x8xf32>
    "tpu.trace_stop"() : () -> ()
    %cst_51 = arith.constant 5.000000e-01 : f32
    %160 = vector.broadcast %cst_51 : f32 to vector<8x8x8xf32>
    %161 = arith.mulf %159, %160 : vector<8x8x8xf32>
    %162 = vector.broadcast %18 : vector<8x1x8xf32> to vector<8x8x8xf32>
    %163 = arith.addf %161, %162 : vector<8x8x8xf32>
    %cst_52 = arith.constant dense<0xFF800000> : vector<8x8xf32>
    %164 = vector.multi_reduction <maximumf>, %163, %cst_52 [2] : vector<8x8x8xf32> to vector<8x8xf32>
    %165 = vector.shape_cast %164 : vector<8x8xf32> to vector<8x8x1xf32>
    %166 = vector.broadcast %165 : vector<8x8x1xf32> to vector<8x8x8xf32>
    %167 = arith.subf %163, %166 : vector<8x8x8xf32>
    %168 = math.exp %167 : vector<8x8x8xf32>
    %cst_53 = arith.constant dense<0.000000e+00> : vector<8x8xf32>
    %169 = vector.multi_reduction <add>, %168, %cst_53 [2] : vector<8x8x8xf32> to vector<8x8xf32>
    %170 = vector.shape_cast %169 : vector<8x8xf32> to vector<8x8x1xf32>
    %171 = vector.broadcast %170 : vector<8x8x1xf32> to vector<8x8x8xf32>
    %172 = arith.divf %168, %171 : vector<8x8x8xf32>
    "tpu.trace_start"() <{level = 10 : i32, message = "bqk,bkd->bqd"}> : () -> ()
    %cst_54 = arith.constant dense<0.000000e+00> : vector<8x8x4xf32>
    %173 = tpu.matmul %172, %158, %cst_54 {dimension_numbers = #tpu.dot_dimension_numbers<[2], [1], [1], [2], [0, 0, 0, 1, 1, 2], [0], [0]>} : vector<8x8x8xf32>, vector<8x8x4xf32>, vector<8x8x4xf32> -> vector<8x8x4xf32>
    "tpu.trace_stop"() : () -> ()
    %174 = tpu.concatenate %47, %65, %83, %101, %119, %137, %155, %173 in 2 : vector<8x8x4xf32>, vector<8x8x4xf32>, vector<8x8x4xf32>, vector<8x8x4xf32>, vector<8x8x4xf32>, vector<8x8x4xf32>, vector<8x8x4xf32>, vector<8x8x4xf32> -> vector<8x8x32xf32>
    %175 = vector.shape_cast %174 : vector<8x8x32xf32> to vector<64x32xf32>
    %c0_55 = arith.constant 0 : index
    %c0_56 = arith.constant 0 : index
    %176 = vector.load %arg6[%c0_55, %c0_56] : memref<32x32xf32, #tpu.memory_space<vmem>>, vector<32x32xf32>
    %cst_57 = arith.constant dense<0.000000e+00> : vector<64x32xf32>
    %177 = tpu.matmul %175, %176, %cst_57 {dimension_numbers = #tpu.dot_dimension_numbers<[1], [0], [0], [1], [0, 0, 1, 1], [], []>} : vector<64x32xf32>, vector<32x32xf32>, vector<64x32xf32> -> vector<64x32xf32>
    %c0_58 = arith.constant 0 : index
    %c0_59 = arith.constant 0 : index
    %178 = vector.load %arg7[%c0_58, %c0_59] : memref<1x32xf32, #tpu.memory_space<vmem>>, vector<1x32xf32>
    %179 = vector.broadcast %178 : vector<1x32xf32> to vector<64x32xf32>
    %180 = arith.addf %177, %179 : vector<64x32xf32>
    %181 = arith.addf %6, %180 : vector<64x32xf32>
    %c0_60 = arith.constant 0 : index
    %c0_61 = arith.constant 0 : index
    %182 = vector.load %arg12[%c0_60, %c0_61] : memref<1x32xf32, #tpu.memory_space<vmem>>, vector<1x32xf32>
    %c0_62 = arith.constant 0 : index
    %c0_63 = arith.constant 0 : index
    %183 = vector.load %arg13[%c0_62, %c0_63] : memref<1x32xf32, #tpu.memory_space<vmem>>, vector<1x32xf32>
    %cst_64 = arith.constant dense<0.000000e+00> : vector<64xf32>
    %184 = vector.multi_reduction <add>, %181, %cst_64 [1] : vector<64x32xf32> to vector<64xf32>
    %185 = vector.shape_cast %184 : vector<64xf32> to vector<64x1xf32>
    %cst_65 = arith.constant 3.200000e+01 : f32
    %186 = vector.broadcast %cst_65 : f32 to vector<64x1xf32>
    %187 = arith.divf %185, %186 : vector<64x1xf32>
    %188 = vector.broadcast %187 : vector<64x1xf32> to vector<64x32xf32>
    %189 = arith.subf %181, %188 : vector<64x32xf32>
    %190 = arith.mulf %189, %189 : vector<64x32xf32>
    %cst_66 = arith.constant dense<0.000000e+00> : vector<64xf32>
    %191 = vector.multi_reduction <add>, %190, %cst_66 [1] : vector<64x32xf32> to vector<64xf32>
    %192 = vector.shape_cast %191 : vector<64xf32> to vector<64x1xf32>
    %cst_67 = arith.constant 3.200000e+01 : f32
    %193 = vector.broadcast %cst_67 : f32 to vector<64x1xf32>
    %194 = arith.divf %192, %193 : vector<64x1xf32>
    %195 = vector.broadcast %187 : vector<64x1xf32> to vector<64x32xf32>
    %196 = arith.subf %181, %195 : vector<64x32xf32>
    %cst_68 = arith.constant 9.99999974E-6 : f32
    %197 = vector.broadcast %cst_68 : f32 to vector<64x1xf32>
    %198 = arith.addf %194, %197 : vector<64x1xf32>
    %199 = math.sqrt %198 : vector<64x1xf32>
    %200 = vector.broadcast %199 : vector<64x1xf32> to vector<64x32xf32>
    %201 = arith.divf %196, %200 : vector<64x32xf32>
    %202 = vector.broadcast %182 : vector<1x32xf32> to vector<64x32xf32>
    %203 = arith.mulf %201, %202 : vector<64x32xf32>
    %204 = vector.broadcast %183 : vector<1x32xf32> to vector<64x32xf32>
    %205 = arith.addf %203, %204 : vector<64x32xf32>
    %c0_69 = arith.constant 0 : index
    %c0_70 = arith.constant 0 : index
    %206 = vector.load %arg8[%c0_69, %c0_70] : memref<32x2048xf32, #tpu.memory_space<vmem>>, vector<32x2048xf32>
    %cst_71 = arith.constant dense<0.000000e+00> : vector<64x2048xf32>
    %207 = tpu.matmul %205, %206, %cst_71 {dimension_numbers = #tpu.dot_dimension_numbers<[1], [0], [0], [1], [0, 0, 1, 1], [], []>} : vector<64x32xf32>, vector<32x2048xf32>, vector<64x2048xf32> -> vector<64x2048xf32>
    %c0_72 = arith.constant 0 : index
    %c0_73 = arith.constant 0 : index
    %208 = vector.load %arg9[%c0_72, %c0_73] : memref<1x2048xf32, #tpu.memory_space<vmem>>, vector<1x2048xf32>
    %209 = vector.broadcast %208 : vector<1x2048xf32> to vector<64x2048xf32>
    %210 = arith.addf %207, %209 : vector<64x2048xf32>
    %cst_74 = arith.constant 0.000000e+00 : f32
    %211 = vector.broadcast %cst_74 : f32 to vector<64x2048xf32>
    %212 = arith.maximumf %210, %211 : vector<64x2048xf32>
    %c0_75 = arith.constant 0 : index
    %c0_76 = arith.constant 0 : index
    %213 = vector.load %arg10[%c0_75, %c0_76] : memref<2048x32xf32, #tpu.memory_space<vmem>>, vector<2048x32xf32>
    %cst_77 = arith.constant dense<0.000000e+00> : vector<64x32xf32>
    %214 = tpu.matmul %212, %213, %cst_77 {dimension_numbers = #tpu.dot_dimension_numbers<[1], [0], [0], [1], [0, 0, 1, 1], [], []>} : vector<64x2048xf32>, vector<2048x32xf32>, vector<64x32xf32> -> vector<64x32xf32>
    %c0_78 = arith.constant 0 : index
    %c0_79 = arith.constant 0 : index
    %215 = vector.load %arg11[%c0_78, %c0_79] : memref<1x32xf32, #tpu.memory_space<vmem>>, vector<1x32xf32>
    %216 = vector.broadcast %215 : vector<1x32xf32> to vector<64x32xf32>
    %217 = arith.addf %214, %216 : vector<64x32xf32>
    %218 = arith.addf %205, %217 : vector<64x32xf32>
    %c0_80 = arith.constant 0 : index
    %c0_81 = arith.constant 0 : index
    %219 = vector.load %arg14[%c0_80, %c0_81] : memref<1x32xf32, #tpu.memory_space<vmem>>, vector<1x32xf32>
    %c0_82 = arith.constant 0 : index
    %c0_83 = arith.constant 0 : index
    %220 = vector.load %arg15[%c0_82, %c0_83] : memref<1x32xf32, #tpu.memory_space<vmem>>, vector<1x32xf32>
    %cst_84 = arith.constant dense<0.000000e+00> : vector<64xf32>
    %221 = vector.multi_reduction <add>, %218, %cst_84 [1] : vector<64x32xf32> to vector<64xf32>
    %222 = vector.shape_cast %221 : vector<64xf32> to vector<64x1xf32>
    %cst_85 = arith.constant 3.200000e+01 : f32
    %223 = vector.broadcast %cst_85 : f32 to vector<64x1xf32>
    %224 = arith.divf %222, %223 : vector<64x1xf32>
    %225 = vector.broadcast %224 : vector<64x1xf32> to vector<64x32xf32>
    %226 = arith.subf %218, %225 : vector<64x32xf32>
    %227 = arith.mulf %226, %226 : vector<64x32xf32>
    %cst_86 = arith.constant dense<0.000000e+00> : vector<64xf32>
    %228 = vector.multi_reduction <add>, %227, %cst_86 [1] : vector<64x32xf32> to vector<64xf32>
    %229 = vector.shape_cast %228 : vector<64xf32> to vector<64x1xf32>
    %cst_87 = arith.constant 3.200000e+01 : f32
    %230 = vector.broadcast %cst_87 : f32 to vector<64x1xf32>
    %231 = arith.divf %229, %230 : vector<64x1xf32>
    %232 = vector.broadcast %224 : vector<64x1xf32> to vector<64x32xf32>
    %233 = arith.subf %218, %232 : vector<64x32xf32>
    %cst_88 = arith.constant 9.99999974E-6 : f32
    %234 = vector.broadcast %cst_88 : f32 to vector<64x1xf32>
    %235 = arith.addf %231, %234 : vector<64x1xf32>
    %236 = math.sqrt %235 : vector<64x1xf32>
    %237 = vector.broadcast %236 : vector<64x1xf32> to vector<64x32xf32>
    %238 = arith.divf %233, %237 : vector<64x32xf32>
    %239 = vector.broadcast %219 : vector<1x32xf32> to vector<64x32xf32>
    %240 = arith.mulf %238, %239 : vector<64x32xf32>
    %241 = vector.broadcast %220 : vector<1x32xf32> to vector<64x32xf32>
    %242 = arith.addf %240, %241 : vector<64x32xf32>
    %cst_89 = arith.constant dense<true> : vector<8x8xi1>
    %243 = arith.xori %14, %cst_89 : vector<8x8xi1>
    %c-1_i32 = arith.constant -1 : i32
    %244 = vector.broadcast %c-1_i32 : i32 to vector<8x8xi32>
    %245 = arith.select %243, %9, %244 : vector<8x8xi1>, vector<8x8xi32>
    %cst_90 = arith.constant dense<-2147483648> : vector<8xi32>
    %246 = vector.multi_reduction <maxsi>, %245, %cst_90 [1] : vector<8x8xi32> to vector<8xi32>
    %247 = vector.shape_cast %246 : vector<8xi32> to vector<8x1xi32>
    %248 = tpu.iota {dimensions = array<i32: 1>} : vector<8x64xi32>
    %249 = tpu.iota {dimensions = array<i32: 0>} : vector<8x64xi32>
    %c8_i32 = arith.constant 8 : i32
    %250 = vector.broadcast %c8_i32 : i32 to vector<8x64xi32>
    %251 = arith.muli %249, %250 : vector<8x64xi32>
    %252 = vector.broadcast %247 : vector<8x1xi32> to vector<8x64xi32>
    %253 = arith.addi %251, %252 : vector<8x64xi32>
    %254 = arith.cmpi eq, %248, %253 : vector<8x64xi32>
    %255 = arith.extui %254 : vector<8x64xi1> to vector<8x64xi32>
    %256 = arith.sitofp %255 : vector<8x64xi32> to vector<8x64xf32>
    %cst_91 = arith.constant dense<0.000000e+00> : vector<8x32xf32>
    %257 = tpu.matmul %256, %242, %cst_91 {dimension_numbers = #tpu.dot_dimension_numbers<[1], [0], [0], [1], [0, 0, 1, 1], [], []>} : vector<8x64xf32>, vector<64x32xf32>, vector<8x32xf32> -> vector<8x32xf32>
    %c0_92 = arith.constant 0 : index
    %c0_93 = arith.constant 0 : index
    %258 = vector.load %arg16[%c0_92, %c0_93] : memref<32x16xf32, #tpu.memory_space<vmem>>, vector<32x16xf32>
    %cst_94 = arith.constant dense<0.000000e+00> : vector<8x16xf32>
    %259 = tpu.matmul %257, %258, %cst_94 {dimension_numbers = #tpu.dot_dimension_numbers<[1], [0], [0], [1], [0, 0, 1, 1], [], []>} : vector<8x32xf32>, vector<32x16xf32>, vector<8x16xf32> -> vector<8x16xf32>
    %c0_95 = arith.constant 0 : index
    %c0_96 = arith.constant 0 : index
    %260 = vector.load %arg17[%c0_95, %c0_96] : memref<1x16xf32, #tpu.memory_space<vmem>>, vector<1x16xf32>
    %261 = vector.broadcast %260 : vector<1x16xf32> to vector<8x16xf32>
    %262 = arith.addf %259, %261 : vector<8x16xf32>
    %c0_97 = arith.constant 0 : index
    %c0_98 = arith.constant 0 : index
    %263 = vector.load %arg18[%c0_97, %c0_98] : memref<16x32xf32, #tpu.memory_space<vmem>>, vector<16x32xf32>
    %cst_99 = arith.constant dense<0.000000e+00> : vector<8x32xf32>
    %264 = tpu.matmul %262, %263, %cst_99 {dimension_numbers = #tpu.dot_dimension_numbers<[1], [0], [0], [1], [0, 0, 1, 1], [], []>} : vector<8x16xf32>, vector<16x32xf32>, vector<8x32xf32> -> vector<8x32xf32>
    %c0_100 = arith.constant 0 : index
    %c0_101 = arith.constant 0 : index
    %265 = vector.load %arg19[%c0_100, %c0_101] : memref<1x32xf32, #tpu.memory_space<vmem>>, vector<1x32xf32>
    %266 = vector.broadcast %265 : vector<1x32xf32> to vector<8x32xf32>
    %267 = arith.addf %264, %266 : vector<8x32xf32>
    %268 = vector.shape_cast %267 : vector<8x32xf32> to vector<1x8x32xf32>
    %cst_102 = arith.constant dense<0.000000e+00> : vector<1x8xf32>
    %269 = vector.multi_reduction <add>, %268, %cst_102 [2] : vector<1x8x32xf32> to vector<1x8xf32>
    %270 = tpu.iota {dimensions = array<i32: 1>} : vector<1x8xi32>
    %cst_103 = arith.constant 0.000000e+00 : f32
    %271 = vector.broadcast %cst_103 : f32 to vector<1x8xf32>
    %272 = arith.cmpf oeq, %269, %271 : vector<1x8xf32>
    %c0_i32_104 = arith.constant 0 : i32
    %273 = vector.broadcast %c0_i32_104 : i32 to vector<1x8xi32>
    %274 = arith.cmpi ne, %270, %273 : vector<1x8xi32>
    %275 = arith.andi %272, %274 : vector<1x8xi1>
    %cst_105 = arith.constant -1.000000e+30 : f32
    %cst_106 = arith.constant 0.000000e+00 : f32
    %276 = vector.broadcast %cst_105 : f32 to vector<1x8xf32>
    %277 = vector.broadcast %cst_106 : f32 to vector<1x8xf32>
    %278 = arith.select %275, %276, %277 : vector<1x8xi1>, vector<1x8xf32>
    %279 = vector.shape_cast %278 : vector<1x8xf32> to vector<1x1x8xf32>
    %c0_107 = arith.constant 0 : index
    %c0_108 = arith.constant 0 : index
    %280 = vector.load %arg20[%c0_107, %c0_108] : memref<32x96xf32, #tpu.memory_space<vmem>>, vector<32x96xf32>
    %cst_109 = arith.constant dense<0.000000e+00> : vector<8x96xf32>
    %281 = tpu.matmul %267, %280, %cst_109 {dimension_numbers = #tpu.dot_dimension_numbers<[1], [0], [0], [1], [0, 0, 1, 1], [], []>} : vector<8x32xf32>, vector<32x96xf32>, vector<8x96xf32> -> vector<8x96xf32>
    %c0_110 = arith.constant 0 : index
    %c0_111 = arith.constant 0 : index
    %282 = vector.load %arg21[%c0_110, %c0_111] : memref<1x96xf32, #tpu.memory_space<vmem>>, vector<1x96xf32>
    %283 = vector.broadcast %282 : vector<1x96xf32> to vector<8x96xf32>
    %284 = arith.addf %281, %283 : vector<8x96xf32>
    %285 = vector.extract_strided_slice %284 {offsets = [0, 0], sizes = [8, 32], strides = [1, 1]} : vector<8x96xf32> to vector<8x32xf32>
    %286 = vector.shape_cast %285 : vector<8x32xf32> to vector<1x8x32xf32>
    %287 = vector.extract_strided_slice %284 {offsets = [0, 32], sizes = [8, 32], strides = [1, 1]} : vector<8x96xf32> to vector<8x32xf32>
    %288 = vector.shape_cast %287 : vector<8x32xf32> to vector<1x8x32xf32>
    %289 = vector.extract_strided_slice %284 {offsets = [0, 64], sizes = [8, 32], strides = [1, 1]} : vector<8x96xf32> to vector<8x32xf32>
    %290 = vector.shape_cast %289 : vector<8x32xf32> to vector<1x8x32xf32>
    %291 = vector.extract_strided_slice %286 {offsets = [0, 0, 0], sizes = [1, 8, 4], strides = [1, 1, 1]} : vector<1x8x32xf32> to vector<1x8x4xf32>
    %292 = vector.extract_strided_slice %288 {offsets = [0, 0, 0], sizes = [1, 8, 4], strides = [1, 1, 1]} : vector<1x8x32xf32> to vector<1x8x4xf32>
    %293 = vector.extract_strided_slice %290 {offsets = [0, 0, 0], sizes = [1, 8, 4], strides = [1, 1, 1]} : vector<1x8x32xf32> to vector<1x8x4xf32>
    "tpu.trace_start"() <{level = 10 : i32, message = "bqd,bkd->bqk"}> : () -> ()
    %cst_112 = arith.constant dense<0.000000e+00> : vector<1x8x8xf32>
    %294 = tpu.matmul %291, %292, %cst_112 {dimension_numbers = #tpu.dot_dimension_numbers<[2], [2], [1], [1], [0, 0, 0, 1, 1, 1], [0], [0]>} : vector<1x8x4xf32>, vector<1x8x4xf32>, vector<1x8x8xf32> -> vector<1x8x8xf32>
    "tpu.trace_stop"() : () -> ()
    %cst_113 = arith.constant 5.000000e-01 : f32
    %295 = vector.broadcast %cst_113 : f32 to vector<1x8x8xf32>
    %296 = arith.mulf %294, %295 : vector<1x8x8xf32>
    %297 = vector.broadcast %279 : vector<1x1x8xf32> to vector<1x8x8xf32>
    %298 = arith.addf %296, %297 : vector<1x8x8xf32>
    %cst_114 = arith.constant dense<0xFF800000> : vector<1x8xf32>
    %299 = vector.multi_reduction <maximumf>, %298, %cst_114 [2] : vector<1x8x8xf32> to vector<1x8xf32>
    %300 = vector.shape_cast %299 : vector<1x8xf32> to vector<1x8x1xf32>
    %301 = vector.broadcast %300 : vector<1x8x1xf32> to vector<1x8x8xf32>
    %302 = arith.subf %298, %301 : vector<1x8x8xf32>
    %303 = math.exp %302 : vector<1x8x8xf32>
    %cst_115 = arith.constant dense<0.000000e+00> : vector<1x8xf32>
    %304 = vector.multi_reduction <add>, %303, %cst_115 [2] : vector<1x8x8xf32> to vector<1x8xf32>
    %305 = vector.shape_cast %304 : vector<1x8xf32> to vector<1x8x1xf32>
    %306 = vector.broadcast %305 : vector<1x8x1xf32> to vector<1x8x8xf32>
    %307 = arith.divf %303, %306 : vector<1x8x8xf32>
    "tpu.trace_start"() <{level = 10 : i32, message = "bqk,bkd->bqd"}> : () -> ()
    %cst_116 = arith.constant dense<0.000000e+00> : vector<1x8x4xf32>
    %308 = tpu.matmul %307, %293, %cst_116 {dimension_numbers = #tpu.dot_dimension_numbers<[2], [1], [1], [2], [0, 0, 0, 1, 1, 2], [0], [0]>} : vector<1x8x8xf32>, vector<1x8x4xf32>, vector<1x8x4xf32> -> vector<1x8x4xf32>
    "tpu.trace_stop"() : () -> ()
    %309 = vector.extract_strided_slice %286 {offsets = [0, 0, 4], sizes = [1, 8, 4], strides = [1, 1, 1]} : vector<1x8x32xf32> to vector<1x8x4xf32>
    %310 = vector.extract_strided_slice %288 {offsets = [0, 0, 4], sizes = [1, 8, 4], strides = [1, 1, 1]} : vector<1x8x32xf32> to vector<1x8x4xf32>
    %311 = vector.extract_strided_slice %290 {offsets = [0, 0, 4], sizes = [1, 8, 4], strides = [1, 1, 1]} : vector<1x8x32xf32> to vector<1x8x4xf32>
    "tpu.trace_start"() <{level = 10 : i32, message = "bqd,bkd->bqk"}> : () -> ()
    %cst_117 = arith.constant dense<0.000000e+00> : vector<1x8x8xf32>
    %312 = tpu.matmul %309, %310, %cst_117 {dimension_numbers = #tpu.dot_dimension_numbers<[2], [2], [1], [1], [0, 0, 0, 1, 1, 1], [0], [0]>} : vector<1x8x4xf32>, vector<1x8x4xf32>, vector<1x8x8xf32> -> vector<1x8x8xf32>
    "tpu.trace_stop"() : () -> ()
    %cst_118 = arith.constant 5.000000e-01 : f32
    %313 = vector.broadcast %cst_118 : f32 to vector<1x8x8xf32>
    %314 = arith.mulf %312, %313 : vector<1x8x8xf32>
    %315 = vector.broadcast %279 : vector<1x1x8xf32> to vector<1x8x8xf32>
    %316 = arith.addf %314, %315 : vector<1x8x8xf32>
    %cst_119 = arith.constant dense<0xFF800000> : vector<1x8xf32>
    %317 = vector.multi_reduction <maximumf>, %316, %cst_119 [2] : vector<1x8x8xf32> to vector<1x8xf32>
    %318 = vector.shape_cast %317 : vector<1x8xf32> to vector<1x8x1xf32>
    %319 = vector.broadcast %318 : vector<1x8x1xf32> to vector<1x8x8xf32>
    %320 = arith.subf %316, %319 : vector<1x8x8xf32>
    %321 = math.exp %320 : vector<1x8x8xf32>
    %cst_120 = arith.constant dense<0.000000e+00> : vector<1x8xf32>
    %322 = vector.multi_reduction <add>, %321, %cst_120 [2] : vector<1x8x8xf32> to vector<1x8xf32>
    %323 = vector.shape_cast %322 : vector<1x8xf32> to vector<1x8x1xf32>
    %324 = vector.broadcast %323 : vector<1x8x1xf32> to vector<1x8x8xf32>
    %325 = arith.divf %321, %324 : vector<1x8x8xf32>
    "tpu.trace_start"() <{level = 10 : i32, message = "bqk,bkd->bqd"}> : () -> ()
    %cst_121 = arith.constant dense<0.000000e+00> : vector<1x8x4xf32>
    %326 = tpu.matmul %325, %311, %cst_121 {dimension_numbers = #tpu.dot_dimension_numbers<[2], [1], [1], [2], [0, 0, 0, 1, 1, 2], [0], [0]>} : vector<1x8x8xf32>, vector<1x8x4xf32>, vector<1x8x4xf32> -> vector<1x8x4xf32>
    "tpu.trace_stop"() : () -> ()
    %327 = vector.extract_strided_slice %286 {offsets = [0, 0, 8], sizes = [1, 8, 4], strides = [1, 1, 1]} : vector<1x8x32xf32> to vector<1x8x4xf32>
    %328 = vector.extract_strided_slice %288 {offsets = [0, 0, 8], sizes = [1, 8, 4], strides = [1, 1, 1]} : vector<1x8x32xf32> to vector<1x8x4xf32>
    %329 = vector.extract_strided_slice %290 {offsets = [0, 0, 8], sizes = [1, 8, 4], strides = [1, 1, 1]} : vector<1x8x32xf32> to vector<1x8x4xf32>
    "tpu.trace_start"() <{level = 10 : i32, message = "bqd,bkd->bqk"}> : () -> ()
    %cst_122 = arith.constant dense<0.000000e+00> : vector<1x8x8xf32>
    %330 = tpu.matmul %327, %328, %cst_122 {dimension_numbers = #tpu.dot_dimension_numbers<[2], [2], [1], [1], [0, 0, 0, 1, 1, 1], [0], [0]>} : vector<1x8x4xf32>, vector<1x8x4xf32>, vector<1x8x8xf32> -> vector<1x8x8xf32>
    "tpu.trace_stop"() : () -> ()
    %cst_123 = arith.constant 5.000000e-01 : f32
    %331 = vector.broadcast %cst_123 : f32 to vector<1x8x8xf32>
    %332 = arith.mulf %330, %331 : vector<1x8x8xf32>
    %333 = vector.broadcast %279 : vector<1x1x8xf32> to vector<1x8x8xf32>
    %334 = arith.addf %332, %333 : vector<1x8x8xf32>
    %cst_124 = arith.constant dense<0xFF800000> : vector<1x8xf32>
    %335 = vector.multi_reduction <maximumf>, %334, %cst_124 [2] : vector<1x8x8xf32> to vector<1x8xf32>
    %336 = vector.shape_cast %335 : vector<1x8xf32> to vector<1x8x1xf32>
    %337 = vector.broadcast %336 : vector<1x8x1xf32> to vector<1x8x8xf32>
    %338 = arith.subf %334, %337 : vector<1x8x8xf32>
    %339 = math.exp %338 : vector<1x8x8xf32>
    %cst_125 = arith.constant dense<0.000000e+00> : vector<1x8xf32>
    %340 = vector.multi_reduction <add>, %339, %cst_125 [2] : vector<1x8x8xf32> to vector<1x8xf32>
    %341 = vector.shape_cast %340 : vector<1x8xf32> to vector<1x8x1xf32>
    %342 = vector.broadcast %341 : vector<1x8x1xf32> to vector<1x8x8xf32>
    %343 = arith.divf %339, %342 : vector<1x8x8xf32>
    "tpu.trace_start"() <{level = 10 : i32, message = "bqk,bkd->bqd"}> : () -> ()
    %cst_126 = arith.constant dense<0.000000e+00> : vector<1x8x4xf32>
    %344 = tpu.matmul %343, %329, %cst_126 {dimension_numbers = #tpu.dot_dimension_numbers<[2], [1], [1], [2], [0, 0, 0, 1, 1, 2], [0], [0]>} : vector<1x8x8xf32>, vector<1x8x4xf32>, vector<1x8x4xf32> -> vector<1x8x4xf32>
    "tpu.trace_stop"() : () -> ()
    %345 = vector.extract_strided_slice %286 {offsets = [0, 0, 12], sizes = [1, 8, 4], strides = [1, 1, 1]} : vector<1x8x32xf32> to vector<1x8x4xf32>
    %346 = vector.extract_strided_slice %288 {offsets = [0, 0, 12], sizes = [1, 8, 4], strides = [1, 1, 1]} : vector<1x8x32xf32> to vector<1x8x4xf32>
    %347 = vector.extract_strided_slice %290 {offsets = [0, 0, 12], sizes = [1, 8, 4], strides = [1, 1, 1]} : vector<1x8x32xf32> to vector<1x8x4xf32>
    "tpu.trace_start"() <{level = 10 : i32, message = "bqd,bkd->bqk"}> : () -> ()
    %cst_127 = arith.constant dense<0.000000e+00> : vector<1x8x8xf32>
    %348 = tpu.matmul %345, %346, %cst_127 {dimension_numbers = #tpu.dot_dimension_numbers<[2], [2], [1], [1], [0, 0, 0, 1, 1, 1], [0], [0]>} : vector<1x8x4xf32>, vector<1x8x4xf32>, vector<1x8x8xf32> -> vector<1x8x8xf32>
    "tpu.trace_stop"() : () -> ()
    %cst_128 = arith.constant 5.000000e-01 : f32
    %349 = vector.broadcast %cst_128 : f32 to vector<1x8x8xf32>
    %350 = arith.mulf %348, %349 : vector<1x8x8xf32>
    %351 = vector.broadcast %279 : vector<1x1x8xf32> to vector<1x8x8xf32>
    %352 = arith.addf %350, %351 : vector<1x8x8xf32>
    %cst_129 = arith.constant dense<0xFF800000> : vector<1x8xf32>
    %353 = vector.multi_reduction <maximumf>, %352, %cst_129 [2] : vector<1x8x8xf32> to vector<1x8xf32>
    %354 = vector.shape_cast %353 : vector<1x8xf32> to vector<1x8x1xf32>
    %355 = vector.broadcast %354 : vector<1x8x1xf32> to vector<1x8x8xf32>
    %356 = arith.subf %352, %355 : vector<1x8x8xf32>
    %357 = math.exp %356 : vector<1x8x8xf32>
    %cst_130 = arith.constant dense<0.000000e+00> : vector<1x8xf32>
    %358 = vector.multi_reduction <add>, %357, %cst_130 [2] : vector<1x8x8xf32> to vector<1x8xf32>
    %359 = vector.shape_cast %358 : vector<1x8xf32> to vector<1x8x1xf32>
    %360 = vector.broadcast %359 : vector<1x8x1xf32> to vector<1x8x8xf32>
    %361 = arith.divf %357, %360 : vector<1x8x8xf32>
    "tpu.trace_start"() <{level = 10 : i32, message = "bqk,bkd->bqd"}> : () -> ()
    %cst_131 = arith.constant dense<0.000000e+00> : vector<1x8x4xf32>
    %362 = tpu.matmul %361, %347, %cst_131 {dimension_numbers = #tpu.dot_dimension_numbers<[2], [1], [1], [2], [0, 0, 0, 1, 1, 2], [0], [0]>} : vector<1x8x8xf32>, vector<1x8x4xf32>, vector<1x8x4xf32> -> vector<1x8x4xf32>
    "tpu.trace_stop"() : () -> ()
    %363 = vector.extract_strided_slice %286 {offsets = [0, 0, 16], sizes = [1, 8, 4], strides = [1, 1, 1]} : vector<1x8x32xf32> to vector<1x8x4xf32>
    %364 = vector.extract_strided_slice %288 {offsets = [0, 0, 16], sizes = [1, 8, 4], strides = [1, 1, 1]} : vector<1x8x32xf32> to vector<1x8x4xf32>
    %365 = vector.extract_strided_slice %290 {offsets = [0, 0, 16], sizes = [1, 8, 4], strides = [1, 1, 1]} : vector<1x8x32xf32> to vector<1x8x4xf32>
    "tpu.trace_start"() <{level = 10 : i32, message = "bqd,bkd->bqk"}> : () -> ()
    %cst_132 = arith.constant dense<0.000000e+00> : vector<1x8x8xf32>
    %366 = tpu.matmul %363, %364, %cst_132 {dimension_numbers = #tpu.dot_dimension_numbers<[2], [2], [1], [1], [0, 0, 0, 1, 1, 1], [0], [0]>} : vector<1x8x4xf32>, vector<1x8x4xf32>, vector<1x8x8xf32> -> vector<1x8x8xf32>
    "tpu.trace_stop"() : () -> ()
    %cst_133 = arith.constant 5.000000e-01 : f32
    %367 = vector.broadcast %cst_133 : f32 to vector<1x8x8xf32>
    %368 = arith.mulf %366, %367 : vector<1x8x8xf32>
    %369 = vector.broadcast %279 : vector<1x1x8xf32> to vector<1x8x8xf32>
    %370 = arith.addf %368, %369 : vector<1x8x8xf32>
    %cst_134 = arith.constant dense<0xFF800000> : vector<1x8xf32>
    %371 = vector.multi_reduction <maximumf>, %370, %cst_134 [2] : vector<1x8x8xf32> to vector<1x8xf32>
    %372 = vector.shape_cast %371 : vector<1x8xf32> to vector<1x8x1xf32>
    %373 = vector.broadcast %372 : vector<1x8x1xf32> to vector<1x8x8xf32>
    %374 = arith.subf %370, %373 : vector<1x8x8xf32>
    %375 = math.exp %374 : vector<1x8x8xf32>
    %cst_135 = arith.constant dense<0.000000e+00> : vector<1x8xf32>
    %376 = vector.multi_reduction <add>, %375, %cst_135 [2] : vector<1x8x8xf32> to vector<1x8xf32>
    %377 = vector.shape_cast %376 : vector<1x8xf32> to vector<1x8x1xf32>
    %378 = vector.broadcast %377 : vector<1x8x1xf32> to vector<1x8x8xf32>
    %379 = arith.divf %375, %378 : vector<1x8x8xf32>
    "tpu.trace_start"() <{level = 10 : i32, message = "bqk,bkd->bqd"}> : () -> ()
    %cst_136 = arith.constant dense<0.000000e+00> : vector<1x8x4xf32>
    %380 = tpu.matmul %379, %365, %cst_136 {dimension_numbers = #tpu.dot_dimension_numbers<[2], [1], [1], [2], [0, 0, 0, 1, 1, 2], [0], [0]>} : vector<1x8x8xf32>, vector<1x8x4xf32>, vector<1x8x4xf32> -> vector<1x8x4xf32>
    "tpu.trace_stop"() : () -> ()
    %381 = vector.extract_strided_slice %286 {offsets = [0, 0, 20], sizes = [1, 8, 4], strides = [1, 1, 1]} : vector<1x8x32xf32> to vector<1x8x4xf32>
    %382 = vector.extract_strided_slice %288 {offsets = [0, 0, 20], sizes = [1, 8, 4], strides = [1, 1, 1]} : vector<1x8x32xf32> to vector<1x8x4xf32>
    %383 = vector.extract_strided_slice %290 {offsets = [0, 0, 20], sizes = [1, 8, 4], strides = [1, 1, 1]} : vector<1x8x32xf32> to vector<1x8x4xf32>
    "tpu.trace_start"() <{level = 10 : i32, message = "bqd,bkd->bqk"}> : () -> ()
    %cst_137 = arith.constant dense<0.000000e+00> : vector<1x8x8xf32>
    %384 = tpu.matmul %381, %382, %cst_137 {dimension_numbers = #tpu.dot_dimension_numbers<[2], [2], [1], [1], [0, 0, 0, 1, 1, 1], [0], [0]>} : vector<1x8x4xf32>, vector<1x8x4xf32>, vector<1x8x8xf32> -> vector<1x8x8xf32>
    "tpu.trace_stop"() : () -> ()
    %cst_138 = arith.constant 5.000000e-01 : f32
    %385 = vector.broadcast %cst_138 : f32 to vector<1x8x8xf32>
    %386 = arith.mulf %384, %385 : vector<1x8x8xf32>
    %387 = vector.broadcast %279 : vector<1x1x8xf32> to vector<1x8x8xf32>
    %388 = arith.addf %386, %387 : vector<1x8x8xf32>
    %cst_139 = arith.constant dense<0xFF800000> : vector<1x8xf32>
    %389 = vector.multi_reduction <maximumf>, %388, %cst_139 [2] : vector<1x8x8xf32> to vector<1x8xf32>
    %390 = vector.shape_cast %389 : vector<1x8xf32> to vector<1x8x1xf32>
    %391 = vector.broadcast %390 : vector<1x8x1xf32> to vector<1x8x8xf32>
    %392 = arith.subf %388, %391 : vector<1x8x8xf32>
    %393 = math.exp %392 : vector<1x8x8xf32>
    %cst_140 = arith.constant dense<0.000000e+00> : vector<1x8xf32>
    %394 = vector.multi_reduction <add>, %393, %cst_140 [2] : vector<1x8x8xf32> to vector<1x8xf32>
    %395 = vector.shape_cast %394 : vector<1x8xf32> to vector<1x8x1xf32>
    %396 = vector.broadcast %395 : vector<1x8x1xf32> to vector<1x8x8xf32>
    %397 = arith.divf %393, %396 : vector<1x8x8xf32>
    "tpu.trace_start"() <{level = 10 : i32, message = "bqk,bkd->bqd"}> : () -> ()
    %cst_141 = arith.constant dense<0.000000e+00> : vector<1x8x4xf32>
    %398 = tpu.matmul %397, %383, %cst_141 {dimension_numbers = #tpu.dot_dimension_numbers<[2], [1], [1], [2], [0, 0, 0, 1, 1, 2], [0], [0]>} : vector<1x8x8xf32>, vector<1x8x4xf32>, vector<1x8x4xf32> -> vector<1x8x4xf32>
    "tpu.trace_stop"() : () -> ()
    %399 = vector.extract_strided_slice %286 {offsets = [0, 0, 24], sizes = [1, 8, 4], strides = [1, 1, 1]} : vector<1x8x32xf32> to vector<1x8x4xf32>
    %400 = vector.extract_strided_slice %288 {offsets = [0, 0, 24], sizes = [1, 8, 4], strides = [1, 1, 1]} : vector<1x8x32xf32> to vector<1x8x4xf32>
    %401 = vector.extract_strided_slice %290 {offsets = [0, 0, 24], sizes = [1, 8, 4], strides = [1, 1, 1]} : vector<1x8x32xf32> to vector<1x8x4xf32>
    "tpu.trace_start"() <{level = 10 : i32, message = "bqd,bkd->bqk"}> : () -> ()
    %cst_142 = arith.constant dense<0.000000e+00> : vector<1x8x8xf32>
    %402 = tpu.matmul %399, %400, %cst_142 {dimension_numbers = #tpu.dot_dimension_numbers<[2], [2], [1], [1], [0, 0, 0, 1, 1, 1], [0], [0]>} : vector<1x8x4xf32>, vector<1x8x4xf32>, vector<1x8x8xf32> -> vector<1x8x8xf32>
    "tpu.trace_stop"() : () -> ()
    %cst_143 = arith.constant 5.000000e-01 : f32
    %403 = vector.broadcast %cst_143 : f32 to vector<1x8x8xf32>
    %404 = arith.mulf %402, %403 : vector<1x8x8xf32>
    %405 = vector.broadcast %279 : vector<1x1x8xf32> to vector<1x8x8xf32>
    %406 = arith.addf %404, %405 : vector<1x8x8xf32>
    %cst_144 = arith.constant dense<0xFF800000> : vector<1x8xf32>
    %407 = vector.multi_reduction <maximumf>, %406, %cst_144 [2] : vector<1x8x8xf32> to vector<1x8xf32>
    %408 = vector.shape_cast %407 : vector<1x8xf32> to vector<1x8x1xf32>
    %409 = vector.broadcast %408 : vector<1x8x1xf32> to vector<1x8x8xf32>
    %410 = arith.subf %406, %409 : vector<1x8x8xf32>
    %411 = math.exp %410 : vector<1x8x8xf32>
    %cst_145 = arith.constant dense<0.000000e+00> : vector<1x8xf32>
    %412 = vector.multi_reduction <add>, %411, %cst_145 [2] : vector<1x8x8xf32> to vector<1x8xf32>
    %413 = vector.shape_cast %412 : vector<1x8xf32> to vector<1x8x1xf32>
    %414 = vector.broadcast %413 : vector<1x8x1xf32> to vector<1x8x8xf32>
    %415 = arith.divf %411, %414 : vector<1x8x8xf32>
    "tpu.trace_start"() <{level = 10 : i32, message = "bqk,bkd->bqd"}> : () -> ()
    %cst_146 = arith.constant dense<0.000000e+00> : vector<1x8x4xf32>
    %416 = tpu.matmul %415, %401, %cst_146 {dimension_numbers = #tpu.dot_dimension_numbers<[2], [1], [1], [2], [0, 0, 0, 1, 1, 2], [0], [0]>} : vector<1x8x8xf32>, vector<1x8x4xf32>, vector<1x8x4xf32> -> vector<1x8x4xf32>
    "tpu.trace_stop"() : () -> ()
    %417 = vector.extract_strided_slice %286 {offsets = [0, 0, 28], sizes = [1, 8, 4], strides = [1, 1, 1]} : vector<1x8x32xf32> to vector<1x8x4xf32>
    %418 = vector.extract_strided_slice %288 {offsets = [0, 0, 28], sizes = [1, 8, 4], strides = [1, 1, 1]} : vector<1x8x32xf32> to vector<1x8x4xf32>
    %419 = vector.extract_strided_slice %290 {offsets = [0, 0, 28], sizes = [1, 8, 4], strides = [1, 1, 1]} : vector<1x8x32xf32> to vector<1x8x4xf32>
    "tpu.trace_start"() <{level = 10 : i32, message = "bqd,bkd->bqk"}> : () -> ()
    %cst_147 = arith.constant dense<0.000000e+00> : vector<1x8x8xf32>
    %420 = tpu.matmul %417, %418, %cst_147 {dimension_numbers = #tpu.dot_dimension_numbers<[2], [2], [1], [1], [0, 0, 0, 1, 1, 1], [0], [0]>} : vector<1x8x4xf32>, vector<1x8x4xf32>, vector<1x8x8xf32> -> vector<1x8x8xf32>
    "tpu.trace_stop"() : () -> ()
    %cst_148 = arith.constant 5.000000e-01 : f32
    %421 = vector.broadcast %cst_148 : f32 to vector<1x8x8xf32>
    %422 = arith.mulf %420, %421 : vector<1x8x8xf32>
    %423 = vector.broadcast %279 : vector<1x1x8xf32> to vector<1x8x8xf32>
    %424 = arith.addf %422, %423 : vector<1x8x8xf32>
    %cst_149 = arith.constant dense<0xFF800000> : vector<1x8xf32>
    %425 = vector.multi_reduction <maximumf>, %424, %cst_149 [2] : vector<1x8x8xf32> to vector<1x8xf32>
    %426 = vector.shape_cast %425 : vector<1x8xf32> to vector<1x8x1xf32>
    %427 = vector.broadcast %426 : vector<1x8x1xf32> to vector<1x8x8xf32>
    %428 = arith.subf %424, %427 : vector<1x8x8xf32>
    %429 = math.exp %428 : vector<1x8x8xf32>
    %cst_150 = arith.constant dense<0.000000e+00> : vector<1x8xf32>
    %430 = vector.multi_reduction <add>, %429, %cst_150 [2] : vector<1x8x8xf32> to vector<1x8xf32>
    %431 = vector.shape_cast %430 : vector<1x8xf32> to vector<1x8x1xf32>
    %432 = vector.broadcast %431 : vector<1x8x1xf32> to vector<1x8x8xf32>
    %433 = arith.divf %429, %432 : vector<1x8x8xf32>
    "tpu.trace_start"() <{level = 10 : i32, message = "bqk,bkd->bqd"}> : () -> ()
    %cst_151 = arith.constant dense<0.000000e+00> : vector<1x8x4xf32>
    %434 = tpu.matmul %433, %419, %cst_151 {dimension_numbers = #tpu.dot_dimension_numbers<[2], [1], [1], [2], [0, 0, 0, 1, 1, 2], [0], [0]>} : vector<1x8x8xf32>, vector<1x8x4xf32>, vector<1x8x4xf32> -> vector<1x8x4xf32>
    "tpu.trace_stop"() : () -> ()
    %435 = tpu.concatenate %308, %326, %344, %362, %380, %398, %416, %434 in 2 : vector<1x8x4xf32>, vector<1x8x4xf32>, vector<1x8x4xf32>, vector<1x8x4xf32>, vector<1x8x4xf32>, vector<1x8x4xf32>, vector<1x8x4xf32>, vector<1x8x4xf32> -> vector<1x8x32xf32>
    %436 = vector.shape_cast %435 : vector<1x8x32xf32> to vector<8x32xf32>
    %c0_152 = arith.constant 0 : index
    %c0_153 = arith.constant 0 : index
    %437 = vector.load %arg22[%c0_152, %c0_153] : memref<32x32xf32, #tpu.memory_space<vmem>>, vector<32x32xf32>
    %cst_154 = arith.constant dense<0.000000e+00> : vector<8x32xf32>
    %438 = tpu.matmul %436, %437, %cst_154 {dimension_numbers = #tpu.dot_dimension_numbers<[1], [0], [0], [1], [0, 0, 1, 1], [], []>} : vector<8x32xf32>, vector<32x32xf32>, vector<8x32xf32> -> vector<8x32xf32>
    %c0_155 = arith.constant 0 : index
    %c0_156 = arith.constant 0 : index
    %439 = vector.load %arg23[%c0_155, %c0_156] : memref<1x32xf32, #tpu.memory_space<vmem>>, vector<1x32xf32>
    %440 = vector.broadcast %439 : vector<1x32xf32> to vector<8x32xf32>
    %441 = arith.addf %438, %440 : vector<8x32xf32>
    %442 = arith.addf %267, %441 : vector<8x32xf32>
    %c0_157 = arith.constant 0 : index
    %c0_158 = arith.constant 0 : index
    %443 = vector.load %arg28[%c0_157, %c0_158] : memref<1x32xf32, #tpu.memory_space<vmem>>, vector<1x32xf32>
    %c0_159 = arith.constant 0 : index
    %c0_160 = arith.constant 0 : index
    %444 = vector.load %arg29[%c0_159, %c0_160] : memref<1x32xf32, #tpu.memory_space<vmem>>, vector<1x32xf32>
    %cst_161 = arith.constant dense<0.000000e+00> : vector<8xf32>
    %445 = vector.multi_reduction <add>, %442, %cst_161 [1] : vector<8x32xf32> to vector<8xf32>
    %446 = vector.shape_cast %445 : vector<8xf32> to vector<8x1xf32>
    %cst_162 = arith.constant 3.200000e+01 : f32
    %447 = vector.broadcast %cst_162 : f32 to vector<8x1xf32>
    %448 = arith.divf %446, %447 : vector<8x1xf32>
    %449 = vector.broadcast %448 : vector<8x1xf32> to vector<8x32xf32>
    %450 = arith.subf %442, %449 : vector<8x32xf32>
    %451 = arith.mulf %450, %450 : vector<8x32xf32>
    %cst_163 = arith.constant dense<0.000000e+00> : vector<8xf32>
    %452 = vector.multi_reduction <add>, %451, %cst_163 [1] : vector<8x32xf32> to vector<8xf32>
    %453 = vector.shape_cast %452 : vector<8xf32> to vector<8x1xf32>
    %cst_164 = arith.constant 3.200000e+01 : f32
    %454 = vector.broadcast %cst_164 : f32 to vector<8x1xf32>
    %455 = arith.divf %453, %454 : vector<8x1xf32>
    %456 = vector.broadcast %448 : vector<8x1xf32> to vector<8x32xf32>
    %457 = arith.subf %442, %456 : vector<8x32xf32>
    %cst_165 = arith.constant 9.99999974E-6 : f32
    %458 = vector.broadcast %cst_165 : f32 to vector<8x1xf32>
    %459 = arith.addf %455, %458 : vector<8x1xf32>
    %460 = math.sqrt %459 : vector<8x1xf32>
    %461 = vector.broadcast %460 : vector<8x1xf32> to vector<8x32xf32>
    %462 = arith.divf %457, %461 : vector<8x32xf32>
    %463 = vector.broadcast %443 : vector<1x32xf32> to vector<8x32xf32>
    %464 = arith.mulf %462, %463 : vector<8x32xf32>
    %465 = vector.broadcast %444 : vector<1x32xf32> to vector<8x32xf32>
    %466 = arith.addf %464, %465 : vector<8x32xf32>
    %c0_166 = arith.constant 0 : index
    %c0_167 = arith.constant 0 : index
    %467 = vector.load %arg24[%c0_166, %c0_167] : memref<32x2048xf32, #tpu.memory_space<vmem>>, vector<32x2048xf32>
    %cst_168 = arith.constant dense<0.000000e+00> : vector<8x2048xf32>
    %468 = tpu.matmul %466, %467, %cst_168 {dimension_numbers = #tpu.dot_dimension_numbers<[1], [0], [0], [1], [0, 0, 1, 1], [], []>} : vector<8x32xf32>, vector<32x2048xf32>, vector<8x2048xf32> -> vector<8x2048xf32>
    %c0_169 = arith.constant 0 : index
    %c0_170 = arith.constant 0 : index
    %469 = vector.load %arg25[%c0_169, %c0_170] : memref<1x2048xf32, #tpu.memory_space<vmem>>, vector<1x2048xf32>
    %470 = vector.broadcast %469 : vector<1x2048xf32> to vector<8x2048xf32>
    %471 = arith.addf %468, %470 : vector<8x2048xf32>
    %cst_171 = arith.constant 0.000000e+00 : f32
    %472 = vector.broadcast %cst_171 : f32 to vector<8x2048xf32>
    %473 = arith.maximumf %471, %472 : vector<8x2048xf32>
    %c0_172 = arith.constant 0 : index
    %c0_173 = arith.constant 0 : index
    %474 = vector.load %arg26[%c0_172, %c0_173] : memref<2048x32xf32, #tpu.memory_space<vmem>>, vector<2048x32xf32>
    %cst_174 = arith.constant dense<0.000000e+00> : vector<8x32xf32>
    %475 = tpu.matmul %473, %474, %cst_174 {dimension_numbers = #tpu.dot_dimension_numbers<[1], [0], [0], [1], [0, 0, 1, 1], [], []>} : vector<8x2048xf32>, vector<2048x32xf32>, vector<8x32xf32> -> vector<8x32xf32>
    %c0_175 = arith.constant 0 : index
    %c0_176 = arith.constant 0 : index
    %476 = vector.load %arg27[%c0_175, %c0_176] : memref<1x32xf32, #tpu.memory_space<vmem>>, vector<1x32xf32>
    %477 = vector.broadcast %476 : vector<1x32xf32> to vector<8x32xf32>
    %478 = arith.addf %475, %477 : vector<8x32xf32>
    %479 = arith.addf %466, %478 : vector<8x32xf32>
    %c0_177 = arith.constant 0 : index
    %c0_178 = arith.constant 0 : index
    %480 = vector.load %arg30[%c0_177, %c0_178] : memref<1x32xf32, #tpu.memory_space<vmem>>, vector<1x32xf32>
    %c0_179 = arith.constant 0 : index
    %c0_180 = arith.constant 0 : index
    %481 = vector.load %arg31[%c0_179, %c0_180] : memref<1x32xf32, #tpu.memory_space<vmem>>, vector<1x32xf32>
    %cst_181 = arith.constant dense<0.000000e+00> : vector<8xf32>
    %482 = vector.multi_reduction <add>, %479, %cst_181 [1] : vector<8x32xf32> to vector<8xf32>
    %483 = vector.shape_cast %482 : vector<8xf32> to vector<8x1xf32>
    %cst_182 = arith.constant 3.200000e+01 : f32
    %484 = vector.broadcast %cst_182 : f32 to vector<8x1xf32>
    %485 = arith.divf %483, %484 : vector<8x1xf32>
    %486 = vector.broadcast %485 : vector<8x1xf32> to vector<8x32xf32>
    %487 = arith.subf %479, %486 : vector<8x32xf32>
    %488 = arith.mulf %487, %487 : vector<8x32xf32>
    %cst_183 = arith.constant dense<0.000000e+00> : vector<8xf32>
    %489 = vector.multi_reduction <add>, %488, %cst_183 [1] : vector<8x32xf32> to vector<8xf32>
    %490 = vector.shape_cast %489 : vector<8xf32> to vector<8x1xf32>
    %cst_184 = arith.constant 3.200000e+01 : f32
    %491 = vector.broadcast %cst_184 : f32 to vector<8x1xf32>
    %492 = arith.divf %490, %491 : vector<8x1xf32>
    %493 = vector.broadcast %485 : vector<8x1xf32> to vector<8x32xf32>
    %494 = arith.subf %479, %493 : vector<8x32xf32>
    %cst_185 = arith.constant 9.99999974E-6 : f32
    %495 = vector.broadcast %cst_185 : f32 to vector<8x1xf32>
    %496 = arith.addf %492, %495 : vector<8x1xf32>
    %497 = math.sqrt %496 : vector<8x1xf32>
    %498 = vector.broadcast %497 : vector<8x1xf32> to vector<8x32xf32>
    %499 = arith.divf %494, %498 : vector<8x32xf32>
    %500 = vector.broadcast %480 : vector<1x32xf32> to vector<8x32xf32>
    %501 = arith.mulf %499, %500 : vector<8x32xf32>
    %502 = vector.broadcast %481 : vector<1x32xf32> to vector<8x32xf32>
    %503 = arith.addf %501, %502 : vector<8x32xf32>
    %cst_186 = arith.constant dense<true> : vector<1x8xi1>
    %504 = arith.xori %275, %cst_186 : vector<1x8xi1>
    %c-1_i32_187 = arith.constant -1 : i32
    %505 = vector.broadcast %c-1_i32_187 : i32 to vector<1x8xi32>
    %506 = arith.select %504, %270, %505 : vector<1x8xi1>, vector<1x8xi32>
    %cst_188 = arith.constant dense<-2147483648> : vector<1xi32>
    %507 = vector.multi_reduction <maxsi>, %506, %cst_188 [1] : vector<1x8xi32> to vector<1xi32>
    %508 = vector.shape_cast %507 : vector<1xi32> to vector<1x1xi32>
    %509 = tpu.iota {dimensions = array<i32: 1>} : vector<1x8xi32>
    %510 = tpu.iota {dimensions = array<i32: 0>} : vector<1x8xi32>
    %c8_i32_189 = arith.constant 8 : i32
    %511 = vector.broadcast %c8_i32_189 : i32 to vector<1x8xi32>
    %512 = arith.muli %510, %511 : vector<1x8xi32>
    %513 = vector.broadcast %508 : vector<1x1xi32> to vector<1x8xi32>
    %514 = arith.addi %512, %513 : vector<1x8xi32>
    %515 = arith.cmpi eq, %509, %514 : vector<1x8xi32>
    %516 = arith.extui %515 : vector<1x8xi1> to vector<1x8xi32>
    %517 = arith.sitofp %516 : vector<1x8xi32> to vector<1x8xf32>
    %cst_190 = arith.constant dense<0.000000e+00> : vector<1x32xf32>
    %518 = tpu.matmul %517, %503, %cst_190 {dimension_numbers = #tpu.dot_dimension_numbers<[1], [0], [0], [1], [0, 0, 1, 1], [], []>} : vector<1x8xf32>, vector<8x32xf32>, vector<1x32xf32> -> vector<1x32xf32>
    %c0_191 = arith.constant 0 : index
    %c0_192 = arith.constant 0 : index
    %519 = vector.load %arg32[%c0_191, %c0_192] : memref<32x8xf32, #tpu.memory_space<vmem>>, vector<32x8xf32>
    %cst_193 = arith.constant dense<0.000000e+00> : vector<1x8xf32>
    %520 = tpu.matmul %518, %519, %cst_193 {dimension_numbers = #tpu.dot_dimension_numbers<[1], [0], [0], [1], [0, 0, 1, 1], [], []>} : vector<1x32xf32>, vector<32x8xf32>, vector<1x8xf32> -> vector<1x8xf32>
    %c0_194 = arith.constant 0 : index
    %c0_195 = arith.constant 0 : index
    %521 = vector.load %arg33[%c0_194, %c0_195] : memref<1x8xf32, #tpu.memory_space<vmem>>, vector<1x8xf32>
    %522 = arith.addf %520, %521 : vector<1x8xf32>
    %c0_196 = arith.constant 0 : index
    %c0_197 = arith.constant 0 : index
    %c0_198 = arith.constant 0 : index
    %523 = vector.load %arg34[%c0_196, %c0_197, %c0_198] : memref<1x1x8xf32, #tpu.memory_space<vmem>>, vector<1x1x8xf32>
    %524 = vector.shape_cast %523 : vector<1x1x8xf32> to vector<1x8xf32>
    %525 = vector.shape_cast %522 : vector<1x8xf32> to vector<1x1x8xf32>
    tpu.vector_store %arg34[%c0_196, %c0_197, %c0_198], %525 {strides = array<i32>} : memref<1x1x8xf32, #tpu.memory_space<vmem>>, vector<1x1x8xf32>,
    return
  }
  func.func @transform_0(%arg0: i32) -> (i32, i32, i32) {
    %c0_i32 = arith.constant 0 : i32
    %c0_i32_0 = arith.constant 0 : i32
    %c0_i32_1 = arith.constant 0 : i32
    return %arg0, %c0_i32, %c0_i32_0 : i32, i32, i32
  }
  func.func @transform_1(%arg0: i32) -> (i32, i32) {
    %c0_i32 = arith.constant 0 : i32
    %c0_i32_0 = arith.constant 0 : i32
    %c0_i32_1 = arith.constant 0 : i32
    return %c0_i32, %c0_i32_0 : i32, i32
  }
  func.func @transform_2(%arg0: i32) -> (i32, i32) {
    %c0_i32 = arith.constant 0 : i32
    %c0_i32_0 = arith.constant 0 : i32
    %c0_i32_1 = arith.constant 0 : i32
    return %c0_i32, %c0_i32_0 : i32, i32
  }
  func.func @transform_3(%arg0: i32) -> (i32, i32) {
    %c0_i32 = arith.constant 0 : i32
    %c0_i32_0 = arith.constant 0 : i32
    %c0_i32_1 = arith.constant 0 : i32
    return %c0_i32, %c0_i32_0 : i32, i32
  }
  func.func @transform_4(%arg0: i32) -> (i32, i32) {
    %c0_i32 = arith.constant 0 : i32
    %c0_i32_0 = arith.constant 0 : i32
    %c0_i32_1 = arith.constant 0 : i32
    return %c0_i32, %c0_i32_0 : i32, i32
  }
  func.func @transform_5(%arg0: i32) -> (i32, i32) {
    %c0_i32 = arith.constant 0 : i32
    %c0_i32_0 = arith.constant 0 : i32
    %c0_i32_1 = arith.constant 0 : i32
    return %c0_i32, %c0_i32_0 : i32, i32
  }
  func.func @transform_6(%arg0: i32) -> (i32, i32) {
    %c0_i32 = arith.constant 0 : i32
    %c0_i32_0 = arith.constant 0 : i32
    %c0_i32_1 = arith.constant 0 : i32
    return %c0_i32, %c0_i32_0 : i32, i32
  }
  func.func @transform_7(%arg0: i32) -> (i32, i32) {
    %c0_i32 = arith.constant 0 : i32
    %c0_i32_0 = arith.constant 0 : i32
    %c0_i32_1 = arith.constant 0 : i32
    return %c0_i32, %c0_i32_0 : i32, i32
  }
  func.func @transform_8(%arg0: i32) -> (i32, i32) {
    %c0_i32 = arith.constant 0 : i32
    %c0_i32_0 = arith.constant 0 : i32
    %c0_i32_1 = arith.constant 0 : i32
    return %c0_i32, %c0_i32_0 : i32, i32
  }
  func.func @transform_9(%arg0: i32) -> (i32, i32) {
    %c0_i32 = arith.constant 0 : i32
    %c0_i32_0 = arith.constant 0 : i32
    %c0_i32_1 = arith.constant 0 : i32
    return %c0_i32, %c0_i32_0 : i32, i32
  }
  func.func @transform_10(%arg0: i32) -> (i32, i32) {
    %c0_i32 = arith.constant 0 : i32
    %c0_i32_0 = arith.constant 0 : i32
    %c0_i32_1 = arith.constant 0 : i32
    return %c0_i32, %c0_i32_0 : i32, i32
  }
  func.func @transform_11(%arg0: i32) -> (i32, i32) {
    %c0_i32 = arith.constant 0 : i32
    %c0_i32_0 = arith.constant 0 : i32
    %c0_i32_1 = arith.constant 0 : i32
    return %c0_i32, %c0_i32_0 : i32, i32
  }
  func.func @transform_12(%arg0: i32) -> (i32, i32) {
    %c0_i32 = arith.constant 0 : i32
    %c0_i32_0 = arith.constant 0 : i32
    %c0_i32_1 = arith.constant 0 : i32
    return %c0_i32, %c0_i32_0 : i32, i32
  }
  func.func @transform_13(%arg0: i32) -> (i32, i32) {
    %c0_i32 = arith.constant 0 : i32
    %c0_i32_0 = arith.constant 0 : i32
    %c0_i32_1 = arith.constant 0 : i32
    return %c0_i32, %c0_i32_0 : i32, i32
  }
  func.func @transform_14(%arg0: i32) -> (i32, i32) {
    %c0_i32 = arith.constant 0 : i32
    %c0_i32_0 = arith.constant 0 : i32
    %c0_i32_1 = arith.constant 0 : i32
    return %c0_i32, %c0_i32_0 : i32, i32
  }
  func.func @transform_15(%arg0: i32) -> (i32, i32) {
    %c0_i32 = arith.constant 0 : i32
    %c0_i32_0 = arith.constant 0 : i32
    %c0_i32_1 = arith.constant 0 : i32
    return %c0_i32, %c0_i32_0 : i32, i32
  }
  func.func @transform_16(%arg0: i32) -> (i32, i32) {
    %c0_i32 = arith.constant 0 : i32
    %c0_i32_0 = arith.constant 0 : i32
    %c0_i32_1 = arith.constant 0 : i32
    return %c0_i32, %c0_i32_0 : i32, i32
  }
  func.func @transform_17(%arg0: i32) -> (i32, i32) {
    %c0_i32 = arith.constant 0 : i32
    %c0_i32_0 = arith.constant 0 : i32
    %c0_i32_1 = arith.constant 0 : i32
    return %c0_i32, %c0_i32_0 : i32, i32
  }
  func.func @transform_18(%arg0: i32) -> (i32, i32) {
    %c0_i32 = arith.constant 0 : i32
    %c0_i32_0 = arith.constant 0 : i32
    %c0_i32_1 = arith.constant 0 : i32
    return %c0_i32, %c0_i32_0 : i32, i32
  }
  func.func @transform_19(%arg0: i32) -> (i32, i32) {
    %c0_i32 = arith.constant 0 : i32
    %c0_i32_0 = arith.constant 0 : i32
    %c0_i32_1 = arith.constant 0 : i32
    return %c0_i32, %c0_i32_0 : i32, i32
  }
  func.func @transform_20(%arg0: i32) -> (i32, i32) {
    %c0_i32 = arith.constant 0 : i32
    %c0_i32_0 = arith.constant 0 : i32
    %c0_i32_1 = arith.constant 0 : i32
    return %c0_i32, %c0_i32_0 : i32, i32
  }
  func.func @transform_21(%arg0: i32) -> (i32, i32) {
    %c0_i32 = arith.constant 0 : i32
    %c0_i32_0 = arith.constant 0 : i32
    %c0_i32_1 = arith.constant 0 : i32
    return %c0_i32, %c0_i32_0 : i32, i32
  }
  func.func @transform_22(%arg0: i32) -> (i32, i32) {
    %c0_i32 = arith.constant 0 : i32
    %c0_i32_0 = arith.constant 0 : i32
    %c0_i32_1 = arith.constant 0 : i32
    return %c0_i32, %c0_i32_0 : i32, i32
  }
  func.func @transform_23(%arg0: i32) -> (i32, i32) {
    %c0_i32 = arith.constant 0 : i32
    %c0_i32_0 = arith.constant 0 : i32
    %c0_i32_1 = arith.constant 0 : i32
    return %c0_i32, %c0_i32_0 : i32, i32
  }
  func.func @transform_24(%arg0: i32) -> (i32, i32) {
    %c0_i32 = arith.constant 0 : i32
    %c0_i32_0 = arith.constant 0 : i32
    %c0_i32_1 = arith.constant 0 : i32
    return %c0_i32, %c0_i32_0 : i32, i32
  }
  func.func @transform_25(%arg0: i32) -> (i32, i32) {
    %c0_i32 = arith.constant 0 : i32
    %c0_i32_0 = arith.constant 0 : i32
    %c0_i32_1 = arith.constant 0 : i32
    return %c0_i32, %c0_i32_0 : i32, i32
  }
  func.func @transform_26(%arg0: i32) -> (i32, i32) {
    %c0_i32 = arith.constant 0 : i32
    %c0_i32_0 = arith.constant 0 : i32
    %c0_i32_1 = arith.constant 0 : i32
    return %c0_i32, %c0_i32_0 : i32, i32
  }
  func.func @transform_27(%arg0: i32) -> (i32, i32) {
    %c0_i32 = arith.constant 0 : i32
    %c0_i32_0 = arith.constant 0 : i32
    %c0_i32_1 = arith.constant 0 : i32
    return %c0_i32, %c0_i32_0 : i32, i32
  }
  func.func @transform_28(%arg0: i32) -> (i32, i32) {
    %c0_i32 = arith.constant 0 : i32
    %c0_i32_0 = arith.constant 0 : i32
    %c0_i32_1 = arith.constant 0 : i32
    return %c0_i32, %c0_i32_0 : i32, i32
  }
  func.func @transform_29(%arg0: i32) -> (i32, i32) {
    %c0_i32 = arith.constant 0 : i32
    %c0_i32_0 = arith.constant 0 : i32
    %c0_i32_1 = arith.constant 0 : i32
    return %c0_i32, %c0_i32_0 : i32, i32
  }
  func.func @transform_30(%arg0: i32) -> (i32, i32) {
    %c0_i32 = arith.constant 0 : i32
    %c0_i32_0 = arith.constant 0 : i32
    %c0_i32_1 = arith.constant 0 : i32
    return %c0_i32, %c0_i32_0 : i32, i32
  }
  func.func @transform_31(%arg0: i32) -> (i32, i32) {
    %c0_i32 = arith.constant 0 : i32
    %c0_i32_0 = arith.constant 0 : i32
    %c0_i32_1 = arith.constant 0 : i32
    return %c0_i32, %c0_i32_0 : i32, i32
  }
  func.func @transform_32(%arg0: i32) -> (i32, i32) {
    %c0_i32 = arith.constant 0 : i32
    %c0_i32_0 = arith.constant 0 : i32
    %c0_i32_1 = arith.constant 0 : i32
    return %c0_i32, %c0_i32_0 : i32, i32
  }
  func.func @transform_33(%arg0: i32) -> (i32, i32, i32) {
    %c0_i32 = arith.constant 0 : i32
    %c0_i32_0 = arith.constant 0 : i32
    %c0_i32_1 = arith.constant 0 : i32
    return %arg0, %c0_i32, %c0_i32_0 : i32, i32, i32
  }
}

</mosaic_0001>

<bundles_post_ra>
// kernel: tpu_custom_call.1
= control target key start
LH: loop header
LB: loop body
LE: loop exit
PB: predicated region body
PF: predicated region fallthrough
CT: control target
= control target key end

     0   :  { %s22614_s6 = smov 1   ;;  %s22615_s10 = smov 2   ;;  %s27112_s0 = inlined_call_operand.smem [shape: u32[34], index: -1, kind: input, shape index: {}] }
   0x1   :  { %s22691_s5 = sld [smem:[%s27112_s0]]   ;;  %s22616_s14 = smov 3  }
   0x2   :  { %s22696_s9 = sld [smem:[%s27112_s0 + %s22614_s6]]   ;;  %s22617_s18 = smov 4  }
   0x3   :  { %s22701_s13 = sld [smem:[%s27112_s0 + %s22615_s10]]   ;;  %s22618_s22 = smov 5  }
   0x4   :  { %s22706_s17 = sld [smem:[%s27112_s0 + %s22616_s14]]   ;;  %s22619_s26 = smov 6  }
   0x5   :  { %s22711_s21 = sld [smem:[%s27112_s0 + %s22617_s18]]   ;;  %s22620_s30 = smov 7  }
   0x6   :  { %s22716_s25 = sld [smem:[%s27112_s0 + %s22618_s22]]   ;;  %s22621_s4 = smov 8  }
   0x7   :  { %27191 = sst [smem:[#allocation5_spill]] %s22691_s5  ;;  %s22622_s10 = smov 9  }
   0x8   :  { %27192 = sst [smem:[#allocation6_spill]] %s22696_s9  ;;  %s22623_s15 = smov 10  }
   0x9   :  { %27193 = sst [smem:[#allocation7_spill]] %s22701_s13  ;;  %s22624_s20 = smov 11  }
   0xa   :  { %s22721_s29 = sld [smem:[%s27112_s0 + %s22619_s26]]   ;;  %s22625_s26 = smov 12  }
   0xb   :  { %s22726_s3 = sld [smem:[%s27112_s0 + %s22620_s30]]   ;;  %s22626_s1 = smov 13  }
   0xc   :  { %s22731_s8 = sld [smem:[%s27112_s0 + %s22621_s4]]   ;;  %s22627_s7 = smov 14  }
   0xd   :  { %s22736_s14 = sld [smem:[%s27112_s0 + %s22622_s10]]   ;;  %s22629_s22 = smov 16  }
   0xe   :  { %s22741_s19 = sld [smem:[%s27112_s0 + %s22623_s15]]   ;;  %s22628_s15 = smov 15  }
   0xf   :  { %s22746_s24 = sld [smem:[%s27112_s0 + %s22624_s20]]   ;;  %s22630_s28 = smov 17  }
  0x10   :  { %s22751_s30 = sld [smem:[%s27112_s0 + %s22625_s26]]  }
  0x11   :  { %27194 = sst [smem:[#allocation8_spill]] %s22726_s3 }
  0x12   :  { %27195 = sst [smem:[#allocation9_spill]] %s22731_s8 }
  0x13   :  { %27196 = sst [smem:[#allocation10_spill]] %s22736_s14 }
  0x14   :  { %s22756_s6 = sld [smem:[%s27112_s0 + %s22626_s1]]  }
  0x15   :  { %s22761_s12 = sld [smem:[%s27112_s0 + %s22627_s7]]   ;;  %s22631_s7 = smov 18  }
  0x16   :  { %s22766_s20 = sld [smem:[%s27112_s0 + %s22628_s15]]   ;;  %s22632_s15 = smov 19  }
  0x17   :  { %s22771_s27 = sld [smem:[%s27112_s0 + %s22629_s22]]   ;;  %s22633_s22 = smov 20  }
  0x18   :  { %s22776_s4 = sld [smem:[%s27112_s0 + %s22630_s28]]   ;;  %s22634_s28 = smov 21  }
  0x1a   :  { %27197 = sst [smem:[#allocation11_spill]] %s22756_s6 }
  0x1b   :  { %27198 = sst [smem:[#allocation12_spill]] %s22761_s12 }
  0x1c   :  { %27199 = sst [smem:[#allocation13_spill]] %s22766_s20 }
  0x1d   :  { %27200 = sst [smem:[#allocation14_spill]] %s22771_s27 }
  0x1e   :  { %27201 = sst [smem:[#allocation15_spill]] %s22776_s4 }
  0x1f   :  { %s22781_s12 = sld [smem:[%s27112_s0 + %s22631_s7]]   ;;  %s22635_s7 = smov 22  }
  0x20   :  { %s22786_s20 = sld [smem:[%s27112_s0 + %s22632_s15]]   ;;  %s22636_s15 = smov 23  }
  0x21   :  { %s22791_s27 = sld [smem:[%s27112_s0 + %s22633_s22]]   ;;  %s22637_s22 = smov 24  }
  0x22   :  { %s22796_s4 = sld [smem:[%s27112_s0 + %s22634_s28]]   ;;  %s22638_s28 = smov 25  }
  0x25   :  { %27202 = sst [smem:[#allocation16_spill]] %s22781_s12 }
  0x26   :  { %27203 = sst [smem:[#allocation17_spill]] %s22786_s20 }
  0x27   :  { %27204 = sst [smem:[#allocation18_spill]] %s22791_s27 }
  0x28   :  { %27205 = sst [smem:[#allocation19_spill]] %s22796_s4 }
  0x29   :  { %s22801_s12 = sld [smem:[%s27112_s0 + %s22635_s7]]   ;;  %s22639_s7 = smov 26  }
  0x2a   :  { %s22806_s20 = sld [smem:[%s27112_s0 + %s22636_s15]]   ;;  %s22640_s15 = smov 27  }
  0x2b   :  { %s22811_s27 = sld [smem:[%s27112_s0 + %s22637_s22]]   ;;  %s22641_s22 = smov 28  }
  0x2c   :  { %s22816_s4 = sld [smem:[%s27112_s0 + %s22638_s28]]   ;;  %s22642_s28 = smov 29  }
  0x2f   :  { %27206 = sst [smem:[#allocation20_spill]] %s22801_s12 }
  0x30   :  { %27207 = sst [smem:[#allocation21_spill]] %s22806_s20 }
  0x31   :  { %27208 = sst [smem:[#allocation22_spill]] %s22811_s27 }
  0x32   :  { %27209 = sst [smem:[#allocation23_spill]] %s22816_s4 }
  0x33   :  { %s22821_s12 = sld [smem:[%s27112_s0 + %s22639_s7]]   ;;  %s22643_s7 = smov 30  }
  0x34   :  { %s22826_s20 = sld [smem:[%s27112_s0 + %s22640_s15]]   ;;  %s22644_s15 = smov 31  }
  0x35   :  { %s22831_s27 = sld [smem:[%s27112_s0 + %s22641_s22]]   ;;  %s22645_s22 = smov 32  }
  0x36   :  { %s22836_s4 = sld [smem:[%s27112_s0 + %s22642_s28]]   ;;  %s22646_s28 = smov 33  }
  0x39   :  { %27210 = sst [smem:[#allocation24_spill]] %s22821_s12 }
  0x3a   :  { %27211 = sst [smem:[#allocation25_spill]] %s22826_s20 }
  0x3b   :  { %27212 = sst [smem:[#allocation26_spill]] %s22831_s27 }
  0x3c   :  { %27213 = sst [smem:[#allocation27_spill]] %s22836_s4 }
  0x3d   :  { %s22841_s12 = sld [smem:[%s27112_s0 + %s22643_s7]]  }
  0x3e   :  { %s22846_s20 = sld [smem:[%s27112_s0 + %s22644_s15]]  }
  0x3f   :  { %s22851_s27 = sld [smem:[%s27112_s0 + %s22645_s22]]  }
  0x40   :  { %s22856_s4 = sld [smem:[%s27112_s0 + %s22646_s28]]  }
  0x43   :  { %27214 = sst [smem:[#allocation28_spill]] %s22841_s12 }
  0x44   :  { %72 = vsyncpa [#allocation3], 0 }
  0x45   :  { %74 = vsyncpa [#allocation3 + $0x1], 0  ;;  %s22858_s7 = smov 0   ;;  %s22860_s10 = smov 0  }
  0x46   :  { %s22862_s11 = smov 0   ;;  %s22864_s15 = smov 0  }
  0x47 LB: > { %s27215_s14 = sld [smem:[#allocation10_spill]]  ;;  %s27216_s8 = sld [smem:[#allocation9_spill]]  ;;  %s22608_s11 = sphi %s22862_s11, %s27418_s11   ;;  %s22604_s10 = sphi %s22860_s10, %s27417_s10   ;;  %s22600_s7 = sphi %s22858_s7, %s27416_s7   ;;  %s22612_s15 = sphi %s22864_s15, %s27419_s15  }
  0x48   : > { %s27217_s3 = sld [smem:[#allocation8_spill]]  ;;  %s22879_s0 = sadd.s32 4294967295, %s22612_s15  }
  0x49   : > { %s19105_s16 = sadd.s32 4294967294, %s22612_s15   ;;  %s22883_s18 = sadd.s32 1, %s22612_s15  }
  0x4a   : > { %s785_s22 = sadd.s32 1, %s22608_s11  ;;  %s782_s23 = ssub.s32 %s22612_s15, %s22883_s18 }
  0x4b   : > { %p795_p0 = scmp.ne.s32.totalorder %s22608_s11, %s22604_s10  ;;  %p783_p1 = scmp.eq.s32.totalorder %s782_s23, 0 }
  0x4c   : > { %p796_p2 = scmp.eq.s32.totalorder %s22879_s0, 1  ;;  %p801_p3 = scmp.ne.s32.totalorder %s22604_s10, %s22600_s7 }
  0x4d   : > { %p802_p4 = scmp.eq.s32.totalorder %s19105_s16, 1  ;;  %p19108_p7 = scmp.ge.s32.totalorder %s22612_s15, 1 }
  0x4e   : > { %s22894_s26 = scalar_select %p783_p1, %s22608_s11, %s785_s22  }
  0x4f   : > { %p22896_p5 = por %p796_p2, %p795_p0  ;;  %p22900_p6 = por %p802_p4, %p801_p3 }
  0x50   : > { %p924_p8 = scmp.lt.s32.totalorder %s22612_s15, 3 }
  0x52   : > { %p925_p9 = pnand %p19108_p7, %p924_p8 }
  0x54   : > { %928 = sbr.rel (%p925_p9) target bundleno = 10869 (0x2a75), region = 152 }
  0x5b   : > { %s27220_s9 = sld [smem:[#allocation6_spill]]  ;;  %s27221_s5 = sld [smem:[#allocation5_spill]]  ;;  %vm1053_vm0 = vcmask 1043456   ;;  %v1219_v1 = vld [vmem:[%s22706_s17] sm:$0xff]  ;;  %v1220_v2 = vld [vmem:[%s22706_s17 + $0x8] sm:$0xff]  ;;  %vm27176_vm1 = vcmask 31744   ;;  %v1187_v59 = vlaneseq }
  0x5c   : > { %p1007_p10 = scmp.lt.s32.totalorder %s22879_s0, 1  ;;  %v21386_v3 = vpack.c.bf16 %v1220_v2, %v1219_v1  ;;  %s27222_s13 = sld [smem:[#allocation7_spill]]  ;;  %v1221_v12 = vld [vmem:[%s22706_s17 + $0x10] sm:$0xff]  ;;  %v1222_v13 = vld [vmem:[%s22706_s17 + $0x18] sm:$0xff]  ;;  %vm1162_vm2 = vcmask 261120   ;;  %v22647_v32 = vmov 0  }
  0x5d   : > { %v21390_v14 = vpack.c.bf16 %v1222_v13, %v1221_v12  ;;  %22189 = vset.pattern.permute.xlu0 %v22647_v32  ;;  %22188 = vset.pattern.permute.xlu1 %v22647_v32  ;;  %v27120_v33 = vmov 0.0   ;;  %vm27170_vm3 = vmmov 0   ;;  %v19121_v34 = vld [vmem:[%s22711_s21] ss:$0 sm:$0xff]  ;;  %s27129_s23 = smov 96   ;;  %v23011_v60 = vand.u32 127, %v1187_v59 }
  0x5e   : > { %s1008_s2 = scalar_select %p1007_p10, %s22879_s0, 1  ;;  %21387 = vmatprep.subr.bf16.mxu1 %v21386_v3  ;;  %v27233_v13 = vmov 0 }
  0x5f   : > { %21389 = vmatpush3.bf16.msra.mxu1 %v21386_v3  ;;  %27231 = vst [vmem:[#allocation37_spill] sm:$0xff] %v23011_v60  ;;  %vm1197_vm4 = vcmp.ne.s32.totalorder %v23011_v60, 0  ;;  %s27342_s6 = sld [smem:[#allocation11_spill]]  ;;  %s27415_s12 = sld [smem:[#allocation28_spill]] }
  0x60   : > { %s19453_s16 = sshll.u32 %s1008_s2, 6  ;;  %21391 = vmatprep.subr.bf16.mxu1 %v21390_v14  ;;  %v1198_v61 = vsel %vm1197_vm4, 1, %v22647_v32  ;;  %s27127_s2 = smov 64  }
  0x61   : > { %v1020_v0 = vld [vmem:[%s27220_s9] sm:$0xf]  ;;  %s1011_s22 = scalar_lea.vmem %s27221_s5, %s19453_s16  ;;  %s27166_s16 = smov 92  }
  0x62   : > { %20537 = vmatprep.subr.msk.mxu0 %vm1053_vm0, %v1020_v0  ;;  %v1012_v4 = vld [vmem:[%s1011_s22] sm:$0xff]  ;;  %v1013_v5 = vld [vmem:[%s1011_s22 + $0x8] sm:$0xff]  ;;  %v1014_v6 = vld [vmem:[%s1011_s22 + $0x10] sm:$0xff]  ;;  %s27181_s5 = smov 16   ;;  %s27180_s9 = smov 20  }
  0x63   : > { %20538 = vmatpush3.msk.msra.mxu0 %vm1053_vm0, %v1020_v0  ;;  %20539 = vmatprep.mubr.msk.f32.mxu0 %vm27176_vm1, %v1012_v4  ;;  %v1015_v7 = vld [vmem:[%s1011_s22 + $0x18] sm:$0xff]  ;;  %v1016_v8 = vld [vmem:[%s1011_s22 + $0x20] sm:$0xff]  ;;  %v1017_v9 = vld [vmem:[%s1011_s22 + $0x28] sm:$0xff] }
  0x64   : > { %20540 = vmatmul.mubr.msk.f32.vlgmr.msra.gmra.mrb[0].mxu0 %vm27176_vm1, %v1013_v5  ;;  %v1018_v10 = vld [vmem:[%s1011_s22 + $0x30] sm:$0xff]  ;;  %v1019_v11 = vld [vmem:[%s1011_s22 + $0x38] sm:$0xff]  ;;  %21393 = vmatpush3.bf16.msra.mxu1 %v21390_v14  ;;  %v19111_v15 = vld [vmem:[%s27222_s13] ss:$0 sm:$0xff]  ;;  %s27128_s22 = smov 124   ;;  %s27358_s13 = smov 80  }
  0x65   : > { %20542 = vmatprep.mubr.msk.f32.mxu0 %vm27176_vm1, %v1014_v6  ;;  %20571 = vmatprep.subr.mxu0 %v27120_v33 }
  0x66   : > { %20591 = vmatprep.subr.mxu1 %v27120_v33 }
  0x68   : > { %20543 = vmatmul.mubr.msk.f32.gmra.mrb[2].mxu0 %vm27176_vm1, %v1015_v7 }
  0x69   : > { %20545 = vmatprep.mubr.msk.f32.mxu0 %vm27176_vm1, %v1016_v8 }
  0x6c   : > { %20546 = vmatmul.mubr.msk.f32.gmra.mrb[4].mxu0 %vm27176_vm1, %v1017_v9 }
  0x6d   : > { %20548 = vmatprep.mubr.msk.f32.mxu0 %vm27176_vm1, %v1018_v10 }
  0x70   : > { %20549 = vmatmul.mubr.msk.f32.gmra.mrb[6].mxu0 %vm27176_vm1, %v1019_v11 }
  0x71   : > { %20573 = vmatprep.mubr.msk.f32.mxu0 %vm27170_vm3, %v27120_v33 }
 0x137   : > { %v20541_v16 = vpop.f32.mrb[0].mxu0 }
 0x138   : > { %v1123_v17 = vpop.f32.mrb[1].mxu0  ;;  %v22925_v19 = vadd.f32 %v20541_v16, %v19111_v15  ;;  %v27236_v16 = vmov 0 }
 0x139   : > { %v22923_v18 = vadd.f32 %v19111_v15, %v1123_v17 }
 0x13a   : > { %27224 = vst [vmem:[#allocation30_spill] sm:$0xff] %v22925_v19  ;;  %v1166_v54 = vsel %vm1162_vm2, %v22925_v19, 0.0 }
 0x13b   : > { %27223 = vst [vmem:[#allocation29_spill] sm:$0xff] %v22923_v18  ;;  %v20544_v20 = vpop.f32.mrb[2].mxu0  ;;  %20559 = vmatprep.mubr.msk.f32.mxu1 %vm1162_vm2, %v22923_v18  ;;  %v1163_v51 = vsel %vm1162_vm2, %v22923_v18, 0.0 }
 0x13c   : > { %v22929_v21 = vadd.f32 %v20544_v20, %v19111_v15  ;;  %v1133_v22 = vpop.f32.mrb[3].mxu0  ;;  %20560 = vmatmul.mubr.msk.f32.vlgmr.msra.gmra.mrb[0].mxu1 %vm1162_vm2, %v22925_v19  ;;  %v27239_v20 = vmov 0 }
 0x13d   : > { %v22933_v23 = vadd.f32 %v19111_v15, %v1133_v22 }
 0x13e   : > { %27225 = vst [vmem:[#allocation31_spill] sm:$0xff] %v22929_v21  ;;  %v1172_v53 = vsel %vm1162_vm2, %v22929_v21, 0.0 }
 0x13f   : > { %27226 = vst [vmem:[#allocation32_spill] sm:$0xff] %v22933_v23  ;;  %v20547_v24 = vpop.f32.mrb[4].mxu0  ;;  %20562 = vmatprep.mubr.msk.f32.mxu1 %vm1162_vm2, %v22933_v23  ;;  %v1169_v52 = vsel %vm1162_vm2, %v22933_v23, 0.0 }
 0x140   : > { %v22937_v25 = vadd.f32 %v20547_v24, %v19111_v15  ;;  %v1143_v26 = vpop.f32.mrb[5].mxu0  ;;  %20563 = vmatmul.mubr.msk.f32.gmra.mrb[2].mxu1 %vm1162_vm2, %v22929_v21  ;;  %v27242_v24 = vmov 0 }
 0x141   : > { %v22941_v27 = vadd.f32 %v19111_v15, %v1143_v26 }
 0x142   : > { %27227 = vst [vmem:[#allocation33_spill] sm:$0xff] %v22937_v25  ;;  %v1178_v55 = vsel %vm1162_vm2, %v22937_v25, 0.0 }
 0x143   : > { %27228 = vst [vmem:[#allocation34_spill] sm:$0xff] %v22941_v27  ;;  %v20550_v28 = vpop.f32.mrb[6].mxu0  ;;  %20565 = vmatprep.mubr.msk.f32.mxu1 %vm1162_vm2, %v22941_v27  ;;  %v1175_v56 = vsel %vm1162_vm2, %v22941_v27, 0.0 }
 0x144   : > { %v22945_v29 = vadd.f32 %v20550_v28, %v19111_v15  ;;  %v1153_v30 = vpop.f32.mrb[7].mxu0  ;;  %20566 = vmatmul.mubr.msk.f32.gmra.mrb[4].mxu1 %vm1162_vm2, %v22937_v25  ;;  %v27245_v28 = vmov 0 }
 0x145   : > { %v22949_v31 = vadd.f32 %v19111_v15, %v1153_v30 }
 0x146   : > { %27229 = vst [vmem:[#allocation35_spill] sm:$0xff] %v22945_v29  ;;  %v1184_v58 = vsel %vm1162_vm2, %v22945_v29, 0.0 }
 0x147   : > { %27230 = vst [vmem:[#allocation36_spill] sm:$0xff] %v22949_v31  ;;  %20568 = vmatprep.mubr.msk.f32.mxu1 %vm1162_vm2, %v22949_v31  ;;  %v1181_v57 = vsel %vm1162_vm2, %v22949_v31, 0.0 }
 0x148   : > { %20569 = vmatmul.mubr.msk.f32.gmra.mrb[6].mxu1 %vm1162_vm2, %v22945_v29 }
 0x149   : > { %20593 = vmatprep.mubr.msk.f32.mxu1 %vm27170_vm3, %v27120_v33 }
 0x20f   : > { %v20561_v35 = vpop.f32.mrb[0].mxu1 }
 0x210   : > { %v1320_v36 = vpop.f32.mrb[1].mxu1  ;;  %v22966_v40 = vadd.f32 %v20561_v35, %v19121_v34 }
 0x211   : > { %v22962_v37 = vadd.f32 %v19121_v34, %v1320_v36  ;;  %v27251_v36 = vmov 0 }
 0x213   : > { %v20564_v38 = vpop.f32.mrb[2].mxu1  ;;  %1360 = vrot.lane.b32.xlu0 %v22962_v37, %s27129_s23 }
 0x214   : > { %v1330_v39 = vpop.f32.mrb[3].mxu1  ;;  %v22974_v44 = vadd.f32 %v20564_v38, %v19121_v34 }
 0x215   : > { %v22968_v41 = vadd.f32 %v19121_v34, %v1330_v39  ;;  %v27254_v39 = vmov 0 }
 0x217   : > { %v20567_v42 = vpop.f32.mrb[4].mxu1  ;;  %1514 = vrot.lane.b32.xlu1 %v22968_v41, %s27129_s23  ;;  %1437 = vrot.lane.b32.xlu0 %v22966_v40, %s27129_s23 }
 0x218   : > { %v1340_v43 = vpop.f32.mrb[5].mxu1  ;;  %v22982_v48 = vadd.f32 %v20567_v42, %v19121_v34 }
 0x219   : > { %v22976_v45 = vadd.f32 %v19121_v34, %v1340_v43  ;;  %v23138_v43 = vshrl.u32 %v1187_v59, 7 }
 0x21b   : > { %v20570_v46 = vpop.f32.mrb[6].mxu1  ;;  %1591 = vrot.lane.b32.xlu1 %v22974_v44, %s27129_s23  ;;  %1668 = vrot.lane.b32.xlu0 %v22976_v45, %s27129_s23  ;;  %27257 = vst [vmem:[#allocation47_spill] sm:$0xff] %v23138_v43 }
 0x21c   : > { %v1350_v47 = vpop.f32.mrb[7].mxu1  ;;  %v22990_v50 = vadd.f32 %v20570_v46, %v19121_v34 }
 0x21d   : > { %v22984_v49 = vadd.f32 %v19121_v34, %v1350_v47  ;;  %v27248_v34 = vmov 0  ;;  %v23142_v47 = vsub.s32 %v23011_v60, %v23138_v43 }
 0x21f   : > { %1745 = vrot.lane.b32.xlu1 %v22982_v48, %s27129_s23  ;;  %1822 = vrot.lane.b32.xlu0 %v22984_v49, %s27129_s23  ;;  %27258 = vst [vmem:[#allocation48_spill] sm:$0xff] %v23142_v47 }
 0x223   : > { %1899 = vrot.lane.b32.xlu1 %v22990_v50, %s27129_s23  ;;  %s27139_s23 = smov 120  }
 0x23e   : > { %1164 = vadd.xlane.f32.xlu0 %v1163_v51 }
 0x242   : > { %1170 = vadd.xlane.f32.xlu0 %v1169_v52 }
 0x246   : > { %1173 = vadd.xlane.f32.xlu0 %v1172_v53 }
 0x247   : > { %1167 = vadd.xlane.f32.xlu1 %v1166_v54 }
 0x24a   : > { %1179 = vadd.xlane.f32.xlu0 %v1178_v55 }
 0x24b   : > { %1176 = vadd.xlane.f32.xlu1 %v1175_v56 }
 0x24f   : > { %1182 = vadd.xlane.f32.xlu1 %v1181_v57 }
 0x253   : > { %1185 = vadd.xlane.f32.xlu1 %v1184_v58 }
 0x260   : > { %1200 = vbcast.lane.b32.xlu0 %v1198_v61, 256 }
 0x285   : > { %v1361_v62 = vpop.permute.xlu0 %1360 }
 0x286   : > { %20572 = vmatpush3.xpose.msk.msra.mxu0 %vm27176_vm1, %v1361_v62 }
 0x287   : > { %20576 = vmatprep.subr.mxu0 %v27120_v33 }
 0x289   : > { %v1515_v63 = vpop.permute.xlu1 %1514  ;;  %20574 = vmatmul.mubr.msk.f32.vlgmr.msra.gmra.mrb[8].mxu0 %vm27176_vm1, %v22962_v37  ;;  %v1438_v0 = vpop.permute.xlu0 %1437 }
 0x28a   : > { %20577 = vmatpush3.xpose.msk.msra.mxu0 %vm27176_vm1, %v1438_v0  ;;  %20578 = vmatprep.mubr.msk.f32.mxu0 %vm27170_vm3, %v27120_v33 }
 0x28b   : > { %20581 = vmatprep.subr.mxu0 %v27120_v33 }
 0x28d   : > { %v1592_v1 = vpop.permute.xlu1 %1591  ;;  %20579 = vmatmul.mubr.msk.f32.vlgmr.msra.gmra.mrb[10].mxu0 %vm27176_vm1, %v22966_v40  ;;  %v1669_v2 = vpop.permute.xlu0 %1668 }
 0x28e   : > { %20582 = vmatpush3.xpose.msk.msra.mxu0 %vm27176_vm1, %v1515_v63  ;;  %20592 = vmatpush3.xpose.msk.msra.mxu1 %vm27176_vm1, %v1669_v2 }
 0x28f   : > { %20583 = vmatprep.mubr.msk.f32.mxu0 %vm27170_vm3, %v27120_v33  ;;  %20586 = vmatprep.subr.mxu0 %v27120_v33 }
 0x290   : > { %20601 = vmatprep.subr.mxu1 %v27120_v33 }
 0x291   : > { %20584 = vmatmul.mubr.msk.f32.vlgmr.msra.gmra.mrb[12].mxu0 %vm27176_vm1, %v22968_v41  ;;  %20594 = vmatmul.mubr.msk.f32.vlgmr.msra.gmra.mrb[8].mxu1 %vm27176_vm1, %v22976_v45  ;;  %v1823_v3 = vpop.permute.xlu0 %1822  ;;  %v1746_v4 = vpop.permute.xlu1 %1745 }
 0x292   : > { %20587 = vmatpush3.xpose.msk.msra.mxu0 %vm27176_vm1, %v1592_v1  ;;  %20602 = vmatpush3.xpose.msk.msra.mxu1 %vm27176_vm1, %v1823_v3 }
 0x293   : > { %20588 = vmatprep.mubr.msk.f32.mxu0 %vm27170_vm3, %v27120_v33  ;;  %20603 = vmatprep.mubr.msk.f32.mxu1 %vm27170_vm3, %v27120_v33 }
 0x294   : > { %20596 = vmatprep.subr.mxu0 %v27120_v33  ;;  %20611 = vmatprep.subr.mxu1 %v27120_v33 }
 0x295   : > { %20589 = vmatmul.mubr.msk.f32.vlgmr.msra.gmra.mrb[14].mxu0 %vm27176_vm1, %v22974_v44  ;;  %20604 = vmatmul.mubr.msk.f32.vlgmr.msra.gmra.mrb[10].mxu1 %vm27176_vm1, %v22984_v49  ;;  %v1900_v5 = vpop.permute.xlu1 %1899 }
 0x296   : > { %20597 = vmatpush3.xpose.msk.msra.mxu0 %vm27176_vm1, %v1746_v4  ;;  %20598 = vmatprep.mubr.msk.f32.mxu0 %vm27170_vm3, %v27120_v33 }
 0x297   : > { %20606 = vmatprep.subr.mxu0 %v27120_v33  ;;  %20613 = vmatprep.mubr.msk.f32.mxu1 %vm27170_vm3, %v27120_v33 }
 0x299   : > { %20599 = vmatmul.mubr.msk.f32.vlgmr.msra.gmra.mrb[16].mxu0 %vm27176_vm1, %v22982_v48 }
 0x29a   : > { %20607 = vmatpush3.xpose.msk.msra.mxu0 %vm27176_vm1, %v1900_v5  ;;  %20608 = vmatprep.mubr.msk.f32.mxu0 %vm27170_vm3, %v27120_v33 }
 0x29b   : > { %20616 = vmatprep.subr.mxu0 %v27120_v33 }
 0x29d   : > { %20609 = vmatmul.mubr.msk.f32.vlgmr.msra.gmra.mrb[18].mxu0 %vm27176_vm1, %v22990_v50 }
 0x29e   : > { %20618 = vmatprep.mubr.msk.f32.mxu0 %vm27170_vm3, %v27120_v33 }
 0x2cb   : > { %v1165_v6 = vpop.xlane.xlu0 %1164 }
 0x2cc   : > { %vm1189_vm8 = vcmp.eq.f32.partialorder %v1165_v6, 0.0 }
 0x2cf   : > { %v1171_v7 = vpop.xlane.xlu0 %1170 }
 0x2d0   : > { %vm1191_vm12 = vcmp.eq.f32.partialorder %v1171_v7, 0.0 }
 0x2d3   : > { %v1174_v8 = vpop.xlane.xlu0 %1173 }
 0x2d4   : > { %v1168_v9 = vpop.xlane.xlu1 %1167  ;;  %vm1192_vm0 = vcmp.eq.f32.partialorder %v1174_v8, 0.0 }
 0x2d5   : > { %vm1190_vm5 = vcmp.eq.f32.partialorder %v1168_v9, 0.0 }
 0x2d7   : > { %v1180_v10 = vpop.xlane.xlu0 %1179 }
 0x2d8   : > { %v1177_v11 = vpop.xlane.xlu1 %1176 }
 0x2d9   : > { %vm1193_vm10 = vcmp.eq.f32.partialorder %v1177_v11, 0.0 }
 0x2db   : > { %v23062_v12 = vpop.permute.xlu0 %1200 }
 0x2dc   : > { %27232 = vst [vmem:[#allocation38_spill] sm:$0xff] %v23062_v12  ;;  %vm27169_vm6 = vcmp.ne.s32.totalorder %v23062_v12, 0  ;;  %v1183_v15 = vpop.xlane.xlu1 %1182 }
 0x2dd   : > { %vm23067_vm7 = vmand %vm1190_vm5, %vm27169_vm6  ;;  %vm1195_vm13 = vcmp.eq.f32.partialorder %v1183_v15, 0.0  ;;  %vm1194_vm5 = vcmp.eq.f32.partialorder %v1180_v10, 0.0 }
 0x2de   : > { %v27234_v13 = vsel %vm23067_vm7, 4294967295, %v27233_v13  ;;  %v1212_v14 = vsel %vm23067_vm7, -1e+30, %v27120_v33  ;;  %vm23076_vm9 = vmand %vm1189_vm8, %vm27169_vm6 }
 0x2df   : > { %27235 = vst [vmem:[#allocation39_spill] sm:$0xff] %v27234_v13  ;;  %1995 = vperm.xlu0 %22189, %v1212_v14   ;;  %v27237_v16 = vsel %vm23076_vm9, 4294967295, %v27236_v16  ;;  %v1211_v17 = vsel %vm23076_vm9, -1e+30, %v27120_v33  ;;  %vm23085_vm11 = vmand %vm1193_vm10, %vm27169_vm6 }
 0x2e0   : > { %27238 = vst [vmem:[#allocation40_spill] sm:$0xff] %v27237_v16  ;;  %1992 = vperm.xlu1 %22188, %v1211_v17   ;;  %v27240_v20 = vsel %vm23085_vm11, 4294967295, %v27239_v20  ;;  %v1215_v22 = vsel %vm23085_vm11, -1e+30, %v27120_v33  ;;  %vm23094_vm14 = vmand %vm1191_vm12, %vm27169_vm6  ;;  %v1186_v32 = vpop.xlane.xlu1 %1185 }
 0x2e1   : > { %27241 = vst [vmem:[#allocation41_spill] sm:$0xff] %v27240_v20  ;;  %v27243_v24 = vsel %vm23094_vm14, 4294967295, %v27242_v24  ;;  %v1213_v26 = vsel %vm23094_vm14, -1e+30, %v27120_v33  ;;  %vm23103_vm15 = vmand %vm1195_vm13, %vm27169_vm6  ;;  %vm1196_vm10 = vcmp.eq.f32.partialorder %v1186_v32, 0.0  ;;  %vm2118_vm13 = vcmask 64512  }
 0x2e2   : > { %27244 = vst [vmem:[#allocation42_spill] sm:$0xff] %v27243_v24  ;;  %v27246_v28 = vsel %vm23103_vm15, 4294967295, %v27245_v28  ;;  %v1217_v30 = vsel %vm23103_vm15, -1e+30, %v27120_v33  ;;  %vm23112_vm4 = vmand %vm1192_vm0, %vm27169_vm6  ;;  %vm27175_vm0 = vcmask 97280  }
 0x2e3   : > { %2004 = vperm.xlu0 %22189, %v1215_v22   ;;  %27247 = vst [vmem:[#allocation43_spill] sm:$0xff] %v27246_v28  ;;  %v27249_v34 = vsel %vm23112_vm4, 4294967295, %v27248_v34  ;;  %v1214_v35 = vsel %vm23112_vm4, -1e+30, %v27120_v33  ;;  %vm23121_vm8 = vmand %vm1194_vm5, %vm27169_vm6  ;;  %vm27177_vm5 = vcmask 130048  }
 0x2e4   : > { %1998 = vperm.xlu1 %22188, %v1213_v26   ;;  %27250 = vst [vmem:[#allocation44_spill] sm:$0xff] %v27249_v34  ;;  %v27252_v36 = vsel %vm23121_vm8, 4294967295, %v27251_v36  ;;  %v1216_v38 = vsel %vm23121_vm8, -1e+30, %v27120_v33  ;;  %vm23130_vm12 = vmand %vm1196_vm10, %vm27169_vm6  ;;  %vm27174_vm10 = vcmask 162816   ;;  %vm27172_vm6 = vcmask 228352  }
 0x2e5   : > { %27253 = vst [vmem:[#allocation45_spill] sm:$0xff] %v27252_v36  ;;  %v27255_v39 = vsel %vm23130_vm12, 4294967295, %v27254_v39  ;;  %v1218_v42 = vsel %vm23130_vm12, -1e+30, %v27120_v33 }
 0x2e6   : > { %27256 = vst [vmem:[#allocation46_spill] sm:$0xff] %v27255_v39 }
 0x2e7   : > { %2010 = vperm.xlu0 %22189, %v1217_v30  }
 0x2e8   : > { %2001 = vperm.xlu1 %22188, %v1214_v35  }
 0x2ec   : > { %2007 = vperm.xlu1 %22188, %v1216_v38  }
 0x2f0   : > { %2013 = vperm.xlu1 %22188, %v1218_v42  }
 0x35c   : > { %v1432_v46 = vpop.f32.mrb[8].mxu0 }
 0x35d   : > { %v20575_v51 = vpop.f32.mrb[9].mxu0  ;;  %v1975_v55 = vmul.f32 0.5, %v1432_v46 }
 0x35e   : > { %v1996_v52 = vpop.permute.xlu0 %1995 }
 0x35f   : > { %v1993_v53 = vpop.permute.xlu1 %1992  ;;  %v23145_v56 = vrot.slane %v1996_v52, %v23142_v47 }
 0x360   : > { %v1509_v54 = vpop.f32.mrb[10].mxu0  ;;  %v23148_v57 = vrot.slane %v1993_v53, %v23142_v47 }
 0x361   : > { %v1976_v58 = vmul.f32 0.5, %v1509_v54  ;;  %v20580_v61 = vpop.f32.mrb[11].mxu0 }
 0x362   : > { %v2005_v59 = vpop.permute.xlu0 %2004  ;;  %v23151_v62 = vadd.f32 %v23148_v57, %v1975_v55 }
 0x363   : > { %v23154_v63 = vadd.f32 %v23145_v56, %v1976_v58  ;;  %v1999_v0 = vpop.permute.xlu1 %1998  ;;  %v23164_v8 = vrot.slane %v2005_v59, %v23142_v47 }
 0x364   : > { %v1586_v1 = vpop.f32.mrb[12].mxu0  ;;  %v23157_v2 = vrot.slane %v1999_v0, %v23142_v47  ;;  %v1740_v4 = vpop.f32.mrb[8].mxu1  ;;  %v2119_v5 = vsel %vm2118_vm13, %v23151_v62, -inf }
 0x365   : > { %v1977_v3 = vmul.f32 0.5, %v1586_v1  ;;  %v20585_v6 = vpop.f32.mrb[13].mxu0  ;;  %v2122_v7 = vsel %vm2118_vm13, %v23154_v63, -inf  ;;  %v1979_v9 = vmul.f32 0.5, %v1740_v4  ;;  %2120 = vmax.xlane.f32.xlu0 %v2119_v5  ;;  %v20595_v10 = vpop.f32.mrb[9].mxu1 }
 0x366   : > { %2123 = vmax.xlane.f32.xlu1 %v2122_v7  ;;  %v2011_v11 = vpop.permute.xlu0 %2010 }
 0x367   : > { %v23167_v14 = vadd.f32 %v23157_v2, %v1977_v3  ;;  %v2002_v15 = vpop.permute.xlu1 %2001  ;;  %v23170_v22 = vadd.f32 %v23164_v8, %v1979_v9  ;;  %v23178_v42 = vrot.slane %v2011_v11, %v23142_v47 }
 0x368   : > { %v1663_v17 = vpop.f32.mrb[14].mxu0  ;;  %v23173_v26 = vrot.slane %v2002_v15, %v23142_v47  ;;  %v1894_v32 = vpop.f32.mrb[10].mxu1 }
 0x369   : > { %v1978_v30 = vmul.f32 0.5, %v1663_v17  ;;  %v20590_v35 = vpop.f32.mrb[15].mxu0  ;;  %v2125_v38 = vsel %vm2118_vm13, %v23167_v14, -inf  ;;  %v1981_v46 = vmul.f32 0.5, %v1894_v32  ;;  %v20605_v51 = vpop.f32.mrb[11].mxu1  ;;  %v2131_v52 = vsel %vm2118_vm13, %v23170_v22, -inf }
 0x36a   : > { %2126 = vmax.xlane.f32.xlu0 %v2125_v38  ;;  %2132 = vmax.xlane.f32.xlu1 %v2131_v52 }
 0x36b   : > { %v2113_v53 = vadd.f32 %v23173_v26, %v1978_v30  ;;  %v2008_v54 = vpop.permute.xlu1 %2007  ;;  %v2116_v58 = vadd.f32 %v23178_v42, %v1981_v46 }
 0x36c   : > { %v1817_v55 = vpop.f32.mrb[16].mxu0  ;;  %v23185_v61 = vrot.slane %v2008_v54, %v23142_v47 }
 0x36d   : > { %v1980_v59 = vmul.f32 0.5, %v1817_v55  ;;  %v20600_v0 = vpop.f32.mrb[17].mxu0  ;;  %v2128_v1 = vsel %vm2118_vm13, %v2113_v53, -inf  ;;  %v2137_v3 = vsel %vm2118_vm13, %v2116_v58, -inf }
 0x36e   : > { %2129 = vmax.xlane.f32.xlu0 %v2128_v1  ;;  %2138 = vmax.xlane.f32.xlu1 %v2137_v3 }
 0x36f   : > { %v2115_v4 = vadd.f32 %v23185_v61, %v1980_v59  ;;  %v2014_v5 = vpop.permute.xlu1 %2013 }
 0x370   : > { %v1971_v6 = vpop.f32.mrb[18].mxu0  ;;  %v23191_v7 = vrot.slane %v2014_v5, %v23142_v47 }
 0x371   : > { %v1982_v9 = vmul.f32 0.5, %v1971_v6  ;;  %v20610_v10 = vpop.f32.mrb[19].mxu0  ;;  %v2134_v11 = vsel %vm2118_vm13, %v2115_v4, -inf }
 0x372   : > { %2135 = vmax.xlane.f32.xlu0 %v2134_v11 }
 0x373   : > { %v2117_v15 = vadd.f32 %v23191_v7, %v1982_v9 }
 0x375   : > { %v2140_v17 = vsel %vm2118_vm13, %v2117_v15, -inf }
 0x376   : > { %2141 = vmax.xlane.f32.xlu0 %v2140_v17 }
 0x37f   : > { %2207 = vrot.lane.b32.xlu1 %v22962_v37, %s27127_s2 }
 0x383   : > { %2359 = vrot.lane.b32.xlu1 %v22968_v41, %s27127_s2 }
 0x387   : > { %2435 = vrot.lane.b32.xlu1 %v22974_v44, %s27127_s2 }
 0x38b   : > { %2587 = vrot.lane.b32.xlu1 %v22982_v48, %s27127_s2 }
 0x38c   : > { %2283 = vrot.lane.b32.xlu0 %v22966_v40, %s27127_s2 }
 0x38f   : > { %2739 = vrot.lane.b32.xlu1 %v22990_v50, %s27127_s2 }
 0x390   : > { %2511 = vrot.lane.b32.xlu0 %v22976_v45, %s27127_s2 }
 0x393   : > { %2895 = vrot.lane.b32.xlu1 %v22966_v40, %s27166_s16 }
 0x394   : > { %2663 = vrot.lane.b32.xlu0 %v22984_v49, %s27127_s2  ;;  %s27138_s2 = smov 60  }
 0x397   : > { %2893 = vrot.lane.b32.xlu1 %v22966_v40, %s27128_s22 }
 0x398   : > { %2817 = vrot.lane.b32.xlu0 %v22962_v37, %s27166_s16 }
 0x39b   : > { %3051 = vrot.lane.b32.xlu1 %v22974_v44, %s27166_s16 }
 0x39c   : > { %2815 = vrot.lane.b32.xlu0 %v22962_v37, %s27128_s22 }
 0x3a0   : > { %2973 = vrot.lane.b32.xlu0 %v22968_v41, %s27166_s16 }
 0x3f2   : > { %v2121_v30 = vpop.xlane.xlu0 %2120 }
 0x3f3   : > { %v2124_v32 = vpop.xlane.xlu1 %2123  ;;  %v2143_v35 = vsub.f32 %v23151_v62, %v2121_v30 }
 0x3f4   : > { %v2144_v38 = vsub.f32 %v23154_v63, %v2124_v32 }
 0x3f5   : > { %v2151_v46 = vmul.f32 1.442695, %v2143_v35 }
 0x3f6   : > { %v2153_v51 = vmul.f32 1.442695, %v2144_v38 }
 0x3f7   : > { %v2127_v52 = vpop.xlane.xlu0 %2126  ;;  %22190 = vpow2.f32 %v2151_v46  ;;  %v2133_v55 = vpop.xlane.xlu1 %2132 }
 0x3f8   : > { %v2145_v54 = vsub.f32 %v23167_v14, %v2127_v52  ;;  %22192 = vpow2.f32 %v2153_v51  ;;  %v2147_v59 = vsub.f32 %v23170_v22, %v2133_v55 }
 0x3fa   : > { %v2155_v0 = vmul.f32 1.442695, %v2145_v54  ;;  %v2159_v1 = vmul.f32 1.442695, %v2147_v59 }
 0x3fb   : > { %v2130_v3 = vpop.xlane.xlu0 %2129  ;;  %v2139_v6 = vpop.xlane.xlu1 %2138 }
 0x3fc   : > { %22194 = vpow2.f32 %v2155_v0  ;;  %v2146_v5 = vsub.f32 %v2113_v53, %v2130_v3  ;;  %v2149_v9 = vsub.f32 %v2116_v58, %v2139_v6 }
 0x3fd   : > { %22196 = vpow2.f32 %v2159_v1 }
 0x3fe   : > { %v2157_v62 = vmul.f32 1.442695, %v2146_v5  ;;  %v2163_v63 = vmul.f32 1.442695, %v2149_v9 }
 0x3ff   : > { %v2136_v10 = vpop.xlane.xlu0 %2135  ;;  %v2208_v17 = vpop.permute.xlu1 %2207 }
 0x400   : > { %22198 = vpow2.f32 %v2157_v62  ;;  %v2148_v11 = vsub.f32 %v2115_v4, %v2136_v10  ;;  %20612 = vmatpush3.msra.mxu1 %v2208_v17 }
 0x401   : > { %v23228_v14 = vpop.eup %22190  ;;  %22200 = vpow2.f32 %v2163_v63  ;;  %20621 = vmatprep.subr.mxu1 %v27120_v33 }
 0x402   : > { %v2161_v30 = vmul.f32 1.442695, %v2148_v11  ;;  %v23231_v22 = vpop.eup %22192  ;;  %v2167_v53 = vsel %vm2118_vm13, %v23228_v14, 0.0 }
 0x403   : > { %v2142_v58 = vpop.xlane.xlu0 %2141  ;;  %2168 = vadd.xlane.f32.xlu1 %v2167_v53  ;;  %v2170_v4 = vsel %vm2118_vm13, %v23231_v22, 0.0  ;;  %v2360_v9 = vpop.permute.xlu1 %2359 }
 0x404   : > { %22202 = vpow2.f32 %v2161_v30  ;;  %v2150_v32 = vsub.f32 %v2117_v15, %v2142_v58  ;;  %2171 = vadd.xlane.f32.xlu0 %v2170_v4 }
 0x406   : > { %v23237_v35 = vpop.eup %22194  ;;  %v2165_v38 = vmul.f32 1.442695, %v2150_v32 }
 0x407   : > { %v2284_v46 = vpop.permute.xlu0 %2283  ;;  %v2173_v51 = vsel %vm2118_vm13, %v23237_v35, 0.0  ;;  %v23241_v52 = vpop.eup %22196 }
 0x408   : > { %22204 = vpow2.f32 %v2165_v38  ;;  %2174 = vadd.xlane.f32.xlu1 %v2173_v51  ;;  %20617 = vmatpush3.msra.mxu0 %v2284_v46  ;;  %v2179_v55 = vsel %vm2118_vm13, %v23241_v52, 0.0  ;;  %v2436_v62 = vpop.permute.xlu1 %2435 }
 0x409   : > { %20626 = vmatprep.subr.mxu0 %v27120_v33 }
 0x40a   : > { %v23244_v54 = vpop.eup %22198 }
 0x40b   : > { %v2176_v15 = vsel %vm2118_vm13, %v23244_v54, 0.0  ;;  %v23250_v59 = vpop.eup %22200  ;;  %v2512_v10 = vpop.permute.xlu0 %2511 }
 0x40c   : > { %2177 = vadd.xlane.f32.xlu0 %v2176_v15  ;;  %2180 = vadd.xlane.f32.xlu1 %v2179_v55  ;;  %v2185_v3 = vsel %vm2118_vm13, %v23250_v59, 0.0  ;;  %v2588_v63 = vpop.permute.xlu1 %2587 }
 0x40e   : > { %v23252_v0 = vpop.eup %22202 }
 0x40f   : > { %v2182_v1 = vsel %vm2118_vm13, %v23252_v0, 0.0  ;;  %v2664_v17 = vpop.permute.xlu0 %2663 }
 0x410   : > { %2183 = vadd.xlane.f32.xlu0 %v2182_v1  ;;  %2186 = vadd.xlane.f32.xlu1 %v2185_v3  ;;  %v23282_v11 = vpop.permute.xlu1 %2739 }
 0x412   : > { %v23258_v5 = vpop.eup %22204 }
 0x413   : > { %v2188_v6 = vsel %vm2118_vm13, %v23258_v5, 0.0  ;;  %v23286_v53 = vpop.permute.xlu0 %2817 }
 0x414   : > { %2189 = vadd.xlane.f32.xlu0 %v2188_v6  ;;  %v23284_v30 = vpop.permute.xlu1 %2895 }
 0x417   : > { %v23290_v32 = vpop.permute.xlu0 %2815 }
 0x418   : > { %v23288_v58 = vpop.permute.xlu1 %2893 }
 0x41b   : > { %v23294_v38 = vpop.permute.xlu0 %2973 }
 0x41c   : > { %v23292_v4 = vpop.permute.xlu1 %3051 }
 0x421   : > { %3049 = vrot.lane.b32.xlu1 %v22974_v44, %s27128_s22 }
 0x425   : > { %3207 = vrot.lane.b32.xlu1 %v22982_v48, %s27166_s16 }
 0x429   : > { %3205 = vrot.lane.b32.xlu1 %v22982_v48, %s27128_s22 }
 0x42a   : > { %2971 = vrot.lane.b32.xlu0 %v22968_v41, %s27128_s22 }
 0x42d   : > { %3363 = vrot.lane.b32.xlu1 %v22990_v50, %s27166_s16 }
 0x42e   : > { %3129 = vrot.lane.b32.xlu0 %v22976_v45, %s27166_s16 }
 0x431   : > { %3361 = vrot.lane.b32.xlu1 %v22990_v50, %s27128_s22 }
 0x432   : > { %3127 = vrot.lane.b32.xlu0 %v22976_v45, %s27128_s22 }
 0x436   : > { %3285 = vrot.lane.b32.xlu0 %v22984_v49, %s27166_s16  ;;  %s27168_s16 = smov 12  }
 0x43a   : > { %3283 = vrot.lane.b32.xlu0 %v22984_v49, %s27128_s22  ;;  %s27140_s22 = smov 88  }
 0x490   : > { %v2169_v46 = vpop.xlane.xlu1 %2168 }
 0x491   : > { %22206 = vrcp.f32 %v2169_v46  ;;  %v2172_v51 = vpop.xlane.xlu0 %2171 }
 0x492   : > { %22208 = vrcp.f32 %v2172_v51 }
 0x495   : > { %v2175_v15 = vpop.xlane.xlu1 %2174 }
 0x496   : > { %22210 = vrcp.f32 %v2175_v15  ;;  %v27259_v15 = vmov 0.0  }
 0x499   : > { %v2178_v55 = vpop.xlane.xlu0 %2177  ;;  %v2181_v1 = vpop.xlane.xlu1 %2180 }
 0x49a   : > { %22212 = vrcp.f32 %v2178_v55 }
 0x49b   : > { %22214 = vrcp.f32 %v2181_v1  ;;  %v22207_v3 = vpop.eup %22206 }
 0x49c   : > { %v22209_v6 = vpop.eup %22208  ;;  %v2192_v12 = vmul.f32 %v22207_v3, %v23228_v14 }
 0x49d   : > { %v2184_v33 = vpop.xlane.xlu0 %2183  ;;  %v2187_v47 = vpop.xlane.xlu1 %2186  ;;  %v2194_v43 = vmul.f32 %v22209_v6, %v23231_v22 }
 0x49e   : > { %22216 = vrcp.f32 %v2184_v33  ;;  %20614 = vmatmul.mubr.msk.f32.vlgmr.msra.gmra.mrb[12].mxu1 %vm2118_vm13, %v2192_v12 }
 0x49f   : > { %22218 = vrcp.f32 %v2187_v47  ;;  %20622 = vmatpush3.msra.mxu1 %v2360_v9  ;;  %20619 = vmatmul.mubr.msk.f32.vlgmr.msra.gmra.mrb[20].mxu0 %vm2118_vm13, %v2194_v43 }
 0x4a0   : > { %v22211_v46 = vpop.eup %22210  ;;  %20627 = vmatpush3.msra.mxu0 %v2436_v62  ;;  %20623 = vmatprep.mubr.msk.f32.mxu1 %vm27170_vm3, %v27259_v15 }
 0x4a1   : > { %v2190_v51 = vpop.xlane.xlu0 %2189  ;;  %v2196_v55 = vmul.f32 %v22211_v46, %v23237_v35  ;;  %20631 = vmatprep.subr.mxu1 %v27259_v15  ;;  %20628 = vmatprep.mubr.msk.f32.mxu0 %vm27170_vm3, %v27259_v15  ;;  %v3050_v9 = vpop.permute.xlu1 %3049 }
 0x4a2   : > { %22220 = vrcp.f32 %v2190_v51  ;;  %20636 = vmatprep.subr.mxu0 %v27259_v15 }
 0x4a3   : > { %20624 = vmatmul.mubr.msk.f32.vlgmr.msra.gmra.mrb[14].mxu1 %vm2118_vm13, %v2196_v55 }
 0x4a4   : > { %v22213_v33 = vpop.eup %22212  ;;  %20632 = vmatpush3.msra.mxu1 %v2512_v10  ;;  %20633 = vmatprep.mubr.msk.f32.mxu1 %vm27170_vm3, %v27259_v15 }
 0x4a5   : > { %v22215_v12 = vpop.eup %22214  ;;  %20641 = vmatprep.subr.mxu1 %v27259_v15  ;;  %v2198_v43 = vmul.f32 %v22213_v33, %v23244_v54  ;;  %v2972_v47 = vpop.permute.xlu0 %2971 }
 0x4a6   : > { %v2200_v14 = vmul.f32 %v22215_v12, %v23241_v52 }
 0x4a7   : > { %20629 = vmatmul.mubr.msk.f32.vlgmr.msra.gmra.mrb[22].mxu0 %vm2118_vm13, %v2198_v43 }
 0x4a8   : > { %v22217_v22 = vpop.eup %22216  ;;  %20634 = vmatmul.mubr.msk.f32.vlgmr.msra.gmra.mrb[16].mxu1 %vm2118_vm13, %v2200_v14  ;;  %20637 = vmatpush3.msra.mxu0 %v2588_v63 }
 0x4a9   : > { %v22219_v35 = vpop.eup %22218  ;;  %20642 = vmatpush3.msra.mxu1 %v2664_v17  ;;  %20638 = vmatprep.mubr.msk.f32.mxu0 %vm27170_vm3, %v27259_v15  ;;  %v2202_v62 = vmul.f32 %v22217_v22, %v23252_v0  ;;  %v3130_v63 = vpop.permute.xlu0 %3129 }
 0x4aa   : > { %20643 = vmatprep.mubr.msk.f32.mxu1 %vm27170_vm3, %v27259_v15  ;;  %20646 = vmatprep.subr.mxu0 %v27259_v15  ;;  %v2204_v52 = vmul.f32 %v22219_v35, %v23250_v59  ;;  %v3208_v59 = vpop.permute.xlu1 %3207 }
 0x4ab   : > { %20639 = vmatmul.mubr.msk.f32.vlgmr.msra.gmra.mrb[24].mxu0 %vm2118_vm13, %v2202_v62  ;;  %20651 = vmatprep.subr.mxu1 %v27259_v15 }
 0x4ac   : > { %v22221_v54 = vpop.eup %22220  ;;  %20644 = vmatmul.mubr.msk.f32.vlgmr.msra.gmra.mrb[18].mxu1 %vm2118_vm13, %v2204_v52  ;;  %20647 = vmatpush3.msra.mxu0 %v23282_v11 }
 0x4ad   : > { %20648 = vmatprep.mubr.msk.f32.mxu0 %vm27170_vm3, %v27259_v15  ;;  %v2206_v0 = vmul.f32 %v22221_v54, %v23258_v5  ;;  %20653 = vmatprep.mubr.msk.f32.mxu1 %vm27170_vm3, %v27259_v15  ;;  %v3128_v10 = vpop.permute.xlu0 %3127 }
 0x4ae   : > { %20656 = vmatprep.subr.mxu0 %v27259_v15  ;;  %v3206_v5 = vpop.permute.xlu1 %3205 }
 0x4af   : > { %20649 = vmatmul.mubr.msk.f32.vlgmr.msra.gmra.mrb[26].mxu0 %vm2118_vm13, %v2206_v0 }
 0x4b0   : > { %20652 = vmatpush3.xpose.msk.msra.mxu1 %vm27176_vm1, %v23286_v53  ;;  %20658 = vmatprep.mubr.msk.f32.mxu0 %vm27170_vm3, %v27259_v15 }
 0x4b1   : > { %20661 = vmatprep.subr.mxu1 %v27259_v15  ;;  %v3286_v11 = vpop.permute.xlu0 %3285 }
 0x4b2   : > { %v3364_v17 = vpop.permute.xlu1 %3363 }
 0x4b3   : > { %20654 = vmatmul.mubr.msk.f32.vlgmr.msra.gmra.mrb[20].mxu1 %vm27176_vm1, %v23290_v32  ;;  %20657 = vmatpush3.xpose.msk.msra.mxu0 %vm27176_vm1, %v23284_v30 }
 0x4b4   : > { %20662 = vmatpush3.xpose.msk.msra.mxu1 %vm27176_vm1, %v23294_v38  ;;  %20663 = vmatprep.mubr.msk.f32.mxu1 %vm27170_vm3, %v27259_v15 }
 0x4b5   : > { %20666 = vmatprep.subr.mxu0 %v27259_v15  ;;  %20671 = vmatprep.subr.mxu1 %v27259_v15  ;;  %v3284_v30 = vpop.permute.xlu0 %3283 }
 0x4b6   : > { %20659 = vmatmul.mubr.msk.f32.vlgmr.msra.gmra.mrb[28].mxu0 %vm27176_vm1, %v23288_v58  ;;  %v3362_v53 = vpop.permute.xlu1 %3361 }
 0x4b7   : > { %20664 = vmatmul.mubr.msk.f32.vlgmr.msra.gmra.mrb[22].mxu1 %vm27176_vm1, %v2972_v47  ;;  %20667 = vmatpush3.xpose.msk.msra.mxu0 %vm27176_vm1, %v23292_v4 }
 0x4b8   : > { %20672 = vmatpush3.xpose.msk.msra.mxu1 %vm27176_vm1, %v3130_v63  ;;  %20668 = vmatprep.mubr.msk.f32.mxu0 %vm27170_vm3, %v27259_v15 }
 0x4b9   : > { %20673 = vmatprep.mubr.msk.f32.mxu1 %vm27170_vm3, %v27259_v15  ;;  %20676 = vmatprep.subr.mxu0 %v27259_v15 }
 0x4ba   : > { %20669 = vmatmul.mubr.msk.f32.vlgmr.msra.gmra.mrb[30].mxu0 %vm27176_vm1, %v3050_v9  ;;  %20681 = vmatprep.subr.mxu1 %v27259_v15 }
 0x4bb   : > { %20674 = vmatmul.mubr.msk.f32.vlgmr.msra.gmra.mrb[24].mxu1 %vm27176_vm1, %v3128_v10  ;;  %20677 = vmatpush3.xpose.msk.msra.mxu0 %vm27176_vm1, %v3208_v59 }
 0x4bc   : > { %20682 = vmatpush3.xpose.msk.msra.mxu1 %vm27176_vm1, %v3286_v11  ;;  %20678 = vmatprep.mubr.msk.f32.mxu0 %vm27170_vm3, %v27259_v15 }
 0x4bd   : > { %20683 = vmatprep.mubr.msk.f32.mxu1 %vm27170_vm3, %v27259_v15  ;;  %20686 = vmatprep.subr.mxu0 %v27259_v15 }
 0x4be   : > { %20679 = vmatmul.mubr.msk.f32.vlgmr.msra.gmra.mrb[32].mxu0 %vm27176_vm1, %v3206_v5  ;;  %20691 = vmatprep.subr.mxu1 %v27259_v15 }
 0x4bf   : > { %20684 = vmatmul.mubr.msk.f32.vlgmr.msra.gmra.mrb[26].mxu1 %vm27176_vm1, %v3284_v30  ;;  %20687 = vmatpush3.xpose.msk.msra.mxu0 %vm27176_vm1, %v3364_v17 }
 0x4c0   : > { %20688 = vmatprep.mubr.msk.f32.mxu0 %vm27170_vm3, %v27259_v15  ;;  %20696 = vmatprep.subr.mxu0 %v27259_v15 }
 0x4c1   : > { %20693 = vmatprep.mubr.msk.f32.mxu1 %vm27170_vm3, %v27259_v15 }
 0x4c2   : > { %20689 = vmatmul.mubr.msk.f32.vlgmr.msra.gmra.mrb[34].mxu0 %vm27176_vm1, %v3362_v53 }
 0x4c3   : > { %20698 = vmatprep.mubr.msk.f32.mxu0 %vm27170_vm3, %v27259_v15 }
 0x571   : > { %v23381_v58 = vpop.f32.mrb[12].mxu1 }
 0x572   : > { %27260 = vst [vmem:[#allocation49_spill] sm:$0xff] %v23381_v58  ;;  %v20615_v32 = vpop.f32.mrb[13].mxu1  ;;  %v23383_v4 = vpop.f32.mrb[20].mxu0 }
 0x573   : > { %27261 = vst [vmem:[#allocation50_spill] sm:$0xff] %v23383_v4  ;;  %v20620_v38 = vpop.f32.mrb[21].mxu0 }
 0x576   : > { %v23385_v1 = vpop.f32.mrb[14].mxu1 }
 0x577   : > { %27262 = vst [vmem:[#allocation51_spill] sm:$0xff] %v23385_v1  ;;  %v20625_v3 = vpop.f32.mrb[15].mxu1 }
 0x57a   : > { %v23387_v6 = vpop.f32.mrb[22].mxu0 }
 0x57b   : > { %27263 = vst [vmem:[#allocation52_spill] sm:$0xff] %v23387_v6  ;;  %v23389_v46 = vpop.f32.mrb[16].mxu1  ;;  %v20630_v51 = vpop.f32.mrb[23].mxu0 }
 0x57c   : > { %27264 = vst [vmem:[#allocation53_spill] sm:$0xff] %v23389_v46  ;;  %v20635_v55 = vpop.f32.mrb[17].mxu1 }
 0x57e   : > { %v23391_v33 = vpop.f32.mrb[24].mxu0 }
 0x57f   : > { %27265 = vst [vmem:[#allocation54_spill] sm:$0xff] %v23391_v33  ;;  %v23393_v12 = vpop.f32.mrb[18].mxu1  ;;  %v20640_v43 = vpop.f32.mrb[25].mxu0 }
 0x580   : > { %27266 = vst [vmem:[#allocation55_spill] sm:$0xff] %v23393_v12  ;;  %v20645_v47 = vpop.f32.mrb[19].mxu1 }
 0x582   : > { %v23395_v14 = vpop.f32.mrb[26].mxu0 }
 0x583   : > { %27267 = vst [vmem:[#allocation56_spill] sm:$0xff] %v23395_v14  ;;  %v20650_v22 = vpop.f32.mrb[27].mxu0 }
 0x586   : > { %v2889_v35 = vpop.f32.mrb[20].mxu1 }
 0x587   : > { %v3439_v9 = vmul.f32 0.5, %v2889_v35  ;;  %v20655_v62 = vpop.f32.mrb[21].mxu1 }
 0x589   : > { %v2967_v52 = vpop.f32.mrb[28].mxu0  ;;  %v23398_v54 = vadd.f32 %v3439_v9, %v23148_v57 }
 0x58a   : > { %v3440_v63 = vmul.f32 0.5, %v2967_v52  ;;  %v3045_v0 = vpop.f32.mrb[22].mxu1  ;;  %v20660_v59 = vpop.f32.mrb[29].mxu0 }
 0x58b   : > { %v3441_v10 = vmul.f32 0.5, %v3045_v0  ;;  %v20665_v5 = vpop.f32.mrb[23].mxu1  ;;  %v3455_v11 = vsel %vm2118_vm13, %v23398_v54, -inf }
 0x58c   : > { %3456 = vmax.xlane.f32.xlu0 %v3455_v11  ;;  %v3448_v17 = vadd.f32 %v3440_v63, %v23145_v56 }
 0x58d   : > { %v3123_v30 = vpop.f32.mrb[30].mxu0  ;;  %v3449_v53 = vadd.f32 %v3441_v10, %v23157_v2 }
 0x58e   : > { %v3442_v32 = vmul.f32 0.5, %v3123_v30  ;;  %v3201_v38 = vpop.f32.mrb[24].mxu1  ;;  %v20670_v3 = vpop.f32.mrb[31].mxu0  ;;  %v3458_v51 = vsel %vm2118_vm13, %v3448_v17, -inf }
 0x58f   : > { %v3443_v55 = vmul.f32 0.5, %v3201_v38  ;;  %v20675_v43 = vpop.f32.mrb[25].mxu1  ;;  %3459 = vmax.xlane.f32.xlu1 %v3458_v51  ;;  %v3461_v47 = vsel %vm2118_vm13, %v3449_v53, -inf }
 0x590   : > { %3462 = vmax.xlane.f32.xlu0 %v3461_v47  ;;  %v3450_v22 = vadd.f32 %v3442_v32, %v23173_v26 }
 0x591   : > { %v3279_v35 = vpop.f32.mrb[32].mxu0  ;;  %v3451_v9 = vadd.f32 %v3443_v55, %v23164_v8 }
 0x592   : > { %v3444_v62 = vmul.f32 0.5, %v3279_v35  ;;  %v3357_v52 = vpop.f32.mrb[26].mxu1  ;;  %v20680_v63 = vpop.f32.mrb[33].mxu0  ;;  %v3464_v0 = vsel %vm2118_vm13, %v3450_v22, -inf }
 0x593   : > { %v20685_v59 = vpop.f32.mrb[27].mxu1  ;;  %v3467_v10 = vsel %vm2118_vm13, %v3451_v9, -inf  ;;  %v3445_v55 = vmul.f32 0.5, %v3357_v52 }
 0x594   : > { %3468 = vmax.xlane.f32.xlu1 %v3467_v10  ;;  %3465 = vmax.xlane.f32.xlu0 %v3464_v0  ;;  %v3452_v5 = vadd.f32 %v3444_v62, %v23185_v61 }
 0x595   : > { %v3435_v11 = vpop.f32.mrb[34].mxu0  ;;  %v23427_v43 = vadd.f32 %v3445_v55, %v23178_v42 }
 0x596   : > { %v3446_v30 = vmul.f32 0.5, %v3435_v11  ;;  %v20690_v38 = vpop.f32.mrb[35].mxu0  ;;  %v3470_v32 = vsel %vm2118_vm13, %v3452_v5, -inf }
 0x597   : > { %v3473_v47 = vsel %vm2118_vm13, %v23427_v43, -inf }
 0x598   : > { %3471 = vmax.xlane.f32.xlu0 %v3470_v32  ;;  %v3454_v3 = vadd.f32 %v3446_v30, %v23191_v7 }
 0x59a   : > { %v3476_v51 = vsel %vm2118_vm13, %v3454_v3, -inf }
 0x59c   : > { %3477 = vmax.xlane.f32.xlu0 %v3476_v51 }
 0x5a5   : > { %3543 = vrot.lane.b32.xlu1 %v22962_v37, %s27138_s2 }
 0x5b2   : > { %3619 = vrot.lane.b32.xlu0 %v22966_v40, %s27138_s2 }
 0x5b6   : > { %3847 = vrot.lane.b32.xlu0 %v22976_v45, %s27138_s2 }
 0x5ba   : > { %3999 = vrot.lane.b32.xlu0 %v22984_v49, %s27138_s2 }
 0x5be   : > { %4153 = vrot.lane.b32.xlu0 %v22962_v37, %s27140_s22 }
 0x5c2   : > { %4151 = vrot.lane.b32.xlu0 %v22962_v37, %s27139_s23 }
 0x5c6   : > { %4309 = vrot.lane.b32.xlu0 %v22968_v41, %s27140_s22 }
 0x5c9   : > { %3474 = vmax.xlane.f32.xlu1 %v3473_v47 }
 0x5da   : > { %3695 = vrot.lane.b32.xlu1 %v22968_v41, %s27138_s2 }
 0x5de   : > { %3771 = vrot.lane.b32.xlu1 %v22974_v44, %s27138_s2 }
 0x5e2   : > { %3923 = vrot.lane.b32.xlu1 %v22982_v48, %s27138_s2 }
 0x5e6   : > { %4075 = vrot.lane.b32.xlu1 %v22990_v50, %s27138_s2  ;;  %s27147_s2 = smov 56  }
 0x5ea   : > { %4231 = vrot.lane.b32.xlu1 %v22966_v40, %s27140_s22 }
 0x5ee   : > { %4229 = vrot.lane.b32.xlu1 %v22966_v40, %s27139_s23 }
 0x5f2   : > { %4387 = vrot.lane.b32.xlu1 %v22974_v44, %s27140_s22 }
 0x619   : > { %v3457_v35 = vpop.xlane.xlu0 %3456 }
 0x61a   : > { %v3479_v62 = vsub.f32 %v23398_v54, %v3457_v35 }
 0x61c   : > { %v3487_v52 = vmul.f32 1.442695, %v3479_v62  ;;  %v3460_v63 = vpop.xlane.xlu1 %3459 }
 0x61d   : > { %v3463_v0 = vpop.xlane.xlu0 %3462  ;;  %v3480_v59 = vsub.f32 %v3448_v17, %v3460_v63 }
 0x61e   : > { %22222 = vpow2.f32 %v3487_v52  ;;  %v3481_v10 = vsub.f32 %v3449_v53, %v3463_v0 }
 0x61f   : > { %v3489_v11 = vmul.f32 1.442695, %v3480_v59 }
 0x620   : > { %v3491_v30 = vmul.f32 1.442695, %v3481_v10 }
 0x621   : > { %22224 = vpow2.f32 %v3489_v11  ;;  %v3466_v38 = vpop.xlane.xlu0 %3465  ;;  %v3469_v32 = vpop.xlane.xlu1 %3468 }
 0x622   : > { %22226 = vpow2.f32 %v3491_v30  ;;  %v3482_v51 = vsub.f32 %v3450_v22, %v3466_v38  ;;  %v3483_v55 = vsub.f32 %v3451_v9, %v3469_v32 }
 0x624   : > { %v3493_v47 = vmul.f32 1.442695, %v3482_v51  ;;  %v3495_v39 = vmul.f32 1.442695, %v3483_v55 }
 0x625   : > { %v3472_v28 = vpop.xlane.xlu0 %3471  ;;  %v3544_v36 = vpop.permute.xlu1 %3543 }
 0x626   : > { %22228 = vpow2.f32 %v3493_v47  ;;  %v3484_v54 = vsub.f32 %v3452_v5, %v3472_v28  ;;  %20692 = vmatpush3.msra.mxu1 %v3544_v36 }
 0x627   : > { %22230 = vpow2.f32 %v3495_v39  ;;  %20701 = vmatprep.subr.mxu1 %v27259_v15 }
 0x628   : > { %v23449_v17 = vpop.eup %22222  ;;  %v3497_v53 = vmul.f32 1.442695, %v3484_v54 }
 0x629   : > { %v3478_v35 = vpop.xlane.xlu0 %3477  ;;  %v3503_v62 = vsel %vm2118_vm13, %v23449_v17, 0.0 }
 0x62a   : > { %22232 = vpow2.f32 %v3497_v53  ;;  %v3486_v22 = vsub.f32 %v3454_v3, %v3478_v35  ;;  %3504 = vadd.xlane.f32.xlu1 %v3503_v62 }
 0x62b   : > { %v23453_v9 = vpop.eup %22224 }
 0x62c   : > { %v23455_v52 = vpop.eup %22226  ;;  %v3501_v63 = vmul.f32 1.442695, %v3486_v22  ;;  %v3506_v28 = vsel %vm2118_vm13, %v23453_v9, 0.0 }
 0x62d   : > { %v3620_v36 = vpop.permute.xlu0 %3619  ;;  %v3509_v39 = vsel %vm2118_vm13, %v23455_v52, 0.0  ;;  %3507 = vadd.xlane.f32.xlu0 %v3506_v28 }
 0x62e   : > { %22234 = vpow2.f32 %v3501_v63  ;;  %3510 = vadd.xlane.f32.xlu1 %v3509_v39  ;;  %20697 = vmatpush3.msra.mxu0 %v3620_v36 }
 0x62f   : > { %20706 = vmatprep.subr.mxu0 %v27259_v15 }
 0x630   : > { %v23462_v5 = vpop.eup %22228 }
 0x631   : > { %v23464_v3 = vpop.eup %22230  ;;  %v3512_v0 = vsel %vm2118_vm13, %v23462_v5, 0.0  ;;  %v3848_v62 = vpop.permute.xlu0 %3847 }
 0x632   : > { %3513 = vadd.xlane.f32.xlu0 %v3512_v0  ;;  %v3515_v59 = vsel %vm2118_vm13, %v23464_v3, 0.0 }
 0x633   : > { %3516 = vadd.xlane.f32.xlu1 %v3515_v59 }
 0x634   : > { %v23470_v10 = vpop.eup %22232 }
 0x635   : > { %v3518_v11 = vsel %vm2118_vm13, %v23470_v10, 0.0  ;;  %v4000_v63 = vpop.permute.xlu0 %3999 }
 0x636   : > { %3519 = vadd.xlane.f32.xlu0 %v3518_v11 }
 0x638   : > { %v23474_v30 = vpop.eup %22234 }
 0x639   : > { %v3524_v38 = vsel %vm2118_vm13, %v23474_v30, 0.0  ;;  %v23503_v36 = vpop.permute.xlu0 %4153 }
 0x63a   : > { %3525 = vadd.xlane.f32.xlu0 %v3524_v38 }
 0x63d   : > { %v23505_v0 = vpop.permute.xlu0 %4151 }
 0x641   : > { %v23507_v11 = vpop.permute.xlu0 %4309 }
 0x650   : > { %4307 = vrot.lane.b32.xlu0 %v22968_v41, %s27139_s23 }
 0x654   : > { %4465 = vrot.lane.b32.xlu0 %v22976_v45, %s27140_s22 }
 0x656   : > { %v3475_v32 = vpop.xlane.xlu1 %3474 }
 0x657   : > { %v3485_v51 = vsub.f32 %v23427_v43, %v3475_v32 }
 0x658   : > { %4463 = vrot.lane.b32.xlu0 %v22976_v45, %s27139_s23 }
 0x659   : > { %v3499_v55 = vmul.f32 1.442695, %v3485_v51 }
 0x65a   : > { %v3696_v43 = vpop.permute.xlu1 %3695 }
 0x65b   : > { %22236 = vpow2.f32 %v3499_v55 }
 0x65c   : > { %4621 = vrot.lane.b32.xlu0 %v22984_v49, %s27140_s22 }
 0x65e   : > { %v3772_v53 = vpop.permute.xlu1 %3771 }
 0x660   : > { %4619 = vrot.lane.b32.xlu0 %v22984_v49, %s27139_s23 }
 0x662   : > { %v3924_v35 = vpop.permute.xlu1 %3923 }
 0x665   : > { %v23489_v47 = vpop.eup %22236 }
 0x666   : > { %v3521_v54 = vsel %vm2118_vm13, %v23489_v47, 0.0  ;;  %v4076_v22 = vpop.permute.xlu1 %4075 }
 0x667   : > { %3522 = vadd.xlane.f32.xlu1 %v3521_v54 }
 0x66a   : > { %v4232_v28 = vpop.permute.xlu1 %4231 }
 0x66e   : > { %v4230_v39 = vpop.permute.xlu1 %4229 }
 0x672   : > { %v4388_v59 = vpop.permute.xlu1 %4387 }
 0x678   : > { %4385 = vrot.lane.b32.xlu1 %v22974_v44, %s27139_s23 }
 0x67c   : > { %4543 = vrot.lane.b32.xlu1 %v22982_v48, %s27140_s22 }
 0x680   : > { %4541 = vrot.lane.b32.xlu1 %v22982_v48, %s27139_s23 }
 0x684   : > { %4699 = vrot.lane.b32.xlu1 %v22990_v50, %s27140_s22  ;;  %s27148_s22 = smov 116  }
 0x688   : > { %4697 = vrot.lane.b32.xlu1 %v22990_v50, %s27139_s23  ;;  %s27149_s23 = smov 84  }
 0x6b7   : > { %v3505_v38 = vpop.xlane.xlu1 %3504 }
 0x6b8   : > { %22238 = vrcp.f32 %v3505_v38 }
 0x6ba   : > { %v3508_v32 = vpop.xlane.xlu0 %3507 }
 0x6bb   : > { %22240 = vrcp.f32 %v3508_v32  ;;  %v3511_v51 = vpop.xlane.xlu1 %3510 }
 0x6bc   : > { %22242 = vrcp.f32 %v3511_v51 }
 0x6bf   : > { %v3514_v55 = vpop.xlane.xlu0 %3513 }
 0x6c0   : > { %22244 = vrcp.f32 %v3514_v55  ;;  %v3517_v54 = vpop.xlane.xlu1 %3516 }
 0x6c1   : > { %22246 = vrcp.f32 %v3517_v54 }
 0x6c2   : > { %v22239_v20 = vpop.eup %22238 }
 0x6c3   : > { %v3520_v34 = vpop.xlane.xlu0 %3519  ;;  %v3528_v24 = vmul.f32 %v22239_v20, %v23449_v17 }
 0x6c4   : > { %22248 = vrcp.f32 %v3520_v34 }
 0x6c5   : > { %v22241_v16 = vpop.eup %22240  ;;  %20694 = vmatmul.mubr.msk.f32.vlgmr.msra.gmra.mrb[28].mxu1 %vm2118_vm13, %v3528_v24 }
 0x6c6   : > { %v22243_v13 = vpop.eup %22242  ;;  %20702 = vmatpush3.msra.mxu1 %v3696_v43  ;;  %20703 = vmatprep.mubr.msk.f32.mxu1 %vm27170_vm3, %v27259_v15  ;;  %v3530_v38 = vmul.f32 %v22241_v16, %v23453_v9 }
 0x6c7   : > { %v3526_v32 = vpop.xlane.xlu0 %3525  ;;  %20711 = vmatprep.subr.mxu1 %v27259_v15  ;;  %v3532_v51 = vmul.f32 %v22243_v13, %v23455_v52 }
 0x6c8   : > { %22250 = vrcp.f32 %v3526_v32  ;;  %20699 = vmatmul.mubr.msk.f32.vlgmr.msra.gmra.mrb[36].mxu0 %vm2118_vm13, %v3530_v38 }
 0x6c9   : > { %20704 = vmatmul.mubr.msk.f32.vlgmr.msra.gmra.mrb[30].mxu1 %vm2118_vm13, %v3532_v51  ;;  %20707 = vmatpush3.msra.mxu0 %v3772_v53 }
 0x6ca   : > { %v22245_v20 = vpop.eup %22244  ;;  %20712 = vmatpush3.msra.mxu1 %v3848_v62  ;;  %20708 = vmatprep.mubr.msk.f32.mxu0 %vm27170_vm3, %v27259_v15 }
 0x6cb   : > { %v22247_v24 = vpop.eup %22246  ;;  %20713 = vmatprep.mubr.msk.f32.mxu1 %vm27170_vm3, %v27259_v15  ;;  %20716 = vmatprep.subr.mxu0 %v27259_v15  ;;  %v3534_v16 = vmul.f32 %v22245_v20, %v23462_v5 }
 0x6cc   : > { %20721 = vmatprep.subr.mxu1 %v27259_v15  ;;  %v3536_v13 = vmul.f32 %v22247_v24, %v23464_v3 }
 0x6cd   : > { %20709 = vmatmul.mubr.msk.f32.vlgmr.msra.gmra.mrb[38].mxu0 %vm2118_vm13, %v3534_v16 }
 0x6ce   : > { %v22249_v34 = vpop.eup %22248  ;;  %20714 = vmatmul.mubr.msk.f32.vlgmr.msra.gmra.mrb[32].mxu1 %vm2118_vm13, %v3536_v13  ;;  %20717 = vmatpush3.msra.mxu0 %v3924_v35 }
 0x6cf   : > { %20722 = vmatpush3.msra.mxu1 %v4000_v63  ;;  %20718 = vmatprep.mubr.msk.f32.mxu0 %vm27170_vm3, %v27259_v15  ;;  %v3538_v17 = vmul.f32 %v22249_v34, %v23470_v10  ;;  %v4308_v10 = vpop.permute.xlu0 %4307 }
 0x6d0   : > { %20726 = vmatprep.subr.mxu0 %v27259_v15  ;;  %20723 = vmatprep.mubr.msk.f32.mxu1 %vm27170_vm3, %v27259_v15 }
 0x6d1   : > { %20719 = vmatmul.mubr.msk.f32.vlgmr.msra.gmra.mrb[40].mxu0 %vm2118_vm13, %v3538_v17  ;;  %20731 = vmatprep.subr.mxu1 %v27259_v15 }
 0x6d2   : > { %v22251_v9 = vpop.eup %22250  ;;  %20727 = vmatpush3.msra.mxu0 %v4076_v22  ;;  %20728 = vmatprep.mubr.msk.f32.mxu0 %vm27170_vm3, %v27259_v15 }
 0x6d3   : > { %v3542_v52 = vmul.f32 %v22251_v9, %v23474_v30  ;;  %20736 = vmatprep.subr.mxu0 %v27259_v15  ;;  %v4466_v53 = vpop.permute.xlu0 %4465 }
 0x6d5   : > { %20729 = vmatmul.mubr.msk.f32.vlgmr.msra.gmra.mrb[42].mxu0 %vm2118_vm13, %v3542_v52 }
 0x6d6   : > { %20738 = vmatprep.mubr.msk.f32.mxu0 %vm27170_vm3, %v27259_v15 }
 0x6d7   : > { %v4464_v63 = vpop.permute.xlu0 %4463 }
 0x6d9   : > { %20737 = vmatpush3.xpose.msk.msra.mxu0 %vm27176_vm1, %v4232_v28 }
 0x6da   : > { %20746 = vmatprep.subr.mxu0 %v27259_v15 }
 0x6db   : > { %v4622_v28 = vpop.permute.xlu0 %4621 }
 0x6dc   : > { %20739 = vmatmul.mubr.msk.f32.vlgmr.msra.gmra.mrb[44].mxu0 %vm27176_vm1, %v4230_v39 }
 0x6dd   : > { %20747 = vmatpush3.xpose.msk.msra.mxu0 %vm27176_vm1, %v4388_v59  ;;  %20748 = vmatprep.mubr.msk.f32.mxu0 %vm27170_vm3, %v27259_v15 }
 0x6de   : > { %20756 = vmatprep.subr.mxu0 %v27259_v15 }
 0x6f4   : > { %v3523_v5 = vpop.xlane.xlu1 %3522 }
 0x6f5   : > { %22252 = vrcp.f32 %v3523_v5 }
 0x6f8   : > { %v4386_v3 = vpop.permute.xlu1 %4385 }
 0x6f9   : > { %20749 = vmatmul.mubr.msk.f32.vlgmr.msra.gmra.mrb[46].mxu0 %vm27176_vm1, %v4386_v3 }
 0x6fa   : > { %20758 = vmatprep.mubr.msk.f32.mxu0 %vm27170_vm3, %v27259_v15 }
 0x6fc   : > { %v4544_v30 = vpop.permute.xlu1 %4543 }
 0x6fd   : > { %20757 = vmatpush3.xpose.msk.msra.mxu0 %vm27176_vm1, %v4544_v30 }
 0x6fe   : > { %20766 = vmatprep.subr.mxu0 %v27259_v15 }
 0x6ff   : > { %v22253_v43 = vpop.eup %22252 }
 0x700   : > { %v4542_v35 = vpop.permute.xlu1 %4541  ;;  %v3540_v62 = vmul.f32 %v22253_v43, %v23489_v47 }
 0x701   : > { %20759 = vmatmul.mubr.msk.f32.vlgmr.msra.gmra.mrb[48].mxu0 %vm27176_vm1, %v4542_v35 }
 0x702   : > { %20724 = vmatmul.mubr.msk.f32.vlgmr.msra.gmra.mrb[34].mxu1 %vm2118_vm13, %v3540_v62  ;;  %20768 = vmatprep.mubr.msk.f32.mxu0 %vm27170_vm3, %v27259_v15 }
 0x703   : > { %20732 = vmatpush3.xpose.msk.msra.mxu1 %vm27176_vm1, %v23503_v36  ;;  %20733 = vmatprep.mubr.msk.f32.mxu1 %vm27170_vm3, %v27259_v15  ;;  %v4620_v36 = vpop.permute.xlu0 %4619 }
 0x704   : > { %v4700_v22 = vpop.permute.xlu1 %4699  ;;  %20741 = vmatprep.subr.mxu1 %v27259_v15 }
 0x705   : > { %20767 = vmatpush3.xpose.msk.msra.mxu0 %vm27176_vm1, %v4700_v22 }
 0x706   : > { %20734 = vmatmul.mubr.msk.f32.vlgmr.msra.gmra.mrb[36].mxu1 %vm27176_vm1, %v23505_v0  ;;  %20776 = vmatprep.subr.mxu0 %v27259_v15 }
 0x707   : > { %20742 = vmatpush3.xpose.msk.msra.mxu1 %vm27176_vm1, %v23507_v11  ;;  %20743 = vmatprep.mubr.msk.f32.mxu1 %vm27170_vm3, %v27259_v15 }
 0x708   : > { %v4698_v47 = vpop.permute.xlu1 %4697  ;;  %20751 = vmatprep.subr.mxu1 %v27259_v15 }
 0x709   : > { %20769 = vmatmul.mubr.msk.f32.vlgmr.msra.gmra.mrb[50].mxu0 %vm27176_vm1, %v4698_v47 }
 0x70a   : > { %20744 = vmatmul.mubr.msk.f32.vlgmr.msra.gmra.mrb[38].mxu1 %vm27176_vm1, %v4308_v10  ;;  %20778 = vmatprep.mubr.msk.f32.mxu0 %vm27170_vm3, %v27259_v15 }
 0x70b   : > { %20752 = vmatpush3.xpose.msk.msra.mxu1 %vm27176_vm1, %v4466_v53  ;;  %20753 = vmatprep.mubr.msk.f32.mxu1 %vm27170_vm3, %v27259_v15 }
 0x70c   : > { %20761 = vmatprep.subr.mxu1 %v27259_v15 }
 0x70e   : > { %20754 = vmatmul.mubr.msk.f32.vlgmr.msra.gmra.mrb[40].mxu1 %vm27176_vm1, %v4464_v63 }
 0x70f   : > { %20762 = vmatpush3.xpose.msk.msra.mxu1 %vm27176_vm1, %v4622_v28  ;;  %20763 = vmatprep.mubr.msk.f32.mxu1 %vm27170_vm3, %v27259_v15 }
 0x710   : > { %20771 = vmatprep.subr.mxu1 %v27259_v15 }
 0x712   : > { %20764 = vmatmul.mubr.msk.f32.vlgmr.msra.gmra.mrb[42].mxu1 %vm27176_vm1, %v4620_v36 }
 0x713   : > { %20773 = vmatprep.mubr.msk.f32.mxu1 %vm27170_vm3, %v27259_v15 }
 0x798   : > { %v23590_v39 = vpop.f32.mrb[28].mxu1 }
 0x799   : > { %v20695_v0 = vpop.f32.mrb[29].mxu1 }
 0x79b   : > { %v23592_v59 = vpop.f32.mrb[36].mxu0 }
 0x79c   : > { %v23594_v11 = vpop.f32.mrb[30].mxu1  ;;  %v20700_v55 = vpop.f32.mrb[37].mxu0 }
 0x79d   : > { %v20705_v54 = vpop.f32.mrb[31].mxu1 }
 0x7a0   : > { %v23596_v38 = vpop.f32.mrb[38].mxu0 }
 0x7a1   : > { %v23598_v32 = vpop.f32.mrb[32].mxu1  ;;  %v20710_v51 = vpop.f32.mrb[39].mxu0 }
 0x7a2   : > { %27268 = vst [vmem:[#allocation57_spill] sm:$0xff] %v23598_v32  ;;  %v20715_v20 = vpop.f32.mrb[33].mxu1 }
 0x7a4   : > { %v23600_v24 = vpop.f32.mrb[40].mxu0 }
 0x7a5   : > { %27269 = vst [vmem:[#allocation58_spill] sm:$0xff] %v23600_v24  ;;  %v20720_v16 = vpop.f32.mrb[41].mxu0 }
 0x7a8   : > { %v23602_v13 = vpop.f32.mrb[42].mxu0 }
 0x7a9   : > { %27270 = vst [vmem:[#allocation59_spill] sm:$0xff] %v23602_v13  ;;  %v20730_v34 = vpop.f32.mrb[43].mxu0 }
 0x7af   : > { %v4303_v17 = vpop.f32.mrb[44].mxu0 }
 0x7b0   : > { %v4776_v9 = vmul.f32 0.5, %v4303_v17  ;;  %v20740_v52 = vpop.f32.mrb[45].mxu0 }
 0x7b2   : > { %v23605_v5 = vadd.f32 %v4776_v9, %v23145_v56 }
 0x7b4   : > { %v4794_v3 = vsel %vm2118_vm13, %v23605_v5, -inf }
 0x7b5   : > { %4795 = vmax.xlane.f32.xlu1 %v4794_v3 }
 0x7cc   : > { %v4459_v10 = vpop.f32.mrb[46].mxu0 }
 0x7cd   : > { %v20750_v30 = vpop.f32.mrb[47].mxu0  ;;  %v4778_v54 = vmul.f32 0.5, %v4459_v10 }
 0x7d4   : > { %v4615_v43 = vpop.f32.mrb[48].mxu0 }
 0x7d5   : > { %v23609_v53 = vpop.f32.mrb[34].mxu1  ;;  %v20760_v35 = vpop.f32.mrb[49].mxu0  ;;  %v4780_v9 = vmul.f32 0.5, %v4615_v43 }
 0x7d6   : > { %27271 = vst [vmem:[#allocation60_spill] sm:$0xff] %v23609_v53  ;;  %v20725_v62 = vpop.f32.mrb[35].mxu1  ;;  %v4786_v35 = vadd.f32 %v4778_v54, %v23173_v26 }
 0x7d9   : > { %v4225_v22 = vpop.f32.mrb[36].mxu1 }
 0x7da   : > { %v4775_v63 = vmul.f32 0.5, %v4225_v22  ;;  %v20735_v47 = vpop.f32.mrb[37].mxu1 }
 0x7dc   : > { %v4771_v28 = vpop.f32.mrb[50].mxu0  ;;  %v4783_v36 = vadd.f32 %v4775_v63, %v23148_v57 }
 0x7dd   : > { %v4381_v0 = vpop.f32.mrb[38].mxu1  ;;  %v20770_v55 = vpop.f32.mrb[51].mxu0  ;;  %v4782_v10 = vmul.f32 0.5, %v4771_v28 }
 0x7de   : > { %v4777_v51 = vmul.f32 0.5, %v4381_v0  ;;  %v20745_v20 = vpop.f32.mrb[39].mxu1  ;;  %v4791_v16 = vsel %vm2118_vm13, %v4783_v36, -inf  ;;  %v4800_v0 = vsel %vm2118_vm13, %v4786_v35, -inf  ;;  %v4788_v55 = vadd.f32 %v4780_v9, %v23185_v61 }
 0x7df   : > { %4792 = vmax.xlane.f32.xlu0 %v4791_v16 }
 0x7e0   : > { %v4785_v34 = vadd.f32 %v4777_v51, %v23157_v2  ;;  %v4806_v43 = vsel %vm2118_vm13, %v4788_v55, -inf  ;;  %v4790_v51 = vadd.f32 %v4782_v10, %v23191_v7 }
 0x7e1   : > { %v4537_v17 = vpop.f32.mrb[40].mxu1 }
 0x7e2   : > { %v4779_v52 = vmul.f32 0.5, %v4537_v17  ;;  %v20755_v3 = vpop.f32.mrb[41].mxu1  ;;  %v4797_v30 = vsel %vm2118_vm13, %v4785_v34, -inf  ;;  %v4812_v54 = vsel %vm2118_vm13, %v4790_v51, -inf }
 0x7e3   : > { %4798 = vmax.xlane.f32.xlu0 %v4797_v30 }
 0x7e4   : > { %v4787_v62 = vadd.f32 %v4779_v52, %v23164_v8 }
 0x7e5   : > { %v4693_v22 = vpop.f32.mrb[42].mxu1 }
 0x7e6   : > { %v20765_v63 = vpop.f32.mrb[43].mxu1  ;;  %v4803_v47 = vsel %vm2118_vm13, %v4787_v62, -inf  ;;  %v4781_v28 = vmul.f32 0.5, %v4693_v22 }
 0x7e7   : > { %4804 = vmax.xlane.f32.xlu1 %v4803_v47  ;;  %4801 = vmax.xlane.f32.xlu0 %v4800_v0 }
 0x7e8   : > { %v23636_v20 = vadd.f32 %v4781_v28, %v23178_v42 }
 0x7ea   : > { %v4809_v16 = vsel %vm2118_vm13, %v23636_v20, -inf }
 0x7eb   : > { %4807 = vmax.xlane.f32.xlu0 %v4806_v43 }
 0x7ef   : > { %4813 = vmax.xlane.f32.xlu0 %v4812_v54 }
 0x7f8   : > { %4879 = vrot.lane.b32.xlu1 %v22962_v37, %s27147_s2 }
 0x805   : > { %4955 = vrot.lane.b32.xlu0 %v22966_v40, %s27147_s2 }
 0x809   : > { %5183 = vrot.lane.b32.xlu0 %v22976_v45, %s27147_s2 }
 0x80d   : > { %5335 = vrot.lane.b32.xlu0 %v22984_v49, %s27147_s2 }
 0x811   : > { %5489 = vrot.lane.b32.xlu0 %v22962_v37, %s27149_s23 }
 0x815   : > { %5487 = vrot.lane.b32.xlu0 %v22962_v37, %s27148_s22 }
 0x819   : > { %5645 = vrot.lane.b32.xlu0 %v22968_v41, %s27149_s23 }
 0x81c   : > { %4810 = vmax.xlane.f32.xlu1 %v4809_v16 }
 0x82d   : > { %5031 = vrot.lane.b32.xlu1 %v22968_v41, %s27147_s2 }
 0x831   : > { %5107 = vrot.lane.b32.xlu1 %v22974_v44, %s27147_s2 }
 0x835   : > { %5259 = vrot.lane.b32.xlu1 %v22982_v48, %s27147_s2 }
 0x839   : > { %5411 = vrot.lane.b32.xlu1 %v22990_v50, %s27147_s2  ;;  %s27154_s2 = smov 52  }
 0x83d   : > { %5567 = vrot.lane.b32.xlu1 %v22966_v40, %s27149_s23 }
 0x841   : > { %5565 = vrot.lane.b32.xlu1 %v22966_v40, %s27148_s22 }
 0x842   : > { %v4796_v17 = vpop.xlane.xlu1 %4795 }
 0x843   : > { %v4816_v9 = vsub.f32 %v23605_v5, %v4796_v17 }
 0x845   : > { %v4825_v52 = vmul.f32 1.442695, %v4816_v9  ;;  %5723 = vrot.lane.b32.xlu1 %v22974_v44, %s27149_s23 }
 0x847   : > { %22254 = vpow2.f32 %v4825_v52 }
 0x851   : > { %v23657_v3 = vpop.eup %22254 }
 0x852   : > { %v4842_v30 = vsel %vm2118_vm13, %v23657_v3, 0.0 }
 0x853   : > { %4843 = vadd.xlane.f32.xlu0 %v4842_v30 }
 0x86c   : > { %v4793_v22 = vpop.xlane.xlu0 %4792 }
 0x86d   : > { %v4815_v10 = vsub.f32 %v4783_v36, %v4793_v22 }
 0x86f   : > { %v4823_v63 = vmul.f32 1.442695, %v4815_v10 }
 0x870   : > { %v4799_v47 = vpop.xlane.xlu0 %4798 }
 0x871   : > { %22256 = vpow2.f32 %v4823_v63  ;;  %v4817_v0 = vsub.f32 %v4785_v34, %v4799_v47 }
 0x873   : > { %v4827_v43 = vmul.f32 1.442695, %v4817_v0 }
 0x874   : > { %v4802_v54 = vpop.xlane.xlu0 %4801  ;;  %v4805_v5 = vpop.xlane.xlu1 %4804 }
 0x875   : > { %22258 = vpow2.f32 %v4827_v43  ;;  %v4818_v28 = vsub.f32 %v4786_v35, %v4802_v54  ;;  %v4819_v16 = vsub.f32 %v4787_v62, %v4805_v5 }
 0x877   : > { %v4829_v17 = vmul.f32 1.442695, %v4818_v28  ;;  %v4831_v9 = vmul.f32 1.442695, %v4819_v16 }
 0x878   : > { %v4808_v52 = vpop.xlane.xlu0 %4807  ;;  %v4880_v60 = vpop.permute.xlu1 %4879 }
 0x879   : > { %22260 = vpow2.f32 %v4829_v17  ;;  %v4820_v31 = vsub.f32 %v4788_v55, %v4808_v52  ;;  %20772 = vmatpush3.msra.mxu1 %v4880_v60 }
 0x87a   : > { %22262 = vpow2.f32 %v4831_v9  ;;  %20781 = vmatprep.subr.mxu1 %v27259_v15 }
 0x87b   : > { %v23662_v36 = vpop.eup %22256  ;;  %v4833_v30 = vmul.f32 1.442695, %v4820_v31 }
 0x87c   : > { %v4814_v34 = vpop.xlane.xlu0 %4813  ;;  %v4839_v22 = vsel %vm2118_vm13, %v23662_v36, 0.0 }
 0x87d   : > { %22264 = vpow2.f32 %v4833_v30  ;;  %v4822_v35 = vsub.f32 %v4790_v51, %v4814_v34  ;;  %4840 = vadd.xlane.f32.xlu1 %v4839_v22 }
 0x87f   : > { %v23666_v62 = vpop.eup %22258  ;;  %v4837_v10 = vmul.f32 1.442695, %v4822_v35 }
 0x880   : > { %v4956_v63 = vpop.permute.xlu0 %4955  ;;  %v4845_v60 = vsel %vm2118_vm13, %v23666_v62, 0.0 }
 0x881   : > { %22266 = vpow2.f32 %v4837_v10  ;;  %4846 = vadd.xlane.f32.xlu1 %v4845_v60  ;;  %20777 = vmatpush3.msra.mxu0 %v4956_v63 }
 0x882   : > { %20786 = vmatprep.subr.mxu0 %v27259_v15 }
 0x883   : > { %v23671_v31 = vpop.eup %22260 }
 0x884   : > { %v23673_v55 = vpop.eup %22262  ;;  %v4848_v51 = vsel %vm2118_vm13, %v23671_v31, 0.0  ;;  %v5184_v30 = vpop.permute.xlu0 %5183 }
 0x885   : > { %4849 = vadd.xlane.f32.xlu0 %v4848_v51  ;;  %v4851_v47 = vsel %vm2118_vm13, %v23673_v55, 0.0 }
 0x886   : > { %4852 = vadd.xlane.f32.xlu1 %v4851_v47 }
 0x887   : > { %v23679_v0 = vpop.eup %22264 }
 0x888   : > { %v4854_v43 = vsel %vm2118_vm13, %v23679_v0, 0.0  ;;  %v5336_v34 = vpop.permute.xlu0 %5335 }
 0x889   : > { %4855 = vadd.xlane.f32.xlu0 %v4854_v43 }
 0x88b   : > { %v23683_v54 = vpop.eup %22266 }
 0x88c   : > { %v4860_v5 = vsel %vm2118_vm13, %v23683_v54, 0.0 }
 0x88d   : > { %4861 = vadd.xlane.f32.xlu0 %v4860_v5 }
 0x8a3   : > { %5643 = vrot.lane.b32.xlu0 %v22968_v41, %s27148_s22 }
 0x8a7   : > { %5801 = vrot.lane.b32.xlu0 %v22976_v45, %s27149_s23 }
 0x8a9   : > { %v4811_v28 = vpop.xlane.xlu1 %4810 }
 0x8aa   : > { %v4821_v16 = vsub.f32 %v23636_v20, %v4811_v28  ;;  %v23706_v20 = vpop.permute.xlu0 %5489 }
 0x8ab   : > { %5799 = vrot.lane.b32.xlu0 %v22976_v45, %s27148_s22 }
 0x8ac   : > { %v4835_v17 = vmul.f32 1.442695, %v4821_v16 }
 0x8ad   : > { %v5032_v63 = vpop.permute.xlu1 %5031 }
 0x8ae   : > { %22268 = vpow2.f32 %v4835_v17  ;;  %v23710_v22 = vpop.permute.xlu0 %5487 }
 0x8af   : > { %5957 = vrot.lane.b32.xlu0 %v22984_v49, %s27149_s23 }
 0x8b1   : > { %v5108_v60 = vpop.permute.xlu1 %5107 }
 0x8b2   : > { %v23716_v35 = vpop.permute.xlu0 %5645 }
 0x8b3   : > { %5955 = vrot.lane.b32.xlu0 %v22984_v49, %s27148_s22 }
 0x8b5   : > { %v5260_v43 = vpop.permute.xlu1 %5259 }
 0x8b8   : > { %v23698_v9 = vpop.eup %22268 }
 0x8b9   : > { %v4857_v52 = vsel %vm2118_vm13, %v23698_v9, 0.0  ;;  %v5412_v5 = vpop.permute.xlu1 %5411 }
 0x8ba   : > { %4858 = vadd.xlane.f32.xlu1 %v4857_v52 }
 0x8bd   : > { %v5568_v28 = vpop.permute.xlu1 %5567 }
 0x8c1   : > { %v5566_v16 = vpop.permute.xlu1 %5565 }
 0x8c5   : > { %v5724_v17 = vpop.permute.xlu1 %5723 }
 0x8cb   : > { %5721 = vrot.lane.b32.xlu1 %v22974_v44, %s27148_s22 }
 0x8cf   : > { %5879 = vrot.lane.b32.xlu1 %v22982_v48, %s27149_s23 }
 0x8d3   : > { %5877 = vrot.lane.b32.xlu1 %v22982_v48, %s27148_s22 }
 0x8d7   : > { %6035 = vrot.lane.b32.xlu1 %v22990_v50, %s27149_s23  ;;  %s27155_s23 = smov 112  }
 0x8db   : > { %6033 = vrot.lane.b32.xlu1 %v22990_v50, %s27148_s22  ;;  %s27156_s22 = smov 80  }
 0x8e0   : > { %v4844_v10 = vpop.xlane.xlu0 %4843 }
 0x8e1   : > { %22270 = vrcp.f32 %v4844_v10 }
 0x8eb   : > { %v22271_v51 = vpop.eup %22270 }
 0x8ec   : > { %v4866_v47 = vmul.f32 %v22271_v51, %v23657_v3 }
 0x8ee   : > { %20779 = vmatmul.mubr.msk.f32.vlgmr.msra.gmra.mrb[52].mxu0 %vm2118_vm13, %v4866_v47 }
 0x8ef   : > { %20787 = vmatpush3.msra.mxu0 %v5108_v60  ;;  %20788 = vmatprep.mubr.msk.f32.mxu0 %vm27170_vm3, %v27259_v15 }
 0x8f0   : > { %20796 = vmatprep.subr.mxu0 %v27259_v15 }
 0x90a   : > { %v4841_v52 = vpop.xlane.xlu1 %4840 }
 0x90b   : > { %22272 = vrcp.f32 %v4841_v52 }
 0x90e   : > { %v4847_v10 = vpop.xlane.xlu1 %4846 }
 0x90f   : > { %22274 = vrcp.f32 %v4847_v10 }
 0x912   : > { %v4850_v29 = vpop.xlane.xlu0 %4849 }
 0x913   : > { %22276 = vrcp.f32 %v4850_v29  ;;  %v4853_v3 = vpop.xlane.xlu1 %4852 }
 0x914   : > { %22278 = vrcp.f32 %v4853_v3 }
 0x915   : > { %v22273_v51 = vpop.eup %22272 }
 0x916   : > { %v4856_v47 = vpop.xlane.xlu0 %4855  ;;  %v4864_v60 = vmul.f32 %v22273_v51, %v23662_v36 }
 0x917   : > { %22280 = vrcp.f32 %v4856_v47 }
 0x918   : > { %20774 = vmatmul.mubr.msk.f32.vlgmr.msra.gmra.mrb[44].mxu1 %vm2118_vm13, %v4864_v60 }
 0x919   : > { %v22275_v27 = vpop.eup %22274  ;;  %20782 = vmatpush3.msra.mxu1 %v5032_v63  ;;  %20783 = vmatprep.mubr.msk.f32.mxu1 %vm27170_vm3, %v27259_v15 }
 0x91a   : > { %v4862_v25 = vpop.xlane.xlu0 %4861  ;;  %20791 = vmatprep.subr.mxu1 %v27259_v15  ;;  %v4868_v52 = vmul.f32 %v22275_v27, %v23666_v62 }
 0x91b   : > { %22282 = vrcp.f32 %v4862_v25 }
 0x91c   : > { %20784 = vmatmul.mubr.msk.f32.vlgmr.msra.gmra.mrb[46].mxu1 %vm2118_vm13, %v4868_v52 }
 0x91d   : > { %v22277_v29 = vpop.eup %22276  ;;  %20792 = vmatpush3.msra.mxu1 %v5184_v30  ;;  %20793 = vmatprep.mubr.msk.f32.mxu1 %vm27170_vm3, %v27259_v15 }
 0x91e   : > { %v22279_v36 = vpop.eup %22278  ;;  %20801 = vmatprep.subr.mxu1 %v27259_v15  ;;  %v4870_v63 = vmul.f32 %v22277_v29, %v23671_v31 }
 0x91f   : > { %v4872_v10 = vmul.f32 %v22279_v36, %v23673_v55 }
 0x920   : > { %20789 = vmatmul.mubr.msk.f32.vlgmr.msra.gmra.mrb[54].mxu0 %vm2118_vm13, %v4870_v63 }
 0x921   : > { %v22281_v3 = vpop.eup %22280  ;;  %20794 = vmatmul.mubr.msk.f32.vlgmr.msra.gmra.mrb[48].mxu1 %vm2118_vm13, %v4872_v10  ;;  %20797 = vmatpush3.msra.mxu0 %v5260_v43 }
 0x922   : > { %20802 = vmatpush3.msra.mxu1 %v5336_v34  ;;  %20798 = vmatprep.mubr.msk.f32.mxu0 %vm27170_vm3, %v27259_v15  ;;  %v4874_v25 = vmul.f32 %v22281_v3, %v23679_v0  ;;  %v5644_v0 = vpop.permute.xlu0 %5643 }
 0x923   : > { %20806 = vmatprep.subr.mxu0 %v27259_v15  ;;  %20803 = vmatprep.mubr.msk.f32.mxu1 %vm27170_vm3, %v27259_v15 }
 0x924   : > { %20799 = vmatmul.mubr.msk.f32.vlgmr.msra.gmra.mrb[56].mxu0 %vm2118_vm13, %v4874_v25  ;;  %20811 = vmatprep.subr.mxu1 %v27259_v15 }
 0x925   : > { %v22283_v27 = vpop.eup %22282  ;;  %20807 = vmatpush3.msra.mxu0 %v5412_v5  ;;  %20808 = vmatprep.mubr.msk.f32.mxu0 %vm27170_vm3, %v27259_v15 }
 0x926   : > { %v4878_v62 = vmul.f32 %v22283_v27, %v23683_v54  ;;  %20816 = vmatprep.subr.mxu0 %v27259_v15  ;;  %v5802_v34 = vpop.permute.xlu0 %5801 }
 0x928   : > { %20809 = vmatmul.mubr.msk.f32.vlgmr.msra.gmra.mrb[58].mxu0 %vm2118_vm13, %v4878_v62 }
 0x929   : > { %20818 = vmatprep.mubr.msk.f32.mxu0 %vm27170_vm3, %v27259_v15 }
 0x92c   : > { %20817 = vmatpush3.xpose.msk.msra.mxu0 %vm27176_vm1, %v5568_v28 }
 0x92d   : > { %20826 = vmatprep.subr.mxu0 %v27259_v15 }
 0x92f   : > { %20819 = vmatmul.mubr.msk.f32.vlgmr.msra.gmra.mrb[60].mxu0 %vm27176_vm1, %v5566_v16  ;;  %v5800_v16 = vpop.permute.xlu0 %5799 }
 0x930   : > { %20827 = vmatpush3.xpose.msk.msra.mxu0 %vm27176_vm1, %v5724_v17  ;;  %20828 = vmatprep.mubr.msk.f32.mxu0 %vm27170_vm3, %v27259_v15 }
 0x931   : > { %20836 = vmatprep.subr.mxu0 %v27259_v15 }
 0x947   : > { %v4859_v31 = vpop.xlane.xlu1 %4858 }
 0x948   : > { %22284 = vrcp.f32 %v4859_v31 }
 0x94b   : > { %v5722_v55 = vpop.permute.xlu1 %5721 }
 0x94c   : > { %20829 = vmatmul.mubr.msk.f32.vlgmr.msra.gmra.mrb[62].mxu0 %vm27176_vm1, %v5722_v55 }
 0x94d   : > { %20838 = vmatprep.mubr.msk.f32.mxu0 %vm27170_vm3, %v27259_v15 }
 0x94f   : > { %v5880_v54 = vpop.permute.xlu1 %5879 }
 0x950   : > { %20837 = vmatpush3.xpose.msk.msra.mxu0 %vm27176_vm1, %v5880_v54 }
 0x951   : > { %20846 = vmatprep.subr.mxu0 %v27259_v15 }
 0x952   : > { %v22285_v30 = vpop.eup %22284 }
 0x953   : > { %v5878_v43 = vpop.permute.xlu1 %5877  ;;  %v4876_v5 = vmul.f32 %v22285_v30, %v23698_v9 }
 0x954   : > { %20839 = vmatmul.mubr.msk.f32.vlgmr.msra.gmra.mrb[64].mxu0 %vm27176_vm1, %v5878_v43 }
 0x955   : > { %20804 = vmatmul.mubr.msk.f32.vlgmr.msra.gmra.mrb[50].mxu1 %vm2118_vm13, %v4876_v5  ;;  %20848 = vmatprep.mubr.msk.f32.mxu0 %vm27170_vm3, %v27259_v15 }
 0x956   : > { %20812 = vmatpush3.xpose.msk.msra.mxu1 %vm27176_vm1, %v23706_v20  ;;  %20813 = vmatprep.mubr.msk.f32.mxu1 %vm27170_vm3, %v27259_v15  ;;  %v5958_v20 = vpop.permute.xlu0 %5957 }
 0x957   : > { %v6036_v28 = vpop.permute.xlu1 %6035  ;;  %20821 = vmatprep.subr.mxu1 %v27259_v15 }
 0x958   : > { %20847 = vmatpush3.xpose.msk.msra.mxu0 %vm27176_vm1, %v6036_v28 }
 0x959   : > { %20814 = vmatmul.mubr.msk.f32.vlgmr.msra.gmra.mrb[52].mxu1 %vm27176_vm1, %v23710_v22  ;;  %20856 = vmatprep.subr.mxu0 %v27259_v15 }
 0x95a   : > { %20822 = vmatpush3.xpose.msk.msra.mxu1 %vm27176_vm1, %v23716_v35  ;;  %20823 = vmatprep.mubr.msk.f32.mxu1 %vm27170_vm3, %v27259_v15  ;;  %v5956_v22 = vpop.permute.xlu0 %5955 }
 0x95b   : > { %v6034_v9 = vpop.permute.xlu1 %6033  ;;  %20831 = vmatprep.subr.mxu1 %v27259_v15 }
 0x95c   : > { %20849 = vmatmul.mubr.msk.f32.vlgmr.msra.gmra.mrb[66].mxu0 %vm27176_vm1, %v6034_v9 }
 0x95d   : > { %20824 = vmatmul.mubr.msk.f32.vlgmr.msra.gmra.mrb[54].mxu1 %vm27176_vm1, %v5644_v0  ;;  %20858 = vmatprep.mubr.msk.f32.mxu0 %vm27170_vm3, %v27259_v15 }
 0x95e   : > { %20832 = vmatpush3.xpose.msk.msra.mxu1 %vm27176_vm1, %v5802_v34  ;;  %20833 = vmatprep.mubr.msk.f32.mxu1 %vm27170_vm3, %v27259_v15 }
 0x95f   : > { %20841 = vmatprep.subr.mxu1 %v27259_v15 }
 0x961   : > { %20834 = vmatmul.mubr.msk.f32.vlgmr.msra.gmra.mrb[56].mxu1 %vm27176_vm1, %v5800_v16 }
 0x962   : > { %20842 = vmatpush3.xpose.msk.msra.mxu1 %vm27176_vm1, %v5958_v20  ;;  %20843 = vmatprep.mubr.msk.f32.mxu1 %vm27170_vm3, %v27259_v15 }
 0x963   : > { %20851 = vmatprep.subr.mxu1 %v27259_v15 }
 0x965   : > { %20844 = vmatmul.mubr.msk.f32.vlgmr.msra.gmra.mrb[58].mxu1 %vm27176_vm1, %v5956_v22 }
 0x966   : > { %20853 = vmatprep.mubr.msk.f32.mxu1 %vm27170_vm3, %v27259_v15 }
 0x9c1   : > { %v23799_v35 = vpop.f32.mrb[52].mxu0 }
 0x9c2   : > { %v20780_v17 = vpop.f32.mrb[53].mxu0 }
 0x9eb   : > { %v23801_v51 = vpop.f32.mrb[44].mxu1 }
 0x9ec   : > { %v20775_v47 = vpop.f32.mrb[45].mxu1 }
 0x9ef   : > { %v23803_v60 = vpop.f32.mrb[46].mxu1 }
 0x9f0   : > { %v20785_v52 = vpop.f32.mrb[47].mxu1 }
 0x9f3   : > { %v23805_v29 = vpop.f32.mrb[54].mxu0 }
 0x9f4   : > { %v23807_v36 = vpop.f32.mrb[48].mxu1  ;;  %v20790_v63 = vpop.f32.mrb[55].mxu0 }
 0x9f5   : > { %27272 = vst [vmem:[#allocation61_spill] sm:$0xff] %v23807_v36  ;;  %v20795_v10 = vpop.f32.mrb[49].mxu1 }
 0x9f7   : > { %v23809_v3 = vpop.f32.mrb[56].mxu0 }
 0x9f8   : > { %27273 = vst [vmem:[#allocation62_spill] sm:$0xff] %v23809_v3  ;;  %v20800_v25 = vpop.f32.mrb[57].mxu0 }
 0x9fb   : > { %v23811_v27 = vpop.f32.mrb[58].mxu0 }
 0x9fc   : > { %27274 = vst [vmem:[#allocation63_spill] sm:$0xff] %v23811_v27  ;;  %v20810_v62 = vpop.f32.mrb[59].mxu0 }
 0xa02   : > { %v5639_v31 = vpop.f32.mrb[60].mxu0 }
 0xa03   : > { %v6112_v55 = vmul.f32 0.5, %v5639_v31  ;;  %v20820_v0 = vpop.f32.mrb[61].mxu0 }
 0xa05   : > { %v23814_v54 = vadd.f32 %v6112_v55, %v23145_v56 }
 0xa07   : > { %v6130_v30 = vsel %vm2118_vm13, %v23814_v54, -inf }
 0xa08   : > { %6131 = vmax.xlane.f32.xlu1 %v6130_v30 }
 0xa1f   : > { %v5795_v34 = vpop.f32.mrb[62].mxu0 }
 0xa20   : > { %v20830_v43 = vpop.f32.mrb[63].mxu0  ;;  %v6114_v25 = vmul.f32 0.5, %v5795_v34 }
 0xa22   : > { %v6122_v43 = vadd.f32 %v6114_v25, %v23173_v26 }
 0xa27   : > { %v5951_v5 = vpop.f32.mrb[64].mxu0 }
 0xa28   : > { %v23818_v28 = vpop.f32.mrb[50].mxu1  ;;  %v20840_v16 = vpop.f32.mrb[65].mxu0 }
 0xa29   : > { %27275 = vst [vmem:[#allocation64_spill] sm:$0xff] %v23818_v28  ;;  %v20805_v9 = vpop.f32.mrb[51].mxu1  ;;  %v6116_v16 = vmul.f32 0.5, %v5951_v5 }
 0xa2b   : > { %v6124_v34 = vadd.f32 %v6116_v16, %v23185_v61 }
 0xa2c   : > { %v5561_v20 = vpop.f32.mrb[52].mxu1 }
 0xa2d   : > { %v6111_v22 = vmul.f32 0.5, %v5561_v20  ;;  %v20815_v17 = vpop.f32.mrb[53].mxu1  ;;  %v6142_v25 = vsel %vm2118_vm13, %v6124_v34, -inf }
 0xa2f   : > { %v6119_v47 = vadd.f32 %v6111_v22, %v23148_v57  ;;  %v6107_v52 = vpop.f32.mrb[66].mxu0 }
 0xa30   : > { %v5717_v63 = vpop.f32.mrb[54].mxu1  ;;  %v20850_v10 = vpop.f32.mrb[67].mxu0 }
 0xa31   : > { %v6113_v62 = vmul.f32 0.5, %v5717_v63  ;;  %v20825_v31 = vpop.f32.mrb[55].mxu1  ;;  %v6127_v55 = vsel %vm2118_vm13, %v6119_v47, -inf  ;;  %v6118_v63 = vmul.f32 0.5, %v6107_v52 }
 0xa32   : > { %6128 = vmax.xlane.f32.xlu0 %v6127_v55 }
 0xa33   : > { %v6121_v0 = vadd.f32 %v6113_v62, %v23157_v2  ;;  %v6136_v62 = vsel %vm2118_vm13, %v6122_v43, -inf  ;;  %v6126_v5 = vadd.f32 %v6118_v63, %v23191_v7 }
 0xa34   : > { %v5873_v30 = vpop.f32.mrb[56].mxu1 }
 0xa35   : > { %v6115_v9 = vmul.f32 0.5, %v5873_v30  ;;  %v20835_v20 = vpop.f32.mrb[57].mxu1  ;;  %v6133_v17 = vsel %vm2118_vm13, %v6121_v0, -inf  ;;  %v6148_v30 = vsel %vm2118_vm13, %v6126_v5, -inf }
 0xa36   : > { %6134 = vmax.xlane.f32.xlu0 %v6133_v17 }
 0xa37   : > { %v6123_v22 = vadd.f32 %v6115_v9, %v23164_v8 }
 0xa38   : > { %v6029_v10 = vpop.f32.mrb[58].mxu1 }
 0xa39   : > { %v20845_v31 = vpop.f32.mrb[59].mxu1  ;;  %v6139_v55 = vsel %vm2118_vm13, %v6123_v22, -inf  ;;  %v6117_v52 = vmul.f32 0.5, %v6029_v10 }
 0xa3a   : > { %6140 = vmax.xlane.f32.xlu1 %v6139_v55  ;;  %6137 = vmax.xlane.f32.xlu0 %v6136_v62 }
 0xa3b   : > { %v23845_v16 = vadd.f32 %v6117_v52, %v23178_v42 }
 0xa3d   : > { %v6145_v9 = vsel %vm2118_vm13, %v23845_v16, -inf }
 0xa3e   : > { %6143 = vmax.xlane.f32.xlu0 %v6142_v25 }
 0xa42   : > { %6149 = vmax.xlane.f32.xlu0 %v6148_v30 }
 0xa4b   : > { %6215 = vrot.lane.b32.xlu1 %v22962_v37, %s27154_s2 }
 0xa58   : > { %6291 = vrot.lane.b32.xlu0 %v22966_v40, %s27154_s2 }
 0xa5c   : > { %6519 = vrot.lane.b32.xlu0 %v22976_v45, %s27154_s2 }
 0xa60   : > { %6671 = vrot.lane.b32.xlu0 %v22984_v49, %s27154_s2 }
 0xa64   : > { %6825 = vrot.lane.b32.xlu0 %v22962_v37, %s27156_s22 }
 0xa68   : > { %6823 = vrot.lane.b32.xlu0 %v22962_v37, %s27155_s23 }
 0xa6c   : > { %6981 = vrot.lane.b32.xlu0 %v22968_v41, %s27156_s22 }
 0xa6f   : > { %6146 = vmax.xlane.f32.xlu1 %v6145_v9 }
 0xa80   : > { %6367 = vrot.lane.b32.xlu1 %v22968_v41, %s27154_s2 }
 0xa84   : > { %6443 = vrot.lane.b32.xlu1 %v22974_v44, %s27154_s2 }
 0xa88   : > { %6595 = vrot.lane.b32.xlu1 %v22982_v48, %s27154_s2 }
 0xa8c   : > { %6747 = vrot.lane.b32.xlu1 %v22990_v50, %s27154_s2  ;;  %s27157_s2 = smov 48  }
 0xa90   : > { %6903 = vrot.lane.b32.xlu1 %v22966_v40, %s27156_s22 }
 0xa94   : > { %6901 = vrot.lane.b32.xlu1 %v22966_v40, %s27155_s23 }
 0xa95   : > { %v6132_v20 = vpop.xlane.xlu1 %6131 }
 0xa96   : > { %v6152_v17 = vsub.f32 %v23814_v54, %v6132_v20 }
 0xa98   : > { %v6161_v10 = vmul.f32 1.442695, %v6152_v17  ;;  %7059 = vrot.lane.b32.xlu1 %v22974_v44, %s27156_s22 }
 0xa9a   : > { %22286 = vpow2.f32 %v6161_v10 }
 0xaa4   : > { %v23866_v63 = vpop.eup %22286 }
 0xaa5   : > { %v6178_v31 = vsel %vm2118_vm13, %v23866_v63, 0.0 }
 0xaa6   : > { %6179 = vadd.xlane.f32.xlu0 %v6178_v31 }
 0xabf   : > { %v6129_v55 = vpop.xlane.xlu0 %6128 }
 0xac0   : > { %v6151_v62 = vsub.f32 %v6119_v47, %v6129_v55 }
 0xac2   : > { %v6159_v25 = vmul.f32 1.442695, %v6151_v62 }
 0xac3   : > { %v6135_v30 = vpop.xlane.xlu0 %6134 }
 0xac4   : > { %22288 = vpow2.f32 %v6159_v25  ;;  %v6153_v52 = vsub.f32 %v6121_v0, %v6135_v30 }
 0xac6   : > { %v6163_v9 = vmul.f32 1.442695, %v6153_v52 }
 0xac7   : > { %v6138_v21 = vpop.xlane.xlu0 %6137  ;;  %v6141_v54 = vpop.xlane.xlu1 %6140 }
 0xac8   : > { %22290 = vpow2.f32 %v6163_v9  ;;  %v6154_v20 = vsub.f32 %v6122_v43, %v6138_v21  ;;  %v6155_v17 = vsub.f32 %v6123_v22, %v6141_v54 }
 0xaca   : > { %v6165_v23 = vmul.f32 1.442695, %v6154_v20  ;;  %v6167_v10 = vmul.f32 1.442695, %v6155_v17 }
 0xacb   : > { %v6144_v18 = vpop.xlane.xlu0 %6143  ;;  %v6216_v19 = vpop.permute.xlu1 %6215 }
 0xacc   : > { %22292 = vpow2.f32 %v6165_v23  ;;  %v6156_v14 = vsub.f32 %v6124_v34, %v6144_v18  ;;  %20852 = vmatpush3.msra.mxu1 %v6216_v19 }
 0xacd   : > { %22294 = vpow2.f32 %v6167_v10  ;;  %20861 = vmatprep.subr.mxu1 %v27259_v15 }
 0xace   : > { %v23871_v47 = vpop.eup %22288  ;;  %v6169_v31 = vmul.f32 1.442695, %v6156_v14 }
 0xacf   : > { %v6150_v0 = vpop.xlane.xlu0 %6149  ;;  %v6175_v55 = vsel %vm2118_vm13, %v23871_v47, 0.0 }
 0xad0   : > { %22296 = vpow2.f32 %v6169_v31  ;;  %v6158_v21 = vsub.f32 %v6126_v5, %v6150_v0  ;;  %6176 = vadd.xlane.f32.xlu1 %v6175_v55 }
 0xad2   : > { %v23875_v43 = vpop.eup %22290  ;;  %v6173_v22 = vmul.f32 1.442695, %v6158_v21 }
 0xad3   : > { %v6292_v62 = vpop.permute.xlu0 %6291  ;;  %v6181_v18 = vsel %vm2118_vm13, %v23875_v43, 0.0 }
 0xad4   : > { %22298 = vpow2.f32 %v6173_v22  ;;  %6182 = vadd.xlane.f32.xlu1 %v6181_v18  ;;  %20857 = vmatpush3.msra.mxu0 %v6292_v62 }
 0xad5   : > { %20866 = vmatprep.subr.mxu0 %v27259_v15 }
 0xad6   : > { %v23880_v19 = vpop.eup %22292 }
 0xad7   : > { %v23882_v23 = vpop.eup %22294  ;;  %v6184_v14 = vsel %vm2118_vm13, %v23880_v19, 0.0  ;;  %v6520_v31 = vpop.permute.xlu0 %6519 }
 0xad8   : > { %6185 = vadd.xlane.f32.xlu0 %v6184_v14  ;;  %v6187_v34 = vsel %vm2118_vm13, %v23882_v23, 0.0 }
 0xad9   : > { %6188 = vadd.xlane.f32.xlu1 %v6187_v34 }
 0xada   : > { %v23888_v5 = vpop.eup %22296 }
 0xadb   : > { %v6190_v25 = vsel %vm2118_vm13, %v23888_v5, 0.0  ;;  %v6672_v0 = vpop.permute.xlu0 %6671 }
 0xadc   : > { %6191 = vadd.xlane.f32.xlu0 %v6190_v25 }
 0xade   : > { %v23892_v30 = vpop.eup %22298 }
 0xadf   : > { %v6196_v52 = vsel %vm2118_vm13, %v23892_v30, 0.0 }
 0xae0   : > { %6197 = vadd.xlane.f32.xlu0 %v6196_v52 }
 0xaf6   : > { %6979 = vrot.lane.b32.xlu0 %v22968_v41, %s27155_s23 }
 0xafa   : > { %7137 = vrot.lane.b32.xlu0 %v22976_v45, %s27156_s22 }
 0xafc   : > { %v6147_v9 = vpop.xlane.xlu1 %6146 }
 0xafd   : > { %v6157_v54 = vsub.f32 %v23845_v16, %v6147_v9  ;;  %v23915_v16 = vpop.permute.xlu0 %6825 }
 0xafe   : > { %7135 = vrot.lane.b32.xlu0 %v22976_v45, %s27155_s23 }
 0xaff   : > { %v6171_v20 = vmul.f32 1.442695, %v6157_v54 }
 0xb00   : > { %v6368_v62 = vpop.permute.xlu1 %6367 }
 0xb01   : > { %22300 = vpow2.f32 %v6171_v20  ;;  %v23919_v55 = vpop.permute.xlu0 %6823 }
 0xb02   : > { %7293 = vrot.lane.b32.xlu0 %v22984_v49, %s27156_s22 }
 0xb04   : > { %v6444_v18 = vpop.permute.xlu1 %6443 }
 0xb05   : > { %v23925_v21 = vpop.permute.xlu0 %6981 }
 0xb06   : > { %7291 = vrot.lane.b32.xlu0 %v22984_v49, %s27155_s23 }
 0xb08   : > { %v6596_v25 = vpop.permute.xlu1 %6595 }
 0xb0b   : > { %v23907_v17 = vpop.eup %22300 }
 0xb0c   : > { %v6193_v10 = vsel %vm2118_vm13, %v23907_v17, 0.0  ;;  %v6748_v52 = vpop.permute.xlu1 %6747 }
 0xb0d   : > { %6194 = vadd.xlane.f32.xlu1 %v6193_v10 }
 0xb10   : > { %v6904_v9 = vpop.permute.xlu1 %6903 }
 0xb14   : > { %v6902_v54 = vpop.permute.xlu1 %6901 }
 0xb18   : > { %v7060_v20 = vpop.permute.xlu1 %7059 }
 0xb1e   : > { %7057 = vrot.lane.b32.xlu1 %v22974_v44, %s27155_s23 }
 0xb22   : > { %7215 = vrot.lane.b32.xlu1 %v22982_v48, %s27156_s22 }
 0xb26   : > { %7213 = vrot.lane.b32.xlu1 %v22982_v48, %s27155_s23 }
 0xb2a   : > { %7371 = vrot.lane.b32.xlu1 %v22990_v50, %s27156_s22  ;;  %s27158_s22 = smov 108  }
 0xb2e   : > { %7369 = vrot.lane.b32.xlu1 %v22990_v50, %s27155_s23  ;;  %s27159_s23 = smov 76  }
 0xb33   : > { %v6180_v22 = vpop.xlane.xlu0 %6179 }
 0xb34   : > { %22302 = vrcp.f32 %v6180_v22 }
 0xb3e   : > { %v22303_v14 = vpop.eup %22302 }
 0xb3f   : > { %v6202_v34 = vmul.f32 %v22303_v14, %v23866_v63 }
 0xb41   : > { %20859 = vmatmul.mubr.msk.f32.vlgmr.msra.gmra.mrb[68].mxu0 %vm2118_vm13, %v6202_v34 }
 0xb42   : > { %20867 = vmatpush3.msra.mxu0 %v6444_v18  ;;  %20868 = vmatprep.mubr.msk.f32.mxu0 %vm27170_vm3, %v27259_v15 }
 0xb43   : > { %20876 = vmatprep.subr.mxu0 %v27259_v15 }
 0xb5d   : > { %v6177_v10 = vpop.xlane.xlu1 %6176 }
 0xb5e   : > { %22304 = vrcp.f32 %v6177_v10 }
 0xb61   : > { %v6183_v22 = vpop.xlane.xlu1 %6182 }
 0xb62   : > { %22306 = vrcp.f32 %v6183_v22 }
 0xb65   : > { %v6186_v12 = vpop.xlane.xlu0 %6185 }
 0xb66   : > { %22308 = vrcp.f32 %v6186_v12  ;;  %v6189_v63 = vpop.xlane.xlu1 %6188 }
 0xb67   : > { %22310 = vrcp.f32 %v6189_v63 }
 0xb68   : > { %v22305_v14 = vpop.eup %22304 }
 0xb69   : > { %v6192_v34 = vpop.xlane.xlu0 %6191  ;;  %v6200_v18 = vmul.f32 %v22305_v14, %v23871_v47 }
 0xb6a   : > { %22312 = vrcp.f32 %v6192_v34 }
 0xb6b   : > { %20854 = vmatmul.mubr.msk.f32.vlgmr.msra.gmra.mrb[60].mxu1 %vm2118_vm13, %v6200_v18 }
 0xb6c   : > { %v22307_v33 = vpop.eup %22306  ;;  %20862 = vmatpush3.msra.mxu1 %v6368_v62  ;;  %20863 = vmatprep.mubr.msk.f32.mxu1 %vm27170_vm3, %v27259_v15 }
 0xb6d   : > { %v6198_v46 = vpop.xlane.xlu0 %6197  ;;  %20871 = vmatprep.subr.mxu1 %v27259_v15  ;;  %v6204_v10 = vmul.f32 %v22307_v33, %v23875_v43 }
 0xb6e   : > { %22314 = vrcp.f32 %v6198_v46 }
 0xb6f   : > { %20864 = vmatmul.mubr.msk.f32.vlgmr.msra.gmra.mrb[62].mxu1 %vm2118_vm13, %v6204_v10 }
 0xb70   : > { %v22309_v12 = vpop.eup %22308  ;;  %20872 = vmatpush3.msra.mxu1 %v6520_v31  ;;  %20873 = vmatprep.mubr.msk.f32.mxu1 %vm27170_vm3, %v27259_v15 }
 0xb71   : > { %v22311_v47 = vpop.eup %22310  ;;  %20881 = vmatprep.subr.mxu1 %v27259_v15  ;;  %v6206_v62 = vmul.f32 %v22309_v12, %v23880_v19 }
 0xb72   : > { %v6208_v22 = vmul.f32 %v22311_v47, %v23882_v23 }
 0xb73   : > { %20869 = vmatmul.mubr.msk.f32.vlgmr.msra.gmra.mrb[70].mxu0 %vm2118_vm13, %v6206_v62 }
 0xb74   : > { %v22313_v63 = vpop.eup %22312  ;;  %20874 = vmatmul.mubr.msk.f32.vlgmr.msra.gmra.mrb[64].mxu1 %vm2118_vm13, %v6208_v22  ;;  %20877 = vmatpush3.msra.mxu0 %v6596_v25 }
 0xb75   : > { %20882 = vmatpush3.msra.mxu1 %v6672_v0  ;;  %20878 = vmatprep.mubr.msk.f32.mxu0 %vm27170_vm3, %v27259_v15  ;;  %v6210_v46 = vmul.f32 %v22313_v63, %v23888_v5  ;;  %v6980_v5 = vpop.permute.xlu0 %6979 }
 0xb76   : > { %20886 = vmatprep.subr.mxu0 %v27259_v15  ;;  %20883 = vmatprep.mubr.msk.f32.mxu1 %vm27170_vm3, %v27259_v15 }
 0xb77   : > { %20879 = vmatmul.mubr.msk.f32.vlgmr.msra.gmra.mrb[72].mxu0 %vm2118_vm13, %v6210_v46  ;;  %20891 = vmatprep.subr.mxu1 %v27259_v15 }
 0xb78   : > { %v22315_v33 = vpop.eup %22314  ;;  %20887 = vmatpush3.msra.mxu0 %v6748_v52  ;;  %20888 = vmatprep.mubr.msk.f32.mxu0 %vm27170_vm3, %v27259_v15 }
 0xb79   : > { %v6214_v43 = vmul.f32 %v22315_v33, %v23892_v30  ;;  %20896 = vmatprep.subr.mxu0 %v27259_v15  ;;  %v7138_v0 = vpop.permute.xlu0 %7137 }
 0xb7b   : > { %20889 = vmatmul.mubr.msk.f32.vlgmr.msra.gmra.mrb[74].mxu0 %vm2118_vm13, %v6214_v43 }
 0xb7c   : > { %20898 = vmatprep.mubr.msk.f32.mxu0 %vm27170_vm3, %v27259_v15 }
 0xb7f   : > { %20897 = vmatpush3.xpose.msk.msra.mxu0 %vm27176_vm1, %v6904_v9 }
 0xb80   : > { %20906 = vmatprep.subr.mxu0 %v27259_v15 }
 0xb82   : > { %20899 = vmatmul.mubr.msk.f32.vlgmr.msra.gmra.mrb[76].mxu0 %vm27176_vm1, %v6902_v54  ;;  %v7136_v54 = vpop.permute.xlu0 %7135 }
 0xb83   : > { %20907 = vmatpush3.xpose.msk.msra.mxu0 %vm27176_vm1, %v7060_v20  ;;  %20908 = vmatprep.mubr.msk.f32.mxu0 %vm27170_vm3, %v27259_v15 }
 0xb84   : > { %20916 = vmatprep.subr.mxu0 %v27259_v15 }
 0xb9a   : > { %v6195_v19 = vpop.xlane.xlu1 %6194 }
 0xb9b   : > { %22316 = vrcp.f32 %v6195_v19 }
 0xb9e   : > { %v7058_v23 = vpop.permute.xlu1 %7057 }
 0xb9f   : > { %20909 = vmatmul.mubr.msk.f32.vlgmr.msra.gmra.mrb[78].mxu0 %vm27176_vm1, %v7058_v23 }
 0xba0   : > { %20918 = vmatprep.mubr.msk.f32.mxu0 %vm27170_vm3, %v27259_v15 }
 0xba2   : > { %v7216_v30 = vpop.permute.xlu1 %7215 }
 0xba3   : > { %20917 = vmatpush3.xpose.msk.msra.mxu0 %vm27176_vm1, %v7216_v30 }
 0xba4   : > { %20926 = vmatprep.subr.mxu0 %v27259_v15 }
 0xba5   : > { %v22317_v31 = vpop.eup %22316 }
 0xba6   : > { %v7214_v25 = vpop.permute.xlu1 %7213  ;;  %v6212_v52 = vmul.f32 %v22317_v31, %v23907_v17 }
 0xba7   : > { %20919 = vmatmul.mubr.msk.f32.vlgmr.msra.gmra.mrb[80].mxu0 %vm27176_vm1, %v7214_v25 }
 0xba8   : > { %20884 = vmatmul.mubr.msk.f32.vlgmr.msra.gmra.mrb[66].mxu1 %vm2118_vm13, %v6212_v52  ;;  %20928 = vmatprep.mubr.msk.f32.mxu0 %vm27170_vm3, %v27259_v15 }
 0xba9   : > { %20892 = vmatpush3.xpose.msk.msra.mxu1 %vm27176_vm1, %v23915_v16  ;;  %20893 = vmatprep.mubr.msk.f32.mxu1 %vm27170_vm3, %v27259_v15  ;;  %v7294_v16 = vpop.permute.xlu0 %7293 }
 0xbaa   : > { %v7372_v9 = vpop.permute.xlu1 %7371  ;;  %20901 = vmatprep.subr.mxu1 %v27259_v15 }
 0xbab   : > { %20927 = vmatpush3.xpose.msk.msra.mxu0 %vm27176_vm1, %v7372_v9 }
 0xbac   : > { %20894 = vmatmul.mubr.msk.f32.vlgmr.msra.gmra.mrb[68].mxu1 %vm27176_vm1, %v23919_v55  ;;  %20936 = vmatprep.subr.mxu0 %v27259_v15 }
 0xbad   : > { %20902 = vmatpush3.xpose.msk.msra.mxu1 %vm27176_vm1, %v23925_v21  ;;  %20903 = vmatprep.mubr.msk.f32.mxu1 %vm27170_vm3, %v27259_v15  ;;  %v7292_v55 = vpop.permute.xlu0 %7291 }
 0xbae   : > { %v7370_v17 = vpop.permute.xlu1 %7369  ;;  %20911 = vmatprep.subr.mxu1 %v27259_v15 }
 0xbaf   : > { %20929 = vmatmul.mubr.msk.f32.vlgmr.msra.gmra.mrb[82].mxu0 %vm27176_vm1, %v7370_v17 }
 0xbb0   : > { %20904 = vmatmul.mubr.msk.f32.vlgmr.msra.gmra.mrb[70].mxu1 %vm27176_vm1, %v6980_v5  ;;  %20938 = vmatprep.mubr.msk.f32.mxu0 %vm27170_vm3, %v27259_v15 }
 0xbb1   : > { %20912 = vmatpush3.xpose.msk.msra.mxu1 %vm27176_vm1, %v7138_v0  ;;  %20913 = vmatprep.mubr.msk.f32.mxu1 %vm27170_vm3, %v27259_v15 }
 0xbb2   : > { %20921 = vmatprep.subr.mxu1 %v27259_v15 }
 0xbb4   : > { %20914 = vmatmul.mubr.msk.f32.vlgmr.msra.gmra.mrb[72].mxu1 %vm27176_vm1, %v7136_v54 }
 0xbb5   : > { %20922 = vmatpush3.xpose.msk.msra.mxu1 %vm27176_vm1, %v7294_v16  ;;  %20923 = vmatprep.mubr.msk.f32.mxu1 %vm27170_vm3, %v27259_v15 }
 0xbb6   : > { %20931 = vmatprep.subr.mxu1 %v27259_v15 }
 0xbb8   : > { %20924 = vmatmul.mubr.msk.f32.vlgmr.msra.gmra.mrb[74].mxu1 %vm27176_vm1, %v7292_v55 }
 0xbb9   : > { %20933 = vmatprep.mubr.msk.f32.mxu1 %vm27170_vm3, %v27259_v15 }
 0xc14   : > { %v24008_v21 = vpop.f32.mrb[68].mxu0 }
 0xc15   : > { %v20860_v20 = vpop.f32.mrb[69].mxu0 }
 0xc3e   : > { %v24010_v14 = vpop.f32.mrb[60].mxu1 }
 0xc3f   : > { %v20855_v34 = vpop.f32.mrb[61].mxu1 }
 0xc42   : > { %v24012_v18 = vpop.f32.mrb[62].mxu1 }
 0xc43   : > { %v20865_v10 = vpop.f32.mrb[63].mxu1 }
 0xc46   : > { %v24014_v12 = vpop.f32.mrb[70].mxu0 }
 0xc47   : > { %v24016_v47 = vpop.f32.mrb[64].mxu1  ;;  %v20870_v62 = vpop.f32.mrb[71].mxu0 }
 0xc48   : > { %27276 = vst [vmem:[#allocation65_spill] sm:$0xff] %v24016_v47  ;;  %v20875_v22 = vpop.f32.mrb[65].mxu1 }
 0xc4a   : > { %v24018_v63 = vpop.f32.mrb[72].mxu0 }
 0xc4b   : > { %27277 = vst [vmem:[#allocation66_spill] sm:$0xff] %v24018_v63  ;;  %v20880_v46 = vpop.f32.mrb[73].mxu0 }
 0xc4e   : > { %v24020_v33 = vpop.f32.mrb[74].mxu0 }
 0xc4f   : > { %27278 = vst [vmem:[#allocation67_spill] sm:$0xff] %v24020_v33  ;;  %v20890_v43 = vpop.f32.mrb[75].mxu0 }
 0xc55   : > { %v6975_v19 = vpop.f32.mrb[76].mxu0 }
 0xc56   : > { %v7448_v23 = vmul.f32 0.5, %v6975_v19  ;;  %v20900_v5 = vpop.f32.mrb[77].mxu0 }
 0xc58   : > { %v24023_v30 = vadd.f32 %v7448_v23, %v23145_v56 }
 0xc5a   : > { %v7466_v31 = vsel %vm2118_vm13, %v24023_v30, -inf }
 0xc5b   : > { %7467 = vmax.xlane.f32.xlu1 %v7466_v31 }
 0xc72   : > { %v7131_v0 = vpop.f32.mrb[78].mxu0 }
 0xc73   : > { %v20910_v25 = vpop.f32.mrb[79].mxu0  ;;  %v7450_v46 = vmul.f32 0.5, %v7131_v0 }
 0xc75   : > { %v7458_v25 = vadd.f32 %v7450_v46, %v23173_v26 }
 0xc7a   : > { %v7287_v52 = vpop.f32.mrb[80].mxu0 }
 0xc7b   : > { %v24027_v9 = vpop.f32.mrb[66].mxu1  ;;  %v20920_v54 = vpop.f32.mrb[81].mxu0 }
 0xc7c   : > { %27279 = vst [vmem:[#allocation68_spill] sm:$0xff] %v24027_v9  ;;  %v20885_v17 = vpop.f32.mrb[67].mxu1  ;;  %v7452_v54 = vmul.f32 0.5, %v7287_v52 }
 0xc7e   : > { %v7460_v0 = vadd.f32 %v7452_v54, %v23185_v61 }
 0xc7f   : > { %v6897_v16 = vpop.f32.mrb[68].mxu1 }
 0xc80   : > { %v7447_v55 = vmul.f32 0.5, %v6897_v16  ;;  %v20895_v20 = vpop.f32.mrb[69].mxu1  ;;  %v7478_v46 = vsel %vm2118_vm13, %v7460_v0, -inf }
 0xc82   : > { %v7455_v34 = vadd.f32 %v7447_v55, %v23148_v57  ;;  %v7443_v10 = vpop.f32.mrb[82].mxu0 }
 0xc83   : > { %v7053_v62 = vpop.f32.mrb[70].mxu1  ;;  %v20930_v22 = vpop.f32.mrb[83].mxu0 }
 0xc84   : > { %v7449_v43 = vmul.f32 0.5, %v7053_v62  ;;  %v20905_v19 = vpop.f32.mrb[71].mxu1  ;;  %v7463_v23 = vsel %vm2118_vm13, %v7455_v34, -inf  ;;  %v7454_v62 = vmul.f32 0.5, %v7443_v10 }
 0xc85   : > { %7464 = vmax.xlane.f32.xlu0 %v7463_v23 }
 0xc86   : > { %v7457_v5 = vadd.f32 %v7449_v43, %v23157_v2  ;;  %v7472_v43 = vsel %vm2118_vm13, %v7458_v25, -inf  ;;  %v7462_v52 = vadd.f32 %v7454_v62, %v23191_v7 }
 0xc87   : > { %v7209_v31 = vpop.f32.mrb[72].mxu1 }
 0xc88   : > { %v7451_v17 = vmul.f32 0.5, %v7209_v31  ;;  %v20915_v16 = vpop.f32.mrb[73].mxu1  ;;  %v7469_v20 = vsel %vm2118_vm13, %v7457_v5, -inf  ;;  %v7484_v31 = vsel %vm2118_vm13, %v7462_v52, -inf }
 0xc89   : > { %7470 = vmax.xlane.f32.xlu0 %v7469_v20 }
 0xc8a   : > { %v7459_v55 = vadd.f32 %v7451_v17, %v23164_v8 }
 0xc8b   : > { %v7365_v22 = vpop.f32.mrb[74].mxu1 }
 0xc8c   : > { %v20925_v19 = vpop.f32.mrb[75].mxu1  ;;  %v7475_v23 = vsel %vm2118_vm13, %v7459_v55, -inf  ;;  %v7453_v10 = vmul.f32 0.5, %v7365_v22 }
 0xc8d   : > { %7476 = vmax.xlane.f32.xlu1 %v7475_v23  ;;  %7473 = vmax.xlane.f32.xlu0 %v7472_v43 }
 0xc8e   : > { %v24054_v54 = vadd.f32 %v7453_v10, %v23178_v42 }
 0xc90   : > { %v7481_v17 = vsel %vm2118_vm13, %v24054_v54, -inf }
 0xc91   : > { %7479 = vmax.xlane.f32.xlu0 %v7478_v46 }
 0xc95   : > { %7485 = vmax.xlane.f32.xlu0 %v7484_v31 }
 0xc9e   : > { %7551 = vrot.lane.b32.xlu1 %v22962_v37, %s27157_s2 }
 0xcab   : > { %7627 = vrot.lane.b32.xlu0 %v22966_v40, %s27157_s2 }
 0xcaf   : > { %7855 = vrot.lane.b32.xlu0 %v22976_v45, %s27157_s2 }
 0xcb3   : > { %8007 = vrot.lane.b32.xlu0 %v22984_v49, %s27157_s2 }
 0xcb7   : > { %8161 = vrot.lane.b32.xlu0 %v22962_v37, %s27159_s23 }
 0xcbb   : > { %8159 = vrot.lane.b32.xlu0 %v22962_v37, %s27158_s22 }
 0xcbf   : > { %8317 = vrot.lane.b32.xlu0 %v22968_v41, %s27159_s23 }
 0xcc2   : > { %7482 = vmax.xlane.f32.xlu1 %v7481_v17 }
 0xcd3   : > { %7703 = vrot.lane.b32.xlu1 %v22968_v41, %s27157_s2 }
 0xcd7   : > { %7779 = vrot.lane.b32.xlu1 %v22974_v44, %s27157_s2 }
 0xcdb   : > { %7931 = vrot.lane.b32.xlu1 %v22982_v48, %s27157_s2 }
 0xcdf   : > { %8083 = vrot.lane.b32.xlu1 %v22990_v50, %s27157_s2  ;;  %s27160_s2 = smov 44  }
 0xce3   : > { %8239 = vrot.lane.b32.xlu1 %v22966_v40, %s27159_s23 }
 0xce7   : > { %8237 = vrot.lane.b32.xlu1 %v22966_v40, %s27158_s22 }
 0xce8   : > { %v7468_v16 = vpop.xlane.xlu1 %7467 }
 0xce9   : > { %v7488_v20 = vsub.f32 %v24023_v30, %v7468_v16 }
 0xceb   : > { %v7497_v22 = vmul.f32 1.442695, %v7488_v20  ;;  %8395 = vrot.lane.b32.xlu1 %v22974_v44, %s27159_s23 }
 0xced   : > { %22318 = vpow2.f32 %v7497_v22 }
 0xcf7   : > { %v24075_v62 = vpop.eup %22318 }
 0xcf8   : > { %v7514_v19 = vsel %vm2118_vm13, %v24075_v62, 0.0 }
 0xcf9   : > { %7515 = vadd.xlane.f32.xlu0 %v7514_v19 }
 0xd12   : > { %v7465_v23 = vpop.xlane.xlu0 %7464 }
 0xd13   : > { %v7487_v43 = vsub.f32 %v7455_v34, %v7465_v23 }
 0xd15   : > { %v7495_v46 = vmul.f32 1.442695, %v7487_v43 }
 0xd16   : > { %v7471_v31 = vpop.xlane.xlu0 %7470 }
 0xd17   : > { %22320 = vpow2.f32 %v7495_v46  ;;  %v7489_v10 = vsub.f32 %v7457_v5, %v7471_v31 }
 0xd19   : > { %v7499_v17 = vmul.f32 1.442695, %v7489_v10 }
 0xd1a   : > { %v7474_v6 = vpop.xlane.xlu0 %7473  ;;  %v7477_v30 = vpop.xlane.xlu1 %7476 }
 0xd1b   : > { %22322 = vpow2.f32 %v7499_v17  ;;  %v7490_v16 = vsub.f32 %v7458_v25, %v7474_v6  ;;  %v7491_v20 = vsub.f32 %v7459_v55, %v7477_v30 }
 0xd1d   : > { %v7501_v1 = vmul.f32 1.442695, %v7490_v16  ;;  %v7503_v22 = vmul.f32 1.442695, %v7491_v20 }
 0xd1e   : > { %v7480_v4 = vpop.xlane.xlu0 %7479  ;;  %v7552_v58 = vpop.permute.xlu1 %7551 }
 0xd1f   : > { %22324 = vpow2.f32 %v7501_v1  ;;  %v7492_v9 = vsub.f32 %v7460_v0, %v7480_v4  ;;  %20932 = vmatpush3.msra.mxu1 %v7552_v58 }
 0xd20   : > { %22326 = vpow2.f32 %v7503_v22  ;;  %20941 = vmatprep.subr.mxu1 %v27259_v15 }
 0xd21   : > { %v24080_v34 = vpop.eup %22320  ;;  %v7505_v19 = vmul.f32 1.442695, %v7492_v9 }
 0xd22   : > { %v7486_v5 = vpop.xlane.xlu0 %7485  ;;  %v7511_v23 = vsel %vm2118_vm13, %v24080_v34, 0.0 }
 0xd23   : > { %22328 = vpow2.f32 %v7505_v19  ;;  %v7494_v6 = vsub.f32 %v7462_v52, %v7486_v5  ;;  %7512 = vadd.xlane.f32.xlu1 %v7511_v23 }
 0xd25   : > { %v24084_v25 = vpop.eup %22322  ;;  %v7509_v55 = vmul.f32 1.442695, %v7494_v6 }
 0xd26   : > { %v7628_v43 = vpop.permute.xlu0 %7627  ;;  %v7517_v58 = vsel %vm2118_vm13, %v24084_v25, 0.0 }
 0xd27   : > { %22330 = vpow2.f32 %v7509_v55  ;;  %7518 = vadd.xlane.f32.xlu1 %v7517_v58  ;;  %20937 = vmatpush3.msra.mxu0 %v7628_v43 }
 0xd28   : > { %20946 = vmatprep.subr.mxu0 %v27259_v15 }
 0xd29   : > { %v24089_v4 = vpop.eup %22324 }
 0xd2a   : > { %v24091_v1 = vpop.eup %22326  ;;  %v7520_v9 = vsel %vm2118_vm13, %v24089_v4, 0.0  ;;  %v7856_v19 = vpop.permute.xlu0 %7855 }
 0xd2b   : > { %7521 = vadd.xlane.f32.xlu0 %v7520_v9  ;;  %v7523_v0 = vsel %vm2118_vm13, %v24091_v1, 0.0 }
 0xd2c   : > { %7524 = vadd.xlane.f32.xlu1 %v7523_v0 }
 0xd2d   : > { %v24097_v52 = vpop.eup %22328 }
 0xd2e   : > { %v7526_v46 = vsel %vm2118_vm13, %v24097_v52, 0.0  ;;  %v8008_v5 = vpop.permute.xlu0 %8007 }
 0xd2f   : > { %7527 = vadd.xlane.f32.xlu0 %v7526_v46 }
 0xd31   : > { %v24101_v31 = vpop.eup %22330 }
 0xd32   : > { %v7532_v10 = vsel %vm2118_vm13, %v24101_v31, 0.0 }
 0xd33   : > { %7533 = vadd.xlane.f32.xlu0 %v7532_v10 }
 0xd49   : > { %8315 = vrot.lane.b32.xlu0 %v22968_v41, %s27158_s22 }
 0xd4d   : > { %8473 = vrot.lane.b32.xlu0 %v22976_v45, %s27159_s23 }
 0xd4f   : > { %v7483_v17 = vpop.xlane.xlu1 %7482 }
 0xd50   : > { %v7493_v30 = vsub.f32 %v24054_v54, %v7483_v17  ;;  %v24124_v54 = vpop.permute.xlu0 %8161 }
 0xd51   : > { %8471 = vrot.lane.b32.xlu0 %v22976_v45, %s27158_s22 }
 0xd52   : > { %v7507_v16 = vmul.f32 1.442695, %v7493_v30 }
 0xd53   : > { %v7704_v43 = vpop.permute.xlu1 %7703 }
 0xd54   : > { %22332 = vpow2.f32 %v7507_v16  ;;  %v24128_v23 = vpop.permute.xlu0 %8159 }
 0xd55   : > { %8629 = vrot.lane.b32.xlu0 %v22984_v49, %s27159_s23 }
 0xd57   : > { %v7780_v58 = vpop.permute.xlu1 %7779 }
 0xd58   : > { %v24134_v6 = vpop.permute.xlu0 %8317 }
 0xd59   : > { %8627 = vrot.lane.b32.xlu0 %v22984_v49, %s27158_s22 }
 0xd5b   : > { %v7932_v46 = vpop.permute.xlu1 %7931 }
 0xd5e   : > { %v24116_v20 = vpop.eup %22332 }
 0xd5f   : > { %v7529_v22 = vsel %vm2118_vm13, %v24116_v20, 0.0  ;;  %v8084_v10 = vpop.permute.xlu1 %8083 }
 0xd60   : > { %7530 = vadd.xlane.f32.xlu1 %v7529_v22 }
 0xd63   : > { %v8240_v17 = vpop.permute.xlu1 %8239 }
 0xd67   : > { %v8238_v30 = vpop.permute.xlu1 %8237 }
 0xd6b   : > { %v8396_v16 = vpop.permute.xlu1 %8395 }
 0xd71   : > { %8393 = vrot.lane.b32.xlu1 %v22974_v44, %s27158_s22 }
 0xd75   : > { %8551 = vrot.lane.b32.xlu1 %v22982_v48, %s27159_s23 }
 0xd79   : > { %8549 = vrot.lane.b32.xlu1 %v22982_v48, %s27158_s22 }
 0xd7d   : > { %8707 = vrot.lane.b32.xlu1 %v22990_v50, %s27159_s23  ;;  %s27162_s23 = smov 104  }
 0xd81   : > { %8705 = vrot.lane.b32.xlu1 %v22990_v50, %s27158_s22  ;;  %s27163_s22 = smov 72  }
 0xd86   : > { %v7516_v55 = vpop.xlane.xlu0 %7515 }
 0xd87   : > { %22334 = vrcp.f32 %v7516_v55 }
 0xd91   : > { %v22335_v9 = vpop.eup %22334 }
 0xd92   : > { %v7538_v0 = vmul.f32 %v22335_v9, %v24075_v62 }
 0xd94   : > { %20939 = vmatmul.mubr.msk.f32.vlgmr.msra.gmra.mrb[84].mxu0 %vm2118_vm13, %v7538_v0 }
 0xd95   : > { %20947 = vmatpush3.msra.mxu0 %v7780_v58  ;;  %20948 = vmatprep.mubr.msk.f32.mxu0 %vm27170_vm3, %v27259_v15 }
 0xd96   : > { %20956 = vmatprep.subr.mxu0 %v27259_v15 }
 0xdb0   : > { %v7513_v22 = vpop.xlane.xlu1 %7512 }
 0xdb1   : > { %22336 = vrcp.f32 %v7513_v22 }
 0xdb4   : > { %v7519_v55 = vpop.xlane.xlu1 %7518 }
 0xdb5   : > { %22338 = vrcp.f32 %v7519_v55 }
 0xdb8   : > { %v7522_v28 = vpop.xlane.xlu0 %7521 }
 0xdb9   : > { %22340 = vrcp.f32 %v7522_v28  ;;  %v7525_v62 = vpop.xlane.xlu1 %7524 }
 0xdba   : > { %22342 = vrcp.f32 %v7525_v62 }
 0xdbb   : > { %v22337_v9 = vpop.eup %22336 }
 0xdbc   : > { %v7528_v0 = vpop.xlane.xlu0 %7527  ;;  %v7536_v58 = vmul.f32 %v22337_v9, %v24080_v34 }
 0xdbd   : > { %22344 = vrcp.f32 %v7528_v0 }
 0xdbe   : > { %20934 = vmatmul.mubr.msk.f32.vlgmr.msra.gmra.mrb[76].mxu1 %vm2118_vm13, %v7536_v58 }
 0xdbf   : > { %v22339_v53 = vpop.eup %22338  ;;  %20942 = vmatpush3.msra.mxu1 %v7704_v43  ;;  %20943 = vmatprep.mubr.msk.f32.mxu1 %vm27170_vm3, %v27259_v15 }
 0xdc0   : > { %v7534_v33 = vpop.xlane.xlu0 %7533  ;;  %20951 = vmatprep.subr.mxu1 %v27259_v15  ;;  %v7540_v22 = vmul.f32 %v22339_v53, %v24084_v25 }
 0xdc1   : > { %22346 = vrcp.f32 %v7534_v33 }
 0xdc2   : > { %20944 = vmatmul.mubr.msk.f32.vlgmr.msra.gmra.mrb[78].mxu1 %vm2118_vm13, %v7540_v22 }
 0xdc3   : > { %v22341_v28 = vpop.eup %22340  ;;  %20952 = vmatpush3.msra.mxu1 %v7856_v19  ;;  %20953 = vmatprep.mubr.msk.f32.mxu1 %vm27170_vm3, %v27259_v15 }
 0xdc4   : > { %v22343_v34 = vpop.eup %22342  ;;  %20961 = vmatprep.subr.mxu1 %v27259_v15  ;;  %v7542_v43 = vmul.f32 %v22341_v28, %v24089_v4 }
 0xdc5   : > { %v7544_v55 = vmul.f32 %v22343_v34, %v24091_v1 }
 0xdc6   : > { %20949 = vmatmul.mubr.msk.f32.vlgmr.msra.gmra.mrb[86].mxu0 %vm2118_vm13, %v7542_v43 }
 0xdc7   : > { %v22345_v62 = vpop.eup %22344  ;;  %20954 = vmatmul.mubr.msk.f32.vlgmr.msra.gmra.mrb[80].mxu1 %vm2118_vm13, %v7544_v55  ;;  %20957 = vmatpush3.msra.mxu0 %v7932_v46 }
 0xdc8   : > { %20962 = vmatpush3.msra.mxu1 %v8008_v5  ;;  %20958 = vmatprep.mubr.msk.f32.mxu0 %vm27170_vm3, %v27259_v15  ;;  %v7546_v53 = vmul.f32 %v22345_v62, %v24097_v52  ;;  %v8316_v52 = vpop.permute.xlu0 %8315 }
 0xdc9   : > { %20966 = vmatprep.subr.mxu0 %v27259_v15  ;;  %20963 = vmatprep.mubr.msk.f32.mxu1 %vm27170_vm3, %v27259_v15 }
 0xdca   : > { %20959 = vmatmul.mubr.msk.f32.vlgmr.msra.gmra.mrb[88].mxu0 %vm2118_vm13, %v7546_v53  ;;  %20971 = vmatprep.subr.mxu1 %v27259_v15 }
 0xdcb   : > { %v22347_v33 = vpop.eup %22346  ;;  %20967 = vmatpush3.msra.mxu0 %v8084_v10  ;;  %20968 = vmatprep.mubr.msk.f32.mxu0 %vm27170_vm3, %v27259_v15 }
 0xdcc   : > { %v7550_v25 = vmul.f32 %v22347_v33, %v24101_v31  ;;  %20976 = vmatprep.subr.mxu0 %v27259_v15  ;;  %v8474_v5 = vpop.permute.xlu0 %8473 }
 0xdce   : > { %20969 = vmatmul.mubr.msk.f32.vlgmr.msra.gmra.mrb[90].mxu0 %vm2118_vm13, %v7550_v25 }
 0xdcf   : > { %20978 = vmatprep.mubr.msk.f32.mxu0 %vm27170_vm3, %v27259_v15 }
 0xdd2   : > { %20977 = vmatpush3.xpose.msk.msra.mxu0 %vm27176_vm1, %v8240_v17 }
 0xdd3   : > { %20986 = vmatprep.subr.mxu0 %v27259_v15 }
 0xdd5   : > { %20979 = vmatmul.mubr.msk.f32.vlgmr.msra.gmra.mrb[92].mxu0 %vm27176_vm1, %v8238_v30  ;;  %v8472_v30 = vpop.permute.xlu0 %8471 }
 0xdd6   : > { %20987 = vmatpush3.xpose.msk.msra.mxu0 %vm27176_vm1, %v8396_v16  ;;  %20988 = vmatprep.mubr.msk.f32.mxu0 %vm27170_vm3, %v27259_v15 }
 0xdd7   : > { %20996 = vmatprep.subr.mxu0 %v27259_v15 }
 0xded   : > { %v7531_v4 = vpop.xlane.xlu1 %7530 }
 0xdee   : > { %22348 = vrcp.f32 %v7531_v4 }
 0xdf1   : > { %v8394_v1 = vpop.permute.xlu1 %8393 }
 0xdf2   : > { %20989 = vmatmul.mubr.msk.f32.vlgmr.msra.gmra.mrb[94].mxu0 %vm27176_vm1, %v8394_v1 }
 0xdf3   : > { %20998 = vmatprep.mubr.msk.f32.mxu0 %vm27170_vm3, %v27259_v15 }
 0xdf5   : > { %v8552_v31 = vpop.permute.xlu1 %8551 }
 0xdf6   : > { %20997 = vmatpush3.xpose.msk.msra.mxu0 %vm27176_vm1, %v8552_v31 }
 0xdf7   : > { %21006 = vmatprep.subr.mxu0 %v27259_v15 }
 0xdf8   : > { %v22349_v19 = vpop.eup %22348 }
 0xdf9   : > { %v8550_v46 = vpop.permute.xlu1 %8549  ;;  %v7548_v10 = vmul.f32 %v22349_v19, %v24116_v20 }
 0xdfa   : > { %20999 = vmatmul.mubr.msk.f32.vlgmr.msra.gmra.mrb[96].mxu0 %vm27176_vm1, %v8550_v46 }
 0xdfb   : > { %20964 = vmatmul.mubr.msk.f32.vlgmr.msra.gmra.mrb[82].mxu1 %vm2118_vm13, %v7548_v10  ;;  %21008 = vmatprep.mubr.msk.f32.mxu0 %vm27170_vm3, %v27259_v15 }
 0xdfc   : > { %20972 = vmatpush3.xpose.msk.msra.mxu1 %vm27176_vm1, %v24124_v54  ;;  %20973 = vmatprep.mubr.msk.f32.mxu1 %vm27170_vm3, %v27259_v15  ;;  %v8630_v54 = vpop.permute.xlu0 %8629 }
 0xdfd   : > { %v8708_v17 = vpop.permute.xlu1 %8707  ;;  %20981 = vmatprep.subr.mxu1 %v27259_v15 }
 0xdfe   : > { %21007 = vmatpush3.xpose.msk.msra.mxu0 %vm27176_vm1, %v8708_v17 }
 0xdff   : > { %20974 = vmatmul.mubr.msk.f32.vlgmr.msra.gmra.mrb[84].mxu1 %vm27176_vm1, %v24128_v23  ;;  %21016 = vmatprep.subr.mxu0 %v27259_v15 }
 0xe00   : > { %20982 = vmatpush3.xpose.msk.msra.mxu1 %vm27176_vm1, %v24134_v6  ;;  %20983 = vmatprep.mubr.msk.f32.mxu1 %vm27170_vm3, %v27259_v15  ;;  %v8628_v23 = vpop.permute.xlu0 %8627 }
 0xe01   : > { %v8706_v20 = vpop.permute.xlu1 %8705  ;;  %20991 = vmatprep.subr.mxu1 %v27259_v15 }
 0xe02   : > { %21009 = vmatmul.mubr.msk.f32.vlgmr.msra.gmra.mrb[98].mxu0 %vm27176_vm1, %v8706_v20 }
 0xe03   : > { %20984 = vmatmul.mubr.msk.f32.vlgmr.msra.gmra.mrb[86].mxu1 %vm27176_vm1, %v8316_v52  ;;  %21018 = vmatprep.mubr.msk.f32.mxu0 %vm27170_vm3, %v27259_v15 }
 0xe04   : > { %20992 = vmatpush3.xpose.msk.msra.mxu1 %vm27176_vm1, %v8474_v5  ;;  %20993 = vmatprep.mubr.msk.f32.mxu1 %vm27170_vm3, %v27259_v15 }
 0xe05   : > { %21001 = vmatprep.subr.mxu1 %v27259_v15 }
 0xe07   : > { %20994 = vmatmul.mubr.msk.f32.vlgmr.msra.gmra.mrb[88].mxu1 %vm27176_vm1, %v8472_v30 }
 0xe08   : > { %21002 = vmatpush3.xpose.msk.msra.mxu1 %vm27176_vm1, %v8630_v54  ;;  %21003 = vmatprep.mubr.msk.f32.mxu1 %vm27170_vm3, %v27259_v15 }
 0xe09   : > { %21011 = vmatprep.subr.mxu1 %v27259_v15 }
 0xe0b   : > { %21004 = vmatmul.mubr.msk.f32.vlgmr.msra.gmra.mrb[90].mxu1 %vm27176_vm1, %v8628_v23 }
 0xe0c   : > { %21013 = vmatprep.mubr.msk.f32.mxu1 %vm27170_vm3, %v27259_v15 }
 0xe67   : > { %v24217_v6 = vpop.f32.mrb[84].mxu0 }
 0xe68   : > { %v20940_v16 = vpop.f32.mrb[85].mxu0 }
 0xe91   : > { %v24219_v9 = vpop.f32.mrb[76].mxu1 }
 0xe92   : > { %v20935_v0 = vpop.f32.mrb[77].mxu1 }
 0xe95   : > { %v24221_v58 = vpop.f32.mrb[78].mxu1 }
 0xe96   : > { %v20945_v22 = vpop.f32.mrb[79].mxu1 }
 0xe99   : > { %v24223_v28 = vpop.f32.mrb[86].mxu0 }
 0xe9a   : > { %v24225_v34 = vpop.f32.mrb[80].mxu1  ;;  %v20950_v43 = vpop.f32.mrb[87].mxu0 }
 0xe9b   : > { %27280 = vst [vmem:[#allocation69_spill] sm:$0xff] %v24225_v34  ;;  %v20955_v55 = vpop.f32.mrb[81].mxu1 }
 0xe9d   : > { %v24227_v62 = vpop.f32.mrb[88].mxu0 }
 0xe9e   : > { %27281 = vst [vmem:[#allocation70_spill] sm:$0xff] %v24227_v62  ;;  %v20960_v53 = vpop.f32.mrb[89].mxu0 }
 0xea1   : > { %v24229_v33 = vpop.f32.mrb[90].mxu0 }
 0xea2   : > { %27282 = vst [vmem:[#allocation71_spill] sm:$0xff] %v24229_v33  ;;  %v20970_v25 = vpop.f32.mrb[91].mxu0 }
 0xea8   : > { %v8311_v4 = vpop.f32.mrb[92].mxu0 }
 0xea9   : > { %v8784_v1 = vmul.f32 0.5, %v8311_v4  ;;  %v20980_v52 = vpop.f32.mrb[93].mxu0 }
 0xeab   : > { %v24232_v31 = vadd.f32 %v8784_v1, %v23145_v56 }
 0xead   : > { %v8802_v19 = vsel %vm2118_vm13, %v24232_v31, -inf }
 0xeae   : > { %8803 = vmax.xlane.f32.xlu1 %v8802_v19 }
 0xec5   : > { %v8467_v5 = vpop.f32.mrb[94].mxu0 }
 0xec6   : > { %v20990_v46 = vpop.f32.mrb[95].mxu0  ;;  %v8786_v53 = vmul.f32 0.5, %v8467_v5 }
 0xec8   : > { %v8794_v46 = vadd.f32 %v8786_v53, %v23173_v26 }
 0xecd   : > { %v8623_v10 = vpop.f32.mrb[96].mxu0 }
 0xece   : > { %v24236_v17 = vpop.f32.mrb[82].mxu1  ;;  %v21000_v30 = vpop.f32.mrb[97].mxu0 }
 0xecf   : > { %27283 = vst [vmem:[#allocation72_spill] sm:$0xff] %v24236_v17  ;;  %v20965_v20 = vpop.f32.mrb[83].mxu1  ;;  %v8788_v30 = vmul.f32 0.5, %v8623_v10 }
 0xed1   : > { %v8796_v5 = vadd.f32 %v8788_v30, %v23185_v61 }
 0xed2   : > { %v8233_v54 = vpop.f32.mrb[84].mxu1 }
 0xed3   : > { %v8783_v23 = vmul.f32 0.5, %v8233_v54  ;;  %v20975_v16 = vpop.f32.mrb[85].mxu1  ;;  %v8814_v53 = vsel %vm2118_vm13, %v8796_v5, -inf }
 0xed5   : > { %v8791_v0 = vadd.f32 %v8783_v23, %v23148_v57  ;;  %v8779_v22 = vpop.f32.mrb[98].mxu0 }
 0xed6   : > { %v8389_v43 = vpop.f32.mrb[86].mxu1  ;;  %v21010_v55 = vpop.f32.mrb[99].mxu0 }
 0xed7   : > { %v8785_v25 = vmul.f32 0.5, %v8389_v43  ;;  %v20985_v4 = vpop.f32.mrb[87].mxu1  ;;  %v8799_v1 = vsel %vm2118_vm13, %v8791_v0, -inf  ;;  %v8790_v43 = vmul.f32 0.5, %v8779_v22 }
 0xed8   : > { %8800 = vmax.xlane.f32.xlu0 %v8799_v1 }
 0xed9   : > { %v8793_v52 = vadd.f32 %v8785_v25, %v23157_v2  ;;  %v8808_v25 = vsel %vm2118_vm13, %v8794_v46, -inf  ;;  %v8798_v10 = vadd.f32 %v8790_v43, %v23191_v7 }
 0xeda   : > { %v8545_v19 = vpop.f32.mrb[88].mxu1 }
 0xedb   : > { %v8787_v20 = vmul.f32 0.5, %v8545_v19  ;;  %v20995_v54 = vpop.f32.mrb[89].mxu1  ;;  %v8805_v16 = vsel %vm2118_vm13, %v8793_v52, -inf  ;;  %v8820_v19 = vsel %vm2118_vm13, %v8798_v10, -inf }
 0xedc   : > { %8806 = vmax.xlane.f32.xlu0 %v8805_v16 }
 0xedd   : > { %v8795_v23 = vadd.f32 %v8787_v20, %v23164_v8 }
 0xede   : > { %v8701_v55 = vpop.f32.mrb[90].mxu1 }
 0xedf   : > { %v21005_v4 = vpop.f32.mrb[91].mxu1  ;;  %v8811_v1 = vsel %vm2118_vm13, %v8795_v23, -inf  ;;  %v8789_v22 = vmul.f32 0.5, %v8701_v55 }
 0xee0   : > { %8812 = vmax.xlane.f32.xlu1 %v8811_v1  ;;  %8809 = vmax.xlane.f32.xlu0 %v8808_v25 }
 0xee1   : > { %v24263_v30 = vadd.f32 %v8789_v22, %v23178_v42 }
 0xee3   : > { %v8817_v20 = vsel %vm2118_vm13, %v24263_v30, -inf }
 0xee4   : > { %8815 = vmax.xlane.f32.xlu0 %v8814_v53 }
 0xee8   : > { %8821 = vmax.xlane.f32.xlu0 %v8820_v19 }
 0xef1   : > { %8887 = vrot.lane.b32.xlu1 %v22962_v37, %s27160_s2 }
 0xefe   : > { %8963 = vrot.lane.b32.xlu0 %v22966_v40, %s27160_s2 }
 0xf02   : > { %9191 = vrot.lane.b32.xlu0 %v22976_v45, %s27160_s2 }
 0xf06   : > { %9343 = vrot.lane.b32.xlu0 %v22984_v49, %s27160_s2 }
 0xf0a   : > { %9497 = vrot.lane.b32.xlu0 %v22962_v37, %s27163_s22 }
 0xf0e   : > { %9495 = vrot.lane.b32.xlu0 %v22962_v37, %s27162_s23 }
 0xf12   : > { %9653 = vrot.lane.b32.xlu0 %v22968_v41, %s27163_s22 }
 0xf15   : > { %8818 = vmax.xlane.f32.xlu1 %v8817_v20 }
 0xf26   : > { %9039 = vrot.lane.b32.xlu1 %v22968_v41, %s27160_s2 }
 0xf2a   : > { %9115 = vrot.lane.b32.xlu1 %v22974_v44, %s27160_s2 }
 0xf2e   : > { %9267 = vrot.lane.b32.xlu1 %v22982_v48, %s27160_s2 }
 0xf32   : > { %9419 = vrot.lane.b32.xlu1 %v22990_v50, %s27160_s2  ;;  %s27161_s2 = smov 40  }
 0xf36   : > { %9575 = vrot.lane.b32.xlu1 %v22966_v40, %s27163_s22 }
 0xf3a   : > { %9573 = vrot.lane.b32.xlu1 %v22966_v40, %s27162_s23 }
 0xf3b   : > { %v8804_v54 = vpop.xlane.xlu1 %8803 }
 0xf3c   : > { %v8824_v16 = vsub.f32 %v24232_v31, %v8804_v54 }
 0xf3e   : > { %v8833_v55 = vmul.f32 1.442695, %v8824_v16  ;;  %9731 = vrot.lane.b32.xlu1 %v22974_v44, %s27163_s22 }
 0xf40   : > { %22350 = vpow2.f32 %v8833_v55 }
 0xf4a   : > { %v24284_v43 = vpop.eup %22350 }
 0xf4b   : > { %v8850_v4 = vsel %vm2118_vm13, %v24284_v43, 0.0 }
 0xf4c   : > { %8851 = vadd.xlane.f32.xlu0 %v8850_v4 }
 0xf65   : > { %v8801_v1 = vpop.xlane.xlu0 %8800 }
 0xf66   : > { %v8823_v25 = vsub.f32 %v8791_v0, %v8801_v1 }
 0xf68   : > { %v8831_v53 = vmul.f32 1.442695, %v8823_v25 }
 0xf69   : > { %v8807_v19 = vpop.xlane.xlu0 %8806 }
 0xf6a   : > { %22352 = vpow2.f32 %v8831_v53  ;;  %v8825_v22 = vsub.f32 %v8793_v52, %v8807_v19 }
 0xf6c   : > { %v8835_v20 = vmul.f32 1.442695, %v8825_v22 }
 0xf6d   : > { %v8810_v33 = vpop.xlane.xlu0 %8809  ;;  %v8813_v31 = vpop.xlane.xlu1 %8812 }
 0xf6e   : > { %22354 = vpow2.f32 %v8835_v20  ;;  %v8826_v54 = vsub.f32 %v8794_v46, %v8810_v33  ;;  %v8827_v16 = vsub.f32 %v8795_v23, %v8813_v31 }
 0xf70   : > { %v8837_v17 = vmul.f32 1.442695, %v8826_v54  ;;  %v8839_v55 = vmul.f32 1.442695, %v8827_v16 }
 0xf71   : > { %v8816_v27 = vpop.xlane.xlu0 %8815  ;;  %v8888_v13 = vpop.permute.xlu1 %8887 }
 0xf72   : > { %22356 = vpow2.f32 %v8837_v17  ;;  %v8828_v34 = vsub.f32 %v8796_v5, %v8816_v27  ;;  %21012 = vmatpush3.msra.mxu1 %v8888_v13 }
 0xf73   : > { %22358 = vpow2.f32 %v8839_v55  ;;  %21021 = vmatprep.subr.mxu1 %v27259_v15 }
 0xf74   : > { %v24289_v0 = vpop.eup %22352  ;;  %v8841_v4 = vmul.f32 1.442695, %v8828_v34 }
 0xf75   : > { %v8822_v52 = vpop.xlane.xlu0 %8821  ;;  %v8847_v1 = vsel %vm2118_vm13, %v24289_v0, 0.0 }
 0xf76   : > { %22360 = vpow2.f32 %v8841_v4  ;;  %v8830_v33 = vsub.f32 %v8798_v10, %v8822_v52  ;;  %8848 = vadd.xlane.f32.xlu1 %v8847_v1 }
 0xf78   : > { %v24293_v46 = vpop.eup %22354  ;;  %v8845_v23 = vmul.f32 1.442695, %v8830_v33 }
 0xf79   : > { %v8964_v25 = vpop.permute.xlu0 %8963  ;;  %v8853_v13 = vsel %vm2118_vm13, %v24293_v46, 0.0 }
 0xf7a   : > { %22362 = vpow2.f32 %v8845_v23  ;;  %8854 = vadd.xlane.f32.xlu1 %v8853_v13  ;;  %21017 = vmatpush3.msra.mxu0 %v8964_v25 }
 0xf7b   : > { %21026 = vmatprep.subr.mxu0 %v27259_v15 }
 0xf7c   : > { %v24298_v27 = vpop.eup %22356 }
 0xf7d   : > { %v24300_v34 = vpop.eup %22358  ;;  %v8856_v17 = vsel %vm2118_vm13, %v24298_v27, 0.0  ;;  %v9192_v55 = vpop.permute.xlu0 %9191 }
 0xf7e   : > { %8857 = vadd.xlane.f32.xlu0 %v8856_v17  ;;  %v8859_v5 = vsel %vm2118_vm13, %v24300_v34, 0.0 }
 0xf7f   : > { %8860 = vadd.xlane.f32.xlu1 %v8859_v5 }
 0xf80   : > { %v24306_v10 = vpop.eup %22360 }
 0xf81   : > { %v8862_v53 = vsel %vm2118_vm13, %v24306_v10, 0.0  ;;  %v9344_v4 = vpop.permute.xlu0 %9343 }
 0xf82   : > { %8863 = vadd.xlane.f32.xlu0 %v8862_v53 }
 0xf84   : > { %v24310_v19 = vpop.eup %22362 }
 0xf85   : > { %v8868_v22 = vsel %vm2118_vm13, %v24310_v19, 0.0  ;;  %v24337_v52 = vpop.permute.xlu0 %9497 }
 0xf86   : > { %8869 = vadd.xlane.f32.xlu0 %v8868_v22 }
 0xf89   : > { %v24341_v1 = vpop.permute.xlu0 %9495 }
 0xf8d   : > { %v24347_v33 = vpop.permute.xlu0 %9653 }
 0xf9c   : > { %9651 = vrot.lane.b32.xlu0 %v22968_v41, %s27162_s23 }
 0xfa0   : > { %9809 = vrot.lane.b32.xlu0 %v22976_v45, %s27163_s22 }
 0xfa2   : > { %v8819_v20 = vpop.xlane.xlu1 %8818 }
 0xfa3   : > { %v8829_v31 = vsub.f32 %v24263_v30, %v8819_v20 }
 0xfa4   : > { %9807 = vrot.lane.b32.xlu0 %v22976_v45, %s27162_s23 }
 0xfa5   : > { %v8843_v54 = vmul.f32 1.442695, %v8829_v31 }
 0xfa6   : > { %v9040_v25 = vpop.permute.xlu1 %9039 }
 0xfa7   : > { %22364 = vpow2.f32 %v8843_v54 }
 0xfa8   : > { %9965 = vrot.lane.b32.xlu0 %v22984_v49, %s27163_s22 }
 0xfaa   : > { %v9116_v13 = vpop.permute.xlu1 %9115 }
 0xfac   : > { %9963 = vrot.lane.b32.xlu0 %v22984_v49, %s27162_s23 }
 0xfae   : > { %v9268_v53 = vpop.permute.xlu1 %9267 }
 0xfb0   : > { %10299 = vrot.lane.b32.xlu0 %v22966_v40, %s27161_s2 }
 0xfb1   : > { %v24327_v16 = vpop.eup %22364 }
 0xfb2   : > { %v8865_v30 = vsel %vm2118_vm13, %v24327_v16, 0.0  ;;  %v9420_v22 = vpop.permute.xlu1 %9419 }
 0xfb3   : > { %8866 = vadd.xlane.f32.xlu1 %v8865_v30 }
 0xfb4   : > { %10527 = vrot.lane.b32.xlu0 %v22976_v45, %s27161_s2 }
 0xfb6   : > { %v9576_v20 = vpop.permute.xlu1 %9575 }
 0xfba   : > { %v9574_v31 = vpop.permute.xlu1 %9573 }
 0xfbe   : > { %v9732_v54 = vpop.permute.xlu1 %9731 }
 0xfc4   : > { %9729 = vrot.lane.b32.xlu1 %v22974_v44, %s27162_s23 }
 0xfc8   : > { %9887 = vrot.lane.b32.xlu1 %v22982_v48, %s27163_s22 }
 0xfcc   : > { %9885 = vrot.lane.b32.xlu1 %v22982_v48, %s27162_s23 }
 0xfd0   : > { %10043 = vrot.lane.b32.xlu1 %v22990_v50, %s27163_s22  ;;  %s27167_s22 = smov 36  }
 0xfd4   : > { %10041 = vrot.lane.b32.xlu1 %v22990_v50, %s27162_s23  ;;  %s27164_s23 = smov 100  }
 0xfd8   : > { %10223 = vrot.lane.b32.xlu1 %v22962_v37, %s27161_s2 }
 0xfd9   : > { %v8852_v23 = vpop.xlane.xlu0 %8851 }
 0xfda   : > { %22366 = vrcp.f32 %v8852_v23 }
 0xfdc   : > { %10375 = vrot.lane.b32.xlu1 %v22968_v41, %s27161_s2 }
 0xfe0   : > { %10451 = vrot.lane.b32.xlu1 %v22974_v44, %s27161_s2 }
 0xfe4   : > { %v22367_v17 = vpop.eup %22366  ;;  %10603 = vrot.lane.b32.xlu1 %v22982_v48, %s27161_s2 }
 0xfe5   : > { %v8874_v5 = vmul.f32 %v22367_v17, %v24284_v43 }
 0xfe7   : > { %21019 = vmatmul.mubr.msk.f32.vlgmr.msra.gmra.mrb[100].mxu0 %vm2118_vm13, %v8874_v5 }
 0xfe8   : > { %21027 = vmatpush3.msra.mxu0 %v9116_v13  ;;  %21028 = vmatprep.mubr.msk.f32.mxu0 %vm27170_vm3, %v27259_v15 }
 0xfe9   : > { %21036 = vmatprep.subr.mxu0 %v27259_v15 }
0x1003   : > { %v8849_v30 = vpop.xlane.xlu1 %8848 }
0x1004   : > { %22368 = vrcp.f32 %v8849_v30 }
0x1007   : > { %v8855_v23 = vpop.xlane.xlu1 %8854 }
0x1008   : > { %22370 = vrcp.f32 %v8855_v23 }
0x100b   : > { %v8858_v47 = vpop.xlane.xlu0 %8857 }
0x100c   : > { %22372 = vrcp.f32 %v8858_v47  ;;  %v8861_v43 = vpop.xlane.xlu1 %8860 }
0x100d   : > { %22374 = vrcp.f32 %v8861_v43 }
0x100e   : > { %v22369_v17 = vpop.eup %22368 }
0x100f   : > { %v8864_v5 = vpop.xlane.xlu0 %8863  ;;  %v8872_v13 = vmul.f32 %v22369_v17, %v24289_v0 }
0x1010   : > { %22376 = vrcp.f32 %v8864_v5 }
0x1011   : > { %21014 = vmatmul.mubr.msk.f32.vlgmr.msra.gmra.mrb[92].mxu1 %vm2118_vm13, %v8872_v13 }
0x1012   : > { %v22371_v36 = vpop.eup %22370  ;;  %21022 = vmatpush3.msra.mxu1 %v9040_v25  ;;  %21023 = vmatprep.mubr.msk.f32.mxu1 %vm27170_vm3, %v27259_v15 }
0x1013   : > { %v8870_v62 = vpop.xlane.xlu0 %8869  ;;  %21031 = vmatprep.subr.mxu1 %v27259_v15  ;;  %v8876_v30 = vmul.f32 %v22371_v36, %v24293_v46 }
0x1014   : > { %22378 = vrcp.f32 %v8870_v62 }
0x1015   : > { %21024 = vmatmul.mubr.msk.f32.vlgmr.msra.gmra.mrb[94].mxu1 %vm2118_vm13, %v8876_v30 }
0x1016   : > { %v22373_v47 = vpop.eup %22372  ;;  %21032 = vmatpush3.msra.mxu1 %v9192_v55  ;;  %21033 = vmatprep.mubr.msk.f32.mxu1 %vm27170_vm3, %v27259_v15 }
0x1017   : > { %v22375_v0 = vpop.eup %22374  ;;  %21041 = vmatprep.subr.mxu1 %v27259_v15  ;;  %v8878_v25 = vmul.f32 %v22373_v47, %v24298_v27  ;;  %v9652_v27 = vpop.permute.xlu0 %9651 }
0x1018   : > { %v8880_v23 = vmul.f32 %v22375_v0, %v24300_v34 }
0x1019   : > { %21029 = vmatmul.mubr.msk.f32.vlgmr.msra.gmra.mrb[102].mxu0 %vm2118_vm13, %v8878_v25 }
0x101a   : > { %v22377_v43 = vpop.eup %22376  ;;  %21034 = vmatmul.mubr.msk.f32.vlgmr.msra.gmra.mrb[96].mxu1 %vm2118_vm13, %v8880_v23  ;;  %21037 = vmatpush3.msra.mxu0 %v9268_v53 }
0x101b   : > { %21042 = vmatpush3.msra.mxu1 %v9344_v4  ;;  %21038 = vmatprep.mubr.msk.f32.mxu0 %vm27170_vm3, %v27259_v15  ;;  %v8882_v36 = vmul.f32 %v22377_v43, %v24306_v10  ;;  %v9810_v34 = vpop.permute.xlu0 %9809 }
0x101c   : > { %21046 = vmatprep.subr.mxu0 %v27259_v15  ;;  %21043 = vmatprep.mubr.msk.f32.mxu1 %vm27170_vm3, %v27259_v15 }
0x101d   : > { %21039 = vmatmul.mubr.msk.f32.vlgmr.msra.gmra.mrb[104].mxu0 %vm2118_vm13, %v8882_v36  ;;  %21051 = vmatprep.subr.mxu1 %v27259_v15 }
0x101e   : > { %v22379_v62 = vpop.eup %22378  ;;  %21047 = vmatpush3.msra.mxu0 %v9420_v22  ;;  %21048 = vmatprep.mubr.msk.f32.mxu0 %vm27170_vm3, %v27259_v15 }
0x101f   : > { %v8886_v46 = vmul.f32 %v22379_v62, %v24310_v19  ;;  %21056 = vmatprep.subr.mxu0 %v27259_v15  ;;  %v9808_v19 = vpop.permute.xlu0 %9807 }
0x1021   : > { %21049 = vmatmul.mubr.msk.f32.vlgmr.msra.gmra.mrb[106].mxu0 %vm2118_vm13, %v8886_v46 }
0x1022   : > { %21058 = vmatprep.mubr.msk.f32.mxu0 %vm27170_vm3, %v27259_v15 }
0x1023   : > { %v9966_v53 = vpop.permute.xlu0 %9965 }
0x1025   : > { %21057 = vmatpush3.xpose.msk.msra.mxu0 %vm27176_vm1, %v9576_v20 }
0x1026   : > { %21066 = vmatprep.subr.mxu0 %v27259_v15 }
0x1028   : > { %21059 = vmatmul.mubr.msk.f32.vlgmr.msra.gmra.mrb[108].mxu0 %vm27176_vm1, %v9574_v31 }
0x1029   : > { %21067 = vmatpush3.xpose.msk.msra.mxu0 %vm27176_vm1, %v9732_v54  ;;  %21068 = vmatprep.mubr.msk.f32.mxu0 %vm27170_vm3, %v27259_v15  ;;  %v9964_v54 = vpop.permute.xlu0 %9963 }
0x102a   : > { %21076 = vmatprep.subr.mxu0 %v27259_v15 }
0x1040   : > { %v8867_v10 = vpop.xlane.xlu1 %8866 }
0x1041   : > { %22380 = vrcp.f32 %v8867_v10 }
0x1044   : > { %v9730_v55 = vpop.permute.xlu1 %9729 }
0x1045   : > { %21069 = vmatmul.mubr.msk.f32.vlgmr.msra.gmra.mrb[110].mxu0 %vm27176_vm1, %v9730_v55 }
0x1046   : > { %21078 = vmatprep.mubr.msk.f32.mxu0 %vm27170_vm3, %v27259_v15 }
0x1048   : > { %v9888_v4 = vpop.permute.xlu1 %9887 }
0x1049   : > { %21077 = vmatpush3.xpose.msk.msra.mxu0 %vm27176_vm1, %v9888_v4 }
0x104a   : > { %21086 = vmatprep.subr.mxu0 %v27259_v15 }
0x104b   : > { %v22381_v22 = vpop.eup %22380 }
0x104c   : > { %v9886_v20 = vpop.permute.xlu1 %9885  ;;  %v8884_v31 = vmul.f32 %v22381_v22, %v24327_v16 }
0x104d   : > { %21079 = vmatmul.mubr.msk.f32.vlgmr.msra.gmra.mrb[112].mxu0 %vm27176_vm1, %v9886_v20 }
0x104e   : > { %21044 = vmatmul.mubr.msk.f32.vlgmr.msra.gmra.mrb[98].mxu1 %vm2118_vm13, %v8884_v31  ;;  %21088 = vmatprep.mubr.msk.f32.mxu0 %vm27170_vm3, %v27259_v15 }
0x104f   : > { %21052 = vmatpush3.xpose.msk.msra.mxu1 %vm27176_vm1, %v24337_v52  ;;  %21053 = vmatprep.mubr.msk.f32.mxu1 %vm27170_vm3, %v27259_v15  ;;  %v10300_v52 = vpop.permute.xlu0 %10299 }
0x1050   : > { %v10044_v17 = vpop.permute.xlu1 %10043  ;;  %21061 = vmatprep.subr.mxu1 %v27259_v15 }
0x1051   : > { %21087 = vmatpush3.xpose.msk.msra.mxu0 %vm27176_vm1, %v10044_v17 }
0x1052   : > { %21054 = vmatmul.mubr.msk.f32.vlgmr.msra.gmra.mrb[100].mxu1 %vm27176_vm1, %v24341_v1  ;;  %21096 = vmatprep.subr.mxu0 %v27259_v15 }
0x1053   : > { %21062 = vmatpush3.xpose.msk.msra.mxu1 %vm27176_vm1, %v24347_v33  ;;  %21063 = vmatprep.mubr.msk.f32.mxu1 %vm27170_vm3, %v27259_v15 }
0x1054   : > { %v10042_v16 = vpop.permute.xlu1 %10041  ;;  %21071 = vmatprep.subr.mxu1 %v27259_v15 }
0x1055   : > { %21089 = vmatmul.mubr.msk.f32.vlgmr.msra.gmra.mrb[114].mxu0 %vm27176_vm1, %v10042_v16 }
0x1056   : > { %21097 = vmatpush3.msra.mxu0 %v10300_v52  ;;  %21064 = vmatmul.mubr.msk.f32.vlgmr.msra.gmra.mrb[102].mxu1 %vm27176_vm1, %v9652_v27 }
0x1057   : > { %21072 = vmatpush3.xpose.msk.msra.mxu1 %vm27176_vm1, %v9810_v34  ;;  %21073 = vmatprep.mubr.msk.f32.mxu1 %vm27170_vm3, %v27259_v15 }
0x1058   : > { %21081 = vmatprep.subr.mxu1 %v27259_v15  ;;  %21098 = vmatprep.mubr.msk.f32.mxu0 %vm27170_vm3, %v27259_v15  ;;  %v10224_v1 = vpop.permute.xlu1 %10223 }
0x1059   : > { %21106 = vmatprep.subr.mxu0 %v27259_v15 }
0x105a   : > { %21074 = vmatmul.mubr.msk.f32.vlgmr.msra.gmra.mrb[104].mxu1 %vm27176_vm1, %v9808_v19 }
0x105b   : > { %21082 = vmatpush3.xpose.msk.msra.mxu1 %vm27176_vm1, %v9966_v53  ;;  %21083 = vmatprep.mubr.msk.f32.mxu1 %vm27170_vm3, %v27259_v15 }
0x105c   : > { %21091 = vmatprep.subr.mxu1 %v27259_v15 }
0x105e   : > { %21084 = vmatmul.mubr.msk.f32.vlgmr.msra.gmra.mrb[106].mxu1 %vm27176_vm1, %v9964_v54 }
0x105f   : > { %21092 = vmatpush3.msra.mxu1 %v10224_v1  ;;  %21093 = vmatprep.mubr.msk.f32.mxu1 %vm27170_vm3, %v27259_v15 }
0x1060   : > { %21101 = vmatprep.subr.mxu1 %v27259_v15 }
0x10ba   : > { %v24440_v33 = vpop.f32.mrb[100].mxu0 }
0x10bb   : > { %v21020_v5 = vpop.f32.mrb[101].mxu0 }
0x10e4   : > { %v24442_v13 = vpop.f32.mrb[92].mxu1 }
0x10e5   : > { %v21015_v30 = vpop.f32.mrb[93].mxu1 }
0x10e8   : > { %v24444_v47 = vpop.f32.mrb[94].mxu1 }
0x10e9   : > { %27284 = vst [vmem:[#allocation73_spill] sm:$0xff] %v24444_v47  ;;  %v21025_v0 = vpop.f32.mrb[95].mxu1 }
0x10ec   : > { %v24446_v25 = vpop.f32.mrb[102].mxu0 }
0x10ed   : > { %v24448_v23 = vpop.f32.mrb[96].mxu1  ;;  %v21030_v43 = vpop.f32.mrb[103].mxu0 }
0x10ee   : > { %27285 = vst [vmem:[#allocation74_spill] sm:$0xff] %v24448_v23  ;;  %v21035_v36 = vpop.f32.mrb[97].mxu1 }
0x10f0   : > { %v24450_v62 = vpop.f32.mrb[104].mxu0 }
0x10f1   : > { %27286 = vst [vmem:[#allocation75_spill] sm:$0xff] %v24450_v62  ;;  %v21040_v46 = vpop.f32.mrb[105].mxu0 }
0x10f4   : > { %v24452_v27 = vpop.f32.mrb[106].mxu0 }
0x10f5   : > { %27287 = vst [vmem:[#allocation76_spill] sm:$0xff] %v24452_v27  ;;  %v21050_v34 = vpop.f32.mrb[107].mxu0 }
0x10fb   : > { %v9647_v10 = vpop.f32.mrb[108].mxu0 }
0x10fc   : > { %v10120_v19 = vmul.f32 0.5, %v9647_v10  ;;  %v21060_v55 = vpop.f32.mrb[109].mxu0 }
0x10fe   : > { %v10128_v4 = vadd.f32 %v10120_v19, %v23145_v56 }
0x1100   : > { %v10138_v53 = vsel %vm2118_vm13, %v10128_v4, -inf }
0x1101   : > { %10139 = vmax.xlane.f32.xlu1 %v10138_v53 }
0x1118   : > { %v9803_v22 = vpop.f32.mrb[110].mxu0 }
0x1119   : > { %v21070_v20 = vpop.f32.mrb[111].mxu0  ;;  %v10122_v43 = vmul.f32 0.5, %v9803_v22 }
0x111b   : > { %v10130_v53 = vadd.f32 %v10122_v43, %v23173_v26 }
0x1120   : > { %v9959_v31 = vpop.f32.mrb[112].mxu0 }
0x1121   : > { %v24456_v54 = vpop.f32.mrb[98].mxu1  ;;  %v21080_v17 = vpop.f32.mrb[113].mxu0 }
0x1122   : > { %27288 = vst [vmem:[#allocation77_spill] sm:$0xff] %v24456_v54  ;;  %v21045_v16 = vpop.f32.mrb[99].mxu1  ;;  %v10124_v17 = vmul.f32 0.5, %v9959_v31 }
0x1125   : > { %v9569_v52 = vpop.f32.mrb[100].mxu1 }
0x1126   : > { %v10119_v1 = vmul.f32 0.5, %v9569_v52  ;;  %v21055_v5 = vpop.f32.mrb[101].mxu1 }
0x1128   : > { %v10127_v30 = vadd.f32 %v10119_v1, %v23148_v57  ;;  %v10115_v0 = vpop.f32.mrb[114].mxu0 }
0x1129   : > { %v9725_v36 = vpop.f32.mrb[102].mxu1  ;;  %v21090_v46 = vpop.f32.mrb[115].mxu0 }
0x112a   : > { %v10121_v34 = vmul.f32 0.5, %v9725_v36  ;;  %v21065_v10 = vpop.f32.mrb[103].mxu1  ;;  %v10135_v19 = vsel %vm2118_vm13, %v10127_v30, -inf  ;;  %v10144_v36 = vsel %vm2118_vm13, %v10130_v53, -inf  ;;  %v10132_v46 = vadd.f32 %v10124_v17, %v23185_v61 }
0x112b   : > { %10136 = vmax.xlane.f32.xlu0 %v10135_v19  ;;  %v10126_v10 = vmul.f32 0.5, %v10115_v0  ;;  %v24482_v0 = vpop.permute.xlu1 %10375 }
0x112c   : > { %v10129_v55 = vadd.f32 %v10121_v34, %v23157_v2 }
0x112d   : > { %v9881_v20 = vpop.f32.mrb[104].mxu1  ;;  %v24471_v43 = vadd.f32 %v10126_v10, %v23191_v7 }
0x112e   : > { %v10123_v16 = vmul.f32 0.5, %v9881_v20  ;;  %v21075_v52 = vpop.f32.mrb[105].mxu1  ;;  %v10141_v5 = vsel %vm2118_vm13, %v10129_v55, -inf }
0x112f   : > { %10142 = vmax.xlane.f32.xlu0 %v10141_v5  ;;  %v24484_v17 = vpop.permute.xlu1 %10451 }
0x1130   : > { %v10131_v22 = vadd.f32 %v10123_v16, %v23164_v8  ;;  %v10150_v16 = vsel %vm2118_vm13, %v10132_v46, -inf }
0x1131   : > { %v10037_v1 = vpop.f32.mrb[106].mxu1 }
0x1132   : > { %v10125_v19 = vmul.f32 0.5, %v10037_v1  ;;  %v21085_v27 = vpop.f32.mrb[107].mxu1  ;;  %v10147_v34 = vsel %vm2118_vm13, %v10131_v22, -inf }
0x1133   : > { %10148 = vmax.xlane.f32.xlu1 %v10147_v34  ;;  %10145 = vmax.xlane.f32.xlu0 %v10144_v36  ;;  %v10156_v27 = vsel %vm2118_vm13, %v24471_v43, -inf  ;;  %v24486_v52 = vpop.permute.xlu1 %10603  ;;  %v24492_v34 = vpop.permute.xlu0 %10527 }
0x1134   : > { %v24468_v31 = vadd.f32 %v10125_v19, %v23178_v42 }
0x1136   : > { %v10153_v20 = vsel %vm2118_vm13, %v24468_v31, -inf }
0x1137   : > { %10154 = vmax.xlane.f32.xlu1 %v10153_v20  ;;  %10151 = vmax.xlane.f32.xlu0 %v10150_v16 }
0x113b   : > { %10157 = vmax.xlane.f32.xlu0 %v10156_v27 }
0x1148   : > { %10755 = vrot.lane.b32.xlu1 %v22990_v50, %s27161_s2 }
0x1151   : > { %10679 = vrot.lane.b32.xlu0 %v22984_v49, %s27161_s2  ;;  %s27165_s2 = smov 68  }
0x118e   : > { %v10140_v5 = vpop.xlane.xlu1 %10139 }
0x118f   : > { %v10160_v1 = vsub.f32 %v10128_v4, %v10140_v5 }
0x1191   : > { %v10169_v36 = vmul.f32 1.442695, %v10160_v1 }
0x1193   : > { %22382 = vpow2.f32 %v10169_v36 }
0x119d   : > { %v24488_v10 = vpop.eup %22382 }
0x119e   : > { %v10186_v19 = vsel %vm2118_vm13, %v24488_v10, 0.0 }
0x119f   : > { %10187 = vadd.xlane.f32.xlu0 %v10186_v19 }
0x11b8   : > { %v10137_v20 = vpop.xlane.xlu0 %10136 }
0x11b9   : > { %v10159_v16 = vsub.f32 %v10127_v30, %v10137_v20 }
0x11bb   : > { %v10167_v27 = vmul.f32 1.442695, %v10159_v16 }
0x11bc   : > { %v10143_v54 = vpop.xlane.xlu0 %10142 }
0x11bd   : > { %22384 = vpow2.f32 %v10167_v27  ;;  %v10161_v23 = vsub.f32 %v10129_v55, %v10143_v54 }
0x11bf   : > { %v10171_v62 = vmul.f32 1.442695, %v10161_v23 }
0x11c0   : > { %v10146_v32 = vpop.xlane.xlu0 %10145  ;;  %v10149_v63 = vpop.xlane.xlu1 %10148 }
0x11c1   : > { %22386 = vpow2.f32 %v10171_v62  ;;  %v10162_v4 = vsub.f32 %v10130_v53, %v10146_v32  ;;  %v10163_v5 = vsub.f32 %v10131_v22, %v10149_v63 }
0x11c3   : > { %v10173_v1 = vmul.f32 1.442695, %v10162_v4  ;;  %v10175_v36 = vmul.f32 1.442695, %v10163_v5 }
0x11c4   : > { %v10152_v3 = vpop.xlane.xlu0 %10151  ;;  %v10155_v55 = vpop.xlane.xlu1 %10154 }
0x11c5   : > { %22388 = vpow2.f32 %v10173_v1  ;;  %v10164_v47 = vsub.f32 %v10132_v46, %v10152_v3  ;;  %v10165_v53 = vsub.f32 %v24468_v31, %v10155_v55 }
0x11c6   : > { %22390 = vpow2.f32 %v10175_v36 }
0x11c7   : > { %v24494_v19 = vpop.eup %22384  ;;  %v10177_v24 = vmul.f32 1.442695, %v10164_v47  ;;  %v10179_v20 = vmul.f32 1.442695, %v10165_v53 }
0x11c8   : > { %v10183_v30 = vsel %vm2118_vm13, %v24494_v19, 0.0  ;;  %v10158_v22 = vpop.xlane.xlu0 %10157 }
0x11c9   : > { %22392 = vpow2.f32 %v10177_v24  ;;  %10184 = vadd.xlane.f32.xlu1 %v10183_v30  ;;  %v10166_v46 = vsub.f32 %v24471_v43, %v10158_v22 }
0x11ca   : > { %22394 = vpow2.f32 %v10179_v20 }
0x11cb   : > { %v24498_v23 = vpop.eup %22386  ;;  %v10181_v16 = vmul.f32 1.442695, %v10166_v46 }
0x11cc   : > { %v10189_v32 = vsel %vm2118_vm13, %v24498_v23, 0.0  ;;  %v10680_v31 = vpop.permute.xlu0 %10679 }
0x11cd   : > { %10190 = vadd.xlane.f32.xlu1 %v10189_v32  ;;  %22396 = vpow2.f32 %v10181_v16  ;;  %v10756_v32 = vpop.permute.xlu1 %10755 }
0x11cf   : > { %v24502_v63 = vpop.eup %22388 }
0x11d0   : > { %v24504_v62 = vpop.eup %22390  ;;  %v10192_v3 = vsel %vm2118_vm13, %v24502_v63, 0.0 }
0x11d1   : > { %10193 = vadd.xlane.f32.xlu0 %v10192_v3  ;;  %v10195_v47 = vsel %vm2118_vm13, %v24504_v62, 0.0 }
0x11d2   : > { %10196 = vadd.xlane.f32.xlu1 %v10195_v47 }
0x11d3   : > { %v24510_v24 = vpop.eup %22392 }
0x11d4   : > { %v10198_v54 = vsel %vm2118_vm13, %v24510_v24, 0.0  ;;  %v24520_v27 = vpop.eup %22394 }
0x11d5   : > { %10199 = vadd.xlane.f32.xlu0 %v10198_v54  ;;  %v10201_v5 = vsel %vm2118_vm13, %v24520_v27, 0.0 }
0x11d7   : > { %v24522_v4 = vpop.eup %22396 }
0x11d8   : > { %v10204_v1 = vsel %vm2118_vm13, %v24522_v4, 0.0 }
0x11e3   : > { %10911 = vrot.lane.b32.xlu1 %v22966_v40, %s27165_s2 }
0x11eb   : > { %10833 = vrot.lane.b32.xlu0 %v22962_v37, %s27165_s2 }
0x1207   : > { %10202 = vadd.xlane.f32.xlu1 %v10201_v5 }
0x120a   : > { %10205 = vadd.xlane.f32.xlu0 %v10204_v1 }
0x1218   : > { %10909 = vrot.lane.b32.xlu1 %v22966_v40, %s27164_s23 }
0x121c   : > { %11067 = vrot.lane.b32.xlu1 %v22974_v44, %s27165_s2 }
0x1220   : > { %11065 = vrot.lane.b32.xlu1 %v22974_v44, %s27164_s23  ;;  %10831 = vrot.lane.b32.xlu0 %v22962_v37, %s27164_s23 }
0x1224   : > { %11223 = vrot.lane.b32.xlu1 %v22982_v48, %s27165_s2  ;;  %10989 = vrot.lane.b32.xlu0 %v22968_v41, %s27165_s2 }
0x1228   : > { %11221 = vrot.lane.b32.xlu1 %v22982_v48, %s27164_s23  ;;  %10987 = vrot.lane.b32.xlu0 %v22968_v41, %s27164_s23 }
0x122c   : > { %v10188_v43 = vpop.xlane.xlu0 %10187  ;;  %11379 = vrot.lane.b32.xlu1 %v22990_v50, %s27165_s2  ;;  %11145 = vrot.lane.b32.xlu0 %v22976_v45, %s27165_s2 }
0x122d   : > { %22398 = vrcp.f32 %v10188_v43 }
0x1230   : > { %11377 = vrot.lane.b32.xlu1 %v22990_v50, %s27164_s23  ;;  %11143 = vrot.lane.b32.xlu0 %v22976_v45, %s27164_s23 }
0x1234   : > { %11559 = vrot.lane.b32.xlu1 %v22962_v37, %s27167_s22  ;;  %11301 = vrot.lane.b32.xlu0 %v22984_v49, %s27165_s2  ;;  %s27182_s2 = smov 8  }
0x1237   : > { %v22399_v36 = vpop.eup %22398 }
0x1238   : > { %11299 = vrot.lane.b32.xlu0 %v22984_v49, %s27164_s23  ;;  %v10210_v30 = vmul.f32 %v22399_v36, %v24488_v10  ;;  %s27183_s23 = smov 4  }
0x123a   : > { %21099 = vmatmul.mubr.msk.f32.vlgmr.msra.gmra.mrb[116].mxu0 %vm2118_vm13, %v10210_v30 }
0x123b   : > { %21107 = vmatpush3.msra.mxu0 %v24484_v17  ;;  %21108 = vmatprep.mubr.msk.f32.mxu0 %vm27170_vm3, %v27259_v15 }
0x123c   : > { %21116 = vmatprep.subr.mxu0 %v27259_v15 }
0x1256   : > { %v10185_v37 = vpop.xlane.xlu1 %10184 }
0x1257   : > { %22400 = vrcp.f32 %v10185_v37 }
0x125a   : > { %v10191_v3 = vpop.xlane.xlu1 %10190 }
0x125b   : > { %22402 = vrcp.f32 %v10191_v3 }
0x125e   : > { %v10194_v47 = vpop.xlane.xlu0 %10193 }
0x125f   : > { %22404 = vrcp.f32 %v10194_v47  ;;  %v10197_v54 = vpop.xlane.xlu1 %10196 }
0x1260   : > { %22406 = vrcp.f32 %v10197_v54 }
0x1261   : > { %v22401_v55 = vpop.eup %22400 }
0x1262   : > { %v10200_v10 = vpop.xlane.xlu0 %10199  ;;  %v10208_v53 = vmul.f32 %v22401_v55, %v24494_v19 }
0x1263   : > { %22408 = vrcp.f32 %v10200_v10 }
0x1264   : > { %21094 = vmatmul.mubr.msk.f32.vlgmr.msra.gmra.mrb[108].mxu1 %vm2118_vm13, %v10208_v53 }
0x1265   : > { %v22403_v17 = vpop.eup %22402  ;;  %21102 = vmatpush3.msra.mxu1 %v24482_v0  ;;  %21103 = vmatprep.mubr.msk.f32.mxu1 %vm27170_vm3, %v27259_v15 }
0x1266   : > { %21111 = vmatprep.subr.mxu1 %v27259_v15  ;;  %v10212_v22 = vmul.f32 %v22403_v17, %v24498_v23  ;;  %v10834_v23 = vpop.permute.xlu0 %10833 }
0x1268   : > { %21104 = vmatmul.mubr.msk.f32.vlgmr.msra.gmra.mrb[110].mxu1 %vm2118_vm13, %v10212_v22 }
0x1269   : > { %v22405_v46 = vpop.eup %22404  ;;  %21112 = vmatpush3.msra.mxu1 %v24492_v34  ;;  %21113 = vmatprep.mubr.msk.f32.mxu1 %vm27170_vm3, %v27259_v15 }
0x126a   : > { %v22407_v19 = vpop.eup %22406  ;;  %21121 = vmatprep.subr.mxu1 %v27259_v15  ;;  %v10214_v0 = vmul.f32 %v22405_v46, %v24502_v63 }
0x126b   : > { %v10216_v20 = vmul.f32 %v22407_v19, %v24504_v62 }
0x126c   : > { %21109 = vmatmul.mubr.msk.f32.vlgmr.msra.gmra.mrb[118].mxu0 %vm2118_vm13, %v10214_v0 }
0x126d   : > { %v22409_v16 = vpop.eup %22408  ;;  %21114 = vmatmul.mubr.msk.f32.vlgmr.msra.gmra.mrb[112].mxu1 %vm2118_vm13, %v10216_v20  ;;  %21117 = vmatpush3.msra.mxu0 %v24486_v52  ;;  %v10912_v52 = vpop.permute.xlu1 %10911 }
0x126e   : > { %21122 = vmatpush3.msra.mxu1 %v10680_v31  ;;  %21118 = vmatprep.mubr.msk.f32.mxu0 %vm27170_vm3, %v27259_v15  ;;  %v10218_v34 = vmul.f32 %v22409_v16, %v24510_v24 }
0x126f   : > { %21126 = vmatprep.subr.mxu0 %v27259_v15  ;;  %21123 = vmatprep.mubr.msk.f32.mxu1 %vm27170_vm3, %v27259_v15 }
0x1270   : > { %21119 = vmatmul.mubr.msk.f32.vlgmr.msra.gmra.mrb[120].mxu0 %vm2118_vm13, %v10218_v34  ;;  %21131 = vmatprep.subr.mxu1 %v27259_v15 }
0x1271   : > { %21127 = vmatpush3.msra.mxu0 %v10756_v32  ;;  %21128 = vmatprep.mubr.msk.f32.mxu0 %vm27170_vm3, %v27259_v15 }
0x1272   : > { %21136 = vmatprep.subr.mxu0 %v27259_v15 }
0x1294   : > { %v10203_v63 = vpop.xlane.xlu1 %10202 }
0x1295   : > { %22410 = vrcp.f32 %v10203_v63 }
0x1297   : > { %v10206_v62 = vpop.xlane.xlu0 %10205 }
0x1298   : > { %22412 = vrcp.f32 %v10206_v62  ;;  %v10910_v24 = vpop.permute.xlu1 %10909 }
0x129b   : > { %v10832_v5 = vpop.permute.xlu0 %10831 }
0x129c   : > { %v11068_v1 = vpop.permute.xlu1 %11067 }
0x129f   : > { %v22411_v31 = vpop.eup %22410  ;;  %v10990_v43 = vpop.permute.xlu0 %10989 }
0x12a0   : > { %v11066_v36 = vpop.permute.xlu1 %11065  ;;  %v10220_v30 = vmul.f32 %v22411_v31, %v24520_v27 }
0x12a2   : > { %v22413_v32 = vpop.eup %22412  ;;  %21124 = vmatmul.mubr.msk.f32.vlgmr.msra.gmra.mrb[114].mxu1 %vm2118_vm13, %v10220_v30 }
0x12a3   : > { %21132 = vmatpush3.xpose.msk.msra.mxu1 %vm27176_vm1, %v10834_v23  ;;  %v10988_v37 = vpop.permute.xlu0 %10987  ;;  %21133 = vmatprep.mubr.msk.f32.mxu1 %vm27170_vm3, %v27259_v15  ;;  %v10222_v3 = vmul.f32 %v22413_v32, %v24522_v4 }
0x12a4   : > { %v11224_v47 = vpop.permute.xlu1 %11223  ;;  %21141 = vmatprep.subr.mxu1 %v27259_v15 }
0x12a5   : > { %21129 = vmatmul.mubr.msk.f32.vlgmr.msra.gmra.mrb[122].mxu0 %vm2118_vm13, %v10222_v3 }
0x12a6   : > { %21134 = vmatmul.mubr.msk.f32.vlgmr.msra.gmra.mrb[116].mxu1 %vm27176_vm1, %v10832_v5  ;;  %21137 = vmatpush3.xpose.msk.msra.mxu0 %vm27176_vm1, %v10912_v52 }
0x12a7   : > { %21142 = vmatpush3.xpose.msk.msra.mxu1 %vm27176_vm1, %v10990_v43  ;;  %v11146_v27 = vpop.permute.xlu0 %11145  ;;  %21138 = vmatprep.mubr.msk.f32.mxu0 %vm27170_vm3, %v27259_v15 }
0x12a8   : > { %v11222_v54 = vpop.permute.xlu1 %11221  ;;  %21143 = vmatprep.mubr.msk.f32.mxu1 %vm27170_vm3, %v27259_v15  ;;  %21146 = vmatprep.subr.mxu0 %v27259_v15 }
0x12a9   : > { %21151 = vmatprep.subr.mxu1 %v27259_v15  ;;  %21139 = vmatmul.mubr.msk.f32.vlgmr.msra.gmra.mrb[124].mxu0 %vm27176_vm1, %v10910_v24 }
0x12aa   : > { %21144 = vmatmul.mubr.msk.f32.vlgmr.msra.gmra.mrb[118].mxu1 %vm27176_vm1, %v10988_v37  ;;  %21147 = vmatpush3.xpose.msk.msra.mxu0 %vm27176_vm1, %v11068_v1 }
0x12ab   : > { %21152 = vmatpush3.xpose.msk.msra.mxu1 %vm27176_vm1, %v11146_v27  ;;  %v11144_v4 = vpop.permute.xlu0 %11143  ;;  %21148 = vmatprep.mubr.msk.f32.mxu0 %vm27170_vm3, %v27259_v15 }
0x12ac   : > { %v11380_v55 = vpop.permute.xlu1 %11379  ;;  %21153 = vmatprep.mubr.msk.f32.mxu1 %vm27170_vm3, %v27259_v15  ;;  %21156 = vmatprep.subr.mxu0 %v27259_v15 }
0x12ad   : > { %21149 = vmatmul.mubr.msk.f32.vlgmr.msra.gmra.mrb[126].mxu0 %vm27176_vm1, %v11066_v36  ;;  %21161 = vmatprep.subr.mxu1 %v27259_v15 }
0x12ae   : > { %21154 = vmatmul.mubr.msk.f32.vlgmr.msra.gmra.mrb[120].mxu1 %vm27176_vm1, %v11144_v4  ;;  %21157 = vmatpush3.xpose.msk.msra.mxu0 %vm27176_vm1, %v11224_v47 }
0x12af   : > { %v11302_v10 = vpop.permute.xlu0 %11301  ;;  %21158 = vmatprep.mubr.msk.f32.mxu0 %vm27170_vm3, %v27259_v15  ;;  %21166 = vmatprep.subr.mxu0 %v27259_v15 }
0x12b0   : > { %v11378_v53 = vpop.permute.xlu1 %11377  ;;  %21162 = vmatpush3.xpose.msk.msra.mxu1 %vm27176_vm1, %v11302_v10  ;;  %21163 = vmatprep.mubr.msk.f32.mxu1 %vm27170_vm3, %v27259_v15 }
0x12b1   : > { %21159 = vmatmul.mubr.msk.f32.vlgmr.msra.gmra.mrb[128].mxu0 %vm27176_vm1, %v11222_v54  ;;  %21171 = vmatprep.subr.mxu1 %v27259_v15 }
0x12b2   : > { %21167 = vmatpush3.xpose.msk.msra.mxu0 %vm27176_vm1, %v11380_v55  ;;  %21168 = vmatprep.mubr.msk.f32.mxu0 %vm27170_vm3, %v27259_v15 }
0x12b3   : > { %v11300_v17 = vpop.permute.xlu0 %11299  ;;  %21176 = vmatprep.subr.mxu0 %v27259_v15 }
0x12b4   : > { %v11560_v22 = vpop.permute.xlu1 %11559  ;;  %21164 = vmatmul.mubr.msk.f32.vlgmr.msra.gmra.mrb[122].mxu1 %vm27176_vm1, %v11300_v17 }
0x12b5   : > { %21172 = vmatpush3.msra.mxu1 %v11560_v22  ;;  %21169 = vmatmul.mubr.msk.f32.vlgmr.msra.gmra.mrb[130].mxu0 %vm27176_vm1, %v11378_v53 }
0x12b6   : > { %21173 = vmatprep.mubr.msk.f32.mxu1 %vm27170_vm3, %v27259_v15  ;;  %21181 = vmatprep.subr.mxu1 %v27259_v15 }
0x12b7   : > { %21178 = vmatprep.mubr.msk.f32.mxu0 %vm27170_vm3, %v27259_v15 }
0x130d   : > { %v24641_v46 = vpop.f32.mrb[116].mxu0 }
0x130e   : > { %v21100_v19 = vpop.f32.mrb[117].mxu0 }
0x1337   : > { %v24643_v0 = vpop.f32.mrb[108].mxu1 }
0x1338   : > { %v21095_v20 = vpop.f32.mrb[109].mxu1 }
0x133b   : > { %v24645_v16 = vpop.f32.mrb[110].mxu1 }
0x133c   : > { %v21105_v34 = vpop.f32.mrb[111].mxu1 }
0x133f   : > { %v24647_v52 = vpop.f32.mrb[118].mxu0 }
0x1340   : > { %v24649_v23 = vpop.f32.mrb[112].mxu1  ;;  %v21110_v63 = vpop.f32.mrb[119].mxu0 }
0x1341   : > { %v21115_v62 = vpop.f32.mrb[113].mxu1 }
0x1343   : > { %v24651_v24 = vpop.f32.mrb[120].mxu0 }
0x1344   : > { %v21120_v5 = vpop.f32.mrb[121].mxu0 }
0x1375   : > { %v24653_v1 = vpop.f32.mrb[114].mxu1 }
0x1376   : > { %v21125_v31 = vpop.f32.mrb[115].mxu1 }
0x1378   : > { %v24655_v43 = vpop.f32.mrb[122].mxu0 }
0x1379   : > { %v10905_v36 = vpop.f32.mrb[116].mxu1  ;;  %v21130_v30 = vpop.f32.mrb[123].mxu0 }
0x137a   : > { %v11455_v32 = vmul.f32 0.5, %v10905_v36  ;;  %v21135_v37 = vpop.f32.mrb[117].mxu1 }
0x137c   : > { %v11463_v3 = vadd.f32 %v11455_v32, %v23148_v57  ;;  %v10983_v47 = vpop.f32.mrb[124].mxu0 }
0x137d   : > { %v11456_v27 = vmul.f32 0.5, %v10983_v47  ;;  %v11061_v54 = vpop.f32.mrb[118].mxu1  ;;  %v21140_v4 = vpop.f32.mrb[125].mxu0 }
0x137e   : > { %v11457_v55 = vmul.f32 0.5, %v11061_v54  ;;  %v21145_v10 = vpop.f32.mrb[119].mxu1  ;;  %v11471_v53 = vsel %vm2118_vm13, %v11463_v3, -inf }
0x137f   : > { %v11464_v17 = vadd.f32 %v11456_v27, %v23145_v56  ;;  %11472 = vmax.xlane.f32.xlu0 %v11471_v53 }
0x1380   : > { %v11465_v22 = vadd.f32 %v11457_v55, %v23157_v2  ;;  %v11139_v19 = vpop.f32.mrb[126].mxu0 }
0x1381   : > { %v11458_v20 = vmul.f32 0.5, %v11139_v19  ;;  %v11217_v34 = vpop.f32.mrb[120].mxu1  ;;  %v21150_v63 = vpop.f32.mrb[127].mxu0  ;;  %v11474_v62 = vsel %vm2118_vm13, %v11464_v17, -inf }
0x1382   : > { %v11459_v57 = vmul.f32 0.5, %v11217_v34  ;;  %v21155_v5 = vpop.f32.mrb[121].mxu1  ;;  %v11477_v31 = vsel %vm2118_vm13, %v11465_v22, -inf  ;;  %11475 = vmax.xlane.f32.xlu1 %v11474_v62 }
0x1383   : > { %v11466_v36 = vadd.f32 %v11458_v20, %v23173_v26  ;;  %11478 = vmax.xlane.f32.xlu0 %v11477_v31 }
0x1384   : > { %v24665_v30 = vadd.f32 %v11459_v57, %v23164_v8  ;;  %v11295_v56 = vpop.f32.mrb[128].mxu0 }
0x1385   : > { %v11460_v32 = vmul.f32 0.5, %v11295_v56  ;;  %v21160_v2 = vpop.f32.mrb[129].mxu0  ;;  %v11480_v37 = vsel %vm2118_vm13, %v11466_v36, -inf }
0x1386   : > { %v11483_v47 = vsel %vm2118_vm13, %v24665_v30, -inf }
0x1387   : > { %v11468_v27 = vadd.f32 %v11460_v32, %v23185_v61  ;;  %11484 = vmax.xlane.f32.xlu1 %v11483_v47  ;;  %11481 = vmax.xlane.f32.xlu0 %v11480_v37  ;;  %v11373_v54 = vpop.f32.mrb[122].mxu1 }
0x1388   : > { %v11461_v4 = vmul.f32 0.5, %v11373_v54  ;;  %v21165_v55 = vpop.f32.mrb[123].mxu1  ;;  %v11451_v26 = vpop.f32.mrb[130].mxu0 }
0x1389   : > { %v11462_v10 = vmul.f32 0.5, %v11451_v26  ;;  %v21170_v53 = vpop.f32.mrb[131].mxu0  ;;  %v11486_v8 = vsel %vm2118_vm13, %v11468_v27, -inf }
0x138a   : > { %v11469_v19 = vadd.f32 %v11461_v4, %v23178_v42 }
0x138b   : > { %v11470_v20 = vadd.f32 %v11462_v10, %v23191_v7  ;;  %11487 = vmax.xlane.f32.xlu0 %v11486_v8 }
0x138c   : > { %v11489_v34 = vsel %vm2118_vm13, %v11469_v19, -inf }
0x138d   : > { %11490 = vmax.xlane.f32.xlu1 %v11489_v34  ;;  %v11492_v61 = vsel %vm2118_vm13, %v11470_v20, -inf }
0x138f   : > { %11493 = vmax.xlane.f32.xlu0 %v11492_v61 }
0x139e   : > { %11711 = vrot.lane.b32.xlu1 %v22968_v41, %s27167_s22 }
0x13a2   : > { %11787 = vrot.lane.b32.xlu1 %v22974_v44, %s27167_s22 }
0x13a5   : > { %11635 = vrot.lane.b32.xlu0 %v22966_v40, %s27167_s22 }
0x140c   : > { %v11473_v63 = vpop.xlane.xlu0 %11472 }
0x140d   : > { %v11495_v42 = vsub.f32 %v11463_v3, %v11473_v63 }
0x140f   : > { %v11503_v62 = vmul.f32 1.442695, %v11495_v42  ;;  %v11476_v7 = vpop.xlane.xlu1 %11475 }
0x1410   : > { %v11479_v57 = vpop.xlane.xlu0 %11478  ;;  %v11496_v5 = vsub.f32 %v11464_v17, %v11476_v7 }
0x1411   : > { %22414 = vpow2.f32 %v11503_v62  ;;  %v11497_v31 = vsub.f32 %v11465_v22, %v11479_v57 }
0x1412   : > { %v11505_v56 = vmul.f32 1.442695, %v11496_v5 }
0x1413   : > { %v11507_v32 = vmul.f32 1.442695, %v11497_v31 }
0x1414   : > { %22416 = vpow2.f32 %v11505_v56  ;;  %v11482_v2 = vpop.xlane.xlu0 %11481  ;;  %v11485_v10 = vpop.xlane.xlu1 %11484 }
0x1415   : > { %22418 = vpow2.f32 %v11507_v32  ;;  %v11498_v41 = vsub.f32 %v11466_v36, %v11482_v2  ;;  %v11499_v53 = vsub.f32 %v24665_v30, %v11485_v10  ;;  %v27302_v2 = vld [vmem:[#allocation67_spill] sm:$0xff] }
0x1417   : > { %v11509_v37 = vmul.f32 1.442695, %v11498_v41  ;;  %v11511_v61 = vmul.f32 1.442695, %v11499_v53 }
0x1418   : > { %v11488_v47 = vpop.xlane.xlu0 %11487 }
0x1419   : > { %22420 = vpow2.f32 %v11509_v37  ;;  %v11500_v34 = vsub.f32 %v11468_v27, %v11488_v47  ;;  %v27304_v37 = vld [vmem:[#allocation64_spill] sm:$0xff] }
0x141a   : > { %v11491_v8 = vpop.xlane.xlu1 %11490  ;;  %22422 = vpow2.f32 %v11511_v61  ;;  %v27305_v47 = vld [vmem:[#allocation68_spill] sm:$0xff] }
0x141b   : > { %v24682_v44 = vpop.eup %22414  ;;  %v11501_v63 = vsub.f32 %v11469_v19, %v11491_v8  ;;  %v11513_v42 = vmul.f32 1.442695, %v11500_v34  ;;  %v12452_v61 = vld [vmem:[%s22716_s25] sm:$0xff] }
0x141c   : > { %v11494_v40 = vpop.xlane.xlu0 %11493  ;;  %v11519_v3 = vsel %vm2118_vm13, %v24682_v44, 0.0 }
0x141d   : > { %11520 = vadd.xlane.f32.xlu1 %v11519_v3  ;;  %v11515_v62 = vmul.f32 1.442695, %v11501_v63  ;;  %v11502_v7 = vsub.f32 %v11470_v20, %v11494_v40  ;;  %22424 = vpow2.f32 %v11513_v42  ;;  %v12453_v63 = vld [vmem:[%s22716_s25 + $0x8] sm:$0xff] }
0x141e   : > { %v24686_v54 = vpop.eup %22416  ;;  %v21394_v42 = vpack.c.bf16 %v12453_v63, %v12452_v61 }
0x141f   : > { %v24688_v17 = vpop.eup %22418  ;;  %v11522_v22 = vsel %vm2118_vm13, %v24686_v54, 0.0  ;;  %22426 = vpow2.f32 %v11515_v62  ;;  %v11517_v57 = vmul.f32 1.442695, %v11502_v7  ;;  %v12454_v62 = vld [vmem:[%s22716_s25 + $0x10] sm:$0xff]  ;;  %v12455_v7 = vld [vmem:[%s22716_s25 + $0x18] sm:$0xff] }
0x1420   : > { %v11636_v4 = vpop.permute.xlu0 %11635  ;;  %v11525_v36 = vsel %vm2118_vm13, %v24688_v17, 0.0  ;;  %11523 = vadd.xlane.f32.xlu0 %v11522_v22 }
0x1421   : > { %11526 = vadd.xlane.f32.xlu1 %v11525_v36  ;;  %21177 = vmatpush3.msra.mxu0 %v11636_v4  ;;  %22428 = vpow2.f32 %v11517_v57  ;;  %v21398_v57 = vpack.c.bf16 %v12455_v7, %v12454_v62  ;;  %v27310_v62 = vld [vmem:[#allocation49_spill] sm:$0xff] }
0x1422   : > { %21186 = vmatprep.subr.mxu0 %v27259_v15 }
0x1423   : > { %v24695_v55 = vpop.eup %22420 }
0x1424   : > { %v11528_v26 = vsel %vm2118_vm13, %v24695_v55, 0.0  ;;  %v24704_v5 = vpop.eup %22422 }
0x1425   : > { %11529 = vadd.xlane.f32.xlu0 %v11528_v26 }
0x1432   : > { %11939 = vrot.lane.b32.xlu1 %v22982_v48, %s27167_s22  ;;  %v24706_v48 = vpop.eup %22424 }
0x1433   : > { %v24710_v30 = vpop.eup %22426  ;;  %v11534_v27 = vsel %vm2118_vm13, %v24706_v48, 0.0 }
0x1434   : > { %v11537_v19 = vsel %vm2118_vm13, %v24710_v30, 0.0  ;;  %v24716_v20 = vpop.eup %22428 }
0x1435   : > { %v11540_v31 = vsel %vm2118_vm13, %v24716_v20, 0.0 }
0x143b   : > { %11863 = vrot.lane.b32.xlu0 %v22976_v45, %s27167_s22  ;;  %v11531_v45 = vsel %vm2118_vm13, %v24704_v5, 0.0 }
0x1456   : > { %11532 = vadd.xlane.f32.xlu1 %v11531_v45 }
0x145a   : > { %11535 = vadd.xlane.f32.xlu0 %v11534_v27  ;;  %11538 = vadd.xlane.f32.xlu1 %v11537_v19 }
0x145e   : > { %11541 = vadd.xlane.f32.xlu0 %v11540_v31 }
0x146b   : > { %12091 = vrot.lane.b32.xlu1 %v22990_v50, %s27167_s22  ;;  %v11712_v50 = vpop.permute.xlu1 %11711 }
0x146f   : > { %12177 = vrot.lane.b32.xlu1 %v23592_v59, %s27183_s23  ;;  %v27291_v59 = vld [vmem:[#allocation62_spill] sm:$0xff] }
0x1473   : > { %12209 = vrot.lane.b32.xlu1 %v23799_v35, %s27182_s2  ;;  %v27293_v35 = vld [vmem:[#allocation57_spill] sm:$0xff] }
0x1474   : > { %12015 = vrot.lane.b32.xlu0 %v22984_v49, %s27167_s22  ;;  %s27179_s22 = smov 24   ;;  %v27289_v49 = vld [vmem:[#allocation58_spill] sm:$0xff] }
0x1477   : > { %12241 = vrot.lane.b32.xlu1 %v24008_v21, %s27168_s16 }
0x1478   : > { %12175 = vrot.lane.b32.xlu0 %v23590_v39, %s27183_s23  ;;  %v27290_v39 = vld [vmem:[#allocation73_spill] sm:$0xff] }
0x147b   : > { %12273 = vrot.lane.b32.xlu1 %v24217_v6, %s27181_s5 }
0x147c   : > { %12207 = vrot.lane.b32.xlu0 %v23801_v51, %s27182_s2 }
0x147f   : > { %12305 = vrot.lane.b32.xlu1 %v24440_v33, %s27180_s9  ;;  %v27299_v33 = vld [vmem:[#allocation59_spill] sm:$0xff] }
0x1480   : > { %12239 = vrot.lane.b32.xlu0 %v24010_v14, %s27168_s16 }
0x1483   : > { %12337 = vrot.lane.b32.xlu1 %v24641_v46, %s27179_s22 }
0x1484   : > { %12271 = vrot.lane.b32.xlu0 %v24219_v9, %s27181_s5  ;;  %v27298_v9 = vld [vmem:[#allocation69_spill] sm:$0xff] }
0x1487   : > { %12181 = vrot.lane.b32.xlu1 %v23596_v38, %s27183_s23  ;;  %v27292_v38 = vld [vmem:[#allocation66_spill] sm:$0xff] }
0x1488   : > { %12303 = vrot.lane.b32.xlu0 %v24442_v13, %s27180_s9 }
0x148b   : > { %12213 = vrot.lane.b32.xlu1 %v23805_v29, %s27182_s2  ;;  %v27295_v29 = vld [vmem:[#allocation61_spill] sm:$0xff] }
0x148c   : > { %12335 = vrot.lane.b32.xlu0 %v24643_v0, %s27179_s22 }
0x148f   : > { %12245 = vrot.lane.b32.xlu1 %v24014_v12, %s27168_s16  ;;  %v27297_v12 = vld [vmem:[#allocation65_spill] sm:$0xff] }
0x1490   : > { %12179 = vrot.lane.b32.xlu0 %v23594_v11, %s27183_s23  ;;  %v11788_v11 = vpop.permute.xlu1 %11787 }
0x1493   : > { %12277 = vrot.lane.b32.xlu1 %v24223_v28, %s27181_s5 }
0x1494   : > { %12211 = vrot.lane.b32.xlu0 %v23803_v60, %s27182_s2  ;;  %v27294_v60 = vld [vmem:[#allocation70_spill] sm:$0xff] }
0x1497   : > { %12309 = vrot.lane.b32.xlu1 %v24446_v25, %s27180_s9  ;;  %v27300_v25 = vld [vmem:[#allocation74_spill] sm:$0xff] }
0x1498   : > { %12243 = vrot.lane.b32.xlu0 %v24012_v18, %s27168_s16  ;;  %v27296_v18 = vld [vmem:[#allocation75_spill] sm:$0xff] }
0x149b   : > { %12341 = vrot.lane.b32.xlu1 %v24647_v52, %s27179_s22  ;;  %v27301_v52 = vld [vmem:[#allocation63_spill] sm:$0xff] }
0x149c   : > { %12275 = vrot.lane.b32.xlu0 %v24221_v58, %s27181_s5 }
0x149f   : > { %12185 = vrot.lane.b32.xlu1 %v27289_v49, %s27183_s23 }
0x14a0   : > { %12307 = vrot.lane.b32.xlu0 %v27290_v39, %s27180_s9  ;;  %v27306_v39 = vld [vmem:[#allocation72_spill] sm:$0xff] }
0x14a3   : > { %12217 = vrot.lane.b32.xlu1 %v27291_v59, %s27182_s2 }
0x14a4   : > { %12339 = vrot.lane.b32.xlu0 %v24645_v16, %s27179_s22 }
0x14a7   : > { %12249 = vrot.lane.b32.xlu1 %v27292_v38, %s27168_s16 }
0x14a8   : > { %12183 = vrot.lane.b32.xlu0 %v27293_v35, %s27183_s23  ;;  %v27307_v35 = vld [vmem:[#allocation71_spill] sm:$0xff] }
0x14aa   : > { %v11521_v51 = vpop.xlane.xlu1 %11520 }
0x14ab   : > { %22430 = vrcp.f32 %v11521_v51  ;;  %12281 = vrot.lane.b32.xlu1 %v27294_v60, %s27181_s5 }
0x14ac   : > { %12215 = vrot.lane.b32.xlu0 %v27295_v29, %s27182_s2 }
0x14ad   : > { %v11524_v21 = vpop.xlane.xlu0 %11523 }
0x14ae   : > { %22432 = vrcp.f32 %v11524_v21  ;;  %v11527_v14 = vpop.xlane.xlu1 %11526  ;;  %v27308_v21 = vld [vmem:[#allocation77_spill] sm:$0xff] }
0x14af   : > { %22434 = vrcp.f32 %v11527_v14  ;;  %12313 = vrot.lane.b32.xlu1 %v27296_v18, %s27180_s9  ;;  %v27309_v18 = vld [vmem:[#allocation76_spill] sm:$0xff] }
0x14b0   : > { %12247 = vrot.lane.b32.xlu0 %v27297_v12, %s27168_s16 }
0x14b2   : > { %v11530_v6 = vpop.xlane.xlu0 %11529  ;;  %v11940_v41 = vpop.permute.xlu1 %11939 }
0x14b3   : > { %22436 = vrcp.f32 %v11530_v6  ;;  %12345 = vrot.lane.b32.xlu1 %v24651_v24, %s27179_s22 }
0x14b4   : > { %12279 = vrot.lane.b32.xlu0 %v27298_v9, %s27181_s5 }
0x14b5   : > { %v22431_v58 = vpop.eup %22430 }
0x14b6   : > { %v11544_v28 = vmul.f32 %v22431_v58, %v24682_v44  ;;  %v11864_v24 = vpop.permute.xlu0 %11863 }
0x14b7   : > { %12189 = vrot.lane.b32.xlu1 %v27299_v33, %s27183_s23 }
0x14b8   : > { %v22433_v13 = vpop.eup %22432  ;;  %12311 = vrot.lane.b32.xlu0 %v27300_v25, %s27180_s9  ;;  %21174 = vmatmul.mubr.msk.f32.vlgmr.msra.gmra.mrb[124].mxu1 %vm2118_vm13, %v11544_v28 }
0x14b9   : > { %v22435_v46 = vpop.eup %22434  ;;  %21182 = vmatpush3.msra.mxu1 %v11712_v50  ;;  %21183 = vmatprep.mubr.msk.f32.mxu1 %vm27170_vm3, %v27259_v15  ;;  %v11546_v0 = vmul.f32 %v22433_v13, %v24686_v54 }
0x14ba   : > { %21191 = vmatprep.subr.mxu1 %v27259_v15  ;;  %v11548_v16 = vmul.f32 %v22435_v46, %v24688_v17 }
0x14bb   : > { %12221 = vrot.lane.b32.xlu1 %v27301_v52, %s27182_s2  ;;  %21179 = vmatmul.mubr.msk.f32.vlgmr.msra.gmra.mrb[132].mxu0 %vm2118_vm13, %v11546_v0 }
0x14bc   : > { %12343 = vrot.lane.b32.xlu0 %v24649_v23, %s27179_s22  ;;  %21184 = vmatmul.mubr.msk.f32.vlgmr.msra.gmra.mrb[126].mxu1 %vm2118_vm13, %v11548_v16  ;;  %v27303_v23 = vld [vmem:[#allocation60_spill] sm:$0xff] }
0x14bd   : > { %v22437_v56 = vpop.eup %22436  ;;  %21187 = vmatpush3.msra.mxu0 %v11788_v11  ;;  %21192 = vmatpush3.msra.mxu1 %v11864_v24 }
0x14be   : > { %21188 = vmatprep.mubr.msk.f32.mxu0 %vm27170_vm3, %v27259_v15  ;;  %21196 = vmatprep.subr.mxu0 %v27259_v15  ;;  %v11550_v32 = vmul.f32 %v22437_v56, %v24695_v55 }
0x14bf   : > { %12253 = vrot.lane.b32.xlu1 %v27302_v2, %s27168_s16  ;;  %21193 = vmatprep.mubr.msk.f32.mxu1 %vm27170_vm3, %v27259_v15 }
0x14c0   : > { %12187 = vrot.lane.b32.xlu0 %v27303_v23, %s27183_s23  ;;  %21189 = vmatmul.mubr.msk.f32.vlgmr.msra.gmra.mrb[134].mxu0 %vm2118_vm13, %v11550_v32  ;;  %s27349_s23 = sld [smem:[#allocation18_spill]] }
0x14c1   : > { %21197 = vmatpush3.msra.mxu0 %v11940_v41  ;;  %21201 = vmatprep.subr.mxu1 %v27259_v15 }
0x14c2   : > { %21198 = vmatprep.mubr.msk.f32.mxu0 %vm27170_vm3, %v27259_v15  ;;  %21206 = vmatprep.subr.mxu0 %v27259_v15 }
0x14c4   : > { %12219 = vrot.lane.b32.xlu0 %v27304_v37, %s27182_s2  ;;  %s27348_s2 = sld [smem:[#allocation16_spill]] }
0x14c8   : > { %12251 = vrot.lane.b32.xlu0 %v27305_v47, %s27168_s16  ;;  %s27178_s16 = smov 28  }
0x14e3   : > { %v11533_v44 = vpop.xlane.xlu1 %11532 }
0x14e4   : > { %22438 = vrcp.f32 %v11533_v44 }
0x14e7   : > { %v11536_v40 = vpop.xlane.xlu0 %11535  ;;  %v11539_v3 = vpop.xlane.xlu1 %11538 }
0x14e8   : > { %22440 = vrcp.f32 %v11536_v40 }
0x14e9   : > { %22442 = vrcp.f32 %v11539_v3 }
0x14eb   : > { %v11542_v54 = vpop.xlane.xlu0 %11541  ;;  %v12092_v53 = vpop.permute.xlu1 %12091 }
0x14ec   : > { %22444 = vrcp.f32 %v11542_v54 }
0x14ee   : > { %v22439_v17 = vpop.eup %22438 }
0x14ef   : > { %v12016_v22 = vpop.permute.xlu0 %12015  ;;  %v11552_v4 = vmul.f32 %v22439_v17, %v24704_v5 }
0x14f1   : > { %21194 = vmatmul.mubr.msk.f32.vlgmr.msra.gmra.mrb[128].mxu1 %vm2118_vm13, %v11552_v4 }
0x14f2   : > { %v22441_v36 = vpop.eup %22440  ;;  %21202 = vmatpush3.msra.mxu1 %v12016_v22  ;;  %21203 = vmatprep.mubr.msk.f32.mxu1 %vm27170_vm3, %v27259_v15 }
0x14f3   : > { %v22443_v55 = vpop.eup %22442  ;;  %v11554_v26 = vmul.f32 %v22441_v36, %v24706_v48  ;;  %21395 = vmatprep.subr.bf16.mxu1 %v21394_v42  ;;  %v24845_v5 = vpop.permute.xlu0 %12175 }
0x14f4   : > { %v11556_v10 = vmul.f32 %v22443_v55, %v24710_v30  ;;  %v24847_v48 = vpop.permute.xlu1 %12177  ;;  %v12391_v7 = vsel %vm27176_vm1, %v27310_v62, %v24845_v5  ;;  %v27315_v62 = vld [vmem:[#allocation54_spill] sm:$0xff] }
0x14f5   : > { %21199 = vmatmul.mubr.msk.f32.vlgmr.msra.gmra.mrb[136].mxu0 %vm2118_vm13, %v11554_v26 }
0x14f6   : > { %v22445_v8 = vpop.eup %22444  ;;  %21204 = vmatmul.mubr.msk.f32.vlgmr.msra.gmra.mrb[130].mxu1 %vm2118_vm13, %v11556_v10  ;;  %21207 = vmatpush3.msra.mxu0 %v12092_v53 }
0x14f7   : > { %21208 = vmatprep.mubr.msk.f32.mxu0 %vm27170_vm3, %v27259_v15  ;;  %v11558_v34 = vmul.f32 %v22445_v8, %v24716_v20  ;;  %21397 = vmatpush3.bf16.msra.mxu1 %v21394_v42  ;;  %v24849_v45 = vpop.permute.xlu0 %12207  ;;  %vm27173_vm3 = vcmask 195584  }
0x14f8   : > { %21399 = vmatprep.subr.bf16.mxu1 %v21398_v57  ;;  %v24851_v30 = vpop.permute.xlu1 %12209 }
0x14f9   : > { %21209 = vmatmul.mubr.msk.f32.vlgmr.msra.gmra.mrb[138].mxu0 %vm2118_vm13, %v11558_v34 }
0x14fa   : > { %13027 = vmatprep.mubr.f32.mxu0 %v27259_v15 }
0x14fb   : > { %21401 = vmatpush3.bf16.msra.mxu1 %v21398_v57  ;;  %v24854_v20 = vpop.permute.xlu0 %12239  ;;  %v12399_v57 = vsel %vm2118_vm13, %v12391_v7, %v24849_v45 }
0x14fc   : > { %v24859_v11 = vpop.permute.xlu1 %12241 }
0x14ff   : > { %v12272_v51 = vpop.permute.xlu0 %12271 }
0x1500   : > { %v24864_v29 = vpop.permute.xlu1 %12273 }
0x1503   : > { %v12304_v14 = vpop.permute.xlu0 %12303 }
0x1504   : > { %v24871_v12 = vpop.permute.xlu1 %12305 }
0x1507   : > { %v12336_v6 = vpop.permute.xlu0 %12335 }
0x1508   : > { %v24873_v9 = vpop.permute.xlu1 %12337 }
0x150b   : > { %v24875_v58 = vpop.permute.xlu0 %12179 }
0x150c   : > { %v24877_v28 = vpop.permute.xlu1 %12181 }
0x150f   : > { %v24879_v33 = vpop.permute.xlu0 %12211 }
0x1510   : > { %v24881_v13 = vpop.permute.xlu1 %12213 }
0x1513   : > { %v24883_v25 = vpop.permute.xlu0 %12243 }
0x1514   : > { %v24885_v46 = vpop.permute.xlu1 %12245 }
0x1517   : > { %v24887_v0 = vpop.permute.xlu0 %12275 }
0x1518   : > { %v24889_v16 = vpop.permute.xlu1 %12277 }
0x151b   : > { %v24891_v52 = vpop.permute.xlu0 %12307 }
0x151c   : > { %v24893_v24 = vpop.permute.xlu1 %12309 }
0x151f   : > { %v24895_v56 = vpop.permute.xlu0 %12339 }
0x1520   : > { %v24898_v41 = vpop.permute.xlu1 %12341 }
0x1523   : > { %v24903_v44 = vpop.permute.xlu0 %12183 }
0x1524   : > { %v24905_v54 = vpop.permute.xlu1 %12185 }
0x1527   : > { %v12216_v22 = vpop.permute.xlu0 %12215 }
0x1528   : > { %v24911_v4 = vpop.permute.xlu1 %12217 }
0x152b   : > { %v12248_v36 = vpop.permute.xlu0 %12247 }
0x152c   : > { %v24913_v55 = vpop.permute.xlu1 %12249 }
0x1530   : > { %v24915_v26 = vpop.permute.xlu1 %12281 }
0x1534   : > { %v24917_v53 = vpop.permute.xlu1 %12313 }
0x1538   : > { %v24919_v34 = vpop.permute.xlu1 %12345 }
0x153c   : > { %v24923_v61 = vpop.permute.xlu1 %12189 }
0x1540   : > { %v24927_v42 = vpop.permute.xlu1 %12221 }
0x158b   : > { %v11631_v27 = vpop.f32.mrb[124].mxu1 }
0x158c   : > { %12367 = vrot.lane.b32.xlu0 %v11631_v27, %s27178_s16  ;;  %v21175_v19 = vpop.f32.mrb[125].mxu1 }
0x158d   : > { %v12408_v19 = vsel %vm27175_vm0, %v12399_v57, %v24854_v20 }
0x158e   : > { %v11707_v31 = vpop.f32.mrb[132].mxu0 }
0x158f   : > { %v11783_v49 = vpop.f32.mrb[126].mxu1  ;;  %v21180_v50 = vpop.f32.mrb[133].mxu0  ;;  %12369 = vrot.lane.b32.xlu1 %v11707_v31, %s27178_s16  ;;  %v27311_v31 = vld [vmem:[#allocation50_spill] sm:$0xff] }
0x1590   : > { %12283 = vrot.lane.b32.xlu0 %v27306_v39, %s27181_s5  ;;  %v21185_v59 = vpop.f32.mrb[127].mxu1  ;;  %v12417_v50 = vsel %vm27177_vm5, %v12408_v19, %v12272_v51  ;;  %v24945_v39 = vpop.permute.xlu1 %12253 }
0x1591   : > { %v12426_v45 = vsel %vm27174_vm10, %v12417_v50, %v12304_v14 }
0x1592   : > { %v12435_v59 = vsel %vm27173_vm3, %v12426_v45, %v12336_v6 }
0x1593   : > { %v11859_v38 = vpop.f32.mrb[134].mxu0  ;;  %12285 = vrot.lane.b32.xlu1 %v27307_v35, %s27181_s5  ;;  %s27347_s5 = sld [smem:[#allocation14_spill]] }
0x1594   : > { %v21190_v60 = vpop.f32.mrb[135].mxu0  ;;  %12371 = vrot.lane.b32.xlu0 %v11783_v49, %s27178_s16  ;;  %v12392_v49 = vsel %vm27176_vm1, %v27311_v31, %v24847_v48 }
0x1595   : > { %v12400_v5 = vsel %vm2118_vm13, %v12392_v49, %v24851_v30  ;;  %v27312_v60 = vld [vmem:[#allocation51_spill] sm:$0xff] }
0x1596   : > { %v12409_v20 = vsel %vm27175_vm0, %v12400_v5, %v24859_v11  ;;  %v12393_v11 = vsel %vm27176_vm1, %v27312_v60, %v24875_v58  ;;  %v19322_v60 = vld [vmem:[%s22721_s29] ss:$0 sm:$0xff] }
0x1597   : > { %12373 = vrot.lane.b32.xlu1 %v11859_v38, %s27178_s16  ;;  %v12418_v48 = vsel %vm27177_vm5, %v12409_v20, %v24864_v29  ;;  %v12401_v14 = vsel %vm2118_vm13, %v12393_v11, %v24879_v33 }
0x1598   : > { %12315 = vrot.lane.b32.xlu0 %v27308_v21, %s27180_s9  ;;  %v12427_v51 = vsel %vm27174_vm10, %v12418_v48, %v24871_v12  ;;  %v12410_v6 = vsel %vm27175_vm0, %v12401_v14, %v24883_v25  ;;  %v27313_v12 = vld [vmem:[#allocation52_spill] sm:$0xff] }
0x1599   : > { %v12436_v30 = vsel %vm27173_vm3, %v12427_v51, %v24873_v9  ;;  %v12394_v9 = vsel %vm27176_vm1, %v27313_v12, %v24877_v28 }
0x159a   : > { %v12402_v58 = vsel %vm2118_vm13, %v12394_v9, %v24881_v13 }
0x159b   : > { %12317 = vrot.lane.b32.xlu1 %v27309_v18, %s27180_s9  ;;  %s27346_s9 = sld [smem:[#allocation17_spill]] }
0x15c4   : > { %v11935_v32 = vpop.f32.mrb[128].mxu1 }
0x15c5   : > { %12375 = vrot.lane.b32.xlu0 %v11935_v32, %s27178_s16  ;;  %v21195_v2 = vpop.f32.mrb[129].mxu1  ;;  %v12419_v32 = vsel %vm27177_vm5, %v12410_v6, %v24887_v0  ;;  %v27319_v6 = vld [vmem:[#allocation29_spill] sm:$0xff] }
0x15c6   : > { %v12428_v33 = vsel %vm27174_vm10, %v12419_v32, %v24891_v52 }
0x15c7   : > { %v12437_v25 = vsel %vm27173_vm3, %v12428_v33, %v24895_v56  ;;  %v27314_v56 = vld [vmem:[#allocation53_spill] sm:$0xff] }
0x15c8   : > { %v12011_v23 = vpop.f32.mrb[136].mxu0 }
0x15c9   : > { %v12087_v37 = vpop.f32.mrb[130].mxu1  ;;  %12377 = vrot.lane.b32.xlu1 %v12011_v23, %s27178_s16  ;;  %v21200_v47 = vpop.f32.mrb[137].mxu0  ;;  %12347 = vrot.lane.b32.xlu0 %v24653_v1, %s27179_s22  ;;  %v12411_v23 = vsel %vm27175_vm0, %v12402_v58, %v24885_v46 }
0x15ca   : > { %v21205_v40 = vpop.f32.mrb[131].mxu1  ;;  %v12280_v1 = vpop.permute.xlu0 %12279  ;;  %v12420_v28 = vsel %vm27177_vm5, %v12411_v23, %v24889_v16 }
0x15cb   : > { %v12429_v0 = vsel %vm27174_vm10, %v12420_v28, %v24893_v24  ;;  %v12395_v40 = vsel %vm27176_vm1, %v27314_v56, %v24903_v44  ;;  %v27321_v28 = vld [vmem:[#allocation31_spill] sm:$0xff] }
0x15cc   : > { %v12163_v3 = vpop.f32.mrb[138].mxu0  ;;  %v12438_v13 = vsel %vm27173_vm3, %v12429_v0, %v24898_v41  ;;  %v12403_v16 = vsel %vm2118_vm13, %v12395_v40, %v12216_v22  ;;  %v12396_v41 = vsel %vm27176_vm1, %v27315_v62, %v24905_v54 }
0x15cd   : > { %12349 = vrot.lane.b32.xlu1 %v24655_v43, %s27179_s22  ;;  %12379 = vrot.lane.b32.xlu0 %v12087_v37, %s27178_s16  ;;  %v21210_v17 = vpop.f32.mrb[139].mxu0  ;;  %v12404_v57 = vsel %vm2118_vm13, %v12396_v41, %v24911_v4  ;;  %s27345_s22 = sld [smem:[#allocation15_spill]] }
0x15ce   : > { %v12312_v10 = vpop.permute.xlu0 %12311  ;;  %v12412_v17 = vsel %vm27175_vm0, %v12403_v16, %v12248_v36  ;;  %v12413_v22 = vsel %vm27175_vm0, %v12404_v57, %v24913_v55  ;;  %v27322_v16 = vld [vmem:[#allocation33_spill] sm:$0xff] }
0x15cf   : > { %v12421_v24 = vsel %vm27177_vm5, %v12412_v17, %v12280_v1  ;;  %v12422_v1 = vsel %vm27177_vm5, %v12413_v22, %v24915_v26  ;;  %v27323_v17 = vld [vmem:[#allocation34_spill] sm:$0xff] }
0x15d0   : > { %v12430_v7 = vsel %vm27174_vm10, %v12421_v24, %v12312_v10  ;;  %v12431_v54 = vsel %vm27174_vm10, %v12422_v1, %v24917_v53  ;;  %v27316_v10 = vld [vmem:[#allocation55_spill] sm:$0xff]  ;;  %v27317_v53 = vld [vmem:[#allocation56_spill] sm:$0xff] }
0x15d1   : > { %12381 = vrot.lane.b32.xlu1 %v12163_v3, %s27178_s16  ;;  %s27343_s16 = sld [smem:[#allocation12_spill]] }
0x15d2   : > { %v12344_v8 = vpop.permute.xlu0 %12343 }
0x15d3   : > { %v12439_v19 = vsel %vm27173_vm3, %v12430_v7, %v12344_v8  ;;  %v12440_v8 = vsel %vm27173_vm3, %v12431_v54, %v24919_v34 }
0x15d6   : > { %v24921_v43 = vpop.permute.xlu0 %12187 }
0x15d7   : > { %v12397_v4 = vsel %vm27176_vm1, %v27316_v10, %v24921_v43  ;;  %v12398_v43 = vsel %vm27176_vm1, %v27317_v53, %v24923_v61 }
0x15da   : > { %v24925_v63 = vpop.permute.xlu0 %12219 }
0x15db   : > { %v12405_v55 = vsel %vm2118_vm13, %v12397_v4, %v24925_v63  ;;  %v12406_v63 = vsel %vm2118_vm13, %v12398_v43, %v24927_v42 }
0x15de   : > { %v24934_v27 = vpop.permute.xlu0 %12251 }
0x15df   : > { %v12414_v26 = vsel %vm27175_vm0, %v12405_v55, %v24934_v27 }
0x15fe   : > { %v12368_v38 = vpop.permute.xlu0 %12367 }
0x15ff   : > { %v12444_v35 = vsel %vm27172_vm6, %v12435_v59, %v12368_v38  ;;  %v12415_v38 = vsel %vm27175_vm0, %v12406_v63, %v24945_v39 }
0x1600   : > { %21219 = vmatprep.mubr.msk.f32.mxu1 %vm1162_vm2, %v12444_v35 }
0x1601   : > { %v12370_v21 = vpop.permute.xlu1 %12369 }
0x1602   : > { %v12284_v18 = vpop.permute.xlu0 %12283  ;;  %v12445_v29 = vsel %vm27172_vm6, %v12436_v30, %v12370_v21 }
0x1603   : > { %21220 = vmatmul.mubr.msk.f32.vlgmr.msra.gmra.mrb[132].mxu1 %vm1162_vm2, %v12445_v29  ;;  %v12423_v45 = vsel %vm27177_vm5, %v12414_v26, %v12284_v18  ;;  %v27318_v18 = vld [vmem:[#allocation30_spill] sm:$0xff] }
0x1605   : > { %v12286_v2 = vpop.permute.xlu1 %12285 }
0x1606   : > { %v12372_v37 = vpop.permute.xlu0 %12371  ;;  %v12424_v35 = vsel %vm27177_vm5, %v12415_v38, %v12286_v2 }
0x1607   : > { %v12446_v47 = vsel %vm27172_vm6, %v12437_v25, %v12372_v37  ;;  %v27320_v25 = vld [vmem:[#allocation32_spill] sm:$0xff] }
0x1608   : > { %21222 = vmatprep.mubr.msk.f32.mxu1 %vm1162_vm2, %v12446_v47 }
0x1609   : > { %v12374_v52 = vpop.permute.xlu1 %12373 }
0x160a   : > { %v12447_v46 = vsel %vm27172_vm6, %v12438_v13, %v12374_v52  ;;  %v12316_v3 = vpop.permute.xlu0 %12315 }
0x160b   : > { %21223 = vmatmul.mubr.msk.f32.gmra.mrb[134].mxu1 %vm1162_vm2, %v12447_v46  ;;  %v12432_v34 = vsel %vm27174_vm10, %v12423_v45, %v12316_v3 }
0x160d   : > { %v12318_v31 = vpop.permute.xlu1 %12317 }
0x160e   : > { %v12433_v61 = vsel %vm27174_vm10, %v12424_v35, %v12318_v31 }
0x1637   : > { %v12376_v44 = vpop.permute.xlu0 %12375 }
0x1638   : > { %v12448_v36 = vsel %vm27172_vm6, %v12439_v19, %v12376_v44  ;;  %v27324_v44 = vld [vmem:[#allocation35_spill] sm:$0xff] }
0x1639   : > { %21225 = vmatprep.mubr.msk.f32.mxu1 %vm1162_vm2, %v12448_v36  ;;  %v27325_v36 = vld [vmem:[#allocation36_spill] sm:$0xff] }
0x163b   : > { %v12348_v49 = vpop.permute.xlu0 %12347  ;;  %v12378_v50 = vpop.permute.xlu1 %12377 }
0x163c   : > { %v12449_v5 = vsel %vm27172_vm6, %v12440_v8, %v12378_v50  ;;  %v12441_v20 = vsel %vm27173_vm3, %v12432_v34, %v12348_v49 }
0x163d   : > { %21226 = vmatmul.mubr.msk.f32.gmra.mrb[136].mxu1 %vm1162_vm2, %v12449_v5 }
0x163f   : > { %v12380_v59 = vpop.permute.xlu0 %12379  ;;  %v12350_v27 = vpop.permute.xlu1 %12349 }
0x1640   : > { %v12450_v48 = vsel %vm27172_vm6, %v12441_v20, %v12380_v59  ;;  %v12442_v51 = vsel %vm27173_vm3, %v12433_v61, %v12350_v27 }
0x1641   : > { %21228 = vmatprep.mubr.msk.f32.mxu1 %vm1162_vm2, %v12450_v48 }
0x1643   : > { %v12382_v30 = vpop.permute.xlu1 %12381 }
0x1644   : > { %v12451_v42 = vsel %vm27172_vm6, %v12442_v51, %v12382_v30 }
0x1645   : > { %21229 = vmatmul.mubr.msk.f32.gmra.mrb[138].mxu1 %vm1162_vm2, %v12451_v42  ;;  %v12792_v42 = vld [vmem:[%s27217_s3 + $0x8] sm:$0xff] }
0x1646   : > { %13140 = vmatprep.mubr.f32.mxu1 %v27259_v15 }
0x16d6   : > { %v21221_v11 = vpop.f32.mrb[132].mxu1 }
0x16d7   : > { %v12559_v39 = vadd.f32 %v21221_v11, %v19322_v60  ;;  %v12553_v21 = vpop.f32.mrb[133].mxu1  ;;  %v12794_v11 = vld [vmem:[%s27217_s3 + $0x18] sm:$0xff] }
0x16d8   : > { %v12554_v14 = vadd.f32 %v19322_v60, %v12553_v21 }
0x16d9   : > { %v12593_v29 = vadd.f32 %v12559_v39, %v27318_v18  ;;  %v12810_v18 = vld [vmem:[%s27217_s3 + $0x98] sm:$0xff] }
0x16da   : > { %v12592_v12 = vadd.f32 %v12554_v14, %v27319_v6  ;;  %v12807_v6 = vld [vmem:[%s27217_s3 + $0x80] sm:$0xff] }
0x16db   : > { %v12605_v9 = vsel %vm1162_vm2, %v12593_v29, 0.0 }
0x16dc   : > { %12606 = vadd.xlane.f32.xlu1 %v12605_v9  ;;  %v12602_v32 = vsel %vm1162_vm2, %v12592_v12, 0.0  ;;  %v21410_v9 = vpack.c.bf16 %v12810_v18, %v12794_v11 }
0x16dd   : > { %12603 = vadd.xlane.f32.xlu0 %v12602_v32 }
0x16de   : > { %v21224_v58 = vpop.f32.mrb[134].mxu1  ;;  %21411 = vmatprep.subr.bf16.mxu1 %v21410_v9 }
0x16df   : > { %v12563_v33 = vpop.f32.mrb[135].mxu1  ;;  %v12569_v2 = vadd.f32 %v21224_v58, %v19322_v60  ;;  %v12793_v58 = vld [vmem:[%s27217_s3 + $0x10] sm:$0xff] }
0x16e0   : > { %v12564_v23 = vadd.f32 %v19322_v60, %v12563_v33  ;;  %v12809_v33 = vld [vmem:[%s27217_s3 + $0x90] sm:$0xff] }
0x16e1   : > { %v12595_v47 = vadd.f32 %v12569_v2, %v27321_v28  ;;  %v12840_v28 = vld [vmem:[%s27217_s3 + $0x188] sm:$0xff] }
0x16e2   : > { %v12594_v37 = vadd.f32 %v12564_v23, %v27320_v25  ;;  %v21412_v23 = vpack.c.bf16 %v12809_v33, %v12793_v58 }
0x16e3   : > { %v12611_v13 = vsel %vm1162_vm2, %v12595_v47, 0.0 }
0x16e4   : > { %v12608_v0 = vsel %vm1162_vm2, %v12594_v37, 0.0  ;;  %21413 = vmatpush1.bf16.msra.mxu1 %v21412_v23 }
0x16e5   : > { %12609 = vadd.xlane.f32.xlu0 %v12608_v0 }
0x16e9   : > { %12612 = vadd.xlane.f32.xlu0 %v12611_v13 }
0x1710   : > { %v21227_v52 = vpop.f32.mrb[136].mxu1 }
0x1711   : > { %v12579_v46 = vadd.f32 %v21227_v52, %v19322_v60  ;;  %v12573_v56 = vpop.f32.mrb[137].mxu1  ;;  %v12842_v52 = vld [vmem:[%s27217_s3 + $0x198] sm:$0xff] }
0x1712   : > { %v12574_v40 = vadd.f32 %v19322_v60, %v12573_v56  ;;  %v12839_v56 = vld [vmem:[%s27217_s3 + $0x180] sm:$0xff] }
0x1713   : > { %v12597_v3 = vadd.f32 %v12579_v46, %v27322_v16  ;;  %v12823_v46 = vld [vmem:[%s27217_s3 + $0x100] sm:$0xff] }
0x1714   : > { %v12596_v24 = vadd.f32 %v12574_v40, %v27323_v17  ;;  %v12825_v17 = vld [vmem:[%s27217_s3 + $0x110] sm:$0xff] }
0x1715   : > { %v12617_v62 = vsel %vm1162_vm2, %v12597_v3, 0.0 }
0x1716   : > { %12618 = vadd.xlane.f32.xlu0 %v12617_v62  ;;  %v12614_v41 = vsel %vm1162_vm2, %v12596_v24, 0.0 }
0x1717   : > { %12615 = vadd.xlane.f32.xlu1 %v12614_v41 }
0x1718   : > { %v21230_v7 = vpop.f32.mrb[138].mxu1 }
0x1719   : > { %v12589_v57 = vadd.f32 %v21230_v7, %v19322_v60  ;;  %v12583_v19 = vpop.f32.mrb[139].mxu1 }
0x171a   : > { %v12584_v31 = vadd.f32 %v19322_v60, %v12583_v19  ;;  %v12808_v60 = vld [vmem:[%s27217_s3 + $0x88] sm:$0xff] }
0x171b   : > { %v25054_v22 = vadd.f32 %v12589_v57, %v27324_v44  ;;  %v21402_v14 = vpack.c.bf16 %v12808_v60, %v12792_v42 }
0x171c   : > { %v25057_v1 = vadd.f32 %v12584_v31, %v27325_v36 }
0x171d   : > { %v12623_v54 = vsel %vm1162_vm2, %v25054_v22, 0.0  ;;  %21403 = vmatprep.subr.bf16.mxu0 %v21402_v14 }
0x171e   : > { %12624 = vadd.xlane.f32.xlu0 %v12623_v54  ;;  %v12620_v10 = vsel %vm1162_vm2, %v25057_v1, 0.0 }
0x171f   : > { %12621 = vadd.xlane.f32.xlu1 %v12620_v10 }
0x1769   : > { %v12607_v4 = vpop.xlane.xlu1 %12606 }
0x176a   : > { %v12628_v8 = vmul.f32 0.03125, %v12607_v4  ;;  %v12604_v55 = vpop.xlane.xlu0 %12603 }
0x176b   : > { %v12627_v49 = vmul.f32 0.03125, %v12604_v55 }
0x176c   : > { %v25063_v50 = vsub.f32 %v12593_v29, %v12628_v8  ;;  %v12791_v29 = vld [vmem:[%s27217_s3] sm:$0xff] }
0x176d   : > { %v25065_v26 = vsub.f32 %v12592_v12, %v12627_v49  ;;  %v21404_v32 = vpack.c.bf16 %v12807_v6, %v12791_v29  ;;  %v27326_v49 = vld [vmem:[#allocation37_spill] sm:$0xff] }
0x176e   : > { %v12644_v5 = vmul.f32 %v25063_v50, %v25063_v50 }
0x176f   : > { %v12643_v45 = vmul.f32 %v25065_v26, %v25065_v26  ;;  %21405 = vmatpush1.bf16.msra.mxu0 %v21404_v32 }
0x1770   : > { %v12654_v53 = vsel %vm1162_vm2, %v12644_v5, 0.0  ;;  %v12796_v5 = vld [vmem:[%s27217_s3 + $0x28] sm:$0xff] }
0x1771   : > { %12655 = vadd.xlane.f32.xlu0 %v12654_v53  ;;  %v12651_v43 = vsel %vm1162_vm2, %v12643_v45, 0.0  ;;  %v12798_v53 = vld [vmem:[%s27217_s3 + $0x38] sm:$0xff] }
0x1772   : > { %v12610_v34 = vpop.xlane.xlu0 %12609  ;;  %12652 = vadd.xlane.f32.xlu1 %v12651_v43 }
0x1773   : > { %v12629_v63 = vmul.f32 0.03125, %v12610_v34 }
0x1775   : > { %v25073_v20 = vsub.f32 %v12594_v37, %v12629_v63  ;;  %v12824_v37 = vld [vmem:[%s27217_s3 + $0x108] sm:$0xff] }
0x1776   : > { %v12613_v59 = vpop.xlane.xlu0 %12612  ;;  %v21406_v13 = vpack.c.bf16 %v12840_v28, %v12824_v37 }
0x1777   : > { %v12630_v27 = vmul.f32 0.03125, %v12613_v59  ;;  %v12645_v38 = vmul.f32 %v25073_v20, %v25073_v20 }
0x1778   : > { %21407 = vmatprep.subr.bf16.mxu0 %v21406_v13 }
0x1779   : > { %v25077_v48 = vsub.f32 %v12595_v47, %v12630_v27  ;;  %v12657_v35 = vsel %vm1162_vm2, %v12645_v38, 0.0  ;;  %v12826_v47 = vld [vmem:[%s27217_s3 + $0x118] sm:$0xff] }
0x177a   : > { %12658 = vadd.xlane.f32.xlu1 %v12657_v35  ;;  %v21414_v16 = vpack.c.bf16 %v12842_v52, %v12826_v47 }
0x177b   : > { %v12646_v61 = vmul.f32 %v25077_v48, %v25077_v48 }
0x177c   : > { %21415 = vmatprep.subr.bf16.mxu1 %v21414_v16  ;;  %v25130_v16 = vld [vmem:[%s22751_s30] ss:$0 sm:$0xff] }
0x177d   : > { %v12660_v51 = vsel %vm1162_vm2, %v12646_v61, 0.0 }
0x177e   : > { %12661 = vadd.xlane.f32.xlu0 %v12660_v51 }
0x17a3   : > { %v12619_v30 = vpop.xlane.xlu0 %12618 }
0x17a4   : > { %v12632_v39 = vmul.f32 0.03125, %v12619_v30  ;;  %v12616_v21 = vpop.xlane.xlu1 %12615 }
0x17a5   : > { %v12631_v12 = vmul.f32 0.03125, %v12616_v21 }
0x17a6   : > { %v25091_v2 = vsub.f32 %v12597_v3, %v12632_v39  ;;  %v21408_v3 = vpack.c.bf16 %v12839_v56, %v12823_v46  ;;  %v25127_v56 = vld [vmem:[%s22746_s24] ss:$0 sm:$0xff] }
0x17a7   : > { %v25093_v25 = vsub.f32 %v12596_v24, %v12631_v12  ;;  %v12841_v24 = vld [vmem:[%s27217_s3 + $0x190] sm:$0xff] }
0x17a8   : > { %v12648_v0 = vmul.f32 %v25091_v2, %v25091_v2  ;;  %v21416_v41 = vpack.c.bf16 %v12841_v24, %v12825_v17  ;;  %21409 = vmatpush1.bf16.msra.mxu0 %v21408_v3 }
0x17a9   : > { %v12647_v40 = vmul.f32 %v25093_v25, %v25093_v25 }
0x17aa   : > { %v12666_v62 = vsel %vm1162_vm2, %v12648_v0, 0.0  ;;  %21417 = vmatpush1.bf16.msra.mxu1 %v21416_v41  ;;  %v12811_v41 = vld [vmem:[%s27217_s3 + $0xa0] sm:$0xff] }
0x17ab   : > { %v12625_v7 = vpop.xlane.xlu0 %12624  ;;  %12667 = vadd.xlane.f32.xlu0 %v12666_v62  ;;  %v12663_v57 = vsel %vm1162_vm2, %v12647_v40, 0.0  ;;  %v12795_v62 = vld [vmem:[%s27217_s3 + $0x20] sm:$0xff] }
0x17ac   : > { %v12634_v19 = vmul.f32 0.03125, %v12625_v7  ;;  %12664 = vadd.xlane.f32.xlu1 %v12663_v57  ;;  %v12622_v31 = vpop.xlane.xlu1 %12621  ;;  %v12797_v57 = vld [vmem:[%s27217_s3 + $0x30] sm:$0xff] }
0x17ad   : > { %v12633_v44 = vmul.f32 0.03125, %v12622_v31  ;;  %v12828_v31 = vld [vmem:[%s27217_s3 + $0x128] sm:$0xff] }
0x17ae   : > { %v25110_v36 = vsub.f32 %v25054_v22, %v12634_v19  ;;  %v12812_v22 = vld [vmem:[%s27217_s3 + $0xa8] sm:$0xff]  ;;  %v12813_v19 = vld [vmem:[%s27217_s3 + $0xb0] sm:$0xff] }
0x17af   : > { %v25113_v54 = vsub.f32 %v25057_v1, %v12633_v44  ;;  %v21418_v45 = vpack.c.bf16 %v12812_v22, %v12796_v5  ;;  %v12814_v1 = vld [vmem:[%s27217_s3 + $0xb8] sm:$0xff]  ;;  %v21428_v5 = vpack.c.bf16 %v12813_v19, %v12797_v57  ;;  %v12827_v22 = vld [vmem:[%s27217_s3 + $0x120] sm:$0xff] }
0x17b0   : > { %v12650_v10 = vmul.f32 %v25110_v36, %v25110_v36  ;;  %v21426_v43 = vpack.c.bf16 %v12814_v1, %v12798_v53 }
0x17b1   : > { %v12649_v4 = vmul.f32 %v25113_v54, %v25113_v54  ;;  %21419 = vmatprep.subr.bf16.mxu0 %v21418_v45  ;;  %v12843_v45 = vld [vmem:[%s27217_s3 + $0x1a0] sm:$0xff] }
0x17b2   : > { %v12672_v8 = vsel %vm1162_vm2, %v12650_v10, 0.0  ;;  %21427 = vmatprep.subr.bf16.mxu1 %v21426_v43  ;;  %v12844_v10 = vld [vmem:[%s27217_s3 + $0x1a8] sm:$0xff]  ;;  %v12829_v43 = vld [vmem:[%s27217_s3 + $0x130] sm:$0xff] }
0x17b3   : > { %12673 = vadd.xlane.f32.xlu0 %v12672_v8  ;;  %v12669_v55 = vsel %vm1162_vm2, %v12649_v4, 0.0  ;;  %v21422_v53 = vpack.c.bf16 %v12844_v10, %v12828_v31  ;;  %v12833_v31 = vld [vmem:[%s27217_s3 + $0x150] sm:$0xff] }
0x17b4   : > { %12670 = vadd.xlane.f32.xlu1 %v12669_v55  ;;  %v21420_v55 = vpack.c.bf16 %v12811_v41, %v12795_v62  ;;  %v12831_v41 = vld [vmem:[%s27217_s3 + $0x140] sm:$0xff] }
0x17c5   : > { %15305 = vbcast.lane.b32.xlu1 %v27326_v49, 256 }
0x17fe   : > { %v12656_v34 = vpop.xlane.xlu0 %12655 }
0x17ff   : > { %v12676_v63 = vmul.f32 0.03125, %v12656_v34  ;;  %v12653_v59 = vpop.xlane.xlu1 %12652  ;;  %v12845_v34 = vld [vmem:[%s27217_s3 + $0x1b0] sm:$0xff] }
0x1800   : > { %v12675_v27 = vmul.f32 0.03125, %v12653_v59  ;;  %v12816_v59 = vld [vmem:[%s27217_s3 + $0xc8] sm:$0xff] }
0x1801   : > { %v12684_v38 = vadd.f32 1e-05, %v12676_v63  ;;  %v12800_v63 = vld [vmem:[%s27217_s3 + $0x48] sm:$0xff] }
0x1802   : > { %v12683_v35 = vadd.f32 1e-05, %v12675_v27  ;;  %v12802_v27 = vld [vmem:[%s27217_s3 + $0x58] sm:$0xff] }
0x1803   : > { %22446 = vrsqrt.f32 %v12684_v38  ;;  %vm12700_vm6 = vcmp.eq.f32.partialorder %v12684_v38, inf  ;;  %v12703_v14 = vand.u32 2147483648, %v12684_v38  ;;  %vm12702_vm3 = vcmp.eq.f32.partialorder %v12684_v38, 0.0 }
0x1804   : > { %22448 = vrsqrt.f32 %v12683_v35  ;;  %vm12693_vm10 = vcmp.eq.f32.partialorder %v12683_v35, inf  ;;  %v12696_v12 = vand.u32 2147483648, %v12683_v35  ;;  %vm12695_vm0 = vcmp.eq.f32.partialorder %v12683_v35, 0.0 }
0x1807   : > { %v12659_v61 = vpop.xlane.xlu1 %12658 }
0x1808   : > { %v12677_v51 = vmul.f32 0.03125, %v12659_v61  ;;  %v21424_v61 = vpack.c.bf16 %v12843_v45, %v12827_v22 }
0x180a   : > { %v12685_v30 = vadd.f32 1e-05, %v12677_v51 }
0x180b   : > { %v12662_v42 = vpop.xlane.xlu0 %12661 }
0x180c   : > { %22450 = vrsqrt.f32 %v12685_v30  ;;  %v12678_v11 = vmul.f32 0.03125, %v12662_v42  ;;  %vm12707_vm1 = vcmp.eq.f32.partialorder %v12685_v30, inf  ;;  %v12710_v37 = vand.u32 2147483648, %v12685_v30 }
0x180d   : > { %v22447_v60 = vpop.eup %22446  ;;  %vm12709_vm5 = vcmp.eq.f32.partialorder %v12685_v30, 0.0  ;;  %v21432_v42 = vpack.c.bf16 %v12845_v34, %v12829_v43 }
0x180e   : > { %v22449_v39 = vpop.eup %22448  ;;  %v12699_v21 = vmul.f32 %v22447_v60, %v12684_v38  ;;  %v12686_v29 = vadd.f32 1e-05, %v12678_v11  ;;  %v21434_v60 = vpack.c.bf16 %v12816_v59, %v12800_v63  ;;  %v12852_v59 = vld [vmem:[%s27217_s3 + $0x1e8] sm:$0xff] }
0x180f   : > { %v12692_v18 = vmul.f32 %v22449_v39, %v12683_v35 }
0x1810   : > { %v12701_v6 = vsel %vm12700_vm6, %v12684_v38, %v12699_v21  ;;  %22452 = vrsqrt.f32 %v12686_v29  ;;  %v12717_v40 = vand.u32 2147483648, %v12686_v29  ;;  %v12818_v38 = vld [vmem:[%s27217_s3 + $0xd8] sm:$0xff]  ;;  %vm22680_vm6 = vmmov 1  }
0x1811   : > { %v12704_v9 = vsel %vm12702_vm3, %v12703_v14, %v12701_v6  ;;  %v12694_v32 = vsel %vm12693_vm10, %v12683_v35, %v12692_v18  ;;  %vm12714_vm3 = vcmp.eq.f32.partialorder %v12686_v29, inf  ;;  %v21442_v11 = vpack.c.bf16 %v12818_v38, %v12802_v27  ;;  %v12838_v27 = vld [vmem:[%s27217_s3 + $0x178] sm:$0xff] }
0x1812   : > { %22454 = vrcp.f32 %v12704_v9  ;;  %v12697_v58 = vsel %vm12695_vm0, %v12696_v12, %v12694_v32  ;;  %vm15297_vm0 = vmxor %vm23067_vm7, %vm22680_vm6 }
0x1813   : > { %22456 = vrcp.f32 %v12697_v58  ;;  %vm25205_vm7 = vmxor %vm23094_vm14, %vm22680_vm6 }
0x1814   : > { %vm15300_vm14 = vmxor %vm23085_vm11, %vm22680_vm6 }
0x1816   : > { %v22451_v33 = vpop.eup %22450 }
0x1817   : > { %v12706_v23 = vmul.f32 %v22451_v33, %v12685_v30 }
0x1819   : > { %v12708_v28 = vsel %vm12707_vm1, %v12685_v30, %v12706_v23  ;;  %vm12716_vm1 = vcmp.eq.f32.partialorder %v12686_v29, 0.0 }
0x181a   : > { %v12711_v47 = vsel %vm12709_vm5, %v12710_v37, %v12708_v28  ;;  %v22453_v0 = vpop.eup %22452  ;;  %vm15296_vm5 = vmxor %vm23076_vm9, %vm22680_vm6 }
0x181b   : > { %22458 = vrcp.f32 %v12711_v47  ;;  %v12713_v52 = vmul.f32 %v22453_v0, %v12686_v29  ;;  %vm15299_vm9 = vmxor %vm23112_vm4, %vm22680_vm6 }
0x181c   : > { %v22455_v13 = vpop.eup %22454  ;;  %vm15301_vm4 = vmxor %vm23121_vm8, %vm22680_vm6 }
0x181d   : > { %v22457_v46 = vpop.eup %22456  ;;  %v12750_v3 = vmul.f32 %v22455_v13, %v25063_v50  ;;  %v12715_v24 = vsel %vm12714_vm3, %v12686_v29, %v12713_v52  ;;  %v12830_v50 = vld [vmem:[%s27217_s3 + $0x138] sm:$0xff]  ;;  %vm15303_vm8 = vmxor %vm23130_vm12, %vm22680_vm6  ;;  %v12801_v13 = vld [vmem:[%s27217_s3 + $0x50] sm:$0xff]  ;;  %vm2047_vm12 = vcmask 1041409  }
0x181e   : > { %v12748_v17 = vmul.f32 %v22457_v46, %v25065_v26  ;;  %v12718_v7 = vsel %vm12716_vm1, %v12717_v40, %v12715_v24  ;;  %v12846_v26 = vld [vmem:[%s27217_s3 + $0x1b8] sm:$0xff]  ;;  %v12817_v46 = vld [vmem:[%s27217_s3 + $0xd0] sm:$0xff] }
0x181f   : > { %22460 = vrcp.f32 %v12718_v7  ;;  %v12770_v4 = vmul.f32 %v25127_v56, %v12750_v3  ;;  %v21430_v1 = vpack.c.bf16 %v12846_v26, %v12830_v50  ;;  %v12847_v7 = vld [vmem:[%s27217_s3 + $0x1c0] sm:$0xff] }
0x1820   : > { %v12769_v44 = vmul.f32 %v25127_v56, %v12748_v17 }
0x1821   : > { %v25162_v51 = vadd.f32 %v25130_v16, %v12770_v4 }
0x1822   : > { %v25145_v8 = vadd.f32 %v25130_v16, %v12769_v44 }
0x1824   : > { %19333 = vmatmul.mubr.msk.f32.vlgmr.msra.gmra.mrb[140].mxu0 %vm1162_vm2, %v25145_v8  ;;  %19341 = vmatmul.mubr.msk.f32.vlgmr.msra.gmra.mrb[140].mxu1 %vm1162_vm2, %v25145_v8 }
0x1825   : > { %v22459_v35 = vpop.eup %22458  ;;  %13033 = vmatprep.mubr.f32.mxu0 %v27259_v15  ;;  %13146 = vmatprep.mubr.f32.mxu1 %v27259_v15 }
0x1826   : > { %v12752_v30 = vmul.f32 %v22459_v35, %v25073_v20  ;;  %21421 = vmatpush1.bf16.msra.mxu0 %v21420_v55  ;;  %21429 = vmatpush1.bf16.msra.mxu1 %v21428_v5 }
0x1827   : > { %21423 = vmatprep.subr.bf16.mxu0 %v21422_v53  ;;  %21431 = vmatprep.subr.bf16.mxu1 %v21430_v1 }
0x1828   : > { %v12771_v39 = vmul.f32 %v25127_v56, %v12752_v30  ;;  %19334 = vmatmul.mubr.msk.f32.gmra.mrb[142].mxu0 %vm1162_vm2, %v25162_v51  ;;  %19342 = vmatmul.mubr.msk.f32.gmra.mrb[142].mxu1 %vm1162_vm2, %v25162_v51 }
0x1829   : > { %13039 = vmatprep.mubr.f32.mxu0 %v27259_v15  ;;  %13152 = vmatprep.mubr.f32.mxu1 %v27259_v15  ;;  %v22461_v20 = vpop.eup %22460 }
0x182a   : > { %v25173_v21 = vadd.f32 %v25130_v16, %v12771_v39  ;;  %21425 = vmatpush1.bf16.msra.mxu0 %v21424_v61  ;;  %21433 = vmatpush1.bf16.msra.mxu1 %v21432_v42  ;;  %v12754_v14 = vmul.f32 %v22461_v20, %v25077_v48 }
0x182b   : > { %21435 = vmatprep.subr.bf16.mxu0 %v21434_v60  ;;  %21443 = vmatprep.subr.bf16.mxu1 %v21442_v11 }
0x182c   : > { %19335 = vmatmul.mubr.msk.f32.gmra.mrb[144].mxu0 %vm1162_vm2, %v25173_v21  ;;  %19343 = vmatmul.mubr.msk.f32.gmra.mrb[144].mxu1 %vm1162_vm2, %v25173_v21  ;;  %v12772_v18 = vmul.f32 %v25127_v56, %v12754_v14 }
0x182d   : > { %13045 = vmatprep.mubr.f32.mxu0 %v27259_v15  ;;  %13158 = vmatprep.mubr.f32.mxu1 %v27259_v15 }
0x182e   : > { %v25184_v29 = vadd.f32 %v25130_v16, %v12772_v18 }
0x1830   : > { %19336 = vmatmul.mubr.msk.f32.gmra.mrb[146].mxu0 %vm1162_vm2, %v25184_v29  ;;  %19344 = vmatmul.mubr.msk.f32.gmra.mrb[146].mxu1 %vm1162_vm2, %v25184_v29 }
0x1831   : > { %13051 = vmatprep.mubr.f32.mxu0 %v27259_v15  ;;  %13164 = vmatprep.mubr.f32.mxu1 %v27259_v15 }
0x1838   : > { %v12668_v48 = vpop.xlane.xlu0 %12667 }
0x1839   : > { %v12680_v6 = vmul.f32 0.03125, %v12668_v48  ;;  %v12665_v12 = vpop.xlane.xlu1 %12664 }
0x183a   : > { %v12679_v9 = vmul.f32 0.03125, %v12665_v12 }
0x183b   : > { %v12688_v32 = vadd.f32 1e-05, %v12680_v6 }
0x183c   : > { %v12687_v58 = vadd.f32 1e-05, %v12679_v9 }
0x183d   : > { %22462 = vrsqrt.f32 %v12688_v32  ;;  %vm12728_vm10 = vcmp.eq.f32.partialorder %v12688_v32, inf  ;;  %vm12730_vm3 = vcmp.eq.f32.partialorder %v12688_v32, 0.0  ;;  %v12731_v57 = vand.u32 2147483648, %v12688_v32 }
0x183e   : > { %22464 = vrsqrt.f32 %v12687_v58  ;;  %vm12721_vm1 = vcmp.eq.f32.partialorder %v12687_v58, inf  ;;  %v12724_v10 = vand.u32 2147483648, %v12687_v58 }
0x1840   : > { %v12674_v33 = vpop.xlane.xlu0 %12673 }
0x1841   : > { %v12682_v23 = vmul.f32 0.03125, %v12674_v33  ;;  %v12671_v37 = vpop.xlane.xlu1 %12670 }
0x1842   : > { %v12681_v28 = vmul.f32 0.03125, %v12671_v37 }
0x1843   : > { %v12690_v47 = vadd.f32 1e-05, %v12682_v23 }
0x1844   : > { %v12689_v0 = vadd.f32 1e-05, %v12681_v28 }
0x1845   : > { %22466 = vrsqrt.f32 %v12690_v47  ;;  %v25195_v52 = vpop.permute.xlu1 %15305  ;;  %vm12742_vm11 = vcmp.eq.f32.partialorder %v12690_v47, inf  ;;  %v12745_v38 = vand.u32 2147483648, %v12690_v47 }
0x1846   : > { %22468 = vrsqrt.f32 %v12689_v0  ;;  %v15308_v3 = vsel %vm15297_vm0, %v25195_v52, 4294967295  ;;  %v15307_v17 = vsel %vm15296_vm5, %v25195_v52, 4294967295  ;;  %vm12723_vm0 = vcmp.eq.f32.partialorder %v12687_v58, 0.0  ;;  %vm25227_vm5 = vmxor %vm23103_vm15, %vm22680_vm6 }
0x1847   : > { %v22463_v40 = vpop.eup %22462  ;;  %15319 = vperm.xlu1 %22188, %v15308_v3   ;;  %15316 = vperm.xlu0 %22189, %v15307_v17   ;;  %v15309_v4 = vsel %vm25205_vm7, %v25195_v52, 4294967295  ;;  %v15310_v55 = vsel %vm15299_vm9, %v25195_v52, 4294967295  ;;  %v15311_v1 = vsel %vm15300_vm14, %v25195_v52, 4294967295  ;;  %v15312_v43 = vsel %vm15301_vm4, %v25195_v52, 4294967295  ;;  %v12848_v3 = vld [vmem:[%s27217_s3 + $0x1c8] sm:$0xff]  ;;  %v12834_v17 = vld [vmem:[%s27217_s3 + $0x158] sm:$0xff] }
0x1848   : > { %v22465_v24 = vpop.eup %22464  ;;  %v12727_v62 = vmul.f32 %v22463_v40, %v12688_v32  ;;  %vm12744_vm7 = vcmp.eq.f32.partialorder %v12690_v47, 0.0  ;;  %v12738_v42 = vand.u32 2147483648, %v12689_v0  ;;  %v15313_v39 = vsel %vm25227_vm5, %v25195_v52, 4294967295  ;;  %v12832_v40 = vld [vmem:[%s27217_s3 + $0x148] sm:$0xff] }
0x1849   : > { %v12720_v19 = vmul.f32 %v22465_v24, %v12687_v58  ;;  %v15314_v20 = vsel %vm15303_vm8, %v25195_v52, 4294967295  ;;  %vm27340_vm15 = vmmov 0   ;;  %vm2048_vm9 = vcmask 1042434  }
0x184a   : > { %v12729_v44 = vsel %vm12728_vm10, %v12688_v32, %v12727_v62  ;;  %vm12735_vm10 = vcmp.eq.f32.partialorder %v12689_v0, inf  ;;  %v21444_v62 = vpack.c.bf16 %v12817_v46, %v12801_v13  ;;  %v14046_v13 = vld [vmem:[%s27215_s14 + $0x198] sm:$0xff]  ;;  %vm2054_vm14 = vcmask 1045509  }
0x184b   : > { %v12732_v50 = vsel %vm12730_vm3, %v12731_v57, %v12729_v44  ;;  %v12722_v26 = vsel %vm12721_vm1, %v12687_v58, %v12720_v19  ;;  %15322 = vperm.xlu1 %22188, %v15309_v4   ;;  %15325 = vperm.xlu0 %22189, %v15310_v55   ;;  %vm12737_vm3 = vcmp.eq.f32.partialorder %v12689_v0, 0.0  ;;  %v21438_v57 = vpack.c.bf16 %v12848_v3, %v12832_v40  ;;  %v12849_v44 = vld [vmem:[%s27217_s3 + $0x1d0] sm:$0xff]  ;;  %v12822_v4 = vld [vmem:[%s27217_s3 + $0xf8] sm:$0xff] }
0x184c   : > { %22470 = vrcp.f32 %v12732_v50  ;;  %v12725_v5 = vsel %vm12723_vm0, %v12724_v10, %v12722_v26  ;;  %v12804_v10 = vld [vmem:[%s27217_s3 + $0x68] sm:$0xff]  ;;  %v12806_v26 = vld [vmem:[%s27217_s3 + $0x78] sm:$0xff]  ;;  %v21440_v55 = vpack.c.bf16 %v12847_v7, %v12831_v41  ;;  %v13997_v3 = vld [vmem:[%s27215_s14 + $0x10] sm:$0xff]  ;;  %vm2050_vm1 = vcmask 1043459  }
0x184d   : > { %22472 = vrcp.f32 %v12725_v5  ;;  %v12820_v50 = vld [vmem:[%s27217_s3 + $0xe8] sm:$0xff]  ;;  %v21448_v5 = vpack.c.bf16 %v12849_v44, %v12833_v31  ;;  %v21458_v45 = vpack.c.bf16 %v12822_v4, %v12806_v26  ;;  %v14030_v41 = vld [vmem:[%s27215_s14 + $0x118] sm:$0xff]  ;;  %v14015_v7 = vld [vmem:[%s27215_s14 + $0xa0] sm:$0xff]  ;;  %vm2052_vm0 = vcmask 1044484  }
0x184e   : > { %v21450_v22 = vpack.c.bf16 %v12820_v50, %v12804_v10  ;;  %v14048_v31 = vld [vmem:[%s27215_s14 + $0x1a8] sm:$0xff]  ;;  %v13999_v50 = vld [vmem:[%s27215_s14 + $0x20] sm:$0xff]  ;;  %vm2056_vm4 = vcmask 1046534   ;;  %vm2058_vm5 = vcmask 1047559  }
0x184f   : > { %v22467_v53 = vpop.eup %22466  ;;  %15328 = vperm.xlu1 %22188, %v15311_v1   ;;  %15331 = vperm.xlu0 %22189, %v15312_v43   ;;  %v12819_v1 = vld [vmem:[%s27217_s3 + $0xe0] sm:$0xff]  ;;  %v12805_v43 = vld [vmem:[%s27217_s3 + $0x70] sm:$0xff]  ;;  %v14000_v26 = vld [vmem:[%s27215_s14 + $0x28] sm:$0xff] }
0x1850   : > { %v22469_v34 = vpop.eup %22468  ;;  %v12741_v63 = vmul.f32 %v22467_v53, %v12690_v47  ;;  %v12803_v53 = vld [vmem:[%s27217_s3 + $0x60] sm:$0xff] }
0x1851   : > { %v12734_v35 = vmul.f32 %v22469_v34, %v12689_v0  ;;  %v12821_v34 = vld [vmem:[%s27217_s3 + $0xf0] sm:$0xff] }
0x1852   : > { %v12743_v30 = vsel %vm12742_vm11, %v12690_v47, %v12741_v63  ;;  %v12836_v63 = vld [vmem:[%s27217_s3 + $0x168] sm:$0xff]  ;;  %v21460_v61 = vpack.c.bf16 %v12821_v34, %v12805_v43  ;;  %v14050_v43 = vld [vmem:[%s27215_s14 + $0x1b8] sm:$0xff]  ;;  %v21476_v34 = vpack.c.bf16 %v14000_v26, %v13999_v50  ;;  %v14025_v26 = vld [vmem:[%s27215_s14 + $0xf0] sm:$0xff] }
0x1853   : > { %v12746_v60 = vsel %vm12744_vm7, %v12745_v38, %v12743_v30  ;;  %v12736_v11 = vsel %vm12735_vm10, %v12689_v0, %v12734_v35  ;;  %15334 = vperm.xlu1 %22188, %v15313_v39   ;;  %15337 = vperm.xlu0 %22189, %v15314_v20   ;;  %v12815_v0 = vld [vmem:[%s27217_s3 + $0xc0] sm:$0xff]  ;;  %v12854_v38 = vld [vmem:[%s27217_s3 + $0x1f8] sm:$0xff]  ;;  %v21452_v35 = vpack.c.bf16 %v12819_v1, %v12803_v53  ;;  %v12837_v39 = vld [vmem:[%s27217_s3 + $0x170] sm:$0xff] }
0x1854   : > { %22474 = vrcp.f32 %v12746_v60  ;;  %v12739_v14 = vsel %vm12737_vm3, %v12738_v42, %v12736_v11  ;;  %v12835_v30 = vld [vmem:[%s27217_s3 + $0x160] sm:$0xff]  ;;  %v21454_v60 = vpack.c.bf16 %v12852_v59, %v12836_v63  ;;  %v21462_v11 = vpack.c.bf16 %v12854_v38, %v12838_v27  ;;  %v12853_v20 = vld [vmem:[%s27217_s3 + $0x1f0] sm:$0xff]  ;;  %v14018_v53 = vld [vmem:[%s27215_s14 + $0xb8] sm:$0xff] }
0x1855   : > { %22476 = vrcp.f32 %v12739_v14  ;;  %v12851_v42 = vld [vmem:[%s27217_s3 + $0x1e0] sm:$0xff]  ;;  %v14049_v1 = vld [vmem:[%s27215_s14 + $0x1b0] sm:$0xff]  ;;  %v14002_v27 = vld [vmem:[%s27215_s14 + $0x38] sm:$0xff] }
0x1856   : > { %v22471_v18 = vpop.eup %22470  ;;  %v14011_v14 = vld [vmem:[%s27215_s14 + $0x80] sm:$0xff]  ;;  %v14001_v59 = vld [vmem:[%s27215_s14 + $0x30] sm:$0xff]  ;;  %v14040_v50 = vld [vmem:[%s27215_s14 + $0x168] sm:$0xff] }
0x1857   : > { %v22473_v48 = vpop.eup %22472  ;;  %v12758_v6 = vmul.f32 %v22471_v18, %v25091_v2  ;;  %v14012_v18 = vld [vmem:[%s27215_s14 + $0x88] sm:$0xff] }
0x1858   : > { %v12756_v12 = vmul.f32 %v22473_v48, %v25093_v25  ;;  %v14043_v48 = vld [vmem:[%s27215_s14 + $0x180] sm:$0xff] }
0x1859   : > { %v12774_v32 = vmul.f32 %v25127_v56, %v12758_v6  ;;  %v14044_v6 = vld [vmem:[%s27215_s14 + $0x188] sm:$0xff] }
0x185a   : > { %v12773_v9 = vmul.f32 %v25127_v56, %v12756_v12  ;;  %v21456_v12 = vpack.c.bf16 %v12851_v42, %v12835_v30  ;;  %v14034_v30 = vld [vmem:[%s27215_s14 + $0x138] sm:$0xff]  ;;  %v14019_v42 = vld [vmem:[%s27215_s14 + $0xc0] sm:$0xff] }
0x185b   : > { %v25252_v2 = vadd.f32 %v25130_v16, %v12774_v32  ;;  %v21466_v32 = vpack.c.bf16 %v14012_v18, %v14011_v14  ;;  %v14003_v18 = vld [vmem:[%s27215_s14 + $0x40] sm:$0xff] }
0x185c   : > { %v25243_v58 = vadd.f32 %v25130_v16, %v12773_v9  ;;  %v21464_v9 = vpack.c.bf16 %v12853_v20, %v12837_v39  ;;  %v14052_v39 = vld [vmem:[%s27215_s14 + $0x1c8] sm:$0xff]  ;;  %v21480_v20 = vpack.c.bf16 %v14002_v27, %v14001_v59  ;;  %v14042_v59 = vld [vmem:[%s27215_s14 + $0x178] sm:$0xff]  ;;  %v14075_v27 = vld [vmem:[%s27215_s14 + $0x280] sm:$0xff] }
0x185e   : > { %v22475_v33 = vpop.eup %22474  ;;  %19337 = vmatmul.mubr.msk.f32.gmra.mrb[148].mxu0 %vm1162_vm2, %v25243_v58  ;;  %19345 = vmatmul.mubr.msk.f32.gmra.mrb[148].mxu1 %vm1162_vm2, %v25243_v58 }
0x185f   : > { %v22477_v23 = vpop.eup %22476  ;;  %13057 = vmatprep.mubr.f32.mxu0 %v27259_v15  ;;  %13170 = vmatprep.mubr.f32.mxu1 %v27259_v15  ;;  %v12762_v25 = vmul.f32 %v22475_v33, %v25110_v36  ;;  %v21498_v33 = vpack.c.bf16 %v14044_v6, %v14043_v48  ;;  %v14004_v48 = vld [vmem:[%s27215_s14 + $0x48] sm:$0xff] }
0x1860   : > { %v12760_v37 = vmul.f32 %v22477_v23, %v25113_v54  ;;  %v13995_v23 = vld [vmem:[%s27215_s14] sm:$0xff] }
0x1861   : > { %v12776_v36 = vmul.f32 %v25127_v56, %v12762_v25  ;;  %v13996_v25 = vld [vmem:[%s27215_s14 + $0x8] sm:$0xff] }
0x1862   : > { %v12775_v28 = vmul.f32 %v25127_v56, %v12760_v37  ;;  %19338 = vmatmul.mubr.msk.f32.gmra.mrb[150].mxu0 %vm1162_vm2, %v25252_v2  ;;  %19346 = vmatmul.mubr.msk.f32.gmra.mrb[150].mxu1 %vm1162_vm2, %v25252_v2  ;;  %v12799_v56 = vld [vmem:[%s27217_s3 + $0x40] sm:$0xff]  ;;  %v21468_v46 = vpack.c.bf16 %v13996_v25, %v13995_v23  ;;  %v14022_v23 = vld [vmem:[%s27215_s14 + $0xd8] sm:$0xff]  ;;  %v14053_v25 = vld [vmem:[%s27215_s14 + $0x1d0] sm:$0xff] }
0x1863   : > { %13063 = vmatprep.mubr.f32.mxu0 %v27259_v15  ;;  %13176 = vmatprep.mubr.f32.mxu1 %v27259_v15  ;;  %v25274_v47 = vadd.f32 %v25130_v16, %v12776_v36  ;;  %v21436_v24 = vpack.c.bf16 %v12815_v0, %v12799_v56  ;;  %v14027_v37 = vld [vmem:[%s27215_s14 + $0x100] sm:$0xff]  ;;  %v14013_v36 = vld [vmem:[%s27215_s14 + $0x90] sm:$0xff]  ;;  %v14014_v56 = vld [vmem:[%s27215_s14 + $0x98] sm:$0xff] }
0x1864   : > { %v25265_v54 = vadd.f32 %v25130_v16, %v12775_v28  ;;  %v12850_v16 = vld [vmem:[%s27217_s3 + $0x1d8] sm:$0xff]  ;;  %v14028_v28 = vld [vmem:[%s27215_s14 + $0x108] sm:$0xff]  ;;  %v14045_v0 = vld [vmem:[%s27215_s14 + $0x190] sm:$0xff]  ;;  %s27352_s3 = smov 96  }
0x1865   : > { %v21446_v19 = vpack.c.bf16 %v12850_v16, %v12834_v17  ;;  %v21500_v40 = vpack.c.bf16 %v14028_v28, %v14027_v37  ;;  %v13998_v17 = vld [vmem:[%s27215_s14 + $0x18] sm:$0xff]  ;;  %v21470_v16 = vpack.c.bf16 %v14014_v56, %v14013_v36  ;;  %v21484_v28 = vpack.c.bf16 %v14004_v48, %v14003_v18  ;;  %v14005_v56 = vld [vmem:[%s27215_s14 + $0x50] sm:$0xff]  ;;  %v25527_v18 = vld [vmem:[%s27216_s8] sm:$0xff] }
0x1866   : > { %19339 = vmatmul.mubr.msk.f32.gmra.mrb[152].mxu0 %vm1162_vm2, %v25265_v54  ;;  %19347 = vmatmul.mubr.msk.f32.gmra.mrb[152].mxu1 %vm1162_vm2, %v25265_v54  ;;  %v21472_v44 = vpack.c.bf16 %v13998_v17, %v13997_v3  ;;  %v14054_v37 = vld [vmem:[%s27215_s14 + $0x1d8] sm:$0xff]  ;;  %v14023_v17 = vld [vmem:[%s27215_s14 + $0xe0] sm:$0xff] }
0x1867   : > { %13069 = vmatprep.mubr.f32.mxu0 %v27259_v15  ;;  %13182 = vmatprep.mubr.f32.mxu1 %v27259_v15  ;;  %v14038_v3 = vld [vmem:[%s27215_s14 + $0x158] sm:$0xff] }
0x186a   : > { %19340 = vmatmul.mubr.msk.f32.gmra.mrb[154].mxu0 %vm1162_vm2, %v25274_v47  ;;  %19348 = vmatmul.mubr.msk.f32.gmra.mrb[154].mxu1 %vm1162_vm2, %v25274_v47 }
0x186b   : > { %13253 = vmatprep.mubr.f32.mxu0 %v27259_v15  ;;  %13366 = vmatprep.mubr.f32.mxu1 %v27259_v15 }
0x186e   : > { %19349 = vmatmul.mubr.msk.f32.vlgmr.msra.gmra.mrb[156].mxu0 %vm1162_vm2, %v25145_v8  ;;  %19357 = vmatmul.mubr.msk.f32.vlgmr.msra.gmra.mrb[156].mxu1 %vm1162_vm2, %v25145_v8 }
0x186f   : > { %13259 = vmatprep.mubr.f32.mxu0 %v27259_v15  ;;  %13372 = vmatprep.mubr.f32.mxu1 %v27259_v15 }
0x1870   : > { %21437 = vmatpush1.bf16.msra.mxu0 %v21436_v24  ;;  %21445 = vmatpush1.bf16.msra.mxu1 %v21444_v62  ;;  %v21502_v24 = vpack.c.bf16 %v14046_v13, %v14045_v0  ;;  %v14029_v62 = vld [vmem:[%s27215_s14 + $0x110] sm:$0xff]  ;;  %v14006_v0 = vld [vmem:[%s27215_s14 + $0x58] sm:$0xff] }
0x1871   : > { %21439 = vmatprep.subr.bf16.mxu0 %v21438_v57  ;;  %21447 = vmatprep.subr.bf16.mxu1 %v21446_v19  ;;  %v14016_v57 = vld [vmem:[%s27215_s14 + $0xa8] sm:$0xff]  ;;  %v14047_v19 = vld [vmem:[%s27215_s14 + $0x1a0] sm:$0xff]  ;;  %v21504_v10 = vpack.c.bf16 %v14030_v41, %v14029_v62  ;;  %v21488_v41 = vpack.c.bf16 %v14006_v0, %v14005_v56  ;;  %v14077_v0 = vld [vmem:[%s27215_s14 + $0x290] sm:$0xff] }
0x1872   : > { %19350 = vmatmul.mubr.msk.f32.gmra.mrb[158].mxu0 %vm1162_vm2, %v25162_v51  ;;  %19358 = vmatmul.mubr.msk.f32.gmra.mrb[158].mxu1 %vm1162_vm2, %v25162_v51  ;;  %v21474_v4 = vpack.c.bf16 %v14016_v57, %v14015_v7  ;;  %v14056_v62 = vld [vmem:[%s27215_s14 + $0x1e8] sm:$0xff]  ;;  %v14007_v57 = vld [vmem:[%s27215_s14 + $0x60] sm:$0xff] }
0x1873   : > { %13265 = vmatprep.mubr.f32.mxu0 %v27259_v15  ;;  %13378 = vmatprep.mubr.f32.mxu1 %v27259_v15  ;;  %v14092_v56 = vld [vmem:[%s27215_s14 + $0x308] sm:$0xff] }
0x1874   : > { %21441 = vmatpush1.bf16.msra.mxu0 %v21440_v55  ;;  %21449 = vmatpush1.bf16.msra.mxu1 %v21448_v5  ;;  %v21506_v55 = vpack.c.bf16 %v14048_v31, %v14047_v19  ;;  %v14031_v5 = vld [vmem:[%s27215_s14 + $0x120] sm:$0xff]  ;;  %v14008_v19 = vld [vmem:[%s27215_s14 + $0x68] sm:$0xff] }
0x1875   : > { %21451 = vmatprep.subr.bf16.mxu0 %v21450_v22  ;;  %21459 = vmatprep.subr.bf16.mxu1 %v21458_v45  ;;  %v14032_v22 = vld [vmem:[%s27215_s14 + $0x128] sm:$0xff]  ;;  %v14017_v45 = vld [vmem:[%s27215_s14 + $0xb0] sm:$0xff] }
0x1876   : > { %19351 = vmatmul.mubr.msk.f32.gmra.mrb[160].mxu0 %vm1162_vm2, %v25173_v21  ;;  %19359 = vmatmul.mubr.msk.f32.gmra.mrb[160].mxu1 %vm1162_vm2, %v25173_v21  ;;  %v21508_v63 = vpack.c.bf16 %v14032_v22, %v14031_v5  ;;  %v21478_v38 = vpack.c.bf16 %v14018_v53, %v14017_v45  ;;  %v14058_v5 = vld [vmem:[%s27215_s14 + $0x1f8] sm:$0xff]  ;;  %v21492_v22 = vpack.c.bf16 %v14008_v19, %v14007_v57  ;;  %v14009_v53 = vld [vmem:[%s27215_s14 + $0x70] sm:$0xff] }
0x1877   : > { %13271 = vmatprep.mubr.f32.mxu0 %v27259_v15  ;;  %13384 = vmatprep.mubr.f32.mxu1 %v27259_v15 }
0x187a   : > { %19352 = vmatmul.mubr.msk.f32.gmra.mrb[162].mxu0 %vm1162_vm2, %v25184_v29  ;;  %19360 = vmatmul.mubr.msk.f32.gmra.mrb[162].mxu1 %vm1162_vm2, %v25184_v29 }
0x187b   : > { %13277 = vmatprep.mubr.f32.mxu0 %v27259_v15  ;;  %13390 = vmatprep.mubr.f32.mxu1 %v27259_v15 }
0x187e   : > { %19353 = vmatmul.mubr.msk.f32.gmra.mrb[164].mxu0 %vm1162_vm2, %v25243_v58  ;;  %19361 = vmatmul.mubr.msk.f32.gmra.mrb[164].mxu1 %vm1162_vm2, %v25243_v58 }
0x187f   : > { %13283 = vmatprep.mubr.f32.mxu0 %v27259_v15  ;;  %13396 = vmatprep.mubr.f32.mxu1 %v27259_v15 }
0x1882   : > { %19354 = vmatmul.mubr.msk.f32.gmra.mrb[166].mxu0 %vm1162_vm2, %v25252_v2  ;;  %19362 = vmatmul.mubr.msk.f32.gmra.mrb[166].mxu1 %vm1162_vm2, %v25252_v2 }
0x1883   : > { %13289 = vmatprep.mubr.f32.mxu0 %v27259_v15  ;;  %13402 = vmatprep.mubr.f32.mxu1 %v27259_v15 }
0x1886   : > { %19355 = vmatmul.mubr.msk.f32.gmra.mrb[168].mxu0 %vm1162_vm2, %v25265_v54  ;;  %19363 = vmatmul.mubr.msk.f32.gmra.mrb[168].mxu1 %vm1162_vm2, %v25265_v54 }
0x1887   : > { %13295 = vmatprep.mubr.f32.mxu0 %v27259_v15  ;;  %13408 = vmatprep.mubr.f32.mxu1 %v27259_v15 }
0x188a   : > { %19356 = vmatmul.mubr.msk.f32.gmra.mrb[170].mxu0 %vm1162_vm2, %v25274_v47  ;;  %19364 = vmatmul.mubr.msk.f32.gmra.mrb[170].mxu1 %vm1162_vm2, %v25274_v47 }
0x188b   : > { %13479 = vmatprep.mubr.f32.mxu0 %v27259_v15  ;;  %13592 = vmatprep.mubr.f32.mxu1 %v27259_v15 }
0x188e   : > { %19365 = vmatmul.mubr.msk.f32.vlgmr.msra.gmra.mrb[172].mxu0 %vm1162_vm2, %v25145_v8  ;;  %19373 = vmatmul.mubr.msk.f32.vlgmr.msra.gmra.mrb[172].mxu1 %vm1162_vm2, %v25145_v8 }
0x188f   : > { %13485 = vmatprep.mubr.f32.mxu0 %v27259_v15  ;;  %13598 = vmatprep.mubr.f32.mxu1 %v27259_v15 }
0x1890   : > { %21453 = vmatpush1.bf16.msra.mxu0 %v21452_v35  ;;  %21461 = vmatpush1.bf16.msra.mxu1 %v21460_v61  ;;  %v21510_v35 = vpack.c.bf16 %v14050_v43, %v14049_v1  ;;  %v14033_v61 = vld [vmem:[%s27215_s14 + $0x130] sm:$0xff]  ;;  %v14010_v1 = vld [vmem:[%s27215_s14 + $0x78] sm:$0xff] }
0x1891   : > { %21455 = vmatprep.subr.bf16.mxu0 %v21454_v60  ;;  %21463 = vmatprep.subr.bf16.mxu1 %v21462_v11  ;;  %v14020_v60 = vld [vmem:[%s27215_s14 + $0xc8] sm:$0xff]  ;;  %v14051_v11 = vld [vmem:[%s27215_s14 + $0x1c0] sm:$0xff]  ;;  %v21512_v14 = vpack.c.bf16 %v14034_v30, %v14033_v61  ;;  %v21496_v30 = vpack.c.bf16 %v14010_v1, %v14009_v53 }
0x1892   : > { %19366 = vmatmul.mubr.msk.f32.gmra.mrb[174].mxu0 %vm1162_vm2, %v25162_v51  ;;  %19374 = vmatmul.mubr.msk.f32.gmra.mrb[174].mxu1 %vm1162_vm2, %v25162_v51  ;;  %v21482_v6 = vpack.c.bf16 %v14020_v60, %v14019_v42  ;;  %v14108_v61 = vld [vmem:[%s27215_s14 + $0x388] sm:$0xff] }
0x1893   : > { %13491 = vmatprep.mubr.f32.mxu0 %v27259_v15  ;;  %13604 = vmatprep.mubr.f32.mxu1 %v27259_v15  ;;  %v14080_v53 = vld [vmem:[%s27215_s14 + $0x2a8] sm:$0xff] }
0x1894   : > { %21457 = vmatpush1.bf16.msra.mxu0 %v21456_v12  ;;  %21465 = vmatpush1.bf16.msra.mxu1 %v21464_v9  ;;  %v21514_v12 = vpack.c.bf16 %v14052_v39, %v14051_v11  ;;  %v14035_v9 = vld [vmem:[%s27215_s14 + $0x140] sm:$0xff]  ;;  %v27339_v39 = vld [vmem:[#allocation47_spill] sm:$0xff] }
0x1895   : > { %21467 = vmatprep.subr.bf16.mxu0 %v21466_v32  ;;  %21499 = vmatprep.subr.bf16.mxu1 %v21498_v33  ;;  %v14036_v32 = vld [vmem:[%s27215_s14 + $0x148] sm:$0xff]  ;;  %v14021_v33 = vld [vmem:[%s27215_s14 + $0xd0] sm:$0xff]  ;;  %v25530_v48 = vsub.s32 1, %v27339_v39 }
0x1896   : > { %19367 = vmatmul.mubr.msk.f32.gmra.mrb[176].mxu0 %vm1162_vm2, %v25173_v21  ;;  %19375 = vmatmul.mubr.msk.f32.gmra.mrb[176].mxu1 %vm1162_vm2, %v25173_v21  ;;  %v21516_v36 = vpack.c.bf16 %v14036_v32, %v14035_v9  ;;  %v21486_v13 = vpack.c.bf16 %v14022_v23, %v14021_v33  ;;  %v14059_v23 = vld [vmem:[%s27215_s14 + $0x200] sm:$0xff] }
0x1897   : > { %13497 = vmatprep.mubr.f32.mxu0 %v27259_v15  ;;  %13610 = vmatprep.mubr.f32.mxu1 %v27259_v15  ;;  %v25545_v32 = vrot.slane %v25527_v18, %v25530_v48 }
0x189a   : > { %19368 = vmatmul.mubr.msk.f32.gmra.mrb[178].mxu0 %vm1162_vm2, %v25184_v29  ;;  %19376 = vmatmul.mubr.msk.f32.gmra.mrb[178].mxu1 %vm1162_vm2, %v25184_v29 }
0x189b   : > { %13503 = vmatprep.mubr.f32.mxu0 %v27259_v15  ;;  %13616 = vmatprep.mubr.f32.mxu1 %v27259_v15 }
0x189e   : > { %19369 = vmatmul.mubr.msk.f32.gmra.mrb[180].mxu0 %vm1162_vm2, %v25243_v58  ;;  %19377 = vmatmul.mubr.msk.f32.gmra.mrb[180].mxu1 %vm1162_vm2, %v25243_v58 }
0x189f   : > { %13509 = vmatprep.mubr.f32.mxu0 %v27259_v15  ;;  %13622 = vmatprep.mubr.f32.mxu1 %v27259_v15 }
0x18a2   : > { %19370 = vmatmul.mubr.msk.f32.gmra.mrb[182].mxu0 %vm1162_vm2, %v25252_v2  ;;  %19378 = vmatmul.mubr.msk.f32.gmra.mrb[182].mxu1 %vm1162_vm2, %v25252_v2 }
0x18a3   : > { %13515 = vmatprep.mubr.f32.mxu0 %v27259_v15  ;;  %13628 = vmatprep.mubr.f32.mxu1 %v27259_v15 }
0x18a6   : > { %19371 = vmatmul.mubr.msk.f32.gmra.mrb[184].mxu0 %vm1162_vm2, %v25265_v54  ;;  %19379 = vmatmul.mubr.msk.f32.gmra.mrb[184].mxu1 %vm1162_vm2, %v25265_v54 }
0x18a7   : > { %13521 = vmatprep.mubr.f32.mxu0 %v27259_v15  ;;  %13634 = vmatprep.mubr.f32.mxu1 %v27259_v15 }
0x18aa   : > { %19372 = vmatmul.mubr.msk.f32.gmra.mrb[186].mxu0 %vm1162_vm2, %v25274_v47  ;;  %19380 = vmatmul.mubr.msk.f32.gmra.mrb[186].mxu1 %vm1162_vm2, %v25274_v47 }
0x18ab   : > { %13705 = vmatprep.mubr.f32.mxu0 %v27259_v15  ;;  %13818 = vmatprep.mubr.f32.mxu1 %v27259_v15 }
0x18ae   : > { %19381 = vmatmul.mubr.msk.f32.vlgmr.msra.gmra.mrb[188].mxu0 %vm1162_vm2, %v25145_v8  ;;  %19389 = vmatmul.mubr.msk.f32.vlgmr.msra.gmra.mrb[188].mxu1 %vm1162_vm2, %v25145_v8 }
0x18af   : > { %13711 = vmatprep.mubr.f32.mxu0 %v27259_v15  ;;  %13824 = vmatprep.mubr.f32.mxu1 %v27259_v15 }
0x18b0   : > { %21469 = vmatpush3.bf16.msra.mxu0 %v21468_v46  ;;  %21501 = vmatpush3.bf16.msra.mxu1 %v21500_v40  ;;  %v21518_v46 = vpack.c.bf16 %v14054_v37, %v14053_v25  ;;  %v14037_v40 = vld [vmem:[%s27215_s14 + $0x150] sm:$0xff]  ;;  %v14060_v25 = vld [vmem:[%s27215_s14 + $0x208] sm:$0xff] }
0x18b1   : > { %21471 = vmatprep.subr.bf16.mxu0 %v21470_v16  ;;  %21503 = vmatprep.subr.bf16.mxu1 %v21502_v24  ;;  %v14024_v16 = vld [vmem:[%s27215_s14 + $0xe8] sm:$0xff]  ;;  %v14055_v24 = vld [vmem:[%s27215_s14 + $0x1e0] sm:$0xff]  ;;  %v21520_v7 = vpack.c.bf16 %v14038_v3, %v14037_v40  ;;  %v21532_v57 = vpack.c.bf16 %v14060_v25, %v14059_v23 }
0x18b2   : > { %19382 = vmatmul.mubr.msk.f32.gmra.mrb[190].mxu0 %vm1162_vm2, %v25162_v51  ;;  %19390 = vmatmul.mubr.msk.f32.gmra.mrb[190].mxu1 %vm1162_vm2, %v25162_v51  ;;  %v21490_v31 = vpack.c.bf16 %v14024_v16, %v14023_v17  ;;  %v14078_v17 = vld [vmem:[%s27215_s14 + $0x298] sm:$0xff]  ;;  %v14109_v16 = vld [vmem:[%s27215_s14 + $0x390] sm:$0xff] }
0x18b3   : > { %13717 = vmatprep.mubr.f32.mxu0 %v27259_v15  ;;  %13830 = vmatprep.mubr.f32.mxu1 %v27259_v15 }
0x18b4   : > { %21473 = vmatpush3.bf16.msra.mxu0 %v21472_v44  ;;  %21505 = vmatpush3.bf16.msra.mxu1 %v21504_v10  ;;  %v21522_v44 = vpack.c.bf16 %v14056_v62, %v14055_v24  ;;  %v14039_v10 = vld [vmem:[%s27215_s14 + $0x160] sm:$0xff]  ;;  %v14110_v24 = vld [vmem:[%s27215_s14 + $0x398] sm:$0xff] }
0x18b5   : > { %21475 = vmatprep.subr.bf16.mxu0 %v21474_v4  ;;  %21507 = vmatprep.subr.bf16.mxu1 %v21506_v55  ;;  %v14026_v4 = vld [vmem:[%s27215_s14 + $0xf8] sm:$0xff]  ;;  %v14057_v55 = vld [vmem:[%s27215_s14 + $0x1f0] sm:$0xff]  ;;  %v21524_v45 = vpack.c.bf16 %v14040_v50, %v14039_v10 }
0x18b6   : > { %19383 = vmatmul.mubr.msk.f32.gmra.mrb[192].mxu0 %vm1162_vm2, %v25173_v21  ;;  %19391 = vmatmul.mubr.msk.f32.gmra.mrb[192].mxu1 %vm1162_vm2, %v25173_v21  ;;  %v21494_v43 = vpack.c.bf16 %v14026_v4, %v14025_v26  ;;  %v14094_v10 = vld [vmem:[%s27215_s14 + $0x318] sm:$0xff] }
0x18b7   : > { %13723 = vmatprep.mubr.f32.mxu0 %v27259_v15  ;;  %13836 = vmatprep.mubr.f32.mxu1 %v27259_v15 }
0x18b8   : > { %21477 = vmatpush3.bf16.msra.mxu0 %v21476_v34  ;;  %21509 = vmatpush3.bf16.msra.mxu1 %v21508_v63  ;;  %v21526_v34 = vpack.c.bf16 %v14058_v5, %v14057_v55  ;;  %v14041_v63 = vld [vmem:[%s27215_s14 + $0x170] sm:$0xff]  ;;  %v21534_v5 = vpack.c.bf16 %v14078_v17, %v14077_v0  ;;  %v14064_v0 = vld [vmem:[%s27215_s14 + $0x228] sm:$0xff] }
0x18b9   : > { %21479 = vmatprep.subr.bf16.mxu0 %v21478_v38  ;;  %21511 = vmatprep.subr.bf16.mxu1 %v21510_v35  ;;  %v14076_v38 = vld [vmem:[%s27215_s14 + $0x288] sm:$0xff]  ;;  %v14107_v35 = vld [vmem:[%s27215_s14 + $0x380] sm:$0xff]  ;;  %v21528_v42 = vpack.c.bf16 %v14042_v59, %v14041_v63 }
0x18ba   : > { %19384 = vmatmul.mubr.msk.f32.gmra.mrb[194].mxu0 %vm1162_vm2, %v25184_v29  ;;  %19392 = vmatmul.mubr.msk.f32.gmra.mrb[194].mxu1 %vm1162_vm2, %v25184_v29  ;;  %v21530_v60 = vpack.c.bf16 %v14076_v38, %v14075_v27  ;;  %v21562_v11 = vpack.c.bf16 %v14108_v61, %v14107_v35  ;;  %v14111_v38 = vld [vmem:[%s27215_s14 + $0x3a0] sm:$0xff]  ;;  %v14112_v35 = vld [vmem:[%s27215_s14 + $0x3a8] sm:$0xff] }
0x18bb   : > { %13729 = vmatprep.mubr.f32.mxu0 %v27259_v15  ;;  %13842 = vmatprep.mubr.f32.mxu1 %v27259_v15 }
0x18bc   : > { %21481 = vmatpush3.bf16.msra.mxu0 %v21480_v20  ;;  %21513 = vmatpush3.bf16.msra.mxu1 %v21512_v14  ;;  %v25521_v20 = vsub.s32 0, %v27339_v39  ;;  %v25524_v14 = vsub.s32 2, %v27339_v39 }
0x18bd   : > { %21483 = vmatprep.subr.bf16.mxu0 %v21482_v6  ;;  %21515 = vmatprep.subr.bf16.mxu1 %v21514_v12  ;;  %v25533_v6 = vsub.s32 3, %v27339_v39 }
0x18be   : > { %19385 = vmatmul.mubr.msk.f32.gmra.mrb[196].mxu0 %vm1162_vm2, %v25243_v58  ;;  %19393 = vmatmul.mubr.msk.f32.gmra.mrb[196].mxu1 %vm1162_vm2, %v25243_v58  ;;  %v25537_v12 = vrot.slane %v25527_v18, %v25521_v20  ;;  %v25541_v9 = vrot.slane %v25527_v18, %v25524_v14 }
0x18bf   : > { %13735 = vmatprep.mubr.f32.mxu0 %v27259_v15  ;;  %13848 = vmatprep.mubr.f32.mxu1 %v27259_v15  ;;  %v25549_v33 = vrot.slane %v25527_v18, %v25533_v6 }
0x18c0   : > { %21485 = vmatpush3.bf16.msra.mxu0 %v21484_v28  ;;  %21517 = vmatpush3.bf16.msra.mxu1 %v21516_v36  ;;  %v14091_v36 = vld [vmem:[%s27215_s14 + $0x300] sm:$0xff] }
0x18c1   : > { %21487 = vmatprep.subr.bf16.mxu0 %v21486_v13  ;;  %21519 = vmatprep.subr.bf16.mxu1 %v21518_v46  ;;  %v21564_v19 = vpack.c.bf16 %v14092_v56, %v14091_v36  ;;  %v21570_v56 = vpack.c.bf16 %v14112_v35, %v14111_v38  ;;  %v14097_v35 = vld [vmem:[%s27215_s14 + $0x330] sm:$0xff] }
0x18c2   : > { %19386 = vmatmul.mubr.msk.f32.gmra.mrb[198].mxu0 %vm1162_vm2, %v25252_v2  ;;  %19394 = vmatmul.mubr.msk.f32.gmra.mrb[198].mxu1 %vm1162_vm2, %v25252_v2 }
0x18c3   : > { %13741 = vmatprep.mubr.f32.mxu0 %v27259_v15  ;;  %13854 = vmatprep.mubr.f32.mxu1 %v27259_v15 }
0x18c4   : > { %21489 = vmatpush3.bf16.msra.mxu0 %v21488_v41  ;;  %21521 = vmatpush3.bf16.msra.mxu1 %v21520_v7  ;;  %v14061_v7 = vld [vmem:[%s27215_s14 + $0x210] sm:$0xff] }
0x18c5   : > { %21491 = vmatprep.subr.bf16.mxu0 %v21490_v31  ;;  %21523 = vmatprep.subr.bf16.mxu1 %v21522_v44  ;;  %v14062_v31 = vld [vmem:[%s27215_s14 + $0x218] sm:$0xff]  ;;  %v14093_v44 = vld [vmem:[%s27215_s14 + $0x310] sm:$0xff] }
0x18c6   : > { %19387 = vmatmul.mubr.msk.f32.gmra.mrb[200].mxu0 %vm1162_vm2, %v25265_v54  ;;  %19395 = vmatmul.mubr.msk.f32.gmra.mrb[200].mxu1 %vm1162_vm2, %v25265_v54 }
0x18c7   : > { %13747 = vmatprep.mubr.f32.mxu0 %v27259_v15  ;;  %13860 = vmatprep.mubr.f32.mxu1 %v27259_v15 }
0x18c8   : > { %21493 = vmatpush3.bf16.msra.mxu0 %v21492_v22  ;;  %21525 = vmatpush3.bf16.msra.mxu1 %v21524_v45  ;;  %v21566_v22 = vpack.c.bf16 %v14110_v24, %v14109_v16  ;;  %v14079_v45 = vld [vmem:[%s27215_s14 + $0x2a0] sm:$0xff] }
0x18c9   : > { %21495 = vmatprep.subr.bf16.mxu0 %v21494_v43  ;;  %21527 = vmatprep.subr.bf16.mxu1 %v21526_v34  ;;  %v21538_v36 = vpack.c.bf16 %v14080_v53, %v14079_v45 }
0x18ca   : > { %19388 = vmatmul.mubr.msk.f32.gmra.mrb[202].mxu0 %vm1162_vm2, %v25274_v47  ;;  %19396 = vmatmul.mubr.msk.f32.gmra.mrb[202].mxu1 %vm1162_vm2, %v25274_v47 }
0x18cc   : > { %21497 = vmatpush3.bf16.msra.mxu0 %v21496_v30  ;;  %21529 = vmatpush3.bf16.msra.mxu1 %v21528_v42  ;;  %v21536_v42 = vpack.c.bf16 %v14062_v31, %v14061_v7  ;;  %v14113_v31 = vld [vmem:[%s27215_s14 + $0x3b0] sm:$0xff] }
0x18cd   : > { %21531 = vmatprep.subr.bf16.mxu0 %v21530_v60  ;;  %21563 = vmatprep.subr.bf16.mxu1 %v21562_v11  ;;  %v21568_v60 = vpack.c.bf16 %v14094_v10, %v14093_v44  ;;  %v14063_v11 = vld [vmem:[%s27215_s14 + $0x220] sm:$0xff]  ;;  %v14114_v44 = vld [vmem:[%s27215_s14 + $0x3b8] sm:$0xff] }
0x18f7   : > { %v13029_v37 = vpop.f32.mrb[140].mxu0  ;;  %v13142_v28 = vpop.f32.mrb[140].mxu1 }
0x18f8   : > { %v13030_v13 = vadd.f32 %v13029_v37, %v25537_v12  ;;  %v13143_v46 = vadd.f32 %v13142_v28, %v25541_v9  ;;  %v13031_v40 = vpop.f32.mrb[141].mxu0  ;;  %v13144_v3 = vpop.f32.mrb[141].mxu1 }
0x18f9   : > { %v13032_v62 = vadd.f32 %v13031_v40, %v25545_v32  ;;  %v13145_v41 = vadd.f32 %v13144_v3, %v25549_v33 }
0x18fa   : > { %v13867_v1 = vmax.f32 %v13030_v13, 0.0  ;;  %v13869_v43 = vmax.f32 %v13143_v46, 0.0  ;;  %v14095_v13 = vld [vmem:[%s27215_s14 + $0x320] sm:$0xff] }
0x18fb   : > { %v13868_v50 = vmax.f32 %v13032_v62, 0.0  ;;  %v13870_v26 = vmax.f32 %v13145_v41, 0.0  ;;  %v13035_v4 = vpop.f32.mrb[142].mxu0  ;;  %v13148_v55 = vpop.f32.mrb[142].mxu1  ;;  %v14096_v62 = vld [vmem:[%s27215_s14 + $0x328] sm:$0xff]  ;;  %v14081_v41 = vld [vmem:[%s27215_s14 + $0x2b0] sm:$0xff] }
0x18fc   : > { %v13036_v34 = vadd.f32 %v13035_v4, %v25537_v12  ;;  %v13149_v63 = vadd.f32 %v13148_v55, %v25541_v9  ;;  %v13037_v59 = vpop.f32.mrb[143].mxu0  ;;  %v13150_v27 = vpop.f32.mrb[143].mxu1  ;;  %v21572_v4 = vpack.c.bf16 %v14096_v62, %v14095_v13  ;;  %v14068_v13 = vld [vmem:[%s27215_s14 + $0x248] sm:$0xff]  ;;  %v14085_v62 = vld [vmem:[%s27215_s14 + $0x2d0] sm:$0xff] }
0x18fd   : > { %v13038_v61 = vadd.f32 %v13037_v59, %v25545_v32  ;;  %v13151_v30 = vadd.f32 %v13150_v27, %v25549_v33  ;;  %14322 = vmatprep.mubr.f32.mxu0 %v13868_v50  ;;  %14427 = vmatprep.mubr.f32.mxu1 %v13870_v26  ;;  %v21540_v26 = vpack.c.bf16 %v14064_v0, %v14063_v11  ;;  %v14084_v11 = vld [vmem:[%s27215_s14 + $0x2c8] sm:$0xff]  ;;  %v14067_v0 = vld [vmem:[%s27215_s14 + $0x240] sm:$0xff] }
0x18fe   : > { %14323 = vmatmul.mubr.f32.vlgmr.msra.gmra.mrb[204].mxu0 %v13867_v1  ;;  %14428 = vmatmul.mubr.f32.vlgmr.msra.gmra.mrb[204].mxu1 %v13869_v43  ;;  %v13883_v46 = vmax.f32 %v13036_v34, 0.0  ;;  %v13885_v40 = vmax.f32 %v13149_v63, 0.0  ;;  %v21574_v1 = vpack.c.bf16 %v14114_v44, %v14113_v31  ;;  %v14065_v43 = vld [vmem:[%s27215_s14 + $0x230] sm:$0xff]  ;;  %v14066_v34 = vld [vmem:[%s27215_s14 + $0x238] sm:$0xff] }
0x18ff   : > { %v13884_v23 = vmax.f32 %v13038_v61, 0.0  ;;  %v13886_v25 = vmax.f32 %v13151_v30, 0.0  ;;  %v13041_v37 = vpop.f32.mrb[144].mxu0  ;;  %v13154_v28 = vpop.f32.mrb[144].mxu1  ;;  %21533 = vmatpush3.bf16.msra.mxu0 %v21532_v57  ;;  %21565 = vmatpush3.bf16.msra.mxu1 %v21564_v19  ;;  %v14082_v19 = vld [vmem:[%s27215_s14 + $0x2b8] sm:$0xff]  ;;  %v14083_v30 = vld [vmem:[%s27215_s14 + $0x2c0] sm:$0xff] }
0x1900   : > { %v13042_v3 = vadd.f32 %v13041_v37, %v25537_v12  ;;  %v13155_v17 = vadd.f32 %v13154_v28, %v25541_v9  ;;  %v13043_v16 = vpop.f32.mrb[145].mxu0  ;;  %v13156_v24 = vpop.f32.mrb[145].mxu1  ;;  %21535 = vmatprep.subr.bf16.mxu0 %v21534_v5  ;;  %21567 = vmatprep.subr.bf16.mxu1 %v21566_v22  ;;  %v21542_v53 = vpack.c.bf16 %v14082_v19, %v14081_v41  ;;  %v14098_v61 = vld [vmem:[%s27215_s14 + $0x338] sm:$0xff]  ;;  %v14069_v44 = vld [vmem:[%s27215_s14 + $0x250] sm:$0xff] }
0x1901   : > { %v13044_v7 = vadd.f32 %v13043_v16, %v25545_v32  ;;  %v13157_v57 = vadd.f32 %v13156_v24, %v25549_v33  ;;  %14327 = vmatprep.mubr.f32.mxu0 %v13884_v23  ;;  %14432 = vmatprep.mubr.f32.mxu1 %v13886_v25  ;;  %v14115_v23 = vld [vmem:[%s27215_s14 + $0x3c0] sm:$0xff]  ;;  %v14116_v25 = vld [vmem:[%s27215_s14 + $0x3c8] sm:$0xff]  ;;  %v14086_v41 = vld [vmem:[%s27215_s14 + $0x2d8] sm:$0xff]  ;;  %v21548_v19 = vpack.c.bf16 %v14068_v13, %v14067_v0 }
0x1902   : > { %14328 = vmatmul.mubr.f32.gmra.mrb[206].mxu0 %v13883_v46  ;;  %14433 = vmatmul.mubr.f32.gmra.mrb[206].mxu1 %v13885_v40  ;;  %v13899_v55 = vmax.f32 %v13042_v3, 0.0  ;;  %v13901_v5 = vmax.f32 %v13155_v17, 0.0  ;;  %v21546_v3 = vpack.c.bf16 %v14084_v11, %v14083_v30  ;;  %v21578_v17 = vpack.c.bf16 %v14116_v25, %v14115_v23  ;;  %v14099_v16 = vld [vmem:[%s27215_s14 + $0x340] sm:$0xff]  ;;  %v14100_v24 = vld [vmem:[%s27215_s14 + $0x348] sm:$0xff]  ;;  %v14090_v30 = vld [vmem:[%s27215_s14 + $0x2f8] sm:$0xff] }
0x1903   : > { %v13900_v10 = vmax.f32 %v13044_v7, 0.0  ;;  %v13902_v50 = vmax.f32 %v13157_v57, 0.0  ;;  %21537 = vmatpush3.bf16.msra.mxu0 %v21536_v42  ;;  %21569 = vmatpush3.bf16.msra.mxu1 %v21568_v60  ;;  %v13047_v22 = vpop.f32.mrb[146].mxu0  ;;  %v13160_v45 = vpop.f32.mrb[146].mxu1  ;;  %v14117_v7 = vld [vmem:[%s27215_s14 + $0x3d0] sm:$0xff]  ;;  %v14118_v57 = vld [vmem:[%s27215_s14 + $0x3d8] sm:$0xff]  ;;  %v21580_v31 = vpack.c.bf16 %v14100_v24, %v14099_v16 }
0x1904   : > { %21539 = vmatprep.subr.bf16.mxu0 %v21538_v36  ;;  %21571 = vmatprep.subr.bf16.mxu1 %v21570_v56  ;;  %v13048_v63 = vadd.f32 %v13047_v22, %v25537_v12  ;;  %v13161_v59 = vadd.f32 %v13160_v45, %v25541_v9  ;;  %v13049_v27 = vpop.f32.mrb[147].mxu0  ;;  %v13162_v38 = vpop.f32.mrb[147].mxu1  ;;  %v21544_v36 = vpack.c.bf16 %v14066_v34, %v14065_v43  ;;  %v14088_v22 = vld [vmem:[%s27215_s14 + $0x2e8] sm:$0xff]  ;;  %v14119_v45 = vld [vmem:[%s27215_s14 + $0x3e0] sm:$0xff]  ;;  %v14073_v25 = vld [vmem:[%s27215_s14 + $0x270] sm:$0xff] }
0x1905   : > { %14332 = vmatprep.mubr.f32.mxu0 %v13900_v10  ;;  %14437 = vmatprep.mubr.f32.mxu1 %v13902_v50  ;;  %v13050_v42 = vadd.f32 %v13049_v27, %v25545_v32  ;;  %v13163_v60 = vadd.f32 %v13162_v38, %v25549_v33  ;;  %v21576_v56 = vpack.c.bf16 %v14098_v61, %v14097_v35  ;;  %v14070_v10 = vld [vmem:[%s27215_s14 + $0x258] sm:$0xff]  ;;  %v14071_v34 = vld [vmem:[%s27215_s14 + $0x260] sm:$0xff]  ;;  %v14104_v35 = vld [vmem:[%s27215_s14 + $0x368] sm:$0xff] }
0x1906   : > { %14333 = vmatmul.mubr.f32.gmra.mrb[208].mxu0 %v13899_v55  ;;  %14438 = vmatmul.mubr.f32.gmra.mrb[208].mxu1 %v13901_v5  ;;  %v13915_v46 = vmax.f32 %v13048_v63, 0.0  ;;  %v13917_v40 = vmax.f32 %v13161_v59, 0.0  ;;  %v21550_v50 = vpack.c.bf16 %v14086_v41, %v14085_v62  ;;  %v14102_v55 = vld [vmem:[%s27215_s14 + $0x358] sm:$0xff]  ;;  %v14087_v5 = vld [vmem:[%s27215_s14 + $0x2e0] sm:$0xff]  ;;  %v14072_v63 = vld [vmem:[%s27215_s14 + $0x268] sm:$0xff] }
0x1907   : > { %21541 = vmatpush3.bf16.msra.mxu0 %v21540_v26  ;;  %21573 = vmatpush3.bf16.msra.mxu1 %v21572_v4  ;;  %v13916_v37 = vmax.f32 %v13050_v42, 0.0  ;;  %v13918_v28 = vmax.f32 %v13163_v60, 0.0  ;;  %v21582_v26 = vpack.c.bf16 %v14118_v57, %v14117_v7  ;;  %v14101_v4 = vld [vmem:[%s27215_s14 + $0x350] sm:$0xff]  ;;  %v21554_v59 = vpack.c.bf16 %v14088_v22, %v14087_v5  ;;  %v14103_v38 = vld [vmem:[%s27215_s14 + $0x360] sm:$0xff]  ;;  %v14122_v60 = vld [vmem:[%s27215_s14 + $0x3f8] sm:$0xff] }
0x1908   : > { %21543 = vmatprep.subr.bf16.mxu0 %v21542_v53  ;;  %21575 = vmatprep.subr.bf16.mxu1 %v21574_v1  ;;  %v14120_v53 = vld [vmem:[%s27215_s14 + $0x3e8] sm:$0xff]  ;;  %v21552_v1 = vpack.c.bf16 %v14070_v10, %v14069_v44  ;;  %v21584_v43 = vpack.c.bf16 %v14102_v55, %v14101_v4  ;;  %v14089_v61 = vld [vmem:[%s27215_s14 + $0x2f0] sm:$0xff]  ;;  %v21556_v11 = vpack.c.bf16 %v14072_v63, %v14071_v34  ;;  %v14106_v0 = vld [vmem:[%s27215_s14 + $0x378] sm:$0xff] }
0x1909   : > { %14337 = vmatprep.mubr.f32.mxu0 %v13916_v37  ;;  %14442 = vmatprep.mubr.f32.mxu1 %v13918_v28  ;;  %v21586_v27 = vpack.c.bf16 %v14120_v53, %v14119_v45  ;;  %v14121_v42 = vld [vmem:[%s27215_s14 + $0x3f0] sm:$0xff]  ;;  %v21588_v23 = vpack.c.bf16 %v14104_v35, %v14103_v38  ;;  %v14074_v37 = vld [vmem:[%s27215_s14 + $0x278] sm:$0xff]  ;;  %v21558_v28 = vpack.c.bf16 %v14090_v30, %v14089_v61  ;;  %v14139_v13 = vld [vmem:[%s27215_s14 + $0x480] sm:$0xff] }
0x190a   : > { %14338 = vmatmul.mubr.f32.gmra.mrb[210].mxu0 %v13915_v46  ;;  %14443 = vmatmul.mubr.f32.gmra.mrb[210].mxu1 %v13917_v40  ;;  %v14140_v46 = vld [vmem:[%s27215_s14 + $0x488] sm:$0xff]  ;;  %v14171_v40 = vld [vmem:[%s27215_s14 + $0x580] sm:$0xff] }
0x190b   : > { %21545 = vmatpush3.bf16.msra.mxu0 %v21544_v36  ;;  %21577 = vmatpush3.bf16.msra.mxu1 %v21576_v56  ;;  %v21590_v36 = vpack.c.bf16 %v14122_v60, %v14121_v42  ;;  %v14105_v56 = vld [vmem:[%s27215_s14 + $0x370] sm:$0xff]  ;;  %v21594_v24 = vpack.c.bf16 %v14140_v46, %v14139_v13  ;;  %v25643_v42 = vsub.s32 6, %v27339_v39  ;;  %v25646_v60 = vsub.s32 5, %v27339_v39 }
0x190c   : > { %21547 = vmatprep.subr.bf16.mxu0 %v21546_v3  ;;  %21579 = vmatprep.subr.bf16.mxu1 %v21578_v17  ;;  %v14172_v3 = vld [vmem:[%s27215_s14 + $0x588] sm:$0xff]  ;;  %v21560_v17 = vpack.c.bf16 %v14074_v37, %v14073_v25  ;;  %v21592_v16 = vpack.c.bf16 %v14106_v0, %v14105_v56  ;;  %v25653_v13 = vsub.s32 7, %v27339_v39 }
0x190d   : > { %v21626_v62 = vpack.c.bf16 %v14172_v3, %v14171_v40 }
0x190f   : > { %21549 = vmatpush3.bf16.msra.mxu0 %v21548_v19  ;;  %21581 = vmatpush3.bf16.msra.mxu1 %v21580_v31 }
0x1910   : > { %21551 = vmatprep.subr.bf16.mxu0 %v21550_v50  ;;  %21583 = vmatprep.subr.bf16.mxu1 %v21582_v26 }
0x1913   : > { %21553 = vmatpush3.bf16.msra.mxu0 %v21552_v1  ;;  %21585 = vmatpush3.bf16.msra.mxu1 %v21584_v43 }
0x1914   : > { %21555 = vmatprep.subr.bf16.mxu0 %v21554_v59  ;;  %21587 = vmatprep.subr.bf16.mxu1 %v21586_v27  ;;  %v25640_v27 = vsub.s32 4, %v27339_v39 }
0x1916   : > { %v25657_v46 = vrot.slane %v25527_v18, %v25640_v27 }
0x1917   : > { %21557 = vmatpush3.bf16.msra.mxu0 %v21556_v11  ;;  %21589 = vmatpush3.bf16.msra.mxu1 %v21588_v23 }
0x1918   : > { %21559 = vmatprep.subr.bf16.mxu0 %v21558_v28  ;;  %21591 = vmatprep.subr.bf16.mxu1 %v21590_v36 }
0x191b   : > { %21561 = vmatpush3.bf16.msra.mxu0 %v21560_v17  ;;  %21593 = vmatpush3.bf16.msra.mxu1 %v21592_v16 }
0x191c   : > { %21595 = vmatprep.subr.bf16.mxu0 %v21594_v24  ;;  %21627 = vmatprep.subr.bf16.mxu1 %v21626_v62  ;;  %v25661_v24 = vrot.slane %v25527_v18, %v25643_v42  ;;  %v25665_v62 = vrot.slane %v25527_v18, %v25646_v60 }
0x1931   : > { %v13053_v41 = vpop.f32.mrb[148].mxu0  ;;  %v13166_v7 = vpop.f32.mrb[148].mxu1 }
0x1932   : > { %v13054_v57 = vadd.f32 %v13053_v41, %v25537_v12  ;;  %v13167_v19 = vadd.f32 %v13166_v7, %v25541_v9  ;;  %v13055_v31 = vpop.f32.mrb[149].mxu0  ;;  %v13168_v44 = vpop.f32.mrb[149].mxu1 }
0x1933   : > { %v13056_v10 = vadd.f32 %v13055_v31, %v25545_v32  ;;  %v13169_v50 = vadd.f32 %v13168_v44, %v25549_v33 }
0x1934   : > { %v13931_v22 = vmax.f32 %v13054_v57, 0.0  ;;  %v13933_v45 = vmax.f32 %v13167_v19, 0.0 }
0x1935   : > { %v13932_v26 = vmax.f32 %v13056_v10, 0.0  ;;  %v13934_v4 = vmax.f32 %v13169_v50, 0.0  ;;  %v13059_v55 = vpop.f32.mrb[150].mxu0  ;;  %v13172_v5 = vpop.f32.mrb[150].mxu1 }
0x1936   : > { %v13060_v53 = vadd.f32 %v13059_v55, %v25537_v12  ;;  %v13173_v1 = vadd.f32 %v13172_v5, %v25541_v9  ;;  %v13061_v43 = vpop.f32.mrb[151].mxu0  ;;  %v13174_v34 = vpop.f32.mrb[151].mxu1  ;;  %v14156_v55 = vld [vmem:[%s27215_s14 + $0x508] sm:$0xff] }
0x1937   : > { %v13062_v63 = vadd.f32 %v13061_v43, %v25545_v32  ;;  %v13175_v59 = vadd.f32 %v13174_v34, %v25549_v33  ;;  %14342 = vmatprep.mubr.f32.mxu0 %v13932_v26  ;;  %14447 = vmatprep.mubr.f32.mxu1 %v13934_v4  ;;  %v25673_v26 = vrot.slane %v25527_v18, %v25653_v13  ;;  %v25676_v4 = vld [vmem:[%s27215_s14 + $0x400] sm:$0xff] }
0x1938   : > { %14343 = vmatmul.mubr.f32.gmra.mrb[212].mxu0 %v13931_v22  ;;  %14448 = vmatmul.mubr.f32.gmra.mrb[212].mxu1 %v13933_v45  ;;  %v13947_v11 = vmax.f32 %v13060_v53, 0.0  ;;  %v13949_v23 = vmax.f32 %v13173_v1, 0.0  ;;  %v25682_v45 = vld [vmem:[%s27215_s14 + $0x490] sm:$0xff]  ;;  %v25685_v53 = vld [vmem:[%s27215_s14 + $0x498] sm:$0xff] }
0x1939   : > { %v13948_v38 = vmax.f32 %v13062_v63, 0.0  ;;  %v13950_v35 = vmax.f32 %v13175_v59, 0.0  ;;  %v13065_v61 = vpop.f32.mrb[152].mxu0  ;;  %v13178_v30 = vpop.f32.mrb[152].mxu1 }
0x193a   : > { %v13066_v25 = vadd.f32 %v13065_v61, %v25537_v12  ;;  %v13179_v37 = vadd.f32 %v13178_v30, %v25541_v9  ;;  %v13067_v28 = vpop.f32.mrb[153].mxu0  ;;  %v13180_v36 = vpop.f32.mrb[153].mxu1 }
0x193b   : > { %v13068_v56 = vadd.f32 %v13067_v28, %v25545_v32  ;;  %v13181_v0 = vadd.f32 %v13180_v36, %v25549_v33  ;;  %14347 = vmatprep.mubr.f32.mxu0 %v13948_v38  ;;  %14452 = vmatprep.mubr.f32.mxu1 %v13950_v35  ;;  %v14173_v38 = vld [vmem:[%s27215_s14 + $0x590] sm:$0xff]  ;;  %v14174_v35 = vld [vmem:[%s27215_s14 + $0x598] sm:$0xff] }
0x193c   : > { %14348 = vmatmul.mubr.f32.gmra.mrb[214].mxu0 %v13947_v11  ;;  %14453 = vmatmul.mubr.f32.gmra.mrb[214].mxu1 %v13949_v23  ;;  %v13963_v41 = vmax.f32 %v13066_v25, 0.0  ;;  %v13965_v7 = vmax.f32 %v13179_v37, 0.0  ;;  %v25694_v11 = vld [vmem:[%s27215_s14 + $0x410] sm:$0xff]  ;;  %v25698_v37 = vld [vmem:[%s27215_s14 + $0x418] sm:$0xff] }
0x193d   : > { %v13964_v40 = vmax.f32 %v13068_v56, 0.0  ;;  %v13966_v3 = vmax.f32 %v13181_v0, 0.0  ;;  %v13071_v17 = vpop.f32.mrb[154].mxu0  ;;  %v13184_v16 = vpop.f32.mrb[154].mxu1  ;;  %v25701_v28 = vld [vmem:[%s27215_s14 + $0x510] sm:$0xff]  ;;  %v25704_v36 = vld [vmem:[%s27215_s14 + $0x518] sm:$0xff] }
0x193e   : > { %v13072_v57 = vadd.f32 %v13071_v17, %v25537_v12  ;;  %v13185_v19 = vadd.f32 %v13184_v16, %v25541_v9  ;;  %v13073_v31 = vpop.f32.mrb[155].mxu0  ;;  %v13186_v44 = vpop.f32.mrb[155].mxu1  ;;  %v14124_v12 = vld [vmem:[%s27215_s14 + $0x408] sm:$0xff]  ;;  %v14155_v9 = vld [vmem:[%s27215_s14 + $0x500] sm:$0xff]  ;;  %v21598_v17 = vpack.c.bf16 %v25685_v53, %v25682_v45  ;;  %v21630_v16 = vpack.c.bf16 %v14174_v35, %v14173_v38  ;;  %v25742_v38 = vld [vmem:[%s27215_s14 + $0x4b0] sm:$0xff] }
0x193f   : > { %v13074_v10 = vadd.f32 %v13073_v31, %v25545_v32  ;;  %v13187_v50 = vadd.f32 %v13186_v44, %v25549_v33  ;;  %14352 = vmatprep.mubr.f32.mxu0 %v13964_v40  ;;  %14457 = vmatprep.mubr.f32.mxu1 %v13966_v3  ;;  %v21596_v23 = vpack.c.bf16 %v14124_v12, %v25676_v4  ;;  %v25717_v4 = vld [vmem:[%s27215_s14 + $0x5a0] sm:$0xff]  ;;  %v14176_v12 = vld [vmem:[%s27215_s14 + $0x5a8] sm:$0xff]  ;;  %v25745_v35 = vld [vmem:[%s27215_s14 + $0x4b8] sm:$0xff] }
0x1940   : > { %14353 = vmatmul.mubr.f32.gmra.mrb[216].mxu0 %v13963_v41  ;;  %14458 = vmatmul.mubr.f32.gmra.mrb[216].mxu1 %v13965_v7  ;;  %v13979_v18 = vmax.f32 %v13072_v57, 0.0  ;;  %v13981_v1 = vmax.f32 %v13185_v19, 0.0  ;;  %v21628_v25 = vpack.c.bf16 %v14156_v55, %v14155_v9  ;;  %v25709_v41 = vld [vmem:[%s27215_s14 + $0x4a0] sm:$0xff]  ;;  %v25712_v7 = vld [vmem:[%s27215_s14 + $0x4a8] sm:$0xff] }
0x1941   : > { %v13980_v5 = vmax.f32 %v13074_v10, 0.0  ;;  %v13982_v32 = vmax.f32 %v13187_v50, 0.0  ;;  %v13255_v22 = vpop.f32.mrb[156].mxu0  ;;  %v13368_v33 = vpop.f32.mrb[156].mxu1  ;;  %v25733_v45 = vld [vmem:[%s27215_s14 + $0x520] sm:$0xff]  ;;  %v25736_v53 = vld [vmem:[%s27215_s14 + $0x528] sm:$0xff] }
0x1942   : > { %v13256_v43 = vadd.f32 %v13255_v22, %v25657_v46  ;;  %v13369_v34 = vadd.f32 %v13368_v33, %v25661_v24  ;;  %v13257_v63 = vpop.f32.mrb[157].mxu0  ;;  %v13370_v59 = vpop.f32.mrb[157].mxu1  ;;  %v21632_v22 = vpack.c.bf16 %v25704_v36, %v25701_v28  ;;  %v25730_v33 = vld [vmem:[%s27215_s14 + $0x428] sm:$0xff]  ;;  %v14178_v36 = vld [vmem:[%s27215_s14 + $0x5b8] sm:$0xff] }
0x1943   : > { %v13258_v61 = vadd.f32 %v13257_v63, %v25665_v62  ;;  %v13371_v30 = vadd.f32 %v13370_v59, %v25673_v26  ;;  %14357 = vmatprep.mubr.f32.mxu0 %v13980_v5  ;;  %14462 = vmatprep.mubr.f32.mxu1 %v13982_v32  ;;  %v25723_v5 = vld [vmem:[%s27215_s14 + $0x420] sm:$0xff]  ;;  %v21600_v32 = vpack.c.bf16 %v25698_v37, %v25694_v11 }
0x1944   : > { %14358 = vmatmul.mubr.f32.gmra.mrb[218].mxu0 %v13979_v18  ;;  %14463 = vmatmul.mubr.f32.gmra.mrb[218].mxu1 %v13981_v1  ;;  %v13871_v57 = vmax.f32 %v13256_v43, 0.0  ;;  %v13873_v19 = vmax.f32 %v13369_v34, 0.0  ;;  %v21602_v63 = vpack.c.bf16 %v25712_v7, %v25709_v41  ;;  %v21634_v59 = vpack.c.bf16 %v14176_v12, %v25717_v4  ;;  %v25766_v41 = vld [vmem:[%s27215_s14 + $0x530] sm:$0xff]  ;;  %v25769_v7 = vld [vmem:[%s27215_s14 + $0x538] sm:$0xff]  ;;  %v25775_v4 = vld [vmem:[%s27215_s14 + $0x4c0] sm:$0xff] }
0x1945   : > { %v13872_v56 = vmax.f32 %v13258_v61, 0.0  ;;  %v13874_v0 = vmax.f32 %v13371_v30, 0.0  ;;  %v13261_v40 = vpop.f32.mrb[158].mxu0  ;;  %v13374_v3 = vpop.f32.mrb[158].mxu1  ;;  %v25778_v12 = vld [vmem:[%s27215_s14 + $0x4c8] sm:$0xff] }
0x1946   : > { %v13262_v31 = vadd.f32 %v13261_v40, %v25657_v46  ;;  %v13375_v44 = vadd.f32 %v13374_v3, %v25661_v24  ;;  %v13263_v10 = vpop.f32.mrb[159].mxu0  ;;  %v13376_v50 = vpop.f32.mrb[159].mxu1  ;;  %v25756_v40 = vld [vmem:[%s27215_s14 + $0x430] sm:$0xff]  ;;  %v21604_v3 = vpack.c.bf16 %v25730_v33, %v25723_v5 }
0x1947   : > { %v13264_v9 = vadd.f32 %v13263_v10, %v25665_v62  ;;  %v13377_v55 = vadd.f32 %v13376_v50, %v25673_v26  ;;  %14532 = vmatprep.mubr.f32.mxu0 %v13872_v56  ;;  %14637 = vmatprep.mubr.f32.mxu1 %v13874_v0  ;;  %v21606_v10 = vpack.c.bf16 %v25745_v35, %v25742_v38  ;;  %v25801_v38 = vld [vmem:[%s27215_s14 + $0x540] sm:$0xff]  ;;  %v25804_v35 = vld [vmem:[%s27215_s14 + $0x548] sm:$0xff] }
0x1948   : > { %14533 = vmatmul.mubr.f32.vlgmr.msra.gmra.mrb[220].mxu0 %v13871_v57  ;;  %14638 = vmatmul.mubr.f32.vlgmr.msra.gmra.mrb[220].mxu1 %v13873_v19  ;;  %v13887_v61 = vmax.f32 %v13262_v31, 0.0  ;;  %v13889_v30 = vmax.f32 %v13375_v44, 0.0 }
0x1949   : > { %v13888_v18 = vmax.f32 %v13264_v9, 0.0  ;;  %v13890_v1 = vmax.f32 %v13377_v55, 0.0  ;;  %v13267_v43 = vpop.f32.mrb[160].mxu0  ;;  %v13380_v34 = vpop.f32.mrb[160].mxu1  ;;  %21597 = vmatpush3.bf16.msra.mxu0 %v21596_v23  ;;  %21629 = vmatpush3.bf16.msra.mxu1 %v21628_v25  ;;  %v25750_v25 = vld [vmem:[%s27215_s14 + $0x5b0] sm:$0xff] }
0x194a   : > { %v13268_v11 = vadd.f32 %v13267_v43, %v25657_v46  ;;  %v13381_v37 = vadd.f32 %v13380_v34, %v25661_v24  ;;  %v13269_v28 = vpop.f32.mrb[161].mxu0  ;;  %v13382_v23 = vpop.f32.mrb[161].mxu1  ;;  %21599 = vmatprep.subr.bf16.mxu0 %v21598_v17  ;;  %21631 = vmatprep.subr.bf16.mxu1 %v21630_v16  ;;  %v21636_v17 = vpack.c.bf16 %v25736_v53, %v25733_v45  ;;  %v25763_v16 = vld [vmem:[%s27215_s14 + $0x438] sm:$0xff]  ;;  %v25786_v53 = vld [vmem:[%s27215_s14 + $0x5c8] sm:$0xff]  ;;  %v25791_v43 = vld [vmem:[%s27215_s14 + $0x440] sm:$0xff] }
0x194b   : > { %v13270_v56 = vadd.f32 %v13269_v28, %v25665_v62  ;;  %v13383_v0 = vadd.f32 %v13382_v23, %v25673_v26  ;;  %14537 = vmatprep.mubr.f32.mxu0 %v13888_v18  ;;  %14642 = vmatprep.mubr.f32.mxu1 %v13890_v1  ;;  %v21638_v50 = vpack.c.bf16 %v14178_v36, %v25750_v25  ;;  %v25811_v25 = vld [vmem:[%s27215_s14 + $0x4d0] sm:$0xff]  ;;  %v25814_v36 = vld [vmem:[%s27215_s14 + $0x4d8] sm:$0xff] }
0x194c   : > { %14538 = vmatmul.mubr.f32.gmra.mrb[222].mxu0 %v13887_v61  ;;  %14643 = vmatmul.mubr.f32.gmra.mrb[222].mxu1 %v13889_v30  ;;  %v13903_v9 = vmax.f32 %v13268_v11, 0.0  ;;  %v13905_v55 = vmax.f32 %v13381_v37, 0.0  ;;  %v21608_v34 = vpack.c.bf16 %v25763_v16, %v25756_v40  ;;  %v21610_v28 = vpack.c.bf16 %v25778_v12, %v25775_v4  ;;  %v25837_v4 = vld [vmem:[%s27215_s14 + $0x550] sm:$0xff]  ;;  %v25840_v12 = vld [vmem:[%s27215_s14 + $0x558] sm:$0xff] }
0x194d   : > { %v13904_v57 = vmax.f32 %v13270_v56, 0.0  ;;  %v13906_v19 = vmax.f32 %v13383_v0, 0.0  ;;  %v13273_v31 = vpop.f32.mrb[162].mxu0  ;;  %v13386_v44 = vpop.f32.mrb[162].mxu1  ;;  %21601 = vmatpush3.bf16.msra.mxu0 %v21600_v32  ;;  %21633 = vmatpush3.bf16.msra.mxu1 %v21632_v22  ;;  %v25783_v22 = vld [vmem:[%s27215_s14 + $0x5c0] sm:$0xff] }
0x194e   : > { %v13274_v5 = vadd.f32 %v13273_v31, %v25657_v46  ;;  %v13387_v33 = vadd.f32 %v13386_v44, %v25661_v24  ;;  %v13275_v45 = vpop.f32.mrb[163].mxu0  ;;  %v13388_v32 = vpop.f32.mrb[163].mxu1  ;;  %21603 = vmatprep.subr.bf16.mxu0 %v21602_v63  ;;  %21635 = vmatprep.subr.bf16.mxu1 %v21634_v59  ;;  %v21640_v63 = vpack.c.bf16 %v25769_v7, %v25766_v41  ;;  %v25798_v59 = vld [vmem:[%s27215_s14 + $0x448] sm:$0xff]  ;;  %v25819_v41 = vld [vmem:[%s27215_s14 + $0x5d0] sm:$0xff]  ;;  %v25822_v7 = vld [vmem:[%s27215_s14 + $0x5d8] sm:$0xff] }
0x194f   : > { %v13276_v18 = vadd.f32 %v13275_v45, %v25665_v62  ;;  %v13389_v1 = vadd.f32 %v13388_v32, %v25673_v26  ;;  %14542 = vmatprep.mubr.f32.mxu0 %v13904_v57  ;;  %14647 = vmatprep.mubr.f32.mxu1 %v13906_v19  ;;  %v21642_v23 = vpack.c.bf16 %v25786_v53, %v25783_v22  ;;  %v25827_v31 = vld [vmem:[%s27215_s14 + $0x450] sm:$0xff]  ;;  %v25830_v44 = vld [vmem:[%s27215_s14 + $0x458] sm:$0xff]  ;;  %v25850_v53 = vld [vmem:[%s27215_s14 + $0x4e8] sm:$0xff] }
0x1950   : > { %14543 = vmatmul.mubr.f32.gmra.mrb[224].mxu0 %v13903_v9  ;;  %14648 = vmatmul.mubr.f32.gmra.mrb[224].mxu1 %v13905_v55  ;;  %v13919_v56 = vmax.f32 %v13274_v5, 0.0  ;;  %v13921_v0 = vmax.f32 %v13387_v33, 0.0  ;;  %v25843_v9 = vld [vmem:[%s27215_s14 + $0x4e0] sm:$0xff]  ;;  %v21614_v32 = vpack.c.bf16 %v25814_v36, %v25811_v25  ;;  %v21646_v22 = vpack.c.bf16 %v25822_v7, %v25819_v41  ;;  %v25875_v36 = vld [vmem:[%s27215_s14 + $0x468] sm:$0xff] }
0x1951   : > { %v13920_v61 = vmax.f32 %v13276_v18, 0.0  ;;  %v13922_v30 = vmax.f32 %v13389_v1, 0.0  ;;  %v13279_v11 = vpop.f32.mrb[164].mxu0  ;;  %v13392_v37 = vpop.f32.mrb[164].mxu1  ;;  %21605 = vmatpush3.bf16.msra.mxu0 %v21604_v3  ;;  %21637 = vmatpush3.bf16.msra.mxu1 %v21636_v17  ;;  %v25853_v18 = vld [vmem:[%s27215_s14 + $0x5e0] sm:$0xff]  ;;  %v21618_v25 = vpack.c.bf16 %v25850_v53, %v25843_v9  ;;  %v25898_v9 = vld [vmem:[%s27215_s14 + $0x5f0] sm:$0xff] }
0x1952   : > { %v13280_v40 = vadd.f32 %v13279_v11, %v25657_v46  ;;  %v13393_v16 = vadd.f32 %v13392_v37, %v25661_v24  ;;  %v13281_v3 = vpop.f32.mrb[165].mxu0  ;;  %v13394_v17 = vpop.f32.mrb[165].mxu1  ;;  %21607 = vmatprep.subr.bf16.mxu0 %v21606_v10  ;;  %21639 = vmatprep.subr.bf16.mxu1 %v21638_v50  ;;  %v21612_v10 = vpack.c.bf16 %v25798_v59, %v25791_v43  ;;  %v25866_v37 = vld [vmem:[%s27215_s14 + $0x460] sm:$0xff]  ;;  %v25910_v53 = vld [vmem:[%s27215_s14 + $0x470] sm:$0xff] }
0x1953   : > { %v13282_v57 = vadd.f32 %v13281_v3, %v25665_v62  ;;  %v13395_v19 = vadd.f32 %v13394_v17, %v25673_v26  ;;  %14547 = vmatprep.mubr.f32.mxu0 %v13920_v61  ;;  %14652 = vmatprep.mubr.f32.mxu1 %v13922_v30  ;;  %v21644_v50 = vpack.c.bf16 %v25804_v35, %v25801_v38  ;;  %v25861_v61 = vld [vmem:[%s27216_s8 + $0x8] sm:$0xff]  ;;  %s27355_s8 = smov 120  }
0x1954   : > { %14548 = vmatmul.mubr.f32.gmra.mrb[226].mxu0 %v13919_v56  ;;  %14653 = vmatmul.mubr.f32.gmra.mrb[226].mxu1 %v13921_v0  ;;  %v13935_v1 = vmax.f32 %v13280_v40, 0.0  ;;  %v13937_v43 = vmax.f32 %v13393_v16, 0.0  ;;  %v25878_v56 = vld [vmem:[%s27215_s14 + $0x560] sm:$0xff]  ;;  %v25881_v0 = vld [vmem:[%s27215_s14 + $0x568] sm:$0xff]  ;;  %v25887_v7 = vrot.slane %v25861_v61, %v25521_v20 }
0x1955   : > { %v13936_v55 = vmax.f32 %v13282_v57, 0.0  ;;  %v13938_v5 = vmax.f32 %v13395_v19, 0.0  ;;  %v13285_v33 = vpop.f32.mrb[166].mxu0  ;;  %v13398_v45 = vpop.f32.mrb[166].mxu1  ;;  %21609 = vmatpush3.bf16.msra.mxu0 %v21608_v34  ;;  %21641 = vmatpush3.bf16.msra.mxu1 %v21640_v63  ;;  %v25858_v63 = vld [vmem:[%s27215_s14 + $0x5e8] sm:$0xff]  ;;  %v25890_v57 = vld [vmem:[%s27215_s14 + $0x4f0] sm:$0xff] }
0x1956   : > { %v13286_v59 = vadd.f32 %v13285_v33, %v25657_v46  ;;  %v13399_v38 = vadd.f32 %v13398_v45, %v25661_v24  ;;  %v13287_v35 = vpop.f32.mrb[167].mxu0  ;;  %v13400_v34 = vpop.f32.mrb[167].mxu1  ;;  %21611 = vmatprep.subr.bf16.mxu0 %v21610_v28  ;;  %21643 = vmatprep.subr.bf16.mxu1 %v21642_v23  ;;  %v21616_v28 = vpack.c.bf16 %v25830_v44, %v25827_v31  ;;  %v25893_v19 = vld [vmem:[%s27215_s14 + $0x4f8] sm:$0xff] }
0x1957   : > { %v13288_v30 = vadd.f32 %v13287_v35, %v25665_v62  ;;  %v13401_v11 = vadd.f32 %v13400_v34, %v25673_v26  ;;  %14552 = vmatprep.mubr.f32.mxu0 %v13936_v55  ;;  %14657 = vmatprep.mubr.f32.mxu1 %v13938_v5  ;;  %v21648_v23 = vpack.c.bf16 %v25840_v12, %v25837_v4  ;;  %v25901_v55 = vld [vmem:[%s27215_s14 + $0x5f8] sm:$0xff] }
0x1958   : > { %14553 = vmatmul.mubr.f32.gmra.mrb[228].mxu0 %v13935_v1  ;;  %14658 = vmatmul.mubr.f32.gmra.mrb[228].mxu1 %v13937_v43  ;;  %v21650_v41 = vpack.c.bf16 %v25858_v63, %v25853_v18  ;;  %v13951_v31 = vmax.f32 %v13286_v59, 0.0  ;;  %v13953_v44 = vmax.f32 %v13399_v38, 0.0  ;;  %v25907_v45 = vrot.slane %v25861_v61, %v25524_v14  ;;  %v25921_v1 = vld [vmem:[%s27215_s14 + $0x478] sm:$0xff]  ;;  %v25924_v43 = vld [vmem:[%s27215_s14 + $0x570] sm:$0xff] }
0x1959   : > { %v13952_v40 = vmax.f32 %v13288_v30, 0.0  ;;  %v13954_v16 = vmax.f32 %v13401_v11, 0.0  ;;  %v13291_v3 = vpop.f32.mrb[168].mxu0  ;;  %v13404_v17 = vpop.f32.mrb[168].mxu1  ;;  %21613 = vmatpush3.bf16.msra.mxu0 %v21612_v10  ;;  %21645 = vmatpush3.bf16.msra.mxu1 %v21644_v50  ;;  %v25918_v18 = vrot.slane %v25861_v61, %v25530_v48  ;;  %v25927_v59 = vld [vmem:[%s27215_s14 + $0x578] sm:$0xff]  ;;  %v21622_v30 = vpack.c.bf16 %v25893_v19, %v25890_v57 }
0x195a   : > { %v13292_v4 = vadd.f32 %v13291_v3, %v25657_v46  ;;  %v13405_v12 = vadd.f32 %v13404_v17, %v25661_v24  ;;  %v13293_v10 = vpop.f32.mrb[169].mxu0  ;;  %v13406_v50 = vpop.f32.mrb[169].mxu1  ;;  %21615 = vmatprep.subr.bf16.mxu0 %v21614_v32  ;;  %21647 = vmatprep.subr.bf16.mxu1 %v21646_v22  ;;  %v21620_v32 = vpack.c.bf16 %v25875_v36, %v25866_v37  ;;  %v25934_v37 = vld [vmem:[%s27215_s14 + $0x680] sm:$0xff]  ;;  %v25937_v36 = vld [vmem:[%s27215_s14 + $0x688] sm:$0xff] }
0x195b   : > { %v13294_v5 = vadd.f32 %v13293_v10, %v25665_v62  ;;  %v13407_v33 = vadd.f32 %v13406_v50, %v25673_v26  ;;  %14557 = vmatprep.mubr.f32.mxu0 %v13952_v40  ;;  %14662 = vmatprep.mubr.f32.mxu1 %v13954_v16  ;;  %v21652_v22 = vpack.c.bf16 %v25881_v0, %v25878_v56  ;;  %v25945_v17 = vld [vmem:[%s27215_s14 + $0x788] sm:$0xff] }
0x195c   : > { %14558 = vmatmul.mubr.f32.gmra.mrb[230].mxu0 %v13951_v31  ;;  %14663 = vmatmul.mubr.f32.gmra.mrb[230].mxu1 %v13953_v44  ;;  %v21654_v11 = vpack.c.bf16 %v25901_v55, %v25898_v9  ;;  %v13967_v56 = vmax.f32 %v13292_v4, 0.0  ;;  %v13969_v0 = vmax.f32 %v13405_v12, 0.0  ;;  %v25967_v31 = vld [vmem:[%s27215_s14 + $0x708] sm:$0xff]  ;;  %v21658_v50 = vpack.c.bf16 %v25937_v36, %v25934_v37  ;;  %v25974_v55 = vld [vmem:[%s27215_s14 + $0x690] sm:$0xff] }
0x195d   : > { %v13968_v38 = vmax.f32 %v13294_v5, 0.0  ;;  %v13970_v35 = vmax.f32 %v13407_v33, 0.0  ;;  %v13297_v34 = vpop.f32.mrb[170].mxu0  ;;  %v13410_v63 = vpop.f32.mrb[170].mxu1  ;;  %21617 = vmatpush3.bf16.msra.mxu0 %v21616_v28  ;;  %21649 = vmatpush3.bf16.msra.mxu1 %v21648_v23  ;;  %v25942_v23 = vld [vmem:[%s27215_s14 + $0x780] sm:$0xff]  ;;  %v25977_v5 = vld [vmem:[%s27215_s14 + $0x698] sm:$0xff] }
0x195e   : > { %v13298_v40 = vadd.f32 %v13297_v34, %v25657_v46  ;;  %v13411_v16 = vadd.f32 %v13410_v63, %v25661_v24  ;;  %v13299_v3 = vpop.f32.mrb[171].mxu0  ;;  %v13412_v28 = vpop.f32.mrb[171].mxu1  ;;  %21619 = vmatprep.subr.bf16.mxu0 %v21618_v25  ;;  %21651 = vmatprep.subr.bf16.mxu1 %v21650_v41  ;;  %v25951_v46 = vrot.slane %v25861_v61, %v25533_v6  ;;  %v25954_v24 = vld [vmem:[%s27215_s14 + $0x600] sm:$0xff]  ;;  %v25961_v41 = vld [vmem:[%s27215_s14 + $0x608] sm:$0xff]  ;;  %v25988_v63 = vld [vmem:[%s27215_s14 + $0x610] sm:$0xff] }
0x195f   : > { %v13300_v57 = vadd.f32 %v13299_v3, %v25665_v62  ;;  %v13413_v19 = vadd.f32 %v13412_v28, %v25673_v26  ;;  %14562 = vmatprep.mubr.f32.mxu0 %v13968_v38  ;;  %14667 = vmatprep.mubr.f32.mxu1 %v13970_v35  ;;  %v21624_v25 = vpack.c.bf16 %v25921_v1, %v25910_v53  ;;  %v25964_v26 = vld [vmem:[%s27215_s14 + $0x700] sm:$0xff]  ;;  %v14238_v38 = vld [vmem:[%s27215_s14 + $0x798] sm:$0xff]  ;;  %v25998_v36 = vld [vmem:[%s27215_s14 + $0x710] sm:$0xff] }
0x1960   : > { %14563 = vmatmul.mubr.f32.gmra.mrb[232].mxu0 %v13967_v56  ;;  %14668 = vmatmul.mubr.f32.gmra.mrb[232].mxu1 %v13969_v0  ;;  %v21656_v62 = vpack.c.bf16 %v25927_v59, %v25924_v43  ;;  %v21690_v9 = vpack.c.bf16 %v25945_v17, %v25942_v23  ;;  %v13983_v33 = vmax.f32 %v13298_v40, 0.0  ;;  %v13985_v53 = vmax.f32 %v13411_v16, 0.0  ;;  %v25982_v59 = vld [vmem:[%s27215_s14 + $0x790] sm:$0xff]  ;;  %v26001_v56 = vld [vmem:[%s27215_s14 + $0x718] sm:$0xff]  ;;  %v26007_v17 = vld [vmem:[%s27215_s14 + $0x6a0] sm:$0xff] }
0x1961   : > { %v13984_v44 = vmax.f32 %v13300_v57, 0.0  ;;  %v13986_v4 = vmax.f32 %v13413_v19, 0.0  ;;  %v13481_v12 = vpop.f32.mrb[172].mxu0  ;;  %v13594_v10 = vpop.f32.mrb[172].mxu1  ;;  %21621 = vmatpush3.bf16.msra.mxu0 %v21620_v32  ;;  %21653 = vmatpush3.bf16.msra.mxu1 %v21652_v22  ;;  %v21660_v37 = vpack.c.bf16 %v25961_v41, %v25954_v24  ;;  %v21662_v28 = vpack.c.bf16 %v25977_v5, %v25974_v55  ;;  %v26010_v57 = vld [vmem:[%s27215_s14 + $0x6a8] sm:$0xff]  ;;  %v26031_v5 = vld [vmem:[%s27215_s14 + $0x720] sm:$0xff] }
0x1962   : > { %v13482_v1 = vadd.f32 %v13481_v12, %v25887_v7  ;;  %v13595_v43 = vadd.f32 %v13594_v10, %v25907_v45  ;;  %v13483_v32 = vpop.f32.mrb[173].mxu0  ;;  %v13596_v22 = vpop.f32.mrb[173].mxu1  ;;  %21623 = vmatprep.subr.bf16.mxu0 %v21622_v30  ;;  %21655 = vmatprep.subr.bf16.mxu1 %v21654_v11  ;;  %v21692_v30 = vpack.c.bf16 %v25967_v31, %v25964_v26  ;;  %v25995_v11 = vld [vmem:[%s27215_s14 + $0x618] sm:$0xff]  ;;  %v26021_v10 = vld [vmem:[%s27215_s14 + $0x620] sm:$0xff] }
0x1963   : > { %v13484_v35 = vadd.f32 %v13483_v32, %v25918_v18  ;;  %v13597_v34 = vadd.f32 %v13596_v22, %v25951_v46  ;;  %14567 = vmatprep.mubr.f32.mxu0 %v13984_v44  ;;  %14672 = vmatprep.mubr.f32.mxu1 %v13986_v4  ;;  %v21694_v23 = vpack.c.bf16 %v14238_v38, %v25982_v59  ;;  %v14240_v44 = vld [vmem:[%s27215_s14 + $0x7a8] sm:$0xff]  ;;  %v26040_v38 = vld [vmem:[%s27215_s14 + $0x6b0] sm:$0xff] }
0x1964   : > { %14568 = vmatmul.mubr.f32.gmra.mrb[234].mxu0 %v13983_v33  ;;  %14673 = vmatmul.mubr.f32.gmra.mrb[234].mxu1 %v13985_v53  ;;  %v13875_v19 = vmax.f32 %v13482_v1, 0.0  ;;  %v13877_v24 = vmax.f32 %v13595_v43, 0.0  ;;  %v21664_v55 = vpack.c.bf16 %v25995_v11, %v25988_v63  ;;  %v26034_v33 = vld [vmem:[%s27215_s14 + $0x728] sm:$0xff]  ;;  %v21666_v22 = vpack.c.bf16 %v26010_v57, %v26007_v17  ;;  %v26064_v57 = vld [vmem:[%s27215_s14 + $0x730] sm:$0xff] }
0x1965   : > { %v13876_v0 = vmax.f32 %v13484_v35, 0.0  ;;  %v13878_v40 = vmax.f32 %v13597_v34, 0.0  ;;  %v13487_v16 = vpop.f32.mrb[174].mxu0  ;;  %v13600_v3 = vpop.f32.mrb[174].mxu1  ;;  %21625 = vmatpush3.bf16.msra.mxu0 %v21624_v25  ;;  %21657 = vmatpush3.bf16.msra.mxu1 %v21656_v62  ;;  %v26015_v62 = vld [vmem:[%s27215_s14 + $0x7a0] sm:$0xff]  ;;  %v26043_v35 = vld [vmem:[%s27215_s14 + $0x6b8] sm:$0xff] }
0x1966   : > { %v13488_v41 = vadd.f32 %v13487_v16, %v25887_v7  ;;  %v13601_v26 = vadd.f32 %v13600_v3, %v25907_v45  ;;  %v13489_v31 = vpop.f32.mrb[175].mxu0  ;;  %v13602_v25 = vpop.f32.mrb[175].mxu1  ;;  %21659 = vmatprep.subr.bf16.mxu0 %v21658_v50  ;;  %21691 = vmatprep.subr.bf16.mxu1 %v21690_v9  ;;  %v21696_v50 = vpack.c.bf16 %v26001_v56, %v25998_v36  ;;  %v26028_v9 = vld [vmem:[%s27215_s14 + $0x628] sm:$0xff]  ;;  %v26054_v3 = vld [vmem:[%s27215_s14 + $0x630] sm:$0xff] }
0x1967   : > { %v13490_v4 = vadd.f32 %v13489_v31, %v25918_v18  ;;  %v13603_v12 = vadd.f32 %v13602_v25, %v25951_v46  ;;  %14742 = vmatprep.mubr.f32.mxu0 %v13876_v0  ;;  %14847 = vmatprep.mubr.f32.mxu1 %v13878_v40  ;;  %v21698_v59 = vpack.c.bf16 %v14240_v44, %v26015_v62  ;;  %v14242_v0 = vld [vmem:[%s27215_s14 + $0x7b8] sm:$0xff]  ;;  %v26073_v44 = vld [vmem:[%s27215_s14 + $0x6c0] sm:$0xff] }
0x1968   : > { %14743 = vmatmul.mubr.f32.vlgmr.msra.gmra.mrb[236].mxu0 %v13875_v19  ;;  %14848 = vmatmul.mubr.f32.vlgmr.msra.gmra.mrb[236].mxu1 %v13877_v24  ;;  %v13891_v34 = vmax.f32 %v13488_v41, 0.0  ;;  %v13893_v63 = vmax.f32 %v13601_v26, 0.0  ;;  %v21668_v17 = vpack.c.bf16 %v26028_v9, %v26021_v10  ;;  %v26067_v19 = vld [vmem:[%s27215_s14 + $0x738] sm:$0xff]  ;;  %v21670_v25 = vpack.c.bf16 %v26043_v35, %v26040_v38  ;;  %v26097_v35 = vld [vmem:[%s27215_s14 + $0x740] sm:$0xff] }
0x1969   : > { %v13892_v53 = vmax.f32 %v13490_v4, 0.0  ;;  %v13894_v1 = vmax.f32 %v13603_v12, 0.0  ;;  %v13493_v43 = vpop.f32.mrb[176].mxu0  ;;  %v13606_v32 = vpop.f32.mrb[176].mxu1  ;;  %21661 = vmatpush3.bf16.msra.mxu0 %v21660_v37  ;;  %21693 = vmatpush3.bf16.msra.mxu1 %v21692_v30  ;;  %v26048_v30 = vld [vmem:[%s27215_s14 + $0x7b0] sm:$0xff]  ;;  %v26076_v4 = vld [vmem:[%s27215_s14 + $0x6c8] sm:$0xff] }
0x196a   : > { %v13494_v11 = vadd.f32 %v13493_v43, %v25887_v7  ;;  %v13607_v36 = vadd.f32 %v13606_v32, %v25907_v45  ;;  %v13495_v56 = vpop.f32.mrb[177].mxu0  ;;  %v13608_v37 = vpop.f32.mrb[177].mxu1  ;;  %21663 = vmatprep.subr.bf16.mxu0 %v21662_v28  ;;  %21695 = vmatprep.subr.bf16.mxu1 %v21694_v23  ;;  %v21700_v28 = vpack.c.bf16 %v26034_v33, %v26031_v5  ;;  %v26061_v23 = vld [vmem:[%s27215_s14 + $0x638] sm:$0xff]  ;;  %v26087_v32 = vld [vmem:[%s27215_s14 + $0x640] sm:$0xff] }
0x196b   : > { %v13496_v40 = vadd.f32 %v13495_v56, %v25918_v18  ;;  %v13609_v16 = vadd.f32 %v13608_v37, %v25951_v46  ;;  %14747 = vmatprep.mubr.f32.mxu0 %v13892_v53  ;;  %14852 = vmatprep.mubr.f32.mxu1 %v13894_v1  ;;  %v21702_v62 = vpack.c.bf16 %v14242_v0, %v26048_v30  ;;  %v14244_v53 = vld [vmem:[%s27215_s14 + $0x7c8] sm:$0xff]  ;;  %v26106_v0 = vld [vmem:[%s27215_s14 + $0x6d0] sm:$0xff] }
0x196c   : > { %14748 = vmatmul.mubr.f32.gmra.mrb[238].mxu0 %v13891_v34  ;;  %14853 = vmatmul.mubr.f32.gmra.mrb[238].mxu1 %v13893_v63  ;;  %v13907_v12 = vmax.f32 %v13494_v11, 0.0  ;;  %v13909_v10 = vmax.f32 %v13607_v36, 0.0  ;;  %v21672_v38 = vpack.c.bf16 %v26061_v23, %v26054_v3  ;;  %v26100_v34 = vld [vmem:[%s27215_s14 + $0x748] sm:$0xff]  ;;  %v21674_v37 = vpack.c.bf16 %v26076_v4, %v26073_v44  ;;  %v26129_v44 = vld [vmem:[%s27215_s14 + $0x658] sm:$0xff]  ;;  %v26132_v4 = vld [vmem:[%s27215_s14 + $0x750] sm:$0xff] }
0x196d   : > { %v13908_v24 = vmax.f32 %v13496_v40, 0.0  ;;  %v13910_v41 = vmax.f32 %v13609_v16, 0.0  ;;  %v13499_v26 = vpop.f32.mrb[178].mxu0  ;;  %v13612_v31 = vpop.f32.mrb[178].mxu1  ;;  %21665 = vmatpush3.bf16.msra.mxu0 %v21664_v55  ;;  %21697 = vmatpush3.bf16.msra.mxu1 %v21696_v50  ;;  %v26081_v50 = vld [vmem:[%s27215_s14 + $0x7c0] sm:$0xff]  ;;  %v26109_v40 = vld [vmem:[%s27215_s14 + $0x6d8] sm:$0xff] }
0x196e   : > { %v13500_v9 = vadd.f32 %v13499_v26, %v25887_v7  ;;  %v13613_v5 = vadd.f32 %v13612_v31, %v25907_v45  ;;  %v13501_v33 = vpop.f32.mrb[179].mxu0  ;;  %v13614_v55 = vpop.f32.mrb[179].mxu1  ;;  %21667 = vmatprep.subr.bf16.mxu0 %v21666_v22  ;;  %21699 = vmatprep.subr.bf16.mxu1 %v21698_v59  ;;  %v21704_v22 = vpack.c.bf16 %v26067_v19, %v26064_v57  ;;  %v26094_v59 = vld [vmem:[%s27215_s14 + $0x648] sm:$0xff]  ;;  %v26122_v31 = vld [vmem:[%s27215_s14 + $0x650] sm:$0xff] }
0x196f   : > { %v13502_v1 = vadd.f32 %v13501_v33, %v25918_v18  ;;  %v13615_v43 = vadd.f32 %v13614_v55, %v25951_v46  ;;  %14752 = vmatprep.mubr.f32.mxu0 %v13908_v24  ;;  %14857 = vmatprep.mubr.f32.mxu1 %v13910_v41  ;;  %v21706_v30 = vpack.c.bf16 %v14244_v53, %v26081_v50  ;;  %v26117_v24 = vld [vmem:[%s27215_s14 + $0x7d8] sm:$0xff]  ;;  %v26142_v53 = vld [vmem:[%s27215_s14 + $0x6e0] sm:$0xff] }
0x1970   : > { %14753 = vmatmul.mubr.f32.gmra.mrb[240].mxu0 %v13907_v12  ;;  %14858 = vmatmul.mubr.f32.gmra.mrb[240].mxu1 %v13909_v10  ;;  %v13923_v16 = vmax.f32 %v13500_v9, 0.0  ;;  %v13925_v3 = vmax.f32 %v13613_v5, 0.0  ;;  %v26135_v12 = vld [vmem:[%s27215_s14 + $0x758] sm:$0xff]  ;;  %v21678_v55 = vpack.c.bf16 %v26109_v40, %v26106_v0  ;;  %v21680_v0 = vpack.c.bf16 %v26129_v44, %v26122_v31  ;;  %v26163_v40 = vld [vmem:[%s27215_s14 + $0x668] sm:$0xff] }
0x1971   : > { %v13924_v63 = vmax.f32 %v13502_v1, 0.0  ;;  %v13926_v11 = vmax.f32 %v13615_v43, 0.0  ;;  %v13505_v36 = vpop.f32.mrb[180].mxu0  ;;  %v13618_v56 = vpop.f32.mrb[180].mxu1  ;;  %21669 = vmatpush3.bf16.msra.mxu0 %v21668_v17  ;;  %21701 = vmatpush3.bf16.msra.mxu1 %v21700_v28  ;;  %v26114_v28 = vld [vmem:[%s27215_s14 + $0x7d0] sm:$0xff]  ;;  %v26145_v1 = vld [vmem:[%s27215_s14 + $0x6e8] sm:$0xff] }
0x1972   : > { %v13506_v23 = vadd.f32 %v13505_v36, %v25887_v7  ;;  %v13619_v57 = vadd.f32 %v13618_v56, %v25907_v45  ;;  %v13507_v19 = vpop.f32.mrb[181].mxu0  ;;  %v13620_v17 = vpop.f32.mrb[181].mxu1  ;;  %21671 = vmatprep.subr.bf16.mxu0 %v21670_v25  ;;  %21703 = vmatprep.subr.bf16.mxu1 %v21702_v62  ;;  %v21676_v25 = vpack.c.bf16 %v26094_v59, %v26087_v32  ;;  %v26154_v56 = vld [vmem:[%s27215_s14 + $0x660] sm:$0xff] }
0x1973   : > { %v13508_v41 = vadd.f32 %v13507_v19, %v25918_v18  ;;  %v13621_v26 = vadd.f32 %v13620_v17, %v25951_v46  ;;  %14757 = vmatprep.mubr.f32.mxu0 %v13924_v63  ;;  %14862 = vmatprep.mubr.f32.mxu1 %v13926_v11  ;;  %v21708_v62 = vpack.c.bf16 %v26100_v34, %v26097_v35  ;;  %v14248_v63 = vld [vmem:[%s27215_s14 + $0x7e8] sm:$0xff] }
0x1974   : > { %14758 = vmatmul.mubr.f32.gmra.mrb[242].mxu0 %v13923_v16  ;;  %14863 = vmatmul.mubr.f32.gmra.mrb[242].mxu1 %v13925_v3  ;;  %v21710_v50 = vpack.c.bf16 %v26117_v24, %v26114_v28  ;;  %v13939_v43 = vmax.f32 %v13506_v23, 0.0  ;;  %v13941_v32 = vmax.f32 %v13619_v57, 0.0  ;;  %v26166_v16 = vld [vmem:[%s27215_s14 + $0x760] sm:$0xff]  ;;  %v26169_v3 = vld [vmem:[%s27215_s14 + $0x768] sm:$0xff]  ;;  %v26173_v24 = vrot.slane %v25861_v61, %v25640_v27 }
0x1975   : > { %v13940_v10 = vmax.f32 %v13508_v41, 0.0  ;;  %v13942_v9 = vmax.f32 %v13621_v26, 0.0  ;;  %v13511_v5 = vpop.f32.mrb[182].mxu0  ;;  %v13624_v33 = vpop.f32.mrb[182].mxu1  ;;  %21673 = vmatpush3.bf16.msra.mxu0 %v21672_v38  ;;  %21705 = vmatpush3.bf16.msra.mxu1 %v21704_v22  ;;  %v14247_v22 = vld [vmem:[%s27215_s14 + $0x7e0] sm:$0xff]  ;;  %v26176_v41 = vld [vmem:[%s27215_s14 + $0x6f0] sm:$0xff] }
0x1976   : > { %v13512_v59 = vadd.f32 %v13511_v5, %v25887_v7  ;;  %v13625_v35 = vadd.f32 %v13624_v33, %v25907_v45  ;;  %v13513_v34 = vpop.f32.mrb[183].mxu0  ;;  %v13626_v38 = vpop.f32.mrb[183].mxu1  ;;  %21675 = vmatprep.subr.bf16.mxu0 %v21674_v37  ;;  %21707 = vmatprep.subr.bf16.mxu1 %v21706_v30  ;;  %v21712_v37 = vpack.c.bf16 %v26135_v12, %v26132_v4  ;;  %v14218_v26 = vld [vmem:[%s27215_s14 + $0x6f8] sm:$0xff] }
0x1977   : > { %v13514_v11 = vadd.f32 %v13513_v34, %v25918_v18  ;;  %v13627_v36 = vadd.f32 %v13626_v38, %v25951_v46  ;;  %14762 = vmatprep.mubr.f32.mxu0 %v13940_v10  ;;  %14867 = vmatprep.mubr.f32.mxu1 %v13942_v9  ;;  %v21682_v30 = vpack.c.bf16 %v26145_v1, %v26142_v53 }
0x1978   : > { %14763 = vmatmul.mubr.f32.gmra.mrb[244].mxu0 %v13939_v43  ;;  %14868 = vmatmul.mubr.f32.gmra.mrb[244].mxu1 %v13941_v32  ;;  %v21714_v28 = vpack.c.bf16 %v14248_v63, %v14247_v22  ;;  %v13955_v31 = vmax.f32 %v13512_v59, 0.0  ;;  %v13957_v44 = vmax.f32 %v13625_v35, 0.0  ;;  %v26187_v53 = vrot.slane %v25861_v61, %v25643_v42  ;;  %v14201_v22 = vld [vmem:[%s27215_s14 + $0x670] sm:$0xff]  ;;  %v14202_v63 = vld [vmem:[%s27215_s14 + $0x678] sm:$0xff] }
0x1979   : > { %v13956_v23 = vmax.f32 %v13514_v11, 0.0  ;;  %v13958_v57 = vmax.f32 %v13627_v36, 0.0  ;;  %v13517_v19 = vpop.f32.mrb[184].mxu0  ;;  %v13630_v17 = vpop.f32.mrb[184].mxu1  ;;  %21677 = vmatpush3.bf16.msra.mxu0 %v21676_v25  ;;  %21709 = vmatpush3.bf16.msra.mxu1 %v21708_v62  ;;  %v14249_v25 = vld [vmem:[%s27215_s14 + $0x7f0] sm:$0xff]  ;;  %v14250_v62 = vld [vmem:[%s27215_s14 + $0x7f8] sm:$0xff]  ;;  %v26195_v1 = vrot.slane %v25861_v61, %v25646_v60  ;;  %v21686_v34 = vpack.c.bf16 %v14218_v26, %v26176_v41 }
0x197a   : > { %v13518_v4 = vadd.f32 %v13517_v19, %v25887_v7  ;;  %v13631_v12 = vadd.f32 %v13630_v17, %v25907_v45  ;;  %v13519_v10 = vpop.f32.mrb[185].mxu0  ;;  %v13632_v9 = vpop.f32.mrb[185].mxu1  ;;  %21679 = vmatprep.subr.bf16.mxu0 %v21678_v55  ;;  %21711 = vmatprep.subr.bf16.mxu1 %v21710_v50  ;;  %v21684_v55 = vpack.c.bf16 %v26163_v40, %v26154_v56 }
0x197b   : > { %v13520_v5 = vadd.f32 %v13519_v10, %v25918_v18  ;;  %v13633_v33 = vadd.f32 %v13632_v9, %v25951_v46  ;;  %14767 = vmatprep.mubr.f32.mxu0 %v13956_v23  ;;  %14872 = vmatprep.mubr.f32.mxu1 %v13958_v57  ;;  %v21716_v50 = vpack.c.bf16 %v26169_v3, %v26166_v16  ;;  %v14233_v23 = vld [vmem:[%s27215_s14 + $0x770] sm:$0xff]  ;;  %v14234_v57 = vld [vmem:[%s27215_s14 + $0x778] sm:$0xff] }
0x197c   : > { %14768 = vmatmul.mubr.f32.gmra.mrb[246].mxu0 %v13955_v31  ;;  %14873 = vmatmul.mubr.f32.gmra.mrb[246].mxu1 %v13957_v44  ;;  %v21718_v38 = vpack.c.bf16 %v14250_v62, %v14249_v25  ;;  %v13971_v11 = vmax.f32 %v13518_v4, 0.0  ;;  %v13973_v36 = vmax.f32 %v13631_v12, 0.0  ;;  %v26208_v19 = vrot.slane %v25861_v61, %v25653_v13 }
0x197d   : > { %v13972_v43 = vmax.f32 %v13520_v5, 0.0  ;;  %v13974_v32 = vmax.f32 %v13633_v33, 0.0  ;;  %v13523_v59 = vpop.f32.mrb[186].mxu0  ;;  %v13636_v35 = vpop.f32.mrb[186].mxu1  ;;  %21681 = vmatpush3.bf16.msra.mxu0 %v21680_v0  ;;  %21713 = vmatpush3.bf16.msra.mxu1 %v21712_v37 }
0x197e   : > { %v13524_v56 = vadd.f32 %v13523_v59, %v25887_v7  ;;  %v13637_v40 = vadd.f32 %v13636_v35, %v25907_v45  ;;  %v13525_v16 = vpop.f32.mrb[187].mxu0  ;;  %v13638_v3 = vpop.f32.mrb[187].mxu1  ;;  %21683 = vmatprep.subr.bf16.mxu0 %v21682_v30  ;;  %21715 = vmatprep.subr.bf16.mxu1 %v21714_v28  ;;  %v21688_v30 = vpack.c.bf16 %v14202_v63, %v14201_v22 }
0x197f   : > { %v13526_v0 = vadd.f32 %v13525_v16, %v25918_v18  ;;  %v13639_v37 = vadd.f32 %v13638_v3, %v25951_v46  ;;  %14772 = vmatprep.mubr.f32.mxu0 %v13972_v43  ;;  %14877 = vmatprep.mubr.f32.mxu1 %v13974_v32  ;;  %v21720_v28 = vpack.c.bf16 %v14234_v57, %v14233_v23 }
0x1980   : > { %14773 = vmatmul.mubr.f32.gmra.mrb[248].mxu0 %v13971_v11  ;;  %14878 = vmatmul.mubr.f32.gmra.mrb[248].mxu1 %v13973_v36  ;;  %v13987_v26 = vmax.f32 %v13524_v56, 0.0  ;;  %v13989_v18 = vmax.f32 %v13637_v40, 0.0 }
0x1981   : > { %v13988_v7 = vmax.f32 %v13526_v0, 0.0  ;;  %v13990_v45 = vmax.f32 %v13639_v37, 0.0  ;;  %v13707_v17 = vpop.f32.mrb[188].mxu0  ;;  %v13820_v41 = vpop.f32.mrb[188].mxu1  ;;  %21685 = vmatpush3.bf16.msra.mxu0 %v21684_v55  ;;  %21717 = vmatpush3.bf16.msra.mxu1 %v21716_v50 }
0x1982   : > { %v13708_v46 = vadd.f32 %v13707_v17, %v26173_v24  ;;  %v13821_v31 = vadd.f32 %v13820_v41, %v26187_v53  ;;  %v13709_v44 = vpop.f32.mrb[189].mxu0  ;;  %v13822_v4 = vpop.f32.mrb[189].mxu1  ;;  %21687 = vmatprep.subr.bf16.mxu0 %v21686_v34  ;;  %21719 = vmatprep.subr.bf16.mxu1 %v21718_v38 }
0x1983   : > { %v13710_v61 = vadd.f32 %v13709_v44, %v26195_v1  ;;  %v13823_v12 = vadd.f32 %v13822_v4, %v26208_v19  ;;  %14777 = vmatprep.mubr.f32.mxu0 %v13988_v7  ;;  %14882 = vmatprep.mubr.f32.mxu1 %v13990_v45 }
0x1984   : > { %14778 = vmatmul.mubr.f32.gmra.mrb[250].mxu0 %v13987_v26  ;;  %14883 = vmatmul.mubr.f32.gmra.mrb[250].mxu1 %v13989_v18  ;;  %v13879_v5 = vmax.f32 %v13708_v46, 0.0  ;;  %v13881_v33 = vmax.f32 %v13821_v31, 0.0 }
0x1985   : > { %v13880_v10 = vmax.f32 %v13710_v61, 0.0  ;;  %v13882_v9 = vmax.f32 %v13823_v12, 0.0  ;;  %v13713_v25 = vpop.f32.mrb[190].mxu0  ;;  %v13826_v62 = vpop.f32.mrb[190].mxu1  ;;  %21689 = vmatpush3.bf16.msra.mxu0 %v21688_v30  ;;  %21721 = vmatpush3.bf16.msra.mxu1 %v21720_v28 }
0x1986   : > { %v13714_v55 = vadd.f32 %v13713_v25, %v26173_v24  ;;  %v13827_v50 = vadd.f32 %v13826_v62, %v26187_v53  ;;  %v13715_v43 = vpop.f32.mrb[191].mxu0  ;;  %v13828_v32 = vpop.f32.mrb[191].mxu1 }
0x1987   : > { %v13716_v59 = vadd.f32 %v13715_v43, %v26195_v1  ;;  %v13829_v35 = vadd.f32 %v13828_v32, %v26208_v19  ;;  %14952 = vmatprep.mubr.f32.mxu0 %v13880_v10  ;;  %15057 = vmatprep.mubr.f32.mxu1 %v13882_v9 }
0x1988   : > { %14953 = vmatmul.mubr.f32.vlgmr.msra.gmra.mrb[252].mxu0 %v13879_v5  ;;  %15058 = vmatmul.mubr.f32.vlgmr.msra.gmra.mrb[252].mxu1 %v13881_v33  ;;  %v13895_v11 = vmax.f32 %v13714_v55, 0.0  ;;  %v13897_v36 = vmax.f32 %v13827_v50, 0.0 }
0x1989   : > { %v13896_v34 = vmax.f32 %v13716_v59, 0.0  ;;  %v13898_v38 = vmax.f32 %v13829_v35, 0.0  ;;  %v13719_v22 = vpop.f32.mrb[192].mxu0  ;;  %v13832_v63 = vpop.f32.mrb[192].mxu1 }
0x198a   : > { %v13720_v56 = vadd.f32 %v13719_v22, %v26173_v24  ;;  %v13833_v40 = vadd.f32 %v13832_v63, %v26187_v53  ;;  %v13721_v16 = vpop.f32.mrb[193].mxu0  ;;  %v13834_v3 = vpop.f32.mrb[193].mxu1 }
0x198b   : > { %v13722_v23 = vadd.f32 %v13721_v16, %v26195_v1  ;;  %v13835_v57 = vadd.f32 %v13834_v3, %v26208_v19  ;;  %14957 = vmatprep.mubr.f32.mxu0 %v13896_v34  ;;  %15062 = vmatprep.mubr.f32.mxu1 %v13898_v38 }
0x198c   : > { %14958 = vmatmul.mubr.f32.gmra.mrb[254].mxu0 %v13895_v11  ;;  %15063 = vmatmul.mubr.f32.gmra.mrb[254].mxu1 %v13897_v36  ;;  %v13911_v17 = vmax.f32 %v13720_v56, 0.0  ;;  %v13913_v41 = vmax.f32 %v13833_v40, 0.0 }
0x198d   : > { %v13912_v0 = vmax.f32 %v13722_v23, 0.0  ;;  %v13914_v37 = vmax.f32 %v13835_v57, 0.0  ;;  %v13725_v7 = vpop.f32.mrb[194].mxu0  ;;  %v13838_v45 = vpop.f32.mrb[194].mxu1 }
0x198e   : > { %v13726_v30 = vadd.f32 %v13725_v7, %v26173_v24  ;;  %v13839_v28 = vadd.f32 %v13838_v45, %v26187_v53  ;;  %v13727_v26 = vpop.f32.mrb[195].mxu0  ;;  %v13840_v18 = vpop.f32.mrb[195].mxu1 }
0x198f   : > { %v13728_v46 = vadd.f32 %v13727_v26, %v26195_v1  ;;  %v13841_v31 = vadd.f32 %v13840_v18, %v26208_v19  ;;  %14962 = vmatprep.mubr.f32.mxu0 %v13912_v0  ;;  %15067 = vmatprep.mubr.f32.mxu1 %v13914_v37 }
0x1990   : > { %14963 = vmatmul.mubr.f32.gmra.mrb[0].mxu0 %v13911_v17  ;;  %15068 = vmatmul.mubr.f32.gmra.mrb[0].mxu1 %v13913_v41  ;;  %v13927_v10 = vmax.f32 %v13726_v30, 0.0  ;;  %v13929_v9 = vmax.f32 %v13839_v28, 0.0 }
0x1991   : > { %v13928_v44 = vmax.f32 %v13728_v46, 0.0  ;;  %v13930_v4 = vmax.f32 %v13841_v31, 0.0  ;;  %v13731_v61 = vpop.f32.mrb[196].mxu0  ;;  %v13844_v12 = vpop.f32.mrb[196].mxu1 }
0x1992   : > { %v13732_v25 = vadd.f32 %v13731_v61, %v26173_v24  ;;  %v13845_v62 = vadd.f32 %v13844_v12, %v26187_v53  ;;  %v13733_v5 = vpop.f32.mrb[197].mxu0  ;;  %v13846_v33 = vpop.f32.mrb[197].mxu1 }
0x1993   : > { %v13734_v55 = vadd.f32 %v13733_v5, %v26195_v1  ;;  %v13847_v50 = vadd.f32 %v13846_v33, %v26208_v19  ;;  %14967 = vmatprep.mubr.f32.mxu0 %v13928_v44  ;;  %15072 = vmatprep.mubr.f32.mxu1 %v13930_v4 }
0x1994   : > { %14968 = vmatmul.mubr.f32.gmra.mrb[2].mxu0 %v13927_v10  ;;  %15073 = vmatmul.mubr.f32.gmra.mrb[2].mxu1 %v13929_v9  ;;  %v13943_v34 = vmax.f32 %v13732_v25, 0.0  ;;  %v13945_v38 = vmax.f32 %v13845_v62, 0.0 }
0x1995   : > { %v13944_v43 = vmax.f32 %v13734_v55, 0.0  ;;  %v13946_v32 = vmax.f32 %v13847_v50, 0.0  ;;  %v13737_v59 = vpop.f32.mrb[198].mxu0  ;;  %v13850_v35 = vpop.f32.mrb[198].mxu1 }
0x1996   : > { %v13738_v22 = vadd.f32 %v13737_v59, %v26173_v24  ;;  %v13851_v63 = vadd.f32 %v13850_v35, %v26187_v53  ;;  %v13739_v11 = vpop.f32.mrb[199].mxu0  ;;  %v13852_v36 = vpop.f32.mrb[199].mxu1 }
0x1997   : > { %v13740_v56 = vadd.f32 %v13739_v11, %v26195_v1  ;;  %v13853_v40 = vadd.f32 %v13852_v36, %v26208_v19  ;;  %14972 = vmatprep.mubr.f32.mxu0 %v13944_v43  ;;  %15077 = vmatprep.mubr.f32.mxu1 %v13946_v32 }
0x1998   : > { %14973 = vmatmul.mubr.f32.gmra.mrb[4].mxu0 %v13943_v34  ;;  %15078 = vmatmul.mubr.f32.gmra.mrb[4].mxu1 %v13945_v38  ;;  %v13959_v0 = vmax.f32 %v13738_v22, 0.0  ;;  %v13961_v37 = vmax.f32 %v13851_v63, 0.0 }
0x1999   : > { %v13960_v16 = vmax.f32 %v13740_v56, 0.0  ;;  %v13962_v3 = vmax.f32 %v13853_v40, 0.0  ;;  %v13743_v23 = vpop.f32.mrb[200].mxu0  ;;  %v13856_v57 = vpop.f32.mrb[200].mxu1 }
0x199a   : > { %v13744_v7 = vadd.f32 %v13743_v23, %v26173_v24  ;;  %v13857_v45 = vadd.f32 %v13856_v57, %v26187_v53  ;;  %v13745_v17 = vpop.f32.mrb[201].mxu0  ;;  %v13858_v41 = vpop.f32.mrb[201].mxu1 }
0x199b   : > { %v13746_v30 = vadd.f32 %v13745_v17, %v26195_v1  ;;  %v13859_v28 = vadd.f32 %v13858_v41, %v26208_v19  ;;  %14977 = vmatprep.mubr.f32.mxu0 %v13960_v16  ;;  %15082 = vmatprep.mubr.f32.mxu1 %v13962_v3 }
0x199c   : > { %14978 = vmatmul.mubr.f32.gmra.mrb[6].mxu0 %v13959_v0  ;;  %15083 = vmatmul.mubr.f32.gmra.mrb[6].mxu1 %v13961_v37  ;;  %v13975_v44 = vmax.f32 %v13744_v7, 0.0  ;;  %v13977_v4 = vmax.f32 %v13857_v45, 0.0 }
0x199d   : > { %v13976_v26 = vmax.f32 %v13746_v30, 0.0  ;;  %v13978_v18 = vmax.f32 %v13859_v28, 0.0  ;;  %v13749_v46 = vpop.f32.mrb[202].mxu0  ;;  %v13862_v31 = vpop.f32.mrb[202].mxu1 }
0x199e   : > { %v13750_v61 = vadd.f32 %v13749_v46, %v26173_v24  ;;  %v13863_v12 = vadd.f32 %v13862_v31, %v26187_v53  ;;  %v13751_v10 = vpop.f32.mrb[203].mxu0  ;;  %v13864_v9 = vpop.f32.mrb[203].mxu1 }
0x199f   : > { %v13752_v25 = vadd.f32 %v13751_v10, %v26195_v1  ;;  %v13865_v62 = vadd.f32 %v13864_v9, %v26208_v19  ;;  %14982 = vmatprep.mubr.f32.mxu0 %v13976_v26  ;;  %15087 = vmatprep.mubr.f32.mxu1 %v13978_v18  ;;  %v19397_v1 = vld [vmem:[%s22741_s19] ss:$0 sm:$0xff] }
0x19a0   : > { %14983 = vmatmul.mubr.f32.gmra.mrb[8].mxu0 %v13975_v44  ;;  %15088 = vmatmul.mubr.f32.gmra.mrb[8].mxu1 %v13977_v4  ;;  %v13991_v55 = vmax.f32 %v13750_v61, 0.0  ;;  %v13993_v50 = vmax.f32 %v13863_v12, 0.0 }
0x19a1   : > { %v13992_v5 = vmax.f32 %v13752_v25, 0.0  ;;  %v13994_v33 = vmax.f32 %v13865_v62, 0.0 }
0x19a3   : > { %14987 = vmatprep.mubr.f32.mxu0 %v13992_v5  ;;  %15092 = vmatprep.mubr.f32.mxu1 %v13994_v33 }
0x19a4   : > { %14988 = vmatmul.mubr.f32.gmra.mrb[10].mxu0 %v13991_v55  ;;  %15093 = vmatmul.mubr.f32.gmra.mrb[10].mxu1 %v13993_v50 }
0x19a5   : > { %21247 = vmatprep.mubr.msk.f32.mxu0 %vm27340_vm15, %v27259_v15  ;;  %21276 = vmatprep.mubr.msk.f32.mxu1 %vm27340_vm15, %v27259_v15 }
0x19d1   : > { %v19775_v24 = vpop.f32.mrb[204].mxu0  ;;  %v19831_v53 = vpop.f32.mrb[204].mxu1 }
0x19d2   : > { %v19776_v19 = vpop.f32.mrb[205].mxu0  ;;  %v19832_v43 = vpop.f32.mrb[205].mxu1 }
0x19d3   : > { %v19777_v32 = vadd.f32 %v19776_v19, %v19775_v24  ;;  %v19833_v59 = vadd.f32 %v19832_v43, %v19831_v53 }
0x19d5   : > { %v14325_v35 = vadd.f32 %v19777_v32, %v19397_v1  ;;  %v19778_v34 = vpop.f32.mrb[206].mxu0  ;;  %v19834_v38 = vpop.f32.mrb[206].mxu1 }
0x19d6   : > { %v19779_v22 = vpop.f32.mrb[207].mxu0  ;;  %v19835_v63 = vpop.f32.mrb[207].mxu1 }
0x19d7   : > { %v14430_v11 = vadd.f32 %v19833_v59, %v14325_v35  ;;  %v19780_v36 = vadd.f32 %v19779_v22, %v19778_v34  ;;  %v19836_v56 = vadd.f32 %v19835_v63, %v19834_v38 }
0x19d9   : > { %v14330_v40 = vadd.f32 %v19780_v36, %v19397_v1  ;;  %v19781_v16 = vpop.f32.mrb[208].mxu0  ;;  %v19837_v3 = vpop.f32.mrb[208].mxu1 }
0x19da   : > { %v19782_v23 = vpop.f32.mrb[209].mxu0  ;;  %v19838_v57 = vpop.f32.mrb[209].mxu1 }
0x19db   : > { %v14435_v0 = vadd.f32 %v19836_v56, %v14330_v40  ;;  %v19783_v37 = vadd.f32 %v19782_v23, %v19781_v16  ;;  %v19839_v7 = vadd.f32 %v19838_v57, %v19837_v3 }
0x19dd   : > { %v14335_v45 = vadd.f32 %v19783_v37, %v19397_v1  ;;  %v19784_v17 = vpop.f32.mrb[210].mxu0  ;;  %v19840_v41 = vpop.f32.mrb[210].mxu1 }
0x19de   : > { %v19785_v28 = vpop.f32.mrb[211].mxu0  ;;  %v19841_v26 = vpop.f32.mrb[211].mxu1 }
0x19df   : > { %v14440_v30 = vadd.f32 %v19839_v7, %v14335_v45  ;;  %v19786_v18 = vadd.f32 %v19785_v28, %v19784_v17  ;;  %v19842_v46 = vadd.f32 %v19841_v26, %v19840_v41 }
0x19e1   : > { %v14340_v31 = vadd.f32 %v19786_v18, %v19397_v1 }
0x19e3   : > { %v26247_v44 = vadd.f32 %v19842_v46, %v14340_v31 }
0x1a0b   : > { %v19787_v4 = vpop.f32.mrb[212].mxu0  ;;  %v19843_v61 = vpop.f32.mrb[212].mxu1 }
0x1a0c   : > { %v19788_v12 = vpop.f32.mrb[213].mxu0  ;;  %v19844_v10 = vpop.f32.mrb[213].mxu1 }
0x1a0d   : > { %v19789_v9 = vadd.f32 %v19788_v12, %v19787_v4  ;;  %v19845_v25 = vadd.f32 %v19844_v10, %v19843_v61 }
0x1a0f   : > { %v14345_v62 = vadd.f32 %v19789_v9, %v19397_v1  ;;  %v19790_v5 = vpop.f32.mrb[214].mxu0  ;;  %v19846_v33 = vpop.f32.mrb[214].mxu1 }
0x1a10   : > { %v19791_v55 = vpop.f32.mrb[215].mxu0  ;;  %v19847_v50 = vpop.f32.mrb[215].mxu1 }
0x1a11   : > { %v14450_v24 = vadd.f32 %v19845_v25, %v14345_v62  ;;  %v19792_v53 = vadd.f32 %v19791_v55, %v19790_v5  ;;  %v19848_v19 = vadd.f32 %v19847_v50, %v19846_v33 }
0x1a13   : > { %v14350_v43 = vadd.f32 %v19792_v53, %v19397_v1  ;;  %v19793_v32 = vpop.f32.mrb[216].mxu0  ;;  %v19849_v59 = vpop.f32.mrb[216].mxu1 }
0x1a14   : > { %v19794_v35 = vpop.f32.mrb[217].mxu0  ;;  %v19850_v34 = vpop.f32.mrb[217].mxu1 }
0x1a15   : > { %v14455_v38 = vadd.f32 %v19848_v19, %v14350_v43  ;;  %v19795_v22 = vadd.f32 %v19794_v35, %v19793_v32  ;;  %v19851_v63 = vadd.f32 %v19850_v34, %v19849_v59 }
0x1a17   : > { %v14355_v36 = vadd.f32 %v19795_v22, %v19397_v1  ;;  %v19796_v56 = vpop.f32.mrb[218].mxu0  ;;  %v19852_v40 = vpop.f32.mrb[218].mxu1 }
0x1a18   : > { %v19797_v16 = vpop.f32.mrb[219].mxu0  ;;  %v19853_v3 = vpop.f32.mrb[219].mxu1 }
0x1a19   : > { %v14460_v23 = vadd.f32 %v19851_v63, %v14355_v36  ;;  %v19798_v57 = vadd.f32 %v19797_v16, %v19796_v56  ;;  %v19854_v37 = vadd.f32 %v19853_v3, %v19852_v40 }
0x1a1b   : > { %v14360_v7 = vadd.f32 %v19798_v57, %v19397_v1  ;;  %v19887_v45 = vpop.f32.mrb[220].mxu0  ;;  %v19943_v17 = vpop.f32.mrb[220].mxu1 }
0x1a1c   : > { %v19888_v41 = vpop.f32.mrb[221].mxu0  ;;  %v19944_v28 = vpop.f32.mrb[221].mxu1 }
0x1a1d   : > { %v14465_v26 = vadd.f32 %v19854_v37, %v14360_v7  ;;  %v19889_v18 = vadd.f32 %v19888_v41, %v19887_v45  ;;  %v19945_v46 = vadd.f32 %v19944_v28, %v19943_v17 }
0x1a1f   : > { %v14535_v31 = vadd.f32 %v19889_v18, %v14430_v11  ;;  %v19890_v4 = vpop.f32.mrb[222].mxu0  ;;  %v19946_v61 = vpop.f32.mrb[222].mxu1 }
0x1a20   : > { %v19891_v12 = vpop.f32.mrb[223].mxu0  ;;  %v19947_v10 = vpop.f32.mrb[223].mxu1 }
0x1a21   : > { %v14640_v9 = vadd.f32 %v19945_v46, %v14535_v31  ;;  %v19892_v25 = vadd.f32 %v19891_v12, %v19890_v4  ;;  %v19948_v62 = vadd.f32 %v19947_v10, %v19946_v61 }
0x1a23   : > { %v14540_v5 = vadd.f32 %v19892_v25, %v14435_v0  ;;  %v19893_v33 = vpop.f32.mrb[224].mxu0  ;;  %v19949_v55 = vpop.f32.mrb[224].mxu1 }
0x1a24   : > { %v19894_v50 = vpop.f32.mrb[225].mxu0  ;;  %v19950_v1 = vpop.f32.mrb[225].mxu1 }
0x1a25   : > { %v14645_v53 = vadd.f32 %v19948_v62, %v14540_v5  ;;  %v19895_v19 = vadd.f32 %v19894_v50, %v19893_v33  ;;  %v19951_v43 = vadd.f32 %v19950_v1, %v19949_v55 }
0x1a27   : > { %v14545_v32 = vadd.f32 %v19895_v19, %v14440_v30  ;;  %v19896_v59 = vpop.f32.mrb[226].mxu0  ;;  %v19952_v35 = vpop.f32.mrb[226].mxu1 }
0x1a28   : > { %v19897_v34 = vpop.f32.mrb[227].mxu0  ;;  %v19953_v11 = vpop.f32.mrb[227].mxu1 }
0x1a29   : > { %v14650_v22 = vadd.f32 %v19951_v43, %v14545_v32  ;;  %v19898_v63 = vadd.f32 %v19897_v34, %v19896_v59  ;;  %v19954_v36 = vadd.f32 %v19953_v11, %v19952_v35 }
0x1a2b   : > { %v14550_v56 = vadd.f32 %v19898_v63, %v26247_v44  ;;  %v19899_v40 = vpop.f32.mrb[228].mxu0  ;;  %v19955_v16 = vpop.f32.mrb[228].mxu1 }
0x1a2c   : > { %v19900_v0 = vpop.f32.mrb[229].mxu0  ;;  %v19956_v3 = vpop.f32.mrb[229].mxu1 }
0x1a2d   : > { %v14655_v57 = vadd.f32 %v19954_v36, %v14550_v56  ;;  %v19901_v37 = vadd.f32 %v19900_v0, %v19899_v40  ;;  %v19957_v7 = vadd.f32 %v19956_v3, %v19955_v16 }
0x1a2f   : > { %v14555_v45 = vadd.f32 %v19901_v37, %v14450_v24  ;;  %v19902_v17 = vpop.f32.mrb[230].mxu0  ;;  %v19958_v41 = vpop.f32.mrb[230].mxu1 }
0x1a30   : > { %v19903_v30 = vpop.f32.mrb[231].mxu0  ;;  %v19959_v28 = vpop.f32.mrb[231].mxu1 }
0x1a31   : > { %v14660_v18 = vadd.f32 %v19957_v7, %v14555_v45  ;;  %v19904_v46 = vadd.f32 %v19903_v30, %v19902_v17  ;;  %v19960_v31 = vadd.f32 %v19959_v28, %v19958_v41 }
0x1a33   : > { %v14560_v4 = vadd.f32 %v19904_v46, %v14455_v38  ;;  %v19905_v61 = vpop.f32.mrb[232].mxu0  ;;  %v19961_v12 = vpop.f32.mrb[232].mxu1 }
0x1a34   : > { %v19906_v10 = vpop.f32.mrb[233].mxu0  ;;  %v19962_v44 = vpop.f32.mrb[233].mxu1 }
0x1a35   : > { %v14665_v25 = vadd.f32 %v19960_v31, %v14560_v4  ;;  %v19907_v62 = vadd.f32 %v19906_v10, %v19905_v61  ;;  %v19963_v5 = vadd.f32 %v19962_v44, %v19961_v12 }
0x1a37   : > { %v14565_v33 = vadd.f32 %v19907_v62, %v14460_v23  ;;  %v19908_v55 = vpop.f32.mrb[234].mxu0  ;;  %v19964_v50 = vpop.f32.mrb[234].mxu1 }
0x1a38   : > { %v19909_v1 = vpop.f32.mrb[235].mxu0  ;;  %v19965_v24 = vpop.f32.mrb[235].mxu1 }
0x1a39   : > { %v14670_v19 = vadd.f32 %v19963_v5, %v14565_v33  ;;  %v19910_v43 = vadd.f32 %v19909_v1, %v19908_v55  ;;  %v19966_v32 = vadd.f32 %v19965_v24, %v19964_v50 }
0x1a3b   : > { %v14570_v59 = vadd.f32 %v19910_v43, %v14465_v26  ;;  %v19999_v35 = vpop.f32.mrb[236].mxu0  ;;  %v20055_v34 = vpop.f32.mrb[236].mxu1 }
0x1a3c   : > { %v20000_v11 = vpop.f32.mrb[237].mxu0  ;;  %v20056_v38 = vpop.f32.mrb[237].mxu1 }
0x1a3d   : > { %v14675_v63 = vadd.f32 %v19966_v32, %v14570_v59  ;;  %v20001_v36 = vadd.f32 %v20000_v11, %v19999_v35  ;;  %v20057_v56 = vadd.f32 %v20056_v38, %v20055_v34 }
0x1a3f   : > { %v14745_v40 = vadd.f32 %v20001_v36, %v14640_v9  ;;  %v20002_v16 = vpop.f32.mrb[238].mxu0  ;;  %v20058_v0 = vpop.f32.mrb[238].mxu1 }
0x1a40   : > { %v20003_v3 = vpop.f32.mrb[239].mxu0  ;;  %v20059_v23 = vpop.f32.mrb[239].mxu1 }
0x1a41   : > { %v26250_v37 = vadd.f32 %v20057_v56, %v14745_v40  ;;  %v20004_v7 = vadd.f32 %v20003_v3, %v20002_v16  ;;  %v20060_v45 = vadd.f32 %v20059_v23, %v20058_v0  ;;  %v15320_v16 = vpop.permute.xlu1 %15319 }
0x1a43   : > { %v14750_v17 = vadd.f32 %v20004_v7, %v14645_v53  ;;  %v20005_v41 = vpop.f32.mrb[240].mxu0  ;;  %v20061_v30 = vpop.f32.mrb[240].mxu1 }
0x1a44   : > { %v20006_v26 = vpop.f32.mrb[241].mxu0  ;;  %v20062_v28 = vpop.f32.mrb[241].mxu1 }
0x1a45   : > { %v26252_v46 = vadd.f32 %v20060_v45, %v14750_v17  ;;  %v20007_v31 = vadd.f32 %v20006_v26, %v20005_v41  ;;  %v20063_v4 = vadd.f32 %v20062_v28, %v20061_v30  ;;  %v15317_v30 = vpop.permute.xlu0 %15316 }
0x1a47   : > { %v14755_v61 = vadd.f32 %v20007_v31, %v14650_v22  ;;  %v20008_v12 = vpop.f32.mrb[242].mxu0  ;;  %v20064_v9 = vpop.f32.mrb[242].mxu1 }
0x1a48   : > { %v20009_v10 = vpop.f32.mrb[243].mxu0  ;;  %v20065_v44 = vpop.f32.mrb[243].mxu1 }
0x1a49   : > { %v26254_v62 = vadd.f32 %v20063_v4, %v14755_v61  ;;  %v20010_v5 = vadd.f32 %v20009_v10, %v20008_v12  ;;  %v20066_v33 = vadd.f32 %v20065_v44, %v20064_v9  ;;  %v15323_v10 = vpop.permute.xlu1 %15322 }
0x1a4b   : > { %v14760_v55 = vadd.f32 %v20010_v5, %v14655_v57  ;;  %v20011_v50 = vpop.f32.mrb[244].mxu0  ;;  %v20067_v53 = vpop.f32.mrb[244].mxu1 }
0x1a4c   : > { %v20012_v1 = vpop.f32.mrb[245].mxu0  ;;  %v20068_v24 = vpop.f32.mrb[245].mxu1 }
0x1a4d   : > { %v26256_v43 = vadd.f32 %v20066_v33, %v14760_v55  ;;  %v20013_v32 = vadd.f32 %v20012_v1, %v20011_v50  ;;  %v20069_v59 = vadd.f32 %v20068_v24, %v20067_v53  ;;  %v15326_v24 = vpop.permute.xlu0 %15325 }
0x1a4f   : > { %v14765_v35 = vadd.f32 %v20013_v32, %v14660_v18  ;;  %v20014_v34 = vpop.f32.mrb[246].mxu0  ;;  %v20070_v22 = vpop.f32.mrb[246].mxu1 }
0x1a50   : > { %v20015_v11 = vpop.f32.mrb[247].mxu0  ;;  %v20071_v38 = vpop.f32.mrb[247].mxu1 }
0x1a51   : > { %v26258_v36 = vadd.f32 %v20069_v59, %v14765_v35  ;;  %v20016_v56 = vadd.f32 %v20015_v11, %v20014_v34  ;;  %v20072_v40 = vadd.f32 %v20071_v38, %v20070_v22 }
0x1a53   : > { %v14770_v0 = vadd.f32 %v20016_v56, %v14665_v25  ;;  %v20017_v57 = vpop.f32.mrb[248].mxu0  ;;  %v20073_v3 = vpop.f32.mrb[248].mxu1 }
0x1a54   : > { %v20018_v23 = vpop.f32.mrb[249].mxu0  ;;  %v20074_v7 = vpop.f32.mrb[249].mxu1 }
0x1a55   : > { %v26260_v45 = vadd.f32 %v20072_v40, %v14770_v0  ;;  %v20019_v17 = vadd.f32 %v20018_v23, %v20017_v57  ;;  %v20075_v41 = vadd.f32 %v20074_v7, %v20073_v3  ;;  %v15329_v56 = vpop.permute.xlu1 %15328 }
0x1a57   : > { %v14775_v18 = vadd.f32 %v20019_v17, %v14670_v19  ;;  %v20020_v26 = vpop.f32.mrb[250].mxu0  ;;  %v20076_v28 = vpop.f32.mrb[250].mxu1 }
0x1a58   : > { %v20021_v31 = vpop.f32.mrb[251].mxu0  ;;  %v20077_v4 = vpop.f32.mrb[251].mxu1 }
0x1a59   : > { %v26262_v61 = vadd.f32 %v20075_v41, %v14775_v18  ;;  %v20022_v12 = vadd.f32 %v20021_v31, %v20020_v26  ;;  %v20078_v9 = vadd.f32 %v20077_v4, %v20076_v28 }
0x1a5b   : > { %v14780_v25 = vadd.f32 %v20022_v12, %v14675_v63  ;;  %v20111_v44 = vpop.f32.mrb[252].mxu0  ;;  %v20167_v5 = vpop.f32.mrb[252].mxu1  ;;  %v27341_v63 = vld [vmem:[#allocation48_spill] sm:$0xff] }
0x1a5c   : > { %v20112_v33 = vpop.f32.mrb[253].mxu0  ;;  %v20168_v55 = vpop.f32.mrb[253].mxu1  ;;  %v15346_v40 = vrot.slane %v15320_v16, %v27341_v63  ;;  %v15342_v0 = vrot.slane %v15317_v30, %v27341_v63  ;;  %v15354_v31 = vrot.slane %v15326_v24, %v27341_v63 }
0x1a5d   : > { %v26264_v50 = vadd.f32 %v20078_v9, %v14780_v25  ;;  %v20113_v53 = vadd.f32 %v20112_v33, %v20111_v44  ;;  %v20169_v1 = vadd.f32 %v20168_v55, %v20167_v5  ;;  %v15332_v30 = vpop.permute.xlu0 %15331  ;;  %v15358_v25 = vrot.slane %v15329_v56, %v27341_v63  ;;  %v15335_v33 = vpop.permute.xlu1 %15334 }
0x1a5f   : > { %v14955_v19 = vadd.f32 %v20113_v53, %v26250_v37  ;;  %v20114_v32 = vpop.f32.mrb[254].mxu0  ;;  %v20170_v59 = vpop.f32.mrb[254].mxu1  ;;  %v15350_v37 = vrot.slane %v15323_v10, %v27341_v63 }
0x1a60   : > { %v20115_v35 = vpop.f32.mrb[255].mxu0  ;;  %v20171_v34 = vpop.f32.mrb[255].mxu1 }
0x1a61   : > { %v15060_v22 = vadd.f32 %v20169_v1, %v14955_v19  ;;  %v20116_v11 = vadd.f32 %v20115_v35, %v20114_v32  ;;  %v20172_v38 = vadd.f32 %v20171_v34, %v20170_v59  ;;  %v15338_v56 = vpop.permute.xlu0 %15337 }
0x1a63   : > { %v14960_v57 = vadd.f32 %v20116_v11, %v26252_v46  ;;  %v20117_v3 = vpop.f32.mrb[0].mxu0  ;;  %v20173_v23 = vpop.f32.mrb[0].mxu1  ;;  %v26271_v7 = vadd.f32 %v15060_v22, %v25145_v8  ;;  %v15371_v46 = vsel %vm2047_vm12, %v15346_v40, %v15342_v0  ;;  %v15366_v22 = vrot.slane %v15335_v33, %v27341_v63 }
0x1a64   : > { %v20118_v17 = vpop.f32.mrb[1].mxu0  ;;  %v20174_v41 = vpop.f32.mrb[1].mxu1  ;;  %v15372_v10 = vsel %vm2048_vm9, %v15350_v37, %v15371_v46 }
0x1a65   : > { %v15065_v18 = vadd.f32 %v20172_v38, %v14960_v57  ;;  %v20119_v26 = vadd.f32 %v20118_v17, %v20117_v3  ;;  %v20175_v28 = vadd.f32 %v20174_v41, %v20173_v23  ;;  %v15108_v16 = vsel %vm1162_vm2, %v26271_v7, 0.0 }
0x1a66   : > { %15109 = vadd.xlane.f32.xlu1 %v15108_v16  ;;  %v15373_v24 = vsel %vm2050_vm1, %v15354_v31, %v15372_v10 }
0x1a67   : > { %v14965_v8 = vadd.f32 %v20119_v26, %v26254_v62  ;;  %v20120_v4 = vpop.f32.mrb[2].mxu0  ;;  %v20176_v12 = vpop.f32.mrb[2].mxu1  ;;  %v26279_v9 = vadd.f32 %v15065_v18, %v25162_v51  ;;  %v15362_v51 = vrot.slane %v15332_v30, %v27341_v63  ;;  %v15374_v34 = vsel %vm2052_vm0, %v15358_v25, %v15373_v24 }
0x1a68   : > { %v20121_v44 = vpop.f32.mrb[3].mxu0  ;;  %v20177_v5 = vpop.f32.mrb[3].mxu1  ;;  %v15370_v18 = vrot.slane %v15338_v56, %v27341_v63 }
0x1a69   : > { %v15070_v55 = vadd.f32 %v20175_v28, %v14965_v8  ;;  %v20122_v53 = vadd.f32 %v20121_v44, %v20120_v4  ;;  %v20178_v1 = vadd.f32 %v20177_v5, %v20176_v12  ;;  %v15111_v62 = vsel %vm1162_vm2, %v26279_v9, 0.0 }
0x1a6a   : > { %15112 = vadd.xlane.f32.xlu0 %v15111_v62  ;;  %v15375_v3 = vsel %vm2054_vm14, %v15362_v51, %v15374_v34 }
0x1a6b   : > { %v14970_v19 = vadd.f32 %v20122_v53, %v26256_v43  ;;  %v20123_v32 = vpop.f32.mrb[4].mxu0  ;;  %v20179_v59 = vpop.f32.mrb[4].mxu1  ;;  %v26288_v35 = vadd.f32 %v15070_v55, %v25173_v21  ;;  %v15376_v41 = vsel %vm2056_vm4, %v15366_v22, %v15375_v3 }
0x1a6c   : > { %v20124_v11 = vpop.f32.mrb[5].mxu0  ;;  %v20180_v38 = vpop.f32.mrb[5].mxu1  ;;  %v15377_v12 = vsel %vm2058_vm5, %v15370_v18, %v15376_v41 }
0x1a6d   : > { %v15075_v40 = vadd.f32 %v20178_v1, %v14970_v19  ;;  %v20125_v0 = vadd.f32 %v20124_v11, %v20123_v32  ;;  %v20181_v57 = vadd.f32 %v20180_v38, %v20179_v59  ;;  %v15114_v43 = vsel %vm1162_vm2, %v26288_v35, 0.0 }
0x1a6e   : > { %15115 = vadd.xlane.f32.xlu0 %v15114_v43  ;;  %v26307_v19 = vsel %vm2118_vm13, %v15377_v12, 2147483648 }
0x1a6f   : > { %v14975_v21 = vadd.f32 %v20125_v0, %v26258_v36  ;;  %v20126_v23 = vpop.f32.mrb[6].mxu0  ;;  %v20182_v37 = vpop.f32.mrb[6].mxu1  ;;  %v26296_v17 = vadd.f32 %v15075_v40, %v25184_v29 }
0x1a70   : > { %v20127_v26 = vpop.f32.mrb[7].mxu0  ;;  %v20183_v28 = vpop.f32.mrb[7].mxu1 }
0x1a71   : > { %v15080_v16 = vadd.f32 %v20181_v57, %v14975_v21  ;;  %v20128_v30 = vadd.f32 %v20127_v26, %v20126_v23  ;;  %v20184_v46 = vadd.f32 %v20183_v28, %v20182_v37  ;;  %v15117_v31 = vsel %vm1162_vm2, %v26296_v17, 0.0 }
0x1a72   : > { %15118 = vadd.xlane.f32.xlu1 %v15117_v31 }
0x1a73   : > { %v14980_v36 = vadd.f32 %v20128_v30, %v26260_v45  ;;  %v20129_v8 = vpop.f32.mrb[8].mxu0  ;;  %v20185_v4 = vpop.f32.mrb[8].mxu1  ;;  %v15102_v29 = vadd.f32 %v15080_v16, %v25243_v58 }
0x1a74   : > { %v20130_v10 = vpop.f32.mrb[9].mxu0  ;;  %v20186_v25 = vpop.f32.mrb[9].mxu1 }
0x1a75   : > { %v15085_v44 = vadd.f32 %v20184_v46, %v14980_v36  ;;  %v20131_v5 = vadd.f32 %v20130_v10, %v20129_v8  ;;  %v20187_v33 = vadd.f32 %v20186_v25, %v20185_v4  ;;  %v15120_v55 = vsel %vm1162_vm2, %v15102_v29, 0.0 }
0x1a76   : > { %15121 = vadd.xlane.f32.xlu0 %v15120_v55 }
0x1a77   : > { %v14985_v53 = vadd.f32 %v20131_v5, %v26262_v61  ;;  %v20132_v1 = vpop.f32.mrb[10].mxu0  ;;  %v20188_v62 = vpop.f32.mrb[10].mxu1  ;;  %v15103_v24 = vadd.f32 %v15085_v44, %v25252_v2  ;;  %v15380_v61 = vshra.s32 %v26307_v19, 16 }
0x1a78   : > { %v20133_v45 = vpop.f32.mrb[11].mxu0  ;;  %v20189_v51 = vpop.f32.mrb[11].mxu1 }
0x1a79   : > { %v15090_v58 = vadd.f32 %v20187_v33, %v14985_v53  ;;  %v20134_v32 = vadd.f32 %v20133_v45, %v20132_v1  ;;  %v20190_v59 = vadd.f32 %v20189_v51, %v20188_v62  ;;  %v15123_v34 = vsel %vm1162_vm2, %v15103_v24, 0.0 }
0x1a7a   : > { %15124 = vadd.xlane.f32.xlu1 %v15123_v34  ;;  %v15382_v40 = vcvt.s32.f32 %v15380_v61  ;;  %v15379_v51 = vand.u32 65535, %v26307_v19  ;;  %v22681_v61 = vmov 0.0|0.0  }
0x1a7b   : > { %v14990_v22 = vadd.f32 %v20134_v32, %v26264_v50  ;;  %v15104_v11 = vadd.f32 %v15090_v58, %v25265_v54  ;;  %21722 = vmatprep.subr.bf16.mxu0 %v22681_v61  ;;  %21743 = vmatprep.subr.bf16.mxu1 %v22681_v61 }
0x1a7c   : > { %v15381_v34 = vcvt.s32.f32 %v15379_v51 }
0x1a7d   : > { %v15095_v38 = vadd.f32 %v20190_v59, %v14990_v22  ;;  %v15126_v2 = vsel %vm1162_vm2, %v15104_v11, 0.0 }
0x1a7e   : > { %15127 = vadd.xlane.f32.xlu0 %v15126_v2 }
0x1a7f   : > { %v15105_v56 = vadd.f32 %v15095_v38, %v25274_v47 }
0x1a81   : > { %v15129_v0 = vsel %vm1162_vm2, %v15105_v56, 0.0 }
0x1a82   : > { %15130 = vadd.xlane.f32.xlu1 %v15129_v0  ;;  %15383 = vmax.xlane.f32.xlu0 %v15382_v40 }
0x1af3   : > { %v15110_v57 = vpop.xlane.xlu1 %15109 }
0x1af4   : > { %v15132_v43 = vmul.f32 0.03125, %v15110_v57 }
0x1af6   : > { %v26317_v3 = vsub.f32 %v26271_v7, %v15132_v43 }
0x1af7   : > { %v15113_v50 = vpop.xlane.xlu0 %15112 }
0x1af8   : > { %v15133_v54 = vmul.f32 0.03125, %v15113_v50  ;;  %v15148_v21 = vmul.f32 %v26317_v3, %v26317_v3 }
0x1afa   : > { %v26322_v23 = vsub.f32 %v26279_v9, %v15133_v54  ;;  %v15156_v47 = vsel %vm1162_vm2, %v15148_v21, 0.0 }
0x1afb   : > { %15157 = vadd.xlane.f32.xlu1 %v15156_v47  ;;  %v15116_v37 = vpop.xlane.xlu0 %15115 }
0x1afc   : > { %v15134_v41 = vmul.f32 0.03125, %v15116_v37  ;;  %v15149_v18 = vmul.f32 %v26322_v23, %v26322_v23 }
0x1afe   : > { %v26328_v26 = vsub.f32 %v26288_v35, %v15134_v41  ;;  %v15159_v7 = vsel %vm1162_vm2, %v15149_v18, 0.0 }
0x1aff   : > { %v15119_v28 = vpop.xlane.xlu1 %15118  ;;  %15160 = vadd.xlane.f32.xlu0 %v15159_v7 }
0x1b00   : > { %v15135_v16 = vmul.f32 0.03125, %v15119_v28  ;;  %v15150_v9 = vmul.f32 %v26328_v26, %v26328_v26 }
0x1b02   : > { %v26334_v30 = vsub.f32 %v26296_v17, %v15135_v16  ;;  %v15162_v46 = vsel %vm1162_vm2, %v15150_v9, 0.0 }
0x1b03   : > { %15163 = vadd.xlane.f32.xlu1 %v15162_v46  ;;  %v15122_v31 = vpop.xlane.xlu0 %15121 }
0x1b04   : > { %v15136_v36 = vmul.f32 0.03125, %v15122_v31  ;;  %v15151_v35 = vmul.f32 %v26334_v30, %v26334_v30 }
0x1b06   : > { %v26339_v8 = vsub.f32 %v15102_v29, %v15136_v36  ;;  %v15165_v4 = vsel %vm1162_vm2, %v15151_v35, 0.0 }
0x1b07   : > { %v15125_v12 = vpop.xlane.xlu1 %15124  ;;  %15166 = vadd.xlane.f32.xlu0 %v15165_v4 }
0x1b08   : > { %v15137_v10 = vmul.f32 0.03125, %v15125_v12  ;;  %v15152_v25 = vmul.f32 %v26339_v8, %v26339_v8 }
0x1b0a   : > { %v26344_v17 = vsub.f32 %v15103_v24, %v15137_v10  ;;  %v15168_v44 = vsel %vm1162_vm2, %v15152_v25, 0.0 }
0x1b0b   : > { %15169 = vadd.xlane.f32.xlu1 %v15168_v44  ;;  %v15128_v5 = vpop.xlane.xlu0 %15127 }
0x1b0c   : > { %v15138_v33 = vmul.f32 0.03125, %v15128_v5  ;;  %v15153_v55 = vmul.f32 %v26344_v17, %v26344_v17 }
0x1b0e   : > { %v26349_v29 = vsub.f32 %v15104_v11, %v15138_v33  ;;  %v15171_v53 = vsel %vm1162_vm2, %v15153_v55, 0.0 }
0x1b0f   : > { %v15131_v1 = vpop.xlane.xlu1 %15130  ;;  %15172 = vadd.xlane.f32.xlu0 %v15171_v53  ;;  %v26352_v45 = vpop.xlane.xlu0 %15383 }
0x1b10   : > { %v15139_v62 = vmul.f32 0.03125, %v15131_v1  ;;  %v15154_v24 = vmul.f32 %v26349_v29, %v26349_v29  ;;  %vm15385_vm11 = vcmp.eq.f32.partialorder %v15382_v40, %v26352_v45 }
0x1b11   : > { %v15386_v11 = vsel %vm15385_vm11, %v15381_v34, -inf }
0x1b12   : > { %v26357_v58 = vsub.f32 %v15105_v56, %v15139_v62  ;;  %v15174_v32 = vsel %vm1162_vm2, %v15154_v24, 0.0 }
0x1b13   : > { %15175 = vadd.xlane.f32.xlu1 %v15174_v32 }
0x1b14   : > { %v15155_v59 = vmul.f32 %v26357_v58, %v26357_v58 }
0x1b16   : > { %v15177_v22 = vsel %vm1162_vm2, %v15155_v59, 0.0 }
0x1b17   : > { %15178 = vadd.xlane.f32.xlu0 %v15177_v22  ;;  %15387 = vmax.xlane.f32.xlu1 %v15386_v11 }
0x1b88   : > { %v15158_v19 = vpop.xlane.xlu1 %15157 }
0x1b89   : > { %v15180_v38 = vmul.f32 0.03125, %v15158_v19 }
0x1b8b   : > { %v15188_v2 = vadd.f32 1e-05, %v15180_v38 }
0x1b8c   : > { %v15161_v56 = vpop.xlane.xlu0 %15160 }
0x1b8d   : > { %22478 = vrsqrt.f32 %v15188_v2  ;;  %v15181_v40 = vmul.f32 0.03125, %v15161_v56  ;;  %vm15198_vm7 = vcmp.eq.f32.partialorder %v15188_v2, inf  ;;  %v15201_v7 = vand.u32 2147483648, %v15188_v2 }
0x1b8e   : > { %vm15200_vm8 = vcmp.eq.f32.partialorder %v15188_v2, 0.0 }
0x1b8f   : > { %v15189_v0 = vadd.f32 1e-05, %v15181_v40 }
0x1b90   : > { %v15164_v57 = vpop.xlane.xlu1 %15163 }
0x1b91   : > { %v15182_v43 = vmul.f32 0.03125, %v15164_v57  ;;  %22480 = vrsqrt.f32 %v15189_v0  ;;  %vm15205_vm10 = vcmp.eq.f32.partialorder %v15189_v0, inf  ;;  %v15208_v4 = vand.u32 2147483648, %v15189_v0 }
0x1b92   : > { %vm15207_vm3 = vcmp.eq.f32.partialorder %v15189_v0, 0.0 }
0x1b93   : > { %v15190_v50 = vadd.f32 1e-05, %v15182_v43  ;;  %v26368_v43 = vld [vmem:[%s27342_s6] ss:$0 sm:$0xff]  ;;  %s27354_s6 = smov 88  }
0x1b94   : > { %v15167_v54 = vpop.xlane.xlu0 %15166 }
0x1b95   : > { %22482 = vrsqrt.f32 %v15190_v50  ;;  %v15183_v21 = vmul.f32 0.03125, %v15167_v54  ;;  %vm15212_vm12 = vcmp.eq.f32.partialorder %v15190_v50, inf  ;;  %v15215_v53 = vand.u32 2147483648, %v15190_v50 }
0x1b96   : > { %vm15214_vm9 = vcmp.eq.f32.partialorder %v15190_v50, 0.0 }
0x1b97   : > { %v22479_v47 = vpop.eup %22478  ;;  %v15191_v41 = vadd.f32 1e-05, %v15183_v21 }
0x1b98   : > { %v15197_v37 = vmul.f32 %v22479_v47, %v15188_v2  ;;  %v15170_v18 = vpop.xlane.xlu1 %15169 }
0x1b99   : > { %v15184_v28 = vmul.f32 0.03125, %v15170_v18  ;;  %22484 = vrsqrt.f32 %v15191_v41  ;;  %vm15219_vm1 = vcmp.eq.f32.partialorder %v15191_v41, inf  ;;  %v15222_v11 = vand.u32 2147483648, %v15191_v41 }
0x1b9a   : > { %v15199_v16 = vsel %vm15198_vm7, %v15188_v2, %v15197_v37  ;;  %vm15221_vm0 = vcmp.eq.f32.partialorder %v15191_v41, 0.0 }
0x1b9b   : > { %v15202_v9 = vsel %vm15200_vm8, %v15201_v7, %v15199_v16  ;;  %v15192_v46 = vadd.f32 1e-05, %v15184_v28  ;;  %v22481_v31 = vpop.eup %22480 }
0x1b9c   : > { %22486 = vrcp.f32 %v15202_v9  ;;  %v15173_v36 = vpop.xlane.xlu0 %15172  ;;  %v15204_v35 = vmul.f32 %v22481_v31, %v15189_v0 }
0x1b9d   : > { %22488 = vrsqrt.f32 %v15192_v46  ;;  %v15185_v12 = vmul.f32 0.03125, %v15173_v36  ;;  %vm15226_vm14 = vcmp.eq.f32.partialorder %v15192_v46, inf  ;;  %vm15228_vm4 = vcmp.eq.f32.partialorder %v15192_v46, 0.0 }
0x1b9e   : > { %v15206_v25 = vsel %vm15205_vm10, %v15189_v0, %v15204_v35 }
0x1b9f   : > { %v22483_v10 = vpop.eup %22482  ;;  %v15209_v44 = vsel %vm15207_vm3, %v15208_v4, %v15206_v25  ;;  %v15193_v33 = vadd.f32 1e-05, %v15185_v12 }
0x1ba0   : > { %v15211_v5 = vmul.f32 %v22483_v10, %v15190_v50  ;;  %v15176_v55 = vpop.xlane.xlu1 %15175  ;;  %22490 = vrcp.f32 %v15209_v44 }
0x1ba1   : > { %v15186_v1 = vmul.f32 0.03125, %v15176_v55  ;;  %22492 = vrsqrt.f32 %v15193_v33  ;;  %vm15233_vm5 = vcmp.eq.f32.partialorder %v15193_v33, inf  ;;  %v15236_v16 = vand.u32 2147483648, %v15193_v33 }
0x1ba2   : > { %v15213_v62 = vsel %vm15212_vm12, %v15190_v50, %v15211_v5  ;;  %v15229_v50 = vand.u32 2147483648, %v15192_v46  ;;  %vm15235_vm11 = vcmp.eq.f32.partialorder %v15193_v33, 0.0 }
0x1ba3   : > { %v15216_v24 = vsel %vm15214_vm9, %v15215_v53, %v15213_v62  ;;  %v15194_v51 = vadd.f32 1e-05, %v15186_v1  ;;  %v22485_v32 = vpop.eup %22484  ;;  %vm15400_vm9 = vcmask 523264  }
0x1ba4   : > { %22494 = vrcp.f32 %v15216_v24  ;;  %v15179_v59 = vpop.xlane.xlu0 %15178  ;;  %v15218_v34 = vmul.f32 %v22485_v32, %v15191_v41 }
0x1ba5   : > { %22496 = vrsqrt.f32 %v15194_v51  ;;  %v15187_v19 = vmul.f32 0.03125, %v15179_v59  ;;  %vm15240_vm7 = vcmp.eq.f32.partialorder %v15194_v51, inf  ;;  %vm15242_vm8 = vcmp.eq.f32.partialorder %v15194_v51, 0.0 }
0x1ba6   : > { %v22487_v22 = vpop.eup %22486  ;;  %v15220_v2 = vsel %vm15219_vm1, %v15191_v41, %v15218_v34  ;;  %v26372_v41 = vld [vmem:[%s27343_s16] ss:$0 sm:$0xff]  ;;  %s27344_s16 = sld [smem:[#allocation13_spill]]  ;;  %vm27350_vm1 = vcmask 130048  }
0x1ba7   : > { %v22489_v38 = vpop.eup %22488  ;;  %v15253_v56 = vmul.f32 %v22487_v22, %v26317_v3  ;;  %v15223_v40 = vsel %vm15221_vm0, %v15222_v11, %v15220_v2  ;;  %v15195_v57 = vadd.f32 1e-05, %v15187_v19  ;;  %vm27367_vm0 = vcmask 31744  }
0x1ba8   : > { %v15225_v0 = vmul.f32 %v22489_v38, %v15192_v46  ;;  %22498 = vrcp.f32 %v15223_v40  ;;  %v15388_v38 = vpop.xlane.xlu1 %15387  ;;  %v15390_v40 = vcvt.f32.s32 %v26352_v45 }
0x1ba9   : > { %22500 = vrsqrt.f32 %v15195_v57  ;;  %v15274_v37 = vmul.f32 %v26368_v43, %v15253_v56  ;;  %vm15247_vm10 = vcmp.eq.f32.partialorder %v15195_v57, inf  ;;  %vm15249_vm3 = vcmp.eq.f32.partialorder %v15195_v57, 0.0 }
0x1baa   : > { %v15227_v54 = vsel %vm15226_vm14, %v15192_v46, %v15225_v0  ;;  %v22491_v21 = vpop.eup %22490  ;;  %vm27368_vm14 = vmmov %vm27367_vm0 }
0x1bab   : > { %v15230_v47 = vsel %vm15228_vm4, %v15229_v50, %v15227_v54  ;;  %v22493_v18 = vpop.eup %22492  ;;  %v15255_v3 = vmul.f32 %v22491_v21, %v26322_v23  ;;  %v15288_v46 = vadd.f32 %v26372_v41, %v15274_v37  ;;  %v15243_v23 = vand.u32 2147483648, %v15194_v51  ;;  %vm27369_vm4 = vmmov %vm27367_vm0 }
0x1bac   : > { %22502 = vrcp.f32 %v15230_v47  ;;  %v15232_v7 = vmul.f32 %v22493_v18, %v15193_v33  ;;  %v15389_v50 = vcvt.f32.s32 %v15388_v38  ;;  %v15391_v47 = vshll.u32 %v15390_v40, 16 }
0x1bad   : > { %v15275_v9 = vmul.f32 %v26368_v43, %v15255_v3  ;;  %v15395_v18 = vmul.u32 8, %v27339_v39 }
0x1bae   : > { %v22495_v28 = vpop.eup %22494  ;;  %v15234_v36 = vsel %vm15233_vm5, %v15193_v33, %v15232_v7  ;;  %v15392_v45 = vadd.s32 %v15391_v47, %v15389_v50  ;;  %vm27370_vm5 = vmmov %vm27367_vm0 }
0x1baf   : > { %v22497_v31 = vpop.eup %22496  ;;  %v15237_v35 = vsel %vm15235_vm11, %v15236_v16, %v15234_v36  ;;  %v15289_v12 = vadd.f32 %v26372_v41, %v15275_v9  ;;  %v15257_v10 = vmul.f32 %v22495_v28, %v26328_v26  ;;  %v15250_v26 = vand.u32 2147483648, %v15195_v57  ;;  %v15475_v36 = vld [vmem:[%s27344_s16 + $0x8] sm:$0xff]  ;;  %vm27371_vm11 = vmmov %vm27367_vm0 }
0x1bb0   : > { %v15239_v4 = vmul.f32 %v22497_v31, %v15194_v51  ;;  %22504 = vrcp.f32 %v15237_v35  ;;  %v15474_v31 = vld [vmem:[%s27344_s16] sm:$0xff]  ;;  %v15477_v35 = vld [vmem:[%s27344_s16 + $0x18] sm:$0xff] }
0x1bb1   : > { %v21723_v44 = vpack.c.bf16 %v15289_v12, %v15288_v46  ;;  %v15276_v1 = vmul.f32 %v26368_v43, %v15257_v10 }
0x1bb2   : > { %v15241_v25 = vsel %vm15240_vm7, %v15194_v51, %v15239_v4  ;;  %v22499_v5 = vpop.eup %22498  ;;  %vm27372_vm7 = vmmov %vm27367_vm0 }
0x1bb3   : > { %v15244_v55 = vsel %vm15242_vm8, %v15243_v23, %v15241_v25  ;;  %v22501_v53 = vpop.eup %22500  ;;  %21724 = vmatpush3.bf16.msra.mxu0 %v21723_v44  ;;  %v15259_v33 = vmul.f32 %v22499_v5, %v26334_v30  ;;  %v15290_v34 = vadd.f32 %v26372_v41, %v15276_v1  ;;  %v15558_v23 = vld [vmem:[%s27345_s22] sm:$0xff]  ;;  %v15559_v25 = vld [vmem:[%s27345_s22 + $0x8] sm:$0xff]  ;;  %vm27373_vm8 = vmmov %vm27367_vm0 }
0x1bb4   : > { %22506 = vrcp.f32 %v15244_v55  ;;  %v15246_v62 = vmul.f32 %v22501_v53, %v15195_v57  ;;  %21725 = vmatprep.subr.bf16.mxu0 %v22681_v61  ;;  %v21741_v44 = vpack.c.bf16 %v15559_v25, %v15558_v23  ;;  %v15646_v5 = vld [vmem:[%s27346_s9] sm:$0xff]  ;;  %v15647_v55 = vld [vmem:[%s27346_s9 + $0x8] sm:$0xff] }
0x1bb5   : > { %v15277_v32 = vmul.f32 %v26368_v43, %v15259_v33  ;;  %v21744_v53 = vpack.c.bf16 %v15647_v55, %v15646_v5  ;;  %v19402_v33 = vld [vmem:[%s27347_s5] ss:$0 sm:$0xff]  ;;  %s27351_s5 = smov 92  }
0x1bb6   : > { %v22503_v24 = vpop.eup %22502  ;;  %v15248_v59 = vsel %vm15247_vm10, %v15195_v57, %v15246_v62  ;;  %vm27374_vm10 = vmmov %vm27367_vm0 }
0x1bb7   : > { %v15251_v51 = vsel %vm15249_vm3, %v15250_v26, %v15248_v59  ;;  %v15291_v22 = vadd.f32 %v26372_v41, %v15277_v32  ;;  %v15261_v11 = vmul.f32 %v22503_v24, %v26339_v8  ;;  %21745 = vmatpush3.bf16.msra.mxu1 %v21744_v53  ;;  %v15648_v26 = vld [vmem:[%s27346_s9 + $0x10] sm:$0xff]  ;;  %v15649_v32 = vld [vmem:[%s27346_s9 + $0x18] sm:$0xff]  ;;  %s27357_s9 = smov 116   ;;  %vm27375_vm3 = vmmov %vm27367_vm0 }
0x1bb8   : > { %22508 = vrcp.f32 %v15251_v51  ;;  %21746 = vmatprep.subr.bf16.mxu1 %v22681_v61  ;;  %v21747_v59 = vpack.c.bf16 %v15649_v32, %v15648_v26  ;;  %v19404_v51 = vld [vmem:[%s27348_s2] ss:$0 sm:$0xff]  ;;  %s27353_s2 = smov 124  }
0x1bb9   : > { %v21726_v30 = vpack.c.bf16 %v15291_v22, %v15290_v34  ;;  %v15278_v56 = vmul.f32 %v26368_v43, %v15261_v11 }
0x1bba   : > { %v22505_v19 = vpop.eup %22504 }
0x1bbb   : > { %21727 = vmatpush3.bf16.msra.mxu0 %v21726_v30  ;;  %v15263_v2 = vmul.f32 %v22505_v19, %v26344_v17  ;;  %v15292_v54 = vadd.f32 %v26372_v41, %v15278_v56  ;;  %21748 = vmatpush3.bf16.msra.mxu1 %v21747_v59  ;;  %v19406_v30 = vld [vmem:[%s27349_s23] ss:$0 sm:$0xff]  ;;  %s27356_s23 = smov 84  }
0x1bbc   : > { %21728 = vmatprep.subr.bf16.mxu0 %v22681_v61  ;;  %21284 = vmatprep.subr.mxu1 %v27259_v15 }
0x1bbd   : > { %v15279_v57 = vmul.f32 %v26368_v43, %v15263_v2 }
0x1bbe   : > { %v22507_v0 = vpop.eup %22506 }
0x1bbf   : > { %v15293_v8 = vadd.f32 %v26372_v41, %v15279_v57  ;;  %v15265_v21 = vmul.f32 %v22507_v0, %v26349_v29  ;;  %v15396_v29 = vadd.s32 %v15395_v18, %v15392_v45 }
0x1bc1   : > { %v21729_v17 = vpack.c.bf16 %v15293_v8, %v15292_v54  ;;  %v15280_v7 = vmul.f32 %v26368_v43, %v15265_v21  ;;  %vm15397_vm12 = vcmp.eq.s32.totalorder %v27326_v49, %v15396_v29 }
0x1bc2   : > { %v22509_v37 = vpop.eup %22508  ;;  %v19400_v4 = vsel %vm15397_vm12, 1.0, %v27259_v15  ;;  %vm27376_vm12 = vmmov %vm27367_vm0 }
0x1bc3   : > { %21730 = vmatpush3.bf16.msra.mxu0 %v21729_v17  ;;  %v15267_v3 = vmul.f32 %v22509_v37, %v26357_v58  ;;  %v15294_v16 = vadd.f32 %v26372_v41, %v15280_v7  ;;  %v21735_v58 = vpack.c.bf16 %v15475_v36, %v15474_v31 }
0x1bc4   : > { %21731 = vmatprep.subr.bf16.mxu0 %v22681_v61 }
0x1bc5   : > { %v15281_v28 = vmul.f32 %v26368_v43, %v15267_v3  ;;  %v15476_v43 = vld [vmem:[%s27344_s16 + $0x10] sm:$0xff] }
0x1bc7   : > { %v15295_v9 = vadd.f32 %v26372_v41, %v15281_v28  ;;  %v21738_v41 = vpack.c.bf16 %v15477_v35, %v15476_v43 }
0x1bc9   : > { %v21732_v46 = vpack.c.bf16 %v15295_v9, %v15294_v16  ;;  %v27382_v9 = vld [vmem:[#allocation38_spill] sm:$0xff] }
0x1bcb   : > { %21733 = vmatpush3.bf16.msra.mxu0 %v21732_v46 }
0x1bcc   : > { %21734 = vmatprep.subr.bf16.mxu0 %v22681_v61 }
0x1bce   : > { %21248 = vmatmul.mubr.msk.f32.vlgmr.msra.gmra.mrb[12].mxu0 %vm15400_vm9, %v19400_v4  ;;  %vm27377_vm9 = vmmov %vm27367_vm0 }
0x1bcf   : > { %21736 = vmatpush3.bf16.msra.mxu0 %v21735_v58  ;;  %21258 = vmatprep.mubr.msk.f32.mxu0 %vm27340_vm15, %v27259_v15 }
0x1bd0   : > { %21737 = vmatprep.subr.bf16.mxu0 %v22681_v61 }
0x1bd3   : > { %21739 = vmatpush3.bf16.msra.mxu0 %v21738_v41 }
0x1bd4   : > { %21740 = vmatprep.subr.bf16.mxu0 %v22681_v61 }
0x1ca1   : > { %v15470_v12 = vpop.f32.mrb[12].mxu0 }
0x1ca2   : > { %v21249_v10 = vpop.f32.mrb[13].mxu0  ;;  %21259 = vmatmul.mubr.msk.f32.vlgmr.msra.gmra.mrb[14].mxu0 %vm1162_vm2, %v15470_v12 }
0x1ca3   : > { %21265 = vmatprep.mubr.msk.f32.mxu0 %vm27340_vm15, %v27259_v15  ;;  %21742 = vmatpush3.bf16.msra.mxu0 %v21741_v44 }
0x1ca4   : > { %21279 = vmatprep.subr.mxu0 %v27259_v15 }
0x1d75   : > { %v15554_v1 = vpop.f32.mrb[14].mxu0 }
0x1d76   : > { %v15555_v62 = vadd.f32 %v19402_v33, %v15554_v1  ;;  %v21260_v24 = vpop.f32.mrb[15].mxu0 }
0x1d78   : > { %21266 = vmatmul.mubr.msk.f32.vlgmr.msra.gmra.mrb[16].mxu0 %vm27350_vm1, %v15555_v62  ;;  %vm27378_vm1 = vmmov %vm27367_vm0 }
0x1d79   : > { %21281 = vmatprep.mubr.msk.f32.mxu0 %vm27340_vm15, %v27259_v15 }
0x1e4b   : > { %v15636_v34 = vpop.f32.mrb[16].mxu0 }
0x1e4c   : > { %v26431_v22 = vadd.f32 %v19404_v51, %v15636_v34  ;;  %v21267_v11 = vpop.f32.mrb[17].mxu0 }
0x1e4e   : > { %21277 = vmatmul.mubr.msk.f32.vlgmr.msra.gmra.mrb[12].mxu1 %vm1162_vm2, %v26431_v22  ;;  %v15640_v56 = vsel %vm1162_vm2, %v26431_v22, 0.0 }
0x1e4f   : > { %21286 = vmatprep.mubr.msk.f32.mxu1 %vm27340_vm15, %v27259_v15 }
0x1f21   : > { %v15726_v19 = vpop.f32.mrb[12].mxu1 }
0x1f22   : > { %v26438_v38 = vadd.f32 %v19406_v30, %v15726_v19  ;;  %v21278_v2 = vpop.f32.mrb[13].mxu1 }
0x1f24   : > { %15913 = vrot.lane.b32.xlu1 %v26438_v38, %s27351_s5  ;;  %15731 = vrot.lane.b32.xlu0 %v26438_v38, %s27352_s3  ;;  %s27359_s5 = smov 112   ;;  %s27360_s3 = smov 76  }
0x1f28   : > { %15911 = vrot.lane.b32.xlu1 %v26438_v38, %s27353_s2  ;;  %16080 = vrot.lane.b32.xlu0 %v26438_v38, %s27354_s6  ;;  %s27361_s2 = smov 108   ;;  %s27362_s6 = smov 72  }
0x1f2c   : > { %16078 = vrot.lane.b32.xlu1 %v26438_v38, %s27355_s8  ;;  %16247 = vrot.lane.b32.xlu0 %v26438_v38, %s27356_s23  ;;  %s27363_s8 = smov 104   ;;  %s27364_s23 = smov 68  }
0x1f30   : > { %16245 = vrot.lane.b32.xlu1 %v26438_v38, %s27357_s9  ;;  %16414 = vrot.lane.b32.xlu0 %v26438_v38, %s27358_s13  ;;  %s27365_s9 = smov 100   ;;  %s27366_s13 = smov 64  }
0x1f34   : > { %16412 = vrot.lane.b32.xlu1 %v26438_v38, %s27359_s5  ;;  %16581 = vrot.lane.b32.xlu0 %v26438_v38, %s27360_s3  ;;  %s27386_s5 = smov 60   ;;  %s27387_s3 = smov 52  }
0x1f38   : > { %16579 = vrot.lane.b32.xlu1 %v26438_v38, %s27361_s2  ;;  %16748 = vrot.lane.b32.xlu0 %v26438_v38, %s27362_s6  ;;  %s27388_s2 = smov 56   ;;  %s27389_s6 = smov 44  }
0x1f3c   : > { %16746 = vrot.lane.b32.xlu1 %v26438_v38, %s27363_s8  ;;  %16915 = vrot.lane.b32.xlu0 %v26438_v38, %s27364_s23  ;;  %s27390_s8 = smov 48   ;;  %s27391_s23 = smov 36  }
0x1f40   : > { %16913 = vrot.lane.b32.xlu1 %v26438_v38, %s27365_s9  ;;  %s27392_s9 = smov 40  }
0x1f5b   : > { %15641 = vadd.xlane.f32.xlu0 %v15640_v56 }
0x1f71   : > { %15835 = vrot.lane.b32.xlu0 %v26438_v38, %s27366_s13  ;;  %s27393_s13 = sld [smem:[#allocation19_spill]] }
0x1f96   : > { %v15914_v40 = vpop.permute.xlu1 %15913  ;;  %v15732_v0 = vpop.permute.xlu0 %15731 }
0x1f97   : > { %21280 = vmatpush3.xpose.msk.msra.mxu0 %vm27367_vm0, %v15732_v0 }
0x1f98   : > { %21289 = vmatprep.subr.mxu0 %v27259_v15 }
0x1f9a   : > { %v15912_v57 = vpop.permute.xlu1 %15911  ;;  %21282 = vmatmul.mubr.msk.f32.vlgmr.msra.gmra.mrb[18].mxu0 %vm27368_vm14, %v26438_v38  ;;  %v16081_v50 = vpop.permute.xlu0 %16080  ;;  %vm27379_vm14 = vmmov %vm27367_vm0 }
0x1f9b   : > { %21290 = vmatpush3.xpose.msk.msra.mxu0 %vm27369_vm4, %v15914_v40  ;;  %21291 = vmatprep.mubr.msk.f32.mxu0 %vm27340_vm15, %v27259_v15  ;;  %vm27380_vm4 = vmmov %vm27367_vm0 }
0x1f9c   : > { %21299 = vmatprep.subr.mxu0 %v27259_v15 }
0x1f9e   : > { %v16079_v54 = vpop.permute.xlu1 %16078  ;;  %21292 = vmatmul.mubr.msk.f32.vlgmr.msra.gmra.mrb[20].mxu0 %vm27370_vm5, %v15912_v57  ;;  %v16248_v8 = vpop.permute.xlu0 %16247  ;;  %vm27381_vm5 = vmmov %vm27367_vm0 }
0x1f9f   : > { %21300 = vmatpush3.xpose.msk.msra.mxu0 %vm27371_vm11, %v16081_v50  ;;  %21301 = vmatprep.mubr.msk.f32.mxu0 %vm27340_vm15, %v27259_v15 }
0x1fa0   : > { %21309 = vmatprep.subr.mxu0 %v27259_v15 }
0x1fa2   : > { %v16246_v21 = vpop.permute.xlu1 %16245  ;;  %21302 = vmatmul.mubr.msk.f32.vlgmr.msra.gmra.mrb[22].mxu0 %vm27372_vm7, %v16079_v54  ;;  %v16415_v47 = vpop.permute.xlu0 %16414  ;;  %vm27383_vm7 = vcmp.ne.s32.totalorder %v27382_v9, 0 }
0x1fa3   : > { %21310 = vmatpush3.xpose.msk.msra.mxu0 %vm27373_vm8, %v16248_v8  ;;  %21311 = vmatprep.mubr.msk.f32.mxu0 %vm27340_vm15, %v27259_v15 }
0x1fa4   : > { %21319 = vmatprep.subr.mxu0 %v27259_v15 }
0x1fa6   : > { %v16413_v17 = vpop.permute.xlu1 %16412  ;;  %21312 = vmatmul.mubr.msk.f32.vlgmr.msra.gmra.mrb[24].mxu0 %vm27374_vm10, %v16246_v21  ;;  %v16582_v37 = vpop.permute.xlu0 %16581  ;;  %vm27402_vm10 = vmmov %vm27367_vm0 }
0x1fa7   : > { %21320 = vmatpush3.xpose.msk.msra.mxu0 %vm27375_vm3, %v16415_v47  ;;  %21321 = vmatprep.mubr.msk.f32.mxu0 %vm27340_vm15, %v27259_v15  ;;  %vm27403_vm3 = vcmask 97280  }
0x1fa8   : > { %21329 = vmatprep.subr.mxu0 %v27259_v15 }
0x1faa   : > { %v16580_v45 = vpop.permute.xlu1 %16579  ;;  %21322 = vmatmul.mubr.msk.f32.vlgmr.msra.gmra.mrb[26].mxu0 %vm27376_vm12, %v16413_v17  ;;  %v16749_v3 = vpop.permute.xlu0 %16748  ;;  %vm27404_vm12 = vcmask 130048  }
0x1fab   : > { %21330 = vmatpush3.xpose.msk.msra.mxu0 %vm27377_vm9, %v16582_v37  ;;  %21331 = vmatprep.mubr.msk.f32.mxu0 %vm27340_vm15, %v27259_v15  ;;  %vm27405_vm9 = vcmask 162816  }
0x1fac   : > { %21339 = vmatprep.subr.mxu0 %v27259_v15 }
0x1fae   : > { %21332 = vmatmul.mubr.msk.f32.vlgmr.msra.gmra.mrb[28].mxu0 %vm27378_vm1, %v16580_v45  ;;  %v16747_v7 = vpop.permute.xlu1 %16746  ;;  %v16916_v28 = vpop.permute.xlu0 %16915  ;;  %vm27406_vm1 = vcmask 195584  }
0x1faf   : > { %21340 = vmatpush3.xpose.msk.msra.mxu0 %vm27367_vm0, %v16749_v3  ;;  %21341 = vmatprep.mubr.msk.f32.mxu0 %vm27340_vm15, %v27259_v15  ;;  %vm27407_vm0 = vcmask 228352  }
0x1fb0   : > { %21349 = vmatprep.subr.mxu0 %v27259_v15 }
0x1fb2   : > { %21342 = vmatmul.mubr.msk.f32.vlgmr.msra.gmra.mrb[30].mxu0 %vm27379_vm14, %v16747_v7  ;;  %v16914_v29 = vpop.permute.xlu1 %16913 }
0x1fb3   : > { %21350 = vmatpush3.xpose.msk.msra.mxu0 %vm27380_vm4, %v16916_v28  ;;  %21351 = vmatprep.mubr.msk.f32.mxu0 %vm27340_vm15, %v27259_v15 }
0x1fb4   : > { %21749 = vmatprep.subr.bf16.mxu0 %v22681_v61 }
0x1fb6   : > { %21352 = vmatmul.mubr.msk.f32.vlgmr.msra.gmra.mrb[32].mxu0 %vm27381_vm5, %v16914_v29 }
0x1fb7   : > { %21367 = vmatprep.mubr.msk.f32.mxu0 %vm27340_vm15, %v27259_v15 }
0x1fe8   : > { %v15642_v16 = vpop.xlane.xlu0 %15641 }
0x1fe9   : > { %vm15643_vm11 = vcmp.eq.f32.partialorder %v15642_v16, 0.0 }
0x1fea   : > { %vm26517_vm8 = vmand %vm15643_vm11, %vm27383_vm7  ;;  %vm18833_vm11 = vcmask 7168  }
0x1feb   : > { %v15645_v36 = vsel %vm26517_vm8, -1e+30, %v27259_v15  ;;  %vm18831_vm5 = vmxor %vm26517_vm8, %vm22680_vm6 }
0x1fec   : > { %15810 = vperm.xlu1 %22188, %v15645_v36   ;;  %v15836_v46 = vpop.permute.xlu0 %15835 }
0x1fed   : > { %21285 = vmatpush3.msra.mxu1 %v15836_v46 }
0x1fee   : > { %21294 = vmatprep.subr.mxu1 %v27259_v15 }
0x1ff0   : > { %16002 = vrot.lane.b32.xlu1 %v26438_v38, %s27386_s5  ;;  %s27394_s5 = smov 4  }
0x206b   : > { %v15811_v58 = vpop.permute.xlu1 %15810 }
0x206c   : > { %v15815_v35 = vrot.slane %v15811_v58, %v27341_v63 }
0x206d   : > { %v15803_v43 = vpop.f32.mrb[18].mxu0 }
0x206e   : > { %v15807_v4 = vmul.f32 0.5, %v15803_v43  ;;  %v21283_v41 = vpop.f32.mrb[19].mxu0 }
0x206f   : > { %v26540_v29 = vpop.permute.xlu1 %16002 }
0x2070   : > { %v15823_v12 = vadd.f32 %v15815_v35, %v15807_v4 }
0x2071   : > { %v15985_v10 = vpop.f32.mrb[20].mxu0 }
0x2072   : > { %v15989_v23 = vmul.f32 0.5, %v15985_v10  ;;  %v21293_v25 = vpop.f32.mrb[21].mxu0  ;;  %v15824_v44 = vsel %vm2118_vm13, %v15823_v12, -inf }
0x2073   : > { %15825 = vmax.xlane.f32.xlu1 %v15824_v44 }
0x2074   : > { %v15990_v5 = vadd.f32 %v15989_v23, %v15815_v35 }
0x2075   : > { %v16152_v55 = vpop.f32.mrb[22].mxu0 }
0x2076   : > { %v16156_v53 = vmul.f32 0.5, %v16152_v55  ;;  %v21303_v33 = vpop.f32.mrb[23].mxu0  ;;  %v15991_v1 = vsel %vm2118_vm13, %v15990_v5, -inf }
0x2077   : > { %15992 = vmax.xlane.f32.xlu0 %v15991_v1 }
0x2078   : > { %v16157_v62 = vadd.f32 %v16156_v53, %v15815_v35 }
0x2079   : > { %v16319_v24 = vpop.f32.mrb[24].mxu0 }
0x207a   : > { %v16323_v26 = vmul.f32 0.5, %v16319_v24  ;;  %v21313_v63 = vpop.f32.mrb[25].mxu0  ;;  %v16158_v32 = vsel %vm2118_vm13, %v16157_v62, -inf }
0x207b   : > { %16159 = vmax.xlane.f32.xlu0 %v16158_v32 }
0x207c   : > { %v16324_v59 = vadd.f32 %v16323_v26, %v15815_v35 }
0x207d   : > { %v16486_v51 = vpop.f32.mrb[26].mxu0 }
0x207e   : > { %v16490_v34 = vmul.f32 0.5, %v16486_v51  ;;  %v21323_v11 = vpop.f32.mrb[27].mxu0  ;;  %v16325_v30 = vsel %vm2118_vm13, %v16324_v59, -inf }
0x207f   : > { %16326 = vmax.xlane.f32.xlu0 %v16325_v30 }
0x2080   : > { %v16491_v19 = vadd.f32 %v16490_v34, %v15815_v35 }
0x2081   : > { %v16653_v2 = vpop.f32.mrb[28].mxu0 }
0x2082   : > { %v16657_v56 = vmul.f32 0.5, %v16653_v2  ;;  %v21333_v40 = vpop.f32.mrb[29].mxu0  ;;  %v16492_v0 = vsel %vm2118_vm13, %v16491_v19, -inf }
0x2083   : > { %16493 = vmax.xlane.f32.xlu1 %v16492_v0 }
0x2084   : > { %v16658_v57 = vadd.f32 %v16657_v56, %v15815_v35 }
0x2085   : > { %v16820_v50 = vpop.f32.mrb[30].mxu0 }
0x2086   : > { %v16824_v54 = vmul.f32 0.5, %v16820_v50  ;;  %v21343_v8 = vpop.f32.mrb[31].mxu0  ;;  %v16659_v21 = vsel %vm2118_vm13, %v16658_v57, -inf }
0x2087   : > { %16660 = vmax.xlane.f32.xlu0 %v16659_v21 }
0x2088   : > { %v16825_v47 = vadd.f32 %v16824_v54, %v15815_v35 }
0x2089   : > { %v16987_v17 = vpop.f32.mrb[32].mxu0 }
0x208a   : > { %v16991_v37 = vmul.f32 0.5, %v16987_v17  ;;  %v21353_v45 = vpop.f32.mrb[33].mxu0  ;;  %v16826_v3 = vsel %vm2118_vm13, %v16825_v47, -inf }
0x208b   : > { %16827 = vmax.xlane.f32.xlu1 %v16826_v3 }
0x208c   : > { %v16992_v7 = vadd.f32 %v16991_v37, %v15815_v35 }
0x208e   : > { %v16993_v28 = vsel %vm2118_vm13, %v16992_v7, -inf }
0x208f   : > { %16994 = vmax.xlane.f32.xlu0 %v16993_v28 }
0x209c   : > { %16336 = vrot.lane.b32.xlu1 %v26438_v38, %s27387_s3  ;;  %s27395_s3 = smov 8  }
0x20a5   : > { %16169 = vrot.lane.b32.xlu0 %v26438_v38, %s27388_s2  ;;  %s27396_s2 = smov 12  }
0x2100   : > { %v15826_v16 = vpop.xlane.xlu1 %15825 }
0x2101   : > { %v15827_v9 = vsub.f32 %v15823_v12, %v15826_v16 }
0x2103   : > { %v15828_v36 = vmul.f32 1.442695, %v15827_v9 }
0x2104   : > { %v15993_v46 = vpop.xlane.xlu0 %15992 }
0x2105   : > { %22510 = vpow2.f32 %v15828_v36  ;;  %v15994_v58 = vsub.f32 %v15990_v5, %v15993_v46 }
0x2107   : > { %v15995_v43 = vmul.f32 1.442695, %v15994_v58 }
0x2108   : > { %v16160_v4 = vpop.xlane.xlu0 %16159 }
0x2109   : > { %22512 = vpow2.f32 %v15995_v43  ;;  %v16161_v35 = vsub.f32 %v16157_v62, %v16160_v4 }
0x210b   : > { %v16162_v41 = vmul.f32 1.442695, %v16161_v35 }
0x210c   : > { %v16327_v10 = vpop.xlane.xlu0 %16326 }
0x210d   : > { %22514 = vpow2.f32 %v16162_v41  ;;  %v16328_v23 = vsub.f32 %v16324_v59, %v16327_v10 }
0x210f   : > { %v22511_v25 = vpop.eup %22510  ;;  %v16329_v44 = vmul.f32 1.442695, %v16328_v23 }
0x2110   : > { %v15830_v55 = vsel %vm2118_vm13, %v22511_v25, 0.0  ;;  %v16494_v24 = vpop.xlane.xlu1 %16493 }
0x2111   : > { %22516 = vpow2.f32 %v16329_v44  ;;  %15831 = vadd.xlane.f32.xlu1 %v15830_v55  ;;  %v16495_v26 = vsub.f32 %v16491_v19, %v16494_v24 }
0x2113   : > { %v22513_v53 = vpop.eup %22512  ;;  %v16496_v51 = vmul.f32 1.442695, %v16495_v26 }
0x2114   : > { %v15997_v12 = vsel %vm2118_vm13, %v22513_v53, 0.0  ;;  %v16661_v63 = vpop.xlane.xlu0 %16660 }
0x2115   : > { %15998 = vadd.xlane.f32.xlu0 %v15997_v12  ;;  %v16662_v59 = vsub.f32 %v16658_v57, %v16661_v63  ;;  %22518 = vpow2.f32 %v16496_v51 }
0x2117   : > { %v22515_v33 = vpop.eup %22514  ;;  %v16663_v30 = vmul.f32 1.442695, %v16662_v59 }
0x2118   : > { %v16164_v5 = vsel %vm2118_vm13, %v22515_v33, 0.0  ;;  %v16828_v32 = vpop.xlane.xlu1 %16827 }
0x2119   : > { %16165 = vadd.xlane.f32.xlu1 %v16164_v5  ;;  %v16829_v34 = vsub.f32 %v16825_v47, %v16828_v32  ;;  %22520 = vpow2.f32 %v16663_v30 }
0x211b   : > { %v26545_v1 = vpop.eup %22516  ;;  %v16830_v2 = vmul.f32 1.442695, %v16829_v34 }
0x211c   : > { %v16331_v62 = vsel %vm2118_vm13, %v26545_v1, 0.0  ;;  %v16995_v11 = vpop.xlane.xlu0 %16994  ;;  %v16337_v17 = vpop.permute.xlu1 %16336 }
0x211d   : > { %16332 = vadd.xlane.f32.xlu0 %v16331_v62  ;;  %v16996_v56 = vsub.f32 %v16992_v7, %v16995_v11  ;;  %22522 = vpow2.f32 %v16830_v2 }
0x211f   : > { %v16997_v40 = vmul.f32 1.442695, %v16996_v56  ;;  %v22519_v0 = vpop.eup %22518  ;;  %v17115_v56 = vld [vmem:[%s27393_s13] sm:$0xff] }
0x2120   : > { %v16498_v54 = vsel %vm2118_vm13, %v22519_v0, 0.0  ;;  %v16170_v37 = vpop.permute.xlu0 %16169 }
0x2121   : > { %22524 = vpow2.f32 %v16997_v40  ;;  %v17116_v40 = vld [vmem:[%s27393_s13 + $0x8] sm:$0xff] }
0x2123   : > { %v26553_v50 = vpop.eup %22520 }
0x2124   : > { %v16665_v8 = vsel %vm2118_vm13, %v26553_v50, 0.0 }
0x2127   : > { %v26556_v19 = vpop.eup %22522 }
0x2128   : > { %v16832_v57 = vsel %vm2118_vm13, %v26556_v19, 0.0 }
0x212a   : > { %16670 = vrot.lane.b32.xlu1 %v26438_v38, %s27389_s6  ;;  %s27397_s6 = smov 16  }
0x212b   : > { %v26562_v21 = vpop.eup %22524 }
0x212c   : > { %v16999_v47 = vsel %vm2118_vm13, %v26562_v21, 0.0 }
0x2133   : > { %16503 = vrot.lane.b32.xlu0 %v26438_v38, %s27390_s8  ;;  %s27398_s8 = smov 20  }
0x214e   : > { %16499 = vadd.xlane.f32.xlu1 %v16498_v54  ;;  %v17118_v54 = vld [vmem:[%s27393_s13 + $0x18] sm:$0xff] }
0x2152   : > { %16833 = vadd.xlane.f32.xlu1 %v16832_v57  ;;  %16666 = vadd.xlane.f32.xlu0 %v16665_v8 }
0x2156   : > { %17000 = vadd.xlane.f32.xlu1 %v16999_v47 }
0x2167   : > { %17004 = vrot.lane.b32.xlu1 %v26438_v38, %s27391_s23  ;;  %s27399_s23 = smov 24  }
0x2168   : > { %16837 = vrot.lane.b32.xlu0 %v26438_v38, %s27392_s9  ;;  %s27400_s9 = smov 28  }
0x219e   : > { %v15832_v45 = vpop.xlane.xlu1 %15831 }
0x219f   : > { %22526 = vrcp.f32 %v15832_v45 }
0x21a2   : > { %v15999_v3 = vpop.xlane.xlu0 %15998 }
0x21a3   : > { %22528 = vrcp.f32 %v15999_v3 }
0x21a6   : > { %v16166_v7 = vpop.xlane.xlu1 %16165 }
0x21a7   : > { %22530 = vrcp.f32 %v16166_v7 }
0x21a9   : > { %v22527_v28 = vpop.eup %22526 }
0x21aa   : > { %v15834_v16 = vmul.f32 %v22527_v28, %v22511_v25  ;;  %v16333_v9 = vpop.xlane.xlu0 %16332  ;;  %v16671_v35 = vpop.permute.xlu1 %16670 }
0x21ab   : > { %22532 = vrcp.f32 %v16333_v9 }
0x21ac   : > { %21287 = vmatmul.mubr.msk.f32.vlgmr.msra.gmra.mrb[14].mxu1 %vm2118_vm13, %v15834_v16 }
0x21ad   : > { %v22529_v36 = vpop.eup %22528  ;;  %21295 = vmatpush3.msra.mxu1 %v26540_v29  ;;  %21296 = vmatprep.mubr.msk.f32.mxu1 %vm27340_vm15, %v27259_v15 }
0x21ae   : > { %v16001_v38 = vmul.f32 %v22529_v36, %v22513_v53  ;;  %21304 = vmatprep.subr.mxu1 %v27259_v15  ;;  %v16504_v4 = vpop.permute.xlu0 %16503 }
0x21b0   : > { %21297 = vmatmul.mubr.msk.f32.vlgmr.msra.gmra.mrb[16].mxu1 %vm2118_vm13, %v16001_v38 }
0x21b1   : > { %v22531_v46 = vpop.eup %22530  ;;  %21305 = vmatpush3.msra.mxu1 %v16170_v37  ;;  %21306 = vmatprep.mubr.msk.f32.mxu1 %vm27340_vm15, %v27259_v15 }
0x21b2   : > { %v16168_v58 = vmul.f32 %v22531_v46, %v22515_v33  ;;  %21314 = vmatprep.subr.mxu1 %v27259_v15 }
0x21b4   : > { %21307 = vmatmul.mubr.msk.f32.vlgmr.msra.gmra.mrb[18].mxu1 %vm2118_vm13, %v16168_v58 }
0x21b5   : > { %v22533_v43 = vpop.eup %22532  ;;  %21315 = vmatpush3.msra.mxu1 %v16337_v17  ;;  %21316 = vmatprep.mubr.msk.f32.mxu1 %vm27340_vm15, %v27259_v15 }
0x21b6   : > { %v16335_v29 = vmul.f32 %v22533_v43, %v26545_v1  ;;  %21324 = vmatprep.subr.mxu1 %v27259_v15 }
0x21b8   : > { %21317 = vmatmul.mubr.msk.f32.vlgmr.msra.gmra.mrb[20].mxu1 %vm2118_vm13, %v16335_v29 }
0x21b9   : > { %21325 = vmatpush3.msra.mxu1 %v16504_v4  ;;  %21326 = vmatprep.mubr.msk.f32.mxu1 %vm27340_vm15, %v27259_v15 }
0x21ba   : > { %21334 = vmatprep.subr.mxu1 %v27259_v15 }
0x21db   : > { %v16500_v41 = vpop.xlane.xlu1 %16499 }
0x21dc   : > { %22534 = vrcp.f32 %v16500_v41 }
0x21df   : > { %v16834_v10 = vpop.xlane.xlu1 %16833  ;;  %v16667_v23 = vpop.xlane.xlu0 %16666 }
0x21e0   : > { %22536 = vrcp.f32 %v16667_v23 }
0x21e1   : > { %22538 = vrcp.f32 %v16834_v10 }
0x21e3   : > { %v17001_v25 = vpop.xlane.xlu1 %17000  ;;  %v16838_v5 = vpop.permute.xlu0 %16837 }
0x21e4   : > { %22540 = vrcp.f32 %v17001_v25 }
0x21e6   : > { %v22535_v44 = vpop.eup %22534 }
0x21e7   : > { %v16502_v55 = vmul.f32 %v22535_v44, %v22519_v0  ;;  %v17005_v24 = vpop.permute.xlu1 %17004  ;;  %v21750_v0 = vpack.c.bf16 %v17116_v40, %v17115_v56 }
0x21e9   : > { %21327 = vmatmul.mubr.msk.f32.vlgmr.msra.gmra.mrb[22].mxu1 %vm2118_vm13, %v16502_v55  ;;  %21751 = vmatpush3.bf16.msra.mxu0 %v21750_v0 }
0x21ea   : > { %21335 = vmatpush3.msra.mxu1 %v16671_v35  ;;  %21336 = vmatprep.mubr.msk.f32.mxu1 %vm27340_vm15, %v27259_v15  ;;  %v22537_v53 = vpop.eup %22536 }
0x21eb   : > { %21344 = vmatprep.subr.mxu1 %v27259_v15  ;;  %v16669_v12 = vmul.f32 %v22537_v53, %v26553_v50  ;;  %v22539_v33 = vpop.eup %22538  ;;  %21752 = vmatprep.subr.bf16.mxu0 %v22681_v61  ;;  %v17117_v50 = vld [vmem:[%s27393_s13 + $0x10] sm:$0xff] }
0x21ec   : > { %v16836_v1 = vmul.f32 %v22539_v33, %v26556_v19  ;;  %v21753_v19 = vpack.c.bf16 %v17118_v54, %v17117_v50 }
0x21ed   : > { %21337 = vmatmul.mubr.msk.f32.vlgmr.msra.gmra.mrb[24].mxu1 %vm2118_vm13, %v16669_v12 }
0x21ee   : > { %21345 = vmatpush3.msra.mxu1 %v16838_v5  ;;  %21346 = vmatprep.mubr.msk.f32.mxu1 %vm27340_vm15, %v27259_v15  ;;  %v22541_v62 = vpop.eup %22540 }
0x21ef   : > { %21354 = vmatprep.subr.mxu1 %v27259_v15  ;;  %v17003_v26 = vmul.f32 %v22541_v62, %v26562_v21  ;;  %21754 = vmatpush3.bf16.msra.mxu0 %v21753_v19 }
0x21f1   : > { %21347 = vmatmul.mubr.msk.f32.vlgmr.msra.gmra.mrb[26].mxu1 %vm2118_vm13, %v16836_v1 }
0x21f2   : > { %21355 = vmatpush3.msra.mxu1 %v17005_v24  ;;  %21356 = vmatprep.mubr.msk.f32.mxu1 %vm27340_vm15, %v27259_v15 }
0x21f5   : > { %21357 = vmatmul.mubr.msk.f32.vlgmr.msra.gmra.mrb[28].mxu1 %vm2118_vm13, %v17003_v26 }
0x21f6   : > { %17451 = vmatprep.mubr.f32.mxu1 %v27259_v15 }
0x227f   : > { %v15907_v63 = vpop.f32.mrb[14].mxu1 }
0x2280   : > { %v21288_v32 = vpop.f32.mrb[15].mxu1 }
0x2283   : > { %v16074_v59 = vpop.f32.mrb[16].mxu1 }
0x2284   : > { %17081 = vrot.lane.b32.xlu0 %v16074_v59, %s27394_s5  ;;  %v21298_v51 = vpop.f32.mrb[17].mxu1  ;;  %s27401_s5 = sld [smem:[#allocation20_spill]] }
0x2287   : > { %v16241_v34 = vpop.f32.mrb[18].mxu1 }
0x2288   : > { %17085 = vrot.lane.b32.xlu1 %v16241_v34, %s27395_s3  ;;  %v21308_v11 = vpop.f32.mrb[19].mxu1  ;;  %s27408_s3 = sld [smem:[#allocation21_spill]] }
0x228a   : > { %v19432_v23 = vld [vmem:[%s27401_s5] ss:$0 sm:$0xff]  ;;  %s27414_s5 = sld [smem:[#allocation27_spill]] }
0x228b   : > { %v16408_v30 = vpop.f32.mrb[20].mxu1 }
0x228c   : > { %17089 = vrot.lane.b32.xlu0 %v16408_v30, %s27396_s2  ;;  %v21318_v2 = vpop.f32.mrb[21].mxu1  ;;  %s27409_s2 = sld [smem:[#allocation25_spill]] }
0x228e   : > { %v17237_v26 = vld [vmem:[%s27408_s3 + $0x8] sm:$0xff]  ;;  %v17239_v32 = vld [vmem:[%s27408_s3 + $0x18] sm:$0xff]  ;;  %v17236_v51 = vld [vmem:[%s27408_s3] sm:$0xff] }
0x228f   : > { %v17252_v34 = vld [vmem:[%s27408_s3 + $0x80] sm:$0xff]  ;;  %v17238_v2 = vld [vmem:[%s27408_s3 + $0x10] sm:$0xff]  ;;  %v17269_v0 = vld [vmem:[%s27408_s3 + $0x108] sm:$0xff] }
0x2290   : > { %v21757_v30 = vpack.c.bf16 %v17252_v34, %v17236_v51  ;;  %v17254_v56 = vld [vmem:[%s27408_s3 + $0x90] sm:$0xff]  ;;  %v17285_v50 = vld [vmem:[%s27408_s3 + $0x188] sm:$0xff]  ;;  %v17271_v54 = vld [vmem:[%s27408_s3 + $0x118] sm:$0xff] }
0x2291   : > { %v21765_v40 = vpack.c.bf16 %v17254_v56, %v17238_v2  ;;  %v21759_v19 = vpack.c.bf16 %v17285_v50, %v17269_v0  ;;  %v17272_v51 = vld [vmem:[%s27408_s3 + $0x120] sm:$0xff]  ;;  %v17274_v2 = vld [vmem:[%s27408_s3 + $0x130] sm:$0xff]  ;;  %v17261_v0 = vld [vmem:[%s27408_s3 + $0xc8] sm:$0xff] }
0x2292   : > { %v17288_v34 = vld [vmem:[%s27408_s3 + $0x1a0] sm:$0xff]  ;;  %v17290_v56 = vld [vmem:[%s27408_s3 + $0x1b0] sm:$0xff]  ;;  %v17247_v50 = vld [vmem:[%s27408_s3 + $0x58] sm:$0xff] }
0x22bc   : > { %v16575_v57 = vpop.f32.mrb[22].mxu1 }
0x22bd   : > { %17093 = vrot.lane.b32.xlu1 %v16575_v57, %s27397_s6  ;;  %v21328_v8 = vpop.f32.mrb[23].mxu1  ;;  %v17287_v57 = vld [vmem:[%s27408_s3 + $0x198] sm:$0xff]  ;;  %s27410_s6 = sld [smem:[#allocation26_spill]] }
0x22be   : > { %v17268_v8 = vld [vmem:[%s27408_s3 + $0x100] sm:$0xff] }
0x22c0   : > { %v16742_v21 = vpop.f32.mrb[24].mxu1 }
0x22c1   : > { %17097 = vrot.lane.b32.xlu0 %v16742_v21, %s27398_s8  ;;  %v21338_v47 = vpop.f32.mrb[25].mxu1  ;;  %v17284_v21 = vld [vmem:[%s27408_s3 + $0x180] sm:$0xff]  ;;  %s27411_s8 = sld [smem:[#allocation23_spill]] }
0x22c2   : > { %v21767_v47 = vpack.c.bf16 %v17287_v57, %v17271_v54  ;;  %v17263_v54 = vld [vmem:[%s27408_s3 + $0xd8] sm:$0xff]  ;;  %v21785_v57 = vpack.c.bf16 %v17290_v56, %v17274_v2  ;;  %v17282_v2 = vld [vmem:[%s27408_s3 + $0x170] sm:$0xff] }
0x22c3   : > { %v17298_v56 = vld [vmem:[%s27408_s3 + $0x1f0] sm:$0xff] }
0x22c4   : > { %v16909_v17 = vpop.f32.mrb[26].mxu1 }
0x22c5   : > { %17101 = vrot.lane.b32.xlu1 %v16909_v17, %s27399_s23  ;;  %v21348_v37 = vpop.f32.mrb[27].mxu1  ;;  %v21761_v17 = vpack.c.bf16 %v17284_v21, %v17268_v8  ;;  %v17244_v8 = vld [vmem:[%s27408_s3 + $0x40] sm:$0xff]  ;;  %s27412_s23 = sld [smem:[#allocation22_spill]] }
0x22c6   : > { %v17270_v37 = vld [vmem:[%s27408_s3 + $0x110] sm:$0xff]  ;;  %v17260_v21 = vld [vmem:[%s27408_s3 + $0xc0] sm:$0xff] }
0x22c8   : > { %v17076_v45 = vpop.f32.mrb[28].mxu1 }
0x22c9   : > { %17105 = vrot.lane.b32.xlu0 %v17076_v45, %s27400_s9  ;;  %v21358_v3 = vpop.f32.mrb[29].mxu1  ;;  %v17286_v45 = vld [vmem:[%s27408_s3 + $0x190] sm:$0xff]  ;;  %s27413_s9 = sld [smem:[#allocation24_spill]] }
0x22ca   : > { %v17241_v3 = vld [vmem:[%s27408_s3 + $0x28] sm:$0xff] }
0x22f6   : > { %v17082_v7 = vpop.permute.xlu0 %17081 }
0x22f7   : > { %v17108_v36 = vsel %vm27402_vm10, %v15907_v63, %v17082_v7  ;;  %v17253_v63 = vld [vmem:[%s27408_s3 + $0x88] sm:$0xff]  ;;  %v21769_v7 = vpack.c.bf16 %v17286_v45, %v17270_v37  ;;  %v17246_v37 = vld [vmem:[%s27408_s3 + $0x50] sm:$0xff] }
0x22f8   : > { %v21755_v59 = vpack.c.bf16 %v17253_v63, %v17237_v26  ;;  %v17275_v26 = vld [vmem:[%s27408_s3 + $0x138] sm:$0xff]  ;;  %v17262_v45 = vld [vmem:[%s27408_s3 + $0xd0] sm:$0xff] }
0x22f9   : > { %v17291_v63 = vld [vmem:[%s27408_s3 + $0x1b8] sm:$0xff] }
0x22fa   : > { %v17086_v28 = vpop.permute.xlu1 %17085  ;;  %21756 = vmatprep.subr.bf16.mxu1 %v21755_v59 }
0x22fb   : > { %v17109_v38 = vsel %vm2118_vm13, %v17108_v36, %v17086_v28  ;;  %21758 = vmatpush1.bf16.msra.mxu1 %v21757_v30  ;;  %v17257_v28 = vld [vmem:[%s27408_s3 + $0xa8] sm:$0xff]  ;;  %v21783_v30 = vpack.c.bf16 %v17291_v63, %v17275_v26  ;;  %v17283_v63 = vld [vmem:[%s27408_s3 + $0x178] sm:$0xff] }
0x22fc   : > { %21760 = vmatprep.subr.bf16.mxu1 %v21759_v19  ;;  %v21771_v36 = vpack.c.bf16 %v17257_v28, %v17241_v3  ;;  %v21777_v19 = vpack.c.bf16 %v17288_v34, %v17272_v51  ;;  %v17277_v3 = vld [vmem:[%s27408_s3 + $0x148] sm:$0xff]  ;;  %v17279_v28 = vld [vmem:[%s27408_s3 + $0x158] sm:$0xff]  ;;  %v17280_v51 = vld [vmem:[%s27408_s3 + $0x160] sm:$0xff] }
0x22fd   : > { %v17297_v26 = vld [vmem:[%s27408_s3 + $0x1e8] sm:$0xff]  ;;  %v17296_v34 = vld [vmem:[%s27408_s3 + $0x1e0] sm:$0xff] }
0x22fe   : > { %v17090_v16 = vpop.permute.xlu0 %17089 }
0x22ff   : > { %v17110_v58 = vsel %vm27403_vm3, %v17109_v38, %v17090_v16  ;;  %v17243_v16 = vld [vmem:[%s27408_s3 + $0x38] sm:$0xff]  ;;  %21762 = vmatpush1.bf16.msra.mxu1 %v21761_v17  ;;  %v21795_v17 = vpack.c.bf16 %v17263_v54, %v17247_v50  ;;  %v18019_v50 = vld [vmem:[%s27411_s8 + $0x180] sm:$0xff]  ;;  %v18020_v54 = vld [vmem:[%s27411_s8 + $0x188] sm:$0xff] }
0x2300   : > { %21772 = vmatprep.subr.bf16.mxu1 %v21771_v36  ;;  %v21797_v36 = vpack.c.bf16 %v17262_v45, %v17246_v37  ;;  %v18003_v37 = vld [vmem:[%s27411_s8 + $0x100] sm:$0xff]  ;;  %v18004_v45 = vld [vmem:[%s27411_s8 + $0x108] sm:$0xff] }
0x232f   : > { %v17094_v9 = vpop.permute.xlu1 %17093 }
0x2330   : > { %v17111_v29 = vsel %vm27404_vm12, %v17110_v58, %v17094_v9  ;;  %v17259_v9 = vld [vmem:[%s27408_s3 + $0xb8] sm:$0xff] }
0x2331   : > { %v21779_v38 = vpack.c.bf16 %v17259_v9, %v17243_v16  ;;  %v17295_v16 = vld [vmem:[%s27408_s3 + $0x1d8] sm:$0xff]  ;;  %v21789_v9 = vpack.c.bf16 %v17260_v21, %v17244_v8  ;;  %v17971_v8 = vld [vmem:[%s27411_s8] sm:$0xff]  ;;  %v17972_v21 = vld [vmem:[%s27411_s8 + $0x8] sm:$0xff] }
0x2333   : > { %v17098_v46 = vpop.permute.xlu0 %17097 }
0x2334   : > { %v17112_v4 = vsel %vm27405_vm9, %v17111_v29, %v17098_v46 }
0x2337   : > { %v17102_v43 = vpop.permute.xlu1 %17101 }
0x2338   : > { %v17113_v35 = vsel %vm27406_vm1, %v17112_v4, %v17102_v43 }
0x233b   : > { %v17106_v41 = vpop.permute.xlu0 %17105 }
0x233c   : > { %v17114_v10 = vsel %vm27407_vm0, %v17113_v35, %v17106_v41 }
0x233d   : > { %21368 = vmatmul.mubr.msk.f32.vlgmr.msra.gmra.mrb[34].mxu0 %vm1162_vm2, %v17114_v10 }
0x233e   : > { %17522 = vmatprep.mubr.f32.mxu0 %v27259_v15 }
0x2410   : > { %v17195_v25 = vpop.f32.mrb[34].mxu0 }
0x2411   : > { %v17196_v44 = vadd.f32 %v19432_v23, %v17195_v25  ;;  %v21369_v55 = vpop.f32.mrb[35].mxu0  ;;  %v19434_v23 = vld [vmem:[%s27409_s2] ss:$0 sm:$0xff]  ;;  %s1005_s2 = sand.u32 1, %s22604_s10  }
0x2412   : > { %v17240_v55 = vld [vmem:[%s27408_s3 + $0x20] sm:$0xff] }
0x2413   : > { %v17199_v53 = vadd.f32 %v17196_v44, %v26431_v22  ;;  %v17255_v22 = vld [vmem:[%s27408_s3 + $0x98] sm:$0xff]  ;;  %v19435_v44 = vld [vmem:[%s27410_s6] ss:$0 sm:$0xff]  ;;  %s19450_s6 = sshll.u32 %s22879_s0, 4  ;;  %s22682_s0 = smov [#allocation2]  }
0x2414   : > { %v21763_v11 = vpack.c.bf16 %v17255_v22, %v17239_v32  ;;  %s22554_s13 = sshll.u32 %s22682_s0, 4  ;;  %s22555_s13 = int_to_ptr.vmem [resolvable:$false] %s22554_s13 }
0x2415   : > { %v17202_v12 = vsel %vm1162_vm2, %v17199_v53, 0.0  ;;  %s22556_s14 = scalar_lea.vmem %s22555_s13, 32 }
0x2416   : > { %17203 = vadd.xlane.f32.xlu1 %v17202_v12  ;;  %21764 = vmatprep.subr.bf16.mxu0 %v21763_v11 }
0x2417   : > { %21766 = vmatpush1.bf16.msra.mxu0 %v21765_v40  ;;  %v17245_v40 = vld [vmem:[%s27408_s3 + $0x48] sm:$0xff] }
0x2418   : > { %21768 = vmatprep.subr.bf16.mxu0 %v21767_v47  ;;  %v21787_v47 = vpack.c.bf16 %v17261_v0, %v17245_v40  ;;  %v17987_v40 = vld [vmem:[%s27411_s8 + $0x80] sm:$0xff]  ;;  %v17988_v0 = vld [vmem:[%s27411_s8 + $0x88] sm:$0xff] }
0x241b   : > { %21770 = vmatpush1.bf16.msra.mxu0 %v21769_v7  ;;  %v17293_v7 = vld [vmem:[%s27408_s3 + $0x1c8] sm:$0xff] }
0x241c   : > { %21780 = vmatprep.subr.bf16.mxu0 %v21779_v38  ;;  %v17276_v38 = vld [vmem:[%s27408_s3 + $0x140] sm:$0xff] }
0x24a3   : > { %v17204_v33 = vpop.xlane.xlu1 %17203 }
0x24a4   : > { %v17205_v5 = vmul.f32 0.03125, %v17204_v33  ;;  %v17242_v33 = vld [vmem:[%s27408_s3 + $0x30] sm:$0xff] }
0x24a6   : > { %v17206_v1 = vsub.f32 %v17199_v53, %v17205_v5  ;;  %v17256_v53 = vld [vmem:[%s27408_s3 + $0xa0] sm:$0xff]  ;;  %v17258_v5 = vld [vmem:[%s27408_s3 + $0xb0] sm:$0xff] }
0x24a7   : > { %v21773_v59 = vpack.c.bf16 %v17256_v53, %v17240_v55  ;;  %v21781_v22 = vpack.c.bf16 %v17258_v5, %v17242_v33  ;;  %v17248_v55 = vld [vmem:[%s27408_s3 + $0x60] sm:$0xff]  ;;  %v17250_v5 = vld [vmem:[%s27408_s3 + $0x70] sm:$0xff] }
0x24a8   : > { %v17207_v62 = vmul.f32 %v17206_v1, %v17206_v1  ;;  %v17264_v53 = vld [vmem:[%s27408_s3 + $0xe0] sm:$0xff] }
0x24aa   : > { %v17208_v24 = vsel %vm1162_vm2, %v17207_v62, 0.0  ;;  %v17273_v62 = vld [vmem:[%s27408_s3 + $0x128] sm:$0xff] }
0x24ab   : > { %17209 = vadd.xlane.f32.xlu0 %v17208_v24  ;;  %v17289_v24 = vld [vmem:[%s27408_s3 + $0x1a8] sm:$0xff] }
0x2538   : > { %v17210_v46 = vpop.xlane.xlu0 %17209 }
0x2539   : > { %v17211_v58 = vmul.f32 0.03125, %v17210_v46  ;;  %v17292_v46 = vld [vmem:[%s27408_s3 + $0x1c0] sm:$0xff] }
0x253b   : > { %v17212_v43 = vadd.f32 1e-05, %v17211_v58  ;;  %v21791_v58 = vpack.c.bf16 %v17293_v7, %v17277_v3  ;;  %v17989_v3 = vld [vmem:[%s27411_s8 + $0x90] sm:$0xff]  ;;  %v17990_v7 = vld [vmem:[%s27411_s8 + $0x98] sm:$0xff] }
0x253d   : > { %22542 = vrsqrt.f32 %v17212_v43  ;;  %vm17215_vm14 = vcmp.eq.f32.partialorder %v17212_v43, inf  ;;  %v17218_v35 = vand.u32 2147483648, %v17212_v43  ;;  %vm17217_vm4 = vcmp.eq.f32.partialorder %v17212_v43, 0.0 }
0x2547   : > { %v22543_v29 = vpop.eup %22542 }
0x2548   : > { %v17214_v4 = vmul.f32 %v22543_v29, %v17212_v43  ;;  %v17278_v29 = vld [vmem:[%s27408_s3 + $0x150] sm:$0xff] }
0x254a   : > { %v17216_v41 = vsel %vm17215_vm14, %v17212_v43, %v17214_v4  ;;  %v21799_v43 = vpack.c.bf16 %v17295_v16, %v17279_v28  ;;  %v17294_v4 = vld [vmem:[%s27408_s3 + $0x1d0] sm:$0xff]  ;;  %v18022_v16 = vld [vmem:[%s27411_s8 + $0x198] sm:$0xff] }
0x254b   : > { %v17219_v10 = vsel %vm17217_vm4, %v17218_v35, %v17216_v41  ;;  %v17249_v35 = vld [vmem:[%s27408_s3 + $0x68] sm:$0xff]  ;;  %v18021_v28 = vld [vmem:[%s27411_s8 + $0x190] sm:$0xff] }
0x254c   : > { %22544 = vrcp.f32 %v17219_v10  ;;  %v17265_v41 = vld [vmem:[%s27408_s3 + $0xe8] sm:$0xff]  ;;  %v17251_v10 = vld [vmem:[%s27408_s3 + $0x78] sm:$0xff] }
0x2556   : > { %v22545_v25 = vpop.eup %22544 }
0x2557   : > { %v17221_v12 = vmul.f32 %v22545_v25, %v17206_v1  ;;  %v21775_v1 = vpack.c.bf16 %v17289_v24, %v17273_v62  ;;  %v21793_v25 = vpack.c.bf16 %v17292_v46, %v17276_v38  ;;  %v17266_v62 = vld [vmem:[%s27408_s3 + $0xf0] sm:$0xff]  ;;  %v17281_v24 = vld [vmem:[%s27408_s3 + $0x168] sm:$0xff]  ;;  %v17974_v46 = vld [vmem:[%s27411_s8 + $0x18] sm:$0xff] }
0x2558   : > { %v17973_v38 = vld [vmem:[%s27411_s8 + $0x10] sm:$0xff] }
0x2559   : > { %v17228_v32 = vmul.f32 %v19434_v23, %v17221_v12  ;;  %v17267_v23 = vld [vmem:[%s27408_s3 + $0xf8] sm:$0xff]  ;;  %v21803_v12 = vpack.c.bf16 %v17265_v41, %v17249_v35  ;;  %v17991_v35 = vld [vmem:[%s27411_s8 + $0xa0] sm:$0xff]  ;;  %v17992_v41 = vld [vmem:[%s27411_s8 + $0xa8] sm:$0xff] }
0x255a   : > { %v21811_v33 = vpack.c.bf16 %v17267_v23, %v17251_v10  ;;  %v18023_v10 = vld [vmem:[%s27411_s8 + $0x1a0] sm:$0xff]  ;;  %v18024_v23 = vld [vmem:[%s27411_s8 + $0x1a8] sm:$0xff] }
0x255b   : > { %v26661_v11 = vadd.f32 %v19435_v44, %v17228_v32  ;;  %v21801_v44 = vpack.c.bf16 %v17294_v4, %v17278_v29  ;;  %v17299_v32 = vld [vmem:[%s27408_s3 + $0x1f8] sm:$0xff]  ;;  %v18005_v29 = vld [vmem:[%s27411_s8 + $0x110] sm:$0xff]  ;;  %s27074_s3 = scalar_lea.hbm %s22856_s4, %s19450_s6 }
0x255c   : > { %v18006_v4 = vld [vmem:[%s27411_s8 + $0x118] sm:$0xff] }
0x255d   : > { %19436 = vmatmul.mubr.msk.f32.vlgmr.msra.gmra.mrb[30].mxu1 %vm1162_vm2, %v26661_v11  ;;  %19437 = vmatmul.mubr.msk.f32.vlgmr.msra.gmra.mrb[36].mxu0 %vm1162_vm2, %v26661_v11 }
0x255e   : > { %21774 = vmatpush1.bf16.msra.mxu1 %v21773_v59  ;;  %21782 = vmatpush1.bf16.msra.mxu0 %v21781_v22  ;;  %v21805_v59 = vpack.c.bf16 %v17264_v53, %v17248_v55  ;;  %v21813_v22 = vpack.c.bf16 %v17266_v62, %v17250_v5  ;;  %v17975_v55 = vld [vmem:[%s27411_s8 + $0x20] sm:$0xff]  ;;  %v17976_v53 = vld [vmem:[%s27411_s8 + $0x28] sm:$0xff] }
0x255f   : > { %21776 = vmatprep.subr.bf16.mxu1 %v21775_v1  ;;  %21784 = vmatprep.subr.bf16.mxu0 %v21783_v30  ;;  %v21807_v1 = vpack.c.bf16 %v17297_v26, %v17281_v24  ;;  %v21815_v30 = vpack.c.bf16 %v17299_v32, %v17283_v63  ;;  %v18007_v5 = vld [vmem:[%s27411_s8 + $0x120] sm:$0xff]  ;;  %v18008_v62 = vld [vmem:[%s27411_s8 + $0x128] sm:$0xff]  ;;  %v17993_v24 = vld [vmem:[%s27411_s8 + $0xb0] sm:$0xff] }
0x2560   : > { %17593 = vmatprep.mubr.f32.mxu1 %v27259_v15  ;;  %17664 = vmatprep.mubr.f32.mxu0 %v27259_v15  ;;  %v17994_v26 = vld [vmem:[%s27411_s8 + $0xb8] sm:$0xff]  ;;  %v18025_v63 = vld [vmem:[%s27411_s8 + $0x1b0] sm:$0xff] }
0x2561   : > { %v18026_v32 = vld [vmem:[%s27411_s8 + $0x1b8] sm:$0xff] }
0x2562   : > { %21778 = vmatpush1.bf16.msra.mxu1 %v21777_v19  ;;  %21786 = vmatpush1.bf16.msra.mxu0 %v21785_v57  ;;  %v21809_v19 = vpack.c.bf16 %v17296_v34, %v17280_v51  ;;  %v21817_v57 = vpack.c.bf16 %v17298_v56, %v17282_v2  ;;  %v17977_v51 = vld [vmem:[%s27411_s8 + $0x30] sm:$0xff]  ;;  %v17978_v34 = vld [vmem:[%s27411_s8 + $0x38] sm:$0xff] }
0x2563   : > { %21788 = vmatprep.subr.bf16.mxu1 %v21787_v47  ;;  %21796 = vmatprep.subr.bf16.mxu0 %v21795_v17  ;;  %v21819_v47 = vpack.c.bf16 %v17988_v0, %v17987_v40  ;;  %v21851_v17 = vpack.c.bf16 %v18020_v54, %v18019_v50  ;;  %v18009_v2 = vld [vmem:[%s27411_s8 + $0x130] sm:$0xff]  ;;  %v18010_v56 = vld [vmem:[%s27411_s8 + $0x138] sm:$0xff]  ;;  %v17995_v40 = vld [vmem:[%s27411_s8 + $0xc0] sm:$0xff] }
0x2564   : > { %v17996_v0 = vld [vmem:[%s27411_s8 + $0xc8] sm:$0xff]  ;;  %v18027_v50 = vld [vmem:[%s27411_s8 + $0x1c0] sm:$0xff] }
0x2565   : > { %19438 = vmatmul.mubr.msk.f32.vlgmr.msra.gmra.mrb[32].mxu1 %vm1162_vm2, %v26661_v11  ;;  %19439 = vmatmul.mubr.msk.f32.vlgmr.msra.gmra.mrb[38].mxu0 %vm1162_vm2, %v26661_v11  ;;  %v18028_v54 = vld [vmem:[%s27411_s8 + $0x1c8] sm:$0xff] }
0x2566   : > { %21790 = vmatpush1.bf16.msra.mxu1 %v21789_v9  ;;  %21798 = vmatpush1.bf16.msra.mxu0 %v21797_v36  ;;  %v21821_v9 = vpack.c.bf16 %v17972_v21, %v17971_v8  ;;  %v21853_v36 = vpack.c.bf16 %v18004_v45, %v18003_v37  ;;  %v17979_v8 = vld [vmem:[%s27411_s8 + $0x40] sm:$0xff]  ;;  %v17980_v21 = vld [vmem:[%s27411_s8 + $0x48] sm:$0xff] }
0x2567   : > { %21792 = vmatprep.subr.bf16.mxu1 %v21791_v58  ;;  %21800 = vmatprep.subr.bf16.mxu0 %v21799_v43  ;;  %v21823_v58 = vpack.c.bf16 %v17990_v7, %v17989_v3  ;;  %v21855_v43 = vpack.c.bf16 %v18022_v16, %v18021_v28  ;;  %v18011_v37 = vld [vmem:[%s27411_s8 + $0x140] sm:$0xff]  ;;  %v18012_v45 = vld [vmem:[%s27411_s8 + $0x148] sm:$0xff]  ;;  %v17997_v3 = vld [vmem:[%s27411_s8 + $0xd0] sm:$0xff] }
0x2568   : > { %17735 = vmatprep.mubr.f32.mxu1 %v27259_v15  ;;  %17806 = vmatprep.mubr.f32.mxu0 %v27259_v15  ;;  %v17998_v7 = vld [vmem:[%s27411_s8 + $0xd8] sm:$0xff]  ;;  %v18029_v28 = vld [vmem:[%s27411_s8 + $0x1d0] sm:$0xff] }
0x2569   : > { %v18030_v16 = vld [vmem:[%s27411_s8 + $0x1d8] sm:$0xff] }
0x256a   : > { %21794 = vmatpush1.bf16.msra.mxu1 %v21793_v25  ;;  %21802 = vmatpush1.bf16.msra.mxu0 %v21801_v44  ;;  %v21825_v25 = vpack.c.bf16 %v17974_v46, %v17973_v38  ;;  %v21857_v44 = vpack.c.bf16 %v18006_v4, %v18005_v29  ;;  %v17981_v38 = vld [vmem:[%s27411_s8 + $0x50] sm:$0xff]  ;;  %v17982_v46 = vld [vmem:[%s27411_s8 + $0x58] sm:$0xff] }
0x256b   : > { %21804 = vmatprep.subr.bf16.mxu1 %v21803_v12  ;;  %21812 = vmatprep.subr.bf16.mxu0 %v21811_v33  ;;  %v21827_v12 = vpack.c.bf16 %v17992_v41, %v17991_v35  ;;  %v21859_v33 = vpack.c.bf16 %v18024_v23, %v18023_v10  ;;  %v18013_v29 = vld [vmem:[%s27411_s8 + $0x150] sm:$0xff]  ;;  %v18014_v4 = vld [vmem:[%s27411_s8 + $0x158] sm:$0xff]  ;;  %v17999_v35 = vld [vmem:[%s27411_s8 + $0xe0] sm:$0xff] }
0x256c   : > { %v18000_v41 = vld [vmem:[%s27411_s8 + $0xe8] sm:$0xff]  ;;  %v18031_v10 = vld [vmem:[%s27411_s8 + $0x1e0] sm:$0xff] }
0x256d   : > { %19440 = vmatmul.mubr.msk.f32.vlgmr.msra.gmra.mrb[34].mxu1 %vm1162_vm2, %v26661_v11  ;;  %19441 = vmatmul.mubr.msk.f32.vlgmr.msra.gmra.mrb[40].mxu0 %vm1162_vm2, %v26661_v11  ;;  %v18032_v23 = vld [vmem:[%s27411_s8 + $0x1e8] sm:$0xff] }
0x256e   : > { %21806 = vmatpush1.bf16.msra.mxu1 %v21805_v59  ;;  %21814 = vmatpush1.bf16.msra.mxu0 %v21813_v22  ;;  %v21829_v59 = vpack.c.bf16 %v17976_v53, %v17975_v55  ;;  %v21861_v22 = vpack.c.bf16 %v18008_v62, %v18007_v5  ;;  %v17983_v55 = vld [vmem:[%s27411_s8 + $0x60] sm:$0xff]  ;;  %v21843_v53 = vpack.c.bf16 %v18000_v41, %v17999_v35  ;;  %v18016_v62 = vld [vmem:[%s27411_s8 + $0x168] sm:$0xff] }
0x256f   : > { %21808 = vmatprep.subr.bf16.mxu1 %v21807_v1  ;;  %21816 = vmatprep.subr.bf16.mxu0 %v21815_v30  ;;  %v21831_v1 = vpack.c.bf16 %v17994_v26, %v17993_v24  ;;  %v21863_v30 = vpack.c.bf16 %v18026_v32, %v18025_v63  ;;  %v18015_v5 = vld [vmem:[%s27411_s8 + $0x160] sm:$0xff]  ;;  %v18001_v63 = vld [vmem:[%s27411_s8 + $0xf0] sm:$0xff]  ;;  %v18002_v32 = vld [vmem:[%s27411_s8 + $0xf8] sm:$0xff] }
0x2570   : > { %17877 = vmatprep.mubr.f32.mxu1 %v27259_v15  ;;  %17948 = vmatprep.mubr.f32.mxu0 %v27259_v15  ;;  %v21877_v26 = vpack.c.bf16 %v18016_v62, %v18015_v5  ;;  %v18038_v5 = vld [vmem:[%s27411_s8 + $0x218] sm:$0xff] }
0x2572   : > { %21810 = vmatpush1.bf16.msra.mxu1 %v21809_v19  ;;  %21818 = vmatpush1.bf16.msra.mxu0 %v21817_v57  ;;  %v21833_v19 = vpack.c.bf16 %v17978_v34, %v17977_v51  ;;  %v21865_v57 = vpack.c.bf16 %v18010_v56, %v18009_v2  ;;  %v18034_v51 = vld [vmem:[%s27411_s8 + $0x1f8] sm:$0xff]  ;;  %v17985_v34 = vld [vmem:[%s27411_s8 + $0x70] sm:$0xff] }
0x2573   : > { %21820 = vmatprep.subr.bf16.mxu1 %v21819_v47  ;;  %21852 = vmatprep.subr.bf16.mxu0 %v21851_v17  ;;  %v21835_v47 = vpack.c.bf16 %v17996_v0, %v17995_v40  ;;  %v21867_v17 = vpack.c.bf16 %v18028_v54, %v18027_v50  ;;  %v18017_v56 = vld [vmem:[%s27411_s8 + $0x170] sm:$0xff]  ;;  %v18018_v40 = vld [vmem:[%s27411_s8 + $0x178] sm:$0xff]  ;;  %v18051_v0 = vld [vmem:[%s27411_s8 + $0x280] sm:$0xff] }
0x2574   : > { %v21881_v50 = vpack.c.bf16 %v18018_v40, %v18017_v56  ;;  %v18052_v54 = vld [vmem:[%s27411_s8 + $0x288] sm:$0xff] }
0x2575   : > { %19442 = vmatmul.mubr.msk.f32.vlgmr.msra.gmra.mrb[36].mxu1 %vm1162_vm2, %v26661_v11  ;;  %19443 = vmatmul.mubr.msk.f32.vlgmr.msra.gmra.mrb[42].mxu0 %vm1162_vm2, %v26661_v11 }
0x2576   : > { %21822 = vmatpush3.bf16.msra.mxu1 %v21821_v9  ;;  %21854 = vmatpush3.bf16.msra.mxu0 %v21853_v36  ;;  %v21837_v9 = vpack.c.bf16 %v17980_v21, %v17979_v8  ;;  %v21869_v36 = vpack.c.bf16 %v18012_v45, %v18011_v37  ;;  %v21883_v8 = vpack.c.bf16 %v18052_v54, %v18051_v0  ;;  %v18039_v54 = vld [vmem:[%s27411_s8 + $0x220] sm:$0xff] }
0x2577   : > { %21824 = vmatprep.subr.bf16.mxu1 %v21823_v58  ;;  %21856 = vmatprep.subr.bf16.mxu0 %v21855_v43  ;;  %v21839_v58 = vpack.c.bf16 %v17998_v7, %v17997_v3  ;;  %v21871_v43 = vpack.c.bf16 %v18030_v16, %v18029_v28  ;;  %v18035_v16 = vld [vmem:[%s27411_s8 + $0x200] sm:$0xff] }
0x257a   : > { %21826 = vmatpush3.bf16.msra.mxu1 %v21825_v25  ;;  %21858 = vmatpush3.bf16.msra.mxu0 %v21857_v44  ;;  %v21841_v25 = vpack.c.bf16 %v17982_v46, %v17981_v38  ;;  %v21873_v44 = vpack.c.bf16 %v18014_v4, %v18013_v29  ;;  %v18068_v29 = vld [vmem:[%s27411_s8 + $0x308] sm:$0xff]  ;;  %v18053_v4 = vld [vmem:[%s27411_s8 + $0x290] sm:$0xff] }
0x257b   : > { %21828 = vmatprep.subr.bf16.mxu1 %v21827_v12  ;;  %21860 = vmatprep.subr.bf16.mxu0 %v21859_v33  ;;  %v21875_v12 = vpack.c.bf16 %v18032_v23, %v18031_v10  ;;  %v17984_v33 = vld [vmem:[%s27411_s8 + $0x68] sm:$0xff]  ;;  %v18054_v10 = vld [vmem:[%s27411_s8 + $0x298] sm:$0xff]  ;;  %v18085_v23 = vld [vmem:[%s27411_s8 + $0x390] sm:$0xff] }
0x257c   : > { %v21845_v24 = vpack.c.bf16 %v17984_v33, %v17983_v55  ;;  %v18037_v33 = vld [vmem:[%s27411_s8 + $0x210] sm:$0xff] }
0x257d   : > { %v21889_v0 = vpack.c.bf16 %v18038_v5, %v18037_v33 }
0x257e   : > { %21830 = vmatpush3.bf16.msra.mxu1 %v21829_v59  ;;  %21862 = vmatpush3.bf16.msra.mxu0 %v21861_v22  ;;  %v18033_v59 = vld [vmem:[%s27411_s8 + $0x1f0] sm:$0xff]  ;;  %v21847_v22 = vpack.c.bf16 %v18002_v32, %v18001_v63 }
0x257f   : > { %21832 = vmatprep.subr.bf16.mxu1 %v21831_v1  ;;  %21864 = vmatprep.subr.bf16.mxu0 %v21863_v30  ;;  %v17986_v1 = vld [vmem:[%s27411_s8 + $0x78] sm:$0xff]  ;;  %v21879_v30 = vpack.c.bf16 %v18034_v51, %v18033_v59  ;;  %v18069_v32 = vld [vmem:[%s27411_s8 + $0x310] sm:$0xff] }
0x2580   : > { %v21849_v2 = vpack.c.bf16 %v17986_v1, %v17985_v34  ;;  %v18070_v59 = vld [vmem:[%s27411_s8 + $0x318] sm:$0xff]  ;;  %v18056_v1 = vld [vmem:[%s27411_s8 + $0x2a8] sm:$0xff] }
0x2582   : > { %21834 = vmatpush3.bf16.msra.mxu1 %v21833_v19  ;;  %21866 = vmatpush3.bf16.msra.mxu0 %v21865_v57  ;;  %v18083_v19 = vld [vmem:[%s27411_s8 + $0x380] sm:$0xff]  ;;  %v18084_v57 = vld [vmem:[%s27411_s8 + $0x388] sm:$0xff] }
0x2583   : > { %21836 = vmatprep.subr.bf16.mxu1 %v21835_v47  ;;  %21868 = vmatprep.subr.bf16.mxu0 %v21867_v17  ;;  %v21915_v21 = vpack.c.bf16 %v18084_v57, %v18083_v19  ;;  %v26788_v47 = vld [vmem:[%s27412_s23] sm:$0xff]  ;;  %v18040_v19 = vld [vmem:[%s27411_s8 + $0x228] sm:$0xff] }
0x2584   : > { %v17307_v17 = vrot.slane %v26788_v47, %v25521_v20  ;;  %v17315_v37 = vrot.slane %v26788_v47, %v25524_v14  ;;  %v17311_v45 = vrot.slane %v26788_v47, %v25530_v48  ;;  %v17319_v3 = vrot.slane %v26788_v47, %v25533_v6 }
0x2585   : > { %v17327_v51 = vrot.slane %v26788_v47, %v25646_v60  ;;  %v17335_v34 = vrot.slane %v26788_v47, %v25653_v13 }
0x2586   : > { %21838 = vmatpush3.bf16.msra.mxu1 %v21837_v9  ;;  %21870 = vmatpush3.bf16.msra.mxu0 %v21869_v36  ;;  %v18036_v9 = vld [vmem:[%s27411_s8 + $0x208] sm:$0xff] }
0x2587   : > { %21840 = vmatprep.subr.bf16.mxu1 %v21839_v58  ;;  %21872 = vmatprep.subr.bf16.mxu0 %v21871_v43  ;;  %v18067_v43 = vld [vmem:[%s27411_s8 + $0x300] sm:$0xff] }
0x258a   : > { %21842 = vmatpush3.bf16.msra.mxu1 %v21841_v25  ;;  %21874 = vmatpush3.bf16.msra.mxu0 %v21873_v44  ;;  %v18086_v25 = vld [vmem:[%s27411_s8 + $0x398] sm:$0xff] }
0x258b   : > { %21844 = vmatprep.subr.bf16.mxu1 %v21843_v53  ;;  %21876 = vmatprep.subr.bf16.mxu0 %v21875_v12  ;;  %v21885_v53 = vpack.c.bf16 %v18036_v9, %v18035_v16  ;;  %v21917_v12 = vpack.c.bf16 %v18068_v29, %v18067_v43  ;;  %v21919_v63 = vpack.c.bf16 %v18086_v25, %v18085_v23  ;;  %v18058_v16 = vld [vmem:[%s27411_s8 + $0x2b8] sm:$0xff]  ;;  %v18089_v9 = vld [vmem:[%s27411_s8 + $0x3b0] sm:$0xff]  ;;  %v18059_v25 = vld [vmem:[%s27411_s8 + $0x2c0] sm:$0xff] }
0x258c   : > { %v18041_v29 = vld [vmem:[%s27411_s8 + $0x230] sm:$0xff]  ;;  %v18074_v23 = vld [vmem:[%s27411_s8 + $0x338] sm:$0xff] }
0x258e   : > { %21846 = vmatpush3.bf16.msra.mxu1 %v21845_v24  ;;  %21878 = vmatpush3.bf16.msra.mxu0 %v21877_v26  ;;  %v21887_v26 = vpack.c.bf16 %v18054_v10, %v18053_v4  ;;  %v18042_v4 = vld [vmem:[%s27411_s8 + $0x238] sm:$0xff]  ;;  %v18073_v10 = vld [vmem:[%s27411_s8 + $0x330] sm:$0xff] }
0x258f   : > { %21848 = vmatprep.subr.bf16.mxu1 %v21847_v22  ;;  %21880 = vmatprep.subr.bf16.mxu0 %v21879_v30  ;;  %v18055_v22 = vld [vmem:[%s27411_s8 + $0x2a0] sm:$0xff]  ;;  %v21897_v5 = vpack.c.bf16 %v18042_v4, %v18041_v29  ;;  %v18048_v29 = vld [vmem:[%s27411_s8 + $0x268] sm:$0xff] }
0x2590   : > { %v18087_v30 = vld [vmem:[%s27411_s8 + $0x3a0] sm:$0xff] }
0x2592   : > { %21850 = vmatpush3.bf16.msra.mxu1 %v21849_v2  ;;  %21882 = vmatpush3.bf16.msra.mxu0 %v21881_v50  ;;  %v18088_v2 = vld [vmem:[%s27411_s8 + $0x3a8] sm:$0xff]  ;;  %v21921_v50 = vpack.c.bf16 %v18070_v59, %v18069_v32 }
0x2593   : > { %21884 = vmatprep.subr.bf16.mxu1 %v21883_v8  ;;  %21916 = vmatprep.subr.bf16.mxu0 %v21915_v21  ;;  %v21891_v21 = vpack.c.bf16 %v18056_v1, %v18055_v22  ;;  %v18061_v1 = vld [vmem:[%s27411_s8 + $0x2d0] sm:$0xff] }
0x2630   : > { %v17453_v7 = vpop.f32.mrb[30].mxu1  ;;  %v17524_v28 = vpop.f32.mrb[36].mxu0 }
0x2631   : > { %v17454_v36 = vadd.f32 %v17453_v7, %v17307_v17  ;;  %v17525_v38 = vadd.f32 %v17524_v28, %v17315_v37  ;;  %v17455_v46 = vpop.f32.mrb[31].mxu1  ;;  %v17526_v58 = vpop.f32.mrb[37].mxu0  ;;  %v21923_v17 = vpack.c.bf16 %v18088_v2, %v18087_v30  ;;  %v18071_v37 = vld [vmem:[%s27411_s8 + $0x320] sm:$0xff]  ;;  %v18062_v30 = vld [vmem:[%s27411_s8 + $0x2d8] sm:$0xff]  ;;  %v18093_v2 = vld [vmem:[%s27411_s8 + $0x3d0] sm:$0xff] }
0x2632   : > { %v17456_v35 = vadd.f32 %v17455_v46, %v17311_v45  ;;  %v17527_v41 = vadd.f32 %v17526_v58, %v17319_v3  ;;  %v18072_v45 = vld [vmem:[%s27411_s8 + $0x328] sm:$0xff]  ;;  %v18057_v3 = vld [vmem:[%s27411_s8 + $0x2b0] sm:$0xff]  ;;  %v21893_v58 = vpack.c.bf16 %v18040_v19, %v18039_v54 }
0x2633   : > { %v17955_v62 = vmax.f32 %v17454_v36, 0.0  ;;  %v17957_v24 = vmax.f32 %v17525_v38, 0.0  ;;  %v18090_v36 = vld [vmem:[%s27411_s8 + $0x3b8] sm:$0xff]  ;;  %v21925_v43 = vpack.c.bf16 %v18072_v45, %v18071_v37  ;;  %v18077_v45 = vld [vmem:[%s27411_s8 + $0x350] sm:$0xff] }
0x2634   : > { %v17956_v44 = vmax.f32 %v17456_v35, 0.0  ;;  %v17958_v55 = vmax.f32 %v17527_v41, 0.0  ;;  %v21895_v35 = vpack.c.bf16 %v18058_v16, %v18057_v3  ;;  %v21927_v41 = vpack.c.bf16 %v18090_v36, %v18089_v9  ;;  %v18078_v3 = vld [vmem:[%s27411_s8 + $0x358] sm:$0xff]  ;;  %v18095_v16 = vld [vmem:[%s27411_s8 + $0x3e0] sm:$0xff]  ;;  %v18096_v9 = vld [vmem:[%s27411_s8 + $0x3e8] sm:$0xff] }
0x2636   : > { %18298 = vmatprep.mubr.f32.mxu1 %v17956_v44  ;;  %18368 = vmatprep.mubr.f32.mxu0 %v17958_v55  ;;  %v18060_v44 = vld [vmem:[%s27411_s8 + $0x2c8] sm:$0xff]  ;;  %v18091_v55 = vld [vmem:[%s27411_s8 + $0x3c0] sm:$0xff] }
0x2637   : > { %18299 = vmatmul.mubr.f32.vlgmr.msra.gmra.mrb[38].mxu1 %v17955_v62  ;;  %18369 = vmatmul.mubr.f32.vlgmr.msra.gmra.mrb[44].mxu0 %v17957_v24  ;;  %v21929_v62 = vpack.c.bf16 %v18074_v23, %v18073_v10  ;;  %v18043_v24 = vld [vmem:[%s27411_s8 + $0x240] sm:$0xff]  ;;  %v21899_v59 = vpack.c.bf16 %v18060_v44, %v18059_v25  ;;  %v21939_v23 = vpack.c.bf16 %v18096_v9, %v18095_v16  ;;  %v18080_v44 = vld [vmem:[%s27411_s8 + $0x368] sm:$0xff] }
0x2638   : > { %v26818_v56 = vpop.f32.mrb[32].mxu1  ;;  %v26820_v40 = vpop.f32.mrb[38].mxu0  ;;  %21886 = vmatpush3.bf16.msra.mxu1 %v21885_v53  ;;  %21918 = vmatpush3.bf16.msra.mxu0 %v21917_v12  ;;  %v18092_v53 = vld [vmem:[%s27411_s8 + $0x3c8] sm:$0xff]  ;;  %v18079_v25 = vld [vmem:[%s27411_s8 + $0x360] sm:$0xff] }
0x2639   : > { %v17597_v57 = vpop.f32.mrb[33].mxu1  ;;  %v17668_v8 = vpop.f32.mrb[39].mxu0  ;;  %21888 = vmatprep.subr.bf16.mxu1 %v21887_v26  ;;  %21920 = vmatprep.subr.bf16.mxu0 %v21919_v63  ;;  %v18044_v26 = vld [vmem:[%s27411_s8 + $0x248] sm:$0xff]  ;;  %v21931_v22 = vpack.c.bf16 %v18092_v53, %v18091_v55  ;;  %v18065_v55 = vld [vmem:[%s27411_s8 + $0x2f0] sm:$0xff]  ;;  %v18066_v53 = vld [vmem:[%s27411_s8 + $0x2f8] sm:$0xff] }
0x263a   : > { %v17598_v7 = vadd.f32 %v17597_v57, %v17327_v51  ;;  %v17669_v28 = vadd.f32 %v17668_v8, %v17335_v34  ;;  %v18075_v51 = vld [vmem:[%s27411_s8 + $0x340] sm:$0xff]  ;;  %v18076_v34 = vld [vmem:[%s27411_s8 + $0x348] sm:$0xff]  ;;  %v21901_v54 = vpack.c.bf16 %v18044_v26, %v18043_v24  ;;  %v18045_v57 = vld [vmem:[%s27411_s8 + $0x250] sm:$0xff]  ;;  %v17323_v24 = vrot.slane %v26788_v47, %v25640_v27 }
0x263b   : > { %v21933_v19 = vpack.c.bf16 %v18076_v34, %v18075_v51  ;;  %v18046_v8 = vld [vmem:[%s27411_s8 + $0x258] sm:$0xff]  ;;  %v18081_v34 = vld [vmem:[%s27411_s8 + $0x370] sm:$0xff]  ;;  %v18131_v16 = vld [vmem:[%s27411_s8 + $0x500] sm:$0xff] }
0x263c   : > { %v17960_v38 = vmax.f32 %v17598_v7, 0.0  ;;  %v17962_v46 = vmax.f32 %v17669_v28, 0.0  ;;  %21890 = vmatpush3.bf16.msra.mxu1 %v21889_v0  ;;  %21922 = vmatpush3.bf16.msra.mxu0 %v21921_v50  ;;  %v18094_v0 = vld [vmem:[%s27411_s8 + $0x3d8] sm:$0xff]  ;;  %v26855_v50 = vld [vmem:[%s27412_s23 + $0x8] sm:$0xff]  ;;  %v18063_v7 = vld [vmem:[%s27411_s8 + $0x2e0] sm:$0xff] }
0x263d   : > { %21892 = vmatprep.subr.bf16.mxu1 %v21891_v21  ;;  %21924 = vmatprep.subr.bf16.mxu0 %v21923_v17  ;;  %v17363_v21 = vrot.slane %v26855_v50, %v25643_v42  ;;  %v21903_v17 = vpack.c.bf16 %v18062_v30, %v18061_v1  ;;  %v21935_v37 = vpack.c.bf16 %v18094_v0, %v18093_v2  ;;  %v18064_v28 = vld [vmem:[%s27411_s8 + $0x2e8] sm:$0xff]  ;;  %v18050_v51 = vld [vmem:[%s27411_s8 + $0x278] sm:$0xff] }
0x263e   : > { %18438 = vmatprep.mubr.f32.mxu1 %v17960_v38  ;;  %18508 = vmatprep.mubr.f32.mxu0 %v17962_v46  ;;  %v21905_v46 = vpack.c.bf16 %v18046_v8, %v18045_v57  ;;  %v21907_v10 = vpack.c.bf16 %v18064_v28, %v18063_v7  ;;  %v17331_v1 = vrot.slane %v26788_v47, %v25643_v42  ;;  %v18082_v0 = vld [vmem:[%s27411_s8 + $0x378] sm:$0xff]  ;;  %v18147_v8 = vld [vmem:[%s27411_s8 + $0x580] sm:$0xff]  ;;  %v18100_v28 = vld [vmem:[%s27411_s8 + $0x408] sm:$0xff] }
0x263f   : > { %v21911_v30 = vpack.c.bf16 %v18066_v53, %v18065_v55  ;;  %v17343_v57 = vrot.slane %v26855_v50, %v25530_v48  ;;  %v21945_v47 = vpack.c.bf16 %v18082_v0, %v18081_v34  ;;  %v18099_v7 = vld [vmem:[%s27411_s8 + $0x400] sm:$0xff]  ;;  %v18132_v9 = vld [vmem:[%s27411_s8 + $0x508] sm:$0xff] }
0x2640   : > { %v26838_v12 = vpop.f32.mrb[34].mxu1  ;;  %v26840_v33 = vpop.f32.mrb[40].mxu0  ;;  %21894 = vmatpush3.bf16.msra.mxu1 %v21893_v58  ;;  %21926 = vmatpush3.bf16.msra.mxu0 %v21925_v43  ;;  %v21937_v58 = vpack.c.bf16 %v18078_v3, %v18077_v45  ;;  %v18047_v43 = vld [vmem:[%s27411_s8 + $0x260] sm:$0xff]  ;;  %v17596_v45 = vadd.f32 %v26818_v56, %v17323_v24  ;;  %v17667_v48 = vadd.f32 %v26820_v40, %v17331_v1  ;;  %v18150_v56 = vld [vmem:[%s27411_s8 + $0x598] sm:$0xff]  ;;  %v18120_v24 = vld [vmem:[%s27411_s8 + $0x4a8] sm:$0xff] }
0x2641   : > { %v26844_v63 = vpop.f32.mrb[35].mxu1  ;;  %v26846_v32 = vpop.f32.mrb[41].mxu0  ;;  %21896 = vmatprep.subr.bf16.mxu1 %v21895_v35  ;;  %21928 = vmatprep.subr.bf16.mxu0 %v21927_v41  ;;  %v21909_v26 = vpack.c.bf16 %v18048_v29, %v18047_v43  ;;  %v18149_v43 = vld [vmem:[%s27411_s8 + $0x590] sm:$0xff]  ;;  %v21949_v40 = vpack.c.bf16 %v18100_v28, %v18099_v7  ;;  %v18135_v0 = vld [vmem:[%s27411_s8 + $0x520] sm:$0xff]  ;;  %v18138_v28 = vld [vmem:[%s27411_s8 + $0x538] sm:$0xff] }
0x2642   : > { %v17959_v29 = vmax.f32 %v17596_v45, 0.0  ;;  %v21983_v53 = vpack.c.bf16 %v18150_v56, %v18149_v43  ;;  %v18105_v45 = vld [vmem:[%s27411_s8 + $0x430] sm:$0xff]  ;;  %v18107_v56 = vld [vmem:[%s27411_s8 + $0x440] sm:$0xff] }
0x2644   : > { %21898 = vmatpush3.bf16.msra.mxu1 %v21897_v5  ;;  %21930 = vmatpush3.bf16.msra.mxu0 %v21929_v62  ;;  %v18097_v5 = vld [vmem:[%s27411_s8 + $0x3f0] sm:$0xff]  ;;  %v18098_v62 = vld [vmem:[%s27411_s8 + $0x3f8] sm:$0xff] }
0x2645   : > { %21900 = vmatprep.subr.bf16.mxu1 %v21899_v59  ;;  %21932 = vmatprep.subr.bf16.mxu0 %v21931_v22  ;;  %v21941_v59 = vpack.c.bf16 %v18080_v44, %v18079_v25  ;;  %v18049_v22 = vld [vmem:[%s27411_s8 + $0x270] sm:$0xff]  ;;  %v21943_v2 = vpack.c.bf16 %v18098_v62, %v18097_v5  ;;  %v18102_v25 = vld [vmem:[%s27411_s8 + $0x418] sm:$0xff]  ;;  %v18119_v62 = vld [vmem:[%s27411_s8 + $0x4a0] sm:$0xff] }
0x2646   : > { %v21913_v42 = vpack.c.bf16 %v18050_v51, %v18049_v22  ;;  %v18133_v44 = vld [vmem:[%s27411_s8 + $0x510] sm:$0xff]  ;;  %v18134_v5 = vld [vmem:[%s27411_s8 + $0x518] sm:$0xff]  ;;  %v18152_v22 = vld [vmem:[%s27411_s8 + $0x5a8] sm:$0xff]  ;;  %v21955_v1 = vpack.c.bf16 %v18120_v24, %v18119_v62 }
0x2647   : > { %v21985_v34 = vpack.c.bf16 %v18134_v5, %v18133_v44  ;;  %v18157_v44 = vld [vmem:[%s27411_s8 + $0x5d0] sm:$0xff]  ;;  %v18110_v24 = vld [vmem:[%s27411_s8 + $0x458] sm:$0xff] }
0x2648   : > { %v26867_v36 = vpop.f32.mrb[36].mxu1  ;;  %v17950_v38 = vpop.f32.mrb[42].mxu0  ;;  %21902 = vmatpush3.bf16.msra.mxu1 %v21901_v54  ;;  %21934 = vmatpush3.bf16.msra.mxu0 %v21933_v19  ;;  %v18115_v54 = vld [vmem:[%s27411_s8 + $0x480] sm:$0xff]  ;;  %v18116_v19 = vld [vmem:[%s27411_s8 + $0x488] sm:$0xff]  ;;  %v18109_v62 = vld [vmem:[%s27411_s8 + $0x450] sm:$0xff] }
0x2649   : > { %v26871_v4 = vadd.f32 %v17950_v38, %v17363_v21  ;;  %v26873_v35 = vpop.f32.mrb[37].mxu1  ;;  %v26875_v41 = vpop.f32.mrb[43].mxu0  ;;  %21904 = vmatprep.subr.bf16.mxu1 %v21903_v17  ;;  %21936 = vmatprep.subr.bf16.mxu0 %v21935_v37  ;;  %v18148_v21 = vld [vmem:[%s27411_s8 + $0x588] sm:$0xff]  ;;  %v17351_v17 = vrot.slane %v26855_v50, %v25533_v6  ;;  %v21947_v37 = vpack.c.bf16 %v18116_v19, %v18115_v54  ;;  %v18117_v38 = vld [vmem:[%s27411_s8 + $0x490] sm:$0xff] }
0x264a   : > { %v21979_v3 = vpack.c.bf16 %v18148_v21, %v18147_v8  ;;  %v17740_v6 = vadd.f32 %v26844_v63, %v17343_v57  ;;  %v21981_v63 = vpack.c.bf16 %v18132_v9, %v18131_v16  ;;  %v18136_v19 = vld [vmem:[%s27411_s8 + $0x528] sm:$0xff]  ;;  %v18121_v57 = vld [vmem:[%s27411_s8 + $0x4b0] sm:$0xff]  ;;  %v18122_v8 = vld [vmem:[%s27411_s8 + $0x4b8] sm:$0xff] }
0x264b   : > { %v18153_v21 = vld [vmem:[%s27411_s8 + $0x5b0] sm:$0xff]  ;;  %v18124_v16 = vld [vmem:[%s27411_s8 + $0x4c8] sm:$0xff]  ;;  %v18155_v9 = vld [vmem:[%s27411_s8 + $0x5c0] sm:$0xff] }
0x264c   : > { %21906 = vmatpush3.bf16.msra.mxu1 %v21905_v46  ;;  %21938 = vmatpush3.bf16.msra.mxu0 %v21937_v58  ;;  %v17811_v46 = vadd.f32 %v26846_v32, %v17351_v17  ;;  %v18118_v58 = vld [vmem:[%s27411_s8 + $0x498] sm:$0xff]  ;;  %v17964_v32 = vmax.f32 %v17740_v6, 0.0  ;;  %v18123_v6 = vld [vmem:[%s27411_s8 + $0x4c0] sm:$0xff] }
0x264d   : > { %21908 = vmatprep.subr.bf16.mxu1 %v21907_v10  ;;  %21940 = vmatprep.subr.bf16.mxu0 %v21939_v23  ;;  %v17961_v10 = vmax.f32 %v17667_v48, 0.0  ;;  %v18101_v23 = vld [vmem:[%s27411_s8 + $0x410] sm:$0xff]  ;;  %v21951_v55 = vpack.c.bf16 %v18118_v58, %v18117_v38  ;;  %v18154_v17 = vld [vmem:[%s27411_s8 + $0x5b8] sm:$0xff]  ;;  %v18156_v38 = vld [vmem:[%s27411_s8 + $0x5c8] sm:$0xff]  ;;  %v21963_v43 = vpack.c.bf16 %v18124_v16, %v18123_v6 }
0x264e   : > { %v21953_v51 = vpack.c.bf16 %v18102_v25, %v18101_v23  ;;  %v18106_v48 = vld [vmem:[%s27411_s8 + $0x438] sm:$0xff]  ;;  %v21991_v7 = vpack.c.bf16 %v18154_v17, %v18153_v21  ;;  %v18125_v23 = vld [vmem:[%s27411_s8 + $0x4d0] sm:$0xff]  ;;  %v18144_v17 = vld [vmem:[%s27411_s8 + $0x568] sm:$0xff] }
0x264f   : > { %v18126_v25 = vld [vmem:[%s27411_s8 + $0x4d8] sm:$0xff]  ;;  %v18113_v6 = vld [vmem:[%s27411_s8 + $0x470] sm:$0xff] }
0x2650   : > { %21910 = vmatpush3.bf16.msra.mxu1 %v21909_v26  ;;  %21942 = vmatpush3.bf16.msra.mxu0 %v21941_v59  ;;  %v17966_v26 = vmax.f32 %v17811_v46, 0.0  ;;  %v18151_v59 = vld [vmem:[%s27411_s8 + $0x5a0] sm:$0xff]  ;;  %v21961_v46 = vpack.c.bf16 %v18106_v48, %v18105_v45  ;;  %v21967_v5 = vpack.c.bf16 %v18126_v25, %v18125_v23  ;;  %v18162_v45 = vld [vmem:[%s27411_s8 + $0x5f8] sm:$0xff] }
0x2651   : > { %21912 = vmatprep.subr.bf16.mxu1 %v21911_v30  ;;  %21944 = vmatprep.subr.bf16.mxu0 %v21943_v2  ;;  %v18103_v30 = vld [vmem:[%s27411_s8 + $0x420] sm:$0xff]  ;;  %v18104_v2 = vld [vmem:[%s27411_s8 + $0x428] sm:$0xff]  ;;  %v21987_v54 = vpack.c.bf16 %v18152_v22, %v18151_v59  ;;  %v18142_v22 = vld [vmem:[%s27411_s8 + $0x558] sm:$0xff] }
0x2652   : > { %v18114_v16 = vld [vmem:[%s27411_s8 + $0x478] sm:$0xff] }
0x2654   : > { %21914 = vmatpush3.bf16.msra.mxu1 %v21913_v42  ;;  %21946 = vmatpush3.bf16.msra.mxu0 %v21945_v47  ;;  %v21957_v42 = vpack.c.bf16 %v18104_v2, %v18103_v30  ;;  %v21989_v47 = vpack.c.bf16 %v18136_v19, %v18135_v0  ;;  %v18160_v30 = vld [vmem:[%s27411_s8 + $0x5e8] sm:$0xff]  ;;  %v21969_v2 = vpack.c.bf16 %v18110_v24, %v18109_v62  ;;  %v18111_v19 = vld [vmem:[%s27411_s8 + $0x460] sm:$0xff]  ;;  %v18182_v62 = vld [vmem:[%s27411_s8 + $0x698] sm:$0xff] }
0x2655   : > { %21948 = vmatprep.subr.bf16.mxu1 %v21947_v37  ;;  %21980 = vmatprep.subr.bf16.mxu0 %v21979_v3  ;;  %v21959_v37 = vpack.c.bf16 %v18122_v8, %v18121_v57  ;;  %v18137_v3 = vld [vmem:[%s27411_s8 + $0x530] sm:$0xff]  ;;  %v18112_v57 = vld [vmem:[%s27411_s8 + $0x468] sm:$0xff]  ;;  %v18143_v8 = vld [vmem:[%s27411_s8 + $0x560] sm:$0xff] }
0x2656   : > { %v21993_v58 = vpack.c.bf16 %v18138_v28, %v18137_v3  ;;  %v21973_v48 = vpack.c.bf16 %v18112_v57, %v18111_v19  ;;  %v17339_v3 = vrot.slane %v26855_v50, %v25521_v20  ;;  %v17359_v20 = vrot.slane %v26855_v50, %v25646_v60  ;;  %v18163_v60 = vld [vmem:[%s27411_s8 + $0x600] sm:$0xff] }
0x2657   : > { %18439 = vmatmul.mubr.f32.vlgmr.msra.gmra.mrb[40].mxu1 %v17959_v29  ;;  %18509 = vmatmul.mubr.f32.vlgmr.msra.gmra.mrb[46].mxu0 %v17961_v10  ;;  %v18139_v29 = vld [vmem:[%s27411_s8 + $0x540] sm:$0xff]  ;;  %v21995_v10 = vpack.c.bf16 %v18156_v38, %v18155_v9  ;;  %v18145_v9 = vld [vmem:[%s27411_s8 + $0x570] sm:$0xff]  ;;  %v17347_v38 = vrot.slane %v26855_v50, %v25524_v14  ;;  %v21977_v14 = vpack.c.bf16 %v18114_v16, %v18113_v6  ;;  %v18186_v16 = vld [vmem:[%s27411_s8 + $0x6b8] sm:$0xff] }
0x2658   : > { %21950 = vmatpush3.bf16.msra.mxu1 %v21949_v40  ;;  %18578 = vmatprep.mubr.f32.mxu1 %v17964_v32  ;;  %v18108_v40 = vld [vmem:[%s27411_s8 + $0x448] sm:$0xff]  ;;  %v18158_v32 = vld [vmem:[%s27411_s8 + $0x5d8] sm:$0xff]  ;;  %v18185_v6 = vld [vmem:[%s27411_s8 + $0x6b0] sm:$0xff] }
0x2659   : > { %21982 = vmatpush3.bf16.msra.mxu0 %v21981_v63  ;;  %18648 = vmatprep.mubr.f32.mxu0 %v17966_v26  ;;  %v18140_v63 = vld [vmem:[%s27411_s8 + $0x548] sm:$0xff]  ;;  %v18141_v26 = vld [vmem:[%s27411_s8 + $0x550] sm:$0xff]  ;;  %v21999_v59 = vpack.c.bf16 %v18158_v32, %v18157_v44  ;;  %v17809_v32 = vadd.f32 %v26840_v33, %v17347_v38  ;;  %v18214_v33 = vld [vmem:[%s27411_s8 + $0x798] sm:$0xff] }
0x265a   : > { %21952 = vmatprep.subr.bf16.mxu1 %v21951_v55  ;;  %21984 = vmatprep.subr.bf16.mxu0 %v21983_v53  ;;  %v21965_v55 = vpack.c.bf16 %v18108_v40, %v18107_v56  ;;  %v21997_v53 = vpack.c.bf16 %v18140_v63, %v18139_v29  ;;  %v22001_v0 = vpack.c.bf16 %v18142_v22, %v18141_v26  ;;  %v18180_v56 = vld [vmem:[%s27411_s8 + $0x688] sm:$0xff]  ;;  %v18211_v40 = vld [vmem:[%s27411_s8 + $0x780] sm:$0xff]  ;;  %v18218_v38 = vld [vmem:[%s27411_s8 + $0x7b8] sm:$0xff] }
0x265b   : > { %v18212_v29 = vld [vmem:[%s27411_s8 + $0x788] sm:$0xff]  ;;  %v17738_v63 = vadd.f32 %v26838_v12, %v17339_v3  ;;  %v18181_v12 = vld [vmem:[%s27411_s8 + $0x690] sm:$0xff]  ;;  %v18199_v3 = vld [vmem:[%s27411_s8 + $0x720] sm:$0xff] }
0x265c   : > { %21954 = vmatpush3.bf16.msra.mxu1 %v21953_v51  ;;  %v18127_v51 = vld [vmem:[%s27411_s8 + $0x4e0] sm:$0xff]  ;;  %v18164_v44 = vld [vmem:[%s27411_s8 + $0x608] sm:$0xff] }
0x265d   : > { %21986 = vmatpush3.bf16.msra.mxu0 %v21985_v34  ;;  %21956 = vmatprep.subr.bf16.mxu1 %v21955_v1  ;;  %v18128_v34 = vld [vmem:[%s27411_s8 + $0x4e8] sm:$0xff]  ;;  %v18159_v1 = vld [vmem:[%s27411_s8 + $0x5e0] sm:$0xff]  ;;  %v22013_v26 = vpack.c.bf16 %v18164_v44, %v18163_v60  ;;  %v17963_v22 = vmax.f32 %v17738_v63, 0.0 }
0x265e   : > { %21988 = vmatprep.subr.bf16.mxu0 %v21987_v54  ;;  %v21971_v54 = vpack.c.bf16 %v18128_v34, %v18127_v51  ;;  %v22003_v21 = vpack.c.bf16 %v18160_v30, %v18159_v1  ;;  %v18165_v34 = vld [vmem:[%s27411_s8 + $0x610] sm:$0xff]  ;;  %v18166_v1 = vld [vmem:[%s27411_s8 + $0x618] sm:$0xff]  ;;  %v17965_v30 = vmax.f32 %v17809_v32, 0.0  ;;  %v18188_v63 = vld [vmem:[%s27411_s8 + $0x6c8] sm:$0xff] }
0x2660   : > { %21958 = vmatpush3.bf16.msra.mxu1 %v21957_v42  ;;  %v18129_v42 = vld [vmem:[%s27411_s8 + $0x4f0] sm:$0xff] }
0x2661   : > { %21990 = vmatpush3.bf16.msra.mxu0 %v21989_v47  ;;  %21960 = vmatprep.subr.bf16.mxu1 %v21959_v37  ;;  %v18130_v47 = vld [vmem:[%s27411_s8 + $0x4f8] sm:$0xff]  ;;  %v18161_v37 = vld [vmem:[%s27411_s8 + $0x5f0] sm:$0xff] }
0x2662   : > { %21992 = vmatprep.subr.bf16.mxu0 %v21991_v7  ;;  %v22005_v7 = vpack.c.bf16 %v18144_v17, %v18143_v8  ;;  %v21975_v28 = vpack.c.bf16 %v18130_v47, %v18129_v42  ;;  %v18215_v8 = vld [vmem:[%s27411_s8 + $0x7a0] sm:$0xff]  ;;  %v22017_v42 = vpack.c.bf16 %v18166_v1, %v18165_v34  ;;  %v18173_v34 = vld [vmem:[%s27411_s8 + $0x650] sm:$0xff]  ;;  %v18174_v1 = vld [vmem:[%s27411_s8 + $0x658] sm:$0xff] }
0x2664   : > { %21962 = vmatpush3.bf16.msra.mxu1 %v21961_v46  ;;  %v22007_v46 = vpack.c.bf16 %v18162_v45, %v18161_v37  ;;  %v18167_v45 = vld [vmem:[%s27411_s8 + $0x620] sm:$0xff] }
0x2665   : > { %21994 = vmatpush3.bf16.msra.mxu0 %v21993_v58  ;;  %21964 = vmatprep.subr.bf16.mxu1 %v21963_v43  ;;  %v18146_v58 = vld [vmem:[%s27411_s8 + $0x578] sm:$0xff]  ;;  %v18179_v43 = vld [vmem:[%s27411_s8 + $0x680] sm:$0xff] }
0x2666   : > { %21996 = vmatprep.subr.bf16.mxu0 %v21995_v10  ;;  %v17367_v10 = vrot.slane %v26855_v50, %v25653_v13  ;;  %v22009_v23 = vpack.c.bf16 %v18146_v58, %v18145_v9  ;;  %v22011_v25 = vpack.c.bf16 %v18180_v56, %v18179_v43  ;;  %v18195_v13 = vld [vmem:[%s27411_s8 + $0x700] sm:$0xff]  ;;  %v18217_v9 = vld [vmem:[%s27411_s8 + $0x7b0] sm:$0xff]  ;;  %v22023_v43 = vpack.c.bf16 %v18186_v16, %v18185_v6 }
0x2667   : > { %v18169_v56 = vld [vmem:[%s27411_s8 + $0x630] sm:$0xff]  ;;  %v17355_v16 = vrot.slane %v26855_v50, %v25640_v27  ;;  %v17969_v50 = vmax.f32 %v26871_v4, 0.0 }
0x2668   : > { %21966 = vmatpush3.bf16.msra.mxu1 %v21965_v55  ;;  %v22043_v55 = vpack.c.bf16 %v18212_v29, %v18211_v40  ;;  %v17953_v24 = vadd.f32 %v26875_v41, %v17367_v10  ;;  %v18183_v41 = vld [vmem:[%s27411_s8 + $0x6a0] sm:$0xff]  ;;  %v18201_v40 = vld [vmem:[%s27411_s8 + $0x730] sm:$0xff]  ;;  %v22055_v29 = vpack.c.bf16 %v18218_v38, %v18217_v9  ;;  %v18202_v10 = vld [vmem:[%s27411_s8 + $0x738] sm:$0xff] }
0x2669   : > { %21998 = vmatpush3.bf16.msra.mxu0 %v21997_v53  ;;  %21968 = vmatprep.subr.bf16.mxu1 %v21967_v5  ;;  %v18196_v53 = vld [vmem:[%s27411_s8 + $0x708] sm:$0xff]  ;;  %v17882_v5 = vadd.f32 %v26873_v35, %v17359_v20  ;;  %v18197_v35 = vld [vmem:[%s27411_s8 + $0x710] sm:$0xff]  ;;  %v18170_v20 = vld [vmem:[%s27411_s8 + $0x638] sm:$0xff]  ;;  %v22057_v44 = vpack.c.bf16 %v18202_v10, %v18201_v40 }
0x266a   : > { %22000 = vmatprep.subr.bf16.mxu0 %v21999_v59  ;;  %v18213_v59 = vld [vmem:[%s27411_s8 + $0x790] sm:$0xff]  ;;  %v22045_v51 = vpack.c.bf16 %v18196_v53, %v18195_v13  ;;  %v17970_v17 = vmax.f32 %v17953_v24, 0.0  ;;  %v22025_v60 = vpack.c.bf16 %v18170_v20, %v18169_v56  ;;  %v18172_v13 = vld [vmem:[%s27411_s8 + $0x648] sm:$0xff]  ;;  %v18203_v53 = vld [vmem:[%s27411_s8 + $0x740] sm:$0xff] }
0x266b   : > { %v17968_v19 = vmax.f32 %v17882_v5, 0.0  ;;  %v22047_v57 = vpack.c.bf16 %v18214_v33, %v18213_v59  ;;  %v18190_v24 = vld [vmem:[%s27411_s8 + $0x6d8] sm:$0xff]  ;;  %v18209_v56 = vld [vmem:[%s27411_s8 + $0x770] sm:$0xff] }
0x266c   : > { %21970 = vmatpush3.bf16.msra.mxu1 %v21969_v2  ;;  %v22015_v2 = vpack.c.bf16 %v18182_v62, %v18181_v12  ;;  %v18204_v12 = vld [vmem:[%s27411_s8 + $0x748] sm:$0xff]  ;;  %v18189_v62 = vld [vmem:[%s27411_s8 + $0x6d0] sm:$0xff]  ;;  %v18222_v59 = vld [vmem:[%s27411_s8 + $0x7d8] sm:$0xff] }
0x266d   : > { %22002 = vmatpush3.bf16.msra.mxu0 %v22001_v0  ;;  %21972 = vmatprep.subr.bf16.mxu1 %v21971_v54  ;;  %v18198_v0 = vld [vmem:[%s27411_s8 + $0x718] sm:$0xff]  ;;  %v18184_v54 = vld [vmem:[%s27411_s8 + $0x6a8] sm:$0xff] }
0x266e   : > { %22004 = vmatprep.subr.bf16.mxu0 %v22003_v21  ;;  %v18216_v21 = vld [vmem:[%s27411_s8 + $0x7a8] sm:$0xff]  ;;  %v22049_v47 = vpack.c.bf16 %v18198_v0, %v18197_v35  ;;  %v22019_v37 = vpack.c.bf16 %v18184_v54, %v18183_v41  ;;  %v18205_v35 = vld [vmem:[%s27411_s8 + $0x750] sm:$0xff]  ;;  %v18191_v0 = vld [vmem:[%s27411_s8 + $0x6e0] sm:$0xff] }
0x266f   : > { %v18192_v41 = vld [vmem:[%s27411_s8 + $0x6e8] sm:$0xff]  ;;  %v18223_v54 = vld [vmem:[%s27411_s8 + $0x7e0] sm:$0xff]  ;;  %v18210_v20 = vld [vmem:[%s27411_s8 + $0x778] sm:$0xff] }
0x2670   : > { %21974 = vmatpush3.bf16.msra.mxu1 %v21973_v48  ;;  %v18168_v48 = vld [vmem:[%s27411_s8 + $0x628] sm:$0xff]  ;;  %v22073_v10 = vpack.c.bf16 %v18210_v20, %v18209_v56 }
0x2671   : > { %22006 = vmatpush3.bf16.msra.mxu0 %v22005_v7  ;;  %21976 = vmatprep.subr.bf16.mxu1 %v21975_v28  ;;  %v22051_v7 = vpack.c.bf16 %v18216_v21, %v18215_v8  ;;  %v18200_v28 = vld [vmem:[%s27411_s8 + $0x728] sm:$0xff]  ;;  %v22035_v21 = vpack.c.bf16 %v18192_v41, %v18191_v0 }
0x2672   : > { %22008 = vmatprep.subr.bf16.mxu0 %v22007_v46  ;;  %v22021_v46 = vpack.c.bf16 %v18168_v48, %v18167_v45  ;;  %v22053_v58 = vpack.c.bf16 %v18200_v28, %v18199_v3  ;;  %v18208_v45 = vld [vmem:[%s27411_s8 + $0x768] sm:$0xff]  ;;  %v18193_v48 = vld [vmem:[%s27411_s8 + $0x6f0] sm:$0xff]  ;;  %v18194_v3 = vld [vmem:[%s27411_s8 + $0x6f8] sm:$0xff] }
0x2673   : > { %v18226_v28 = vld [vmem:[%s27411_s8 + $0x7f8] sm:$0xff]  ;;  %v22039_v38 = vpack.c.bf16 %v18194_v3, %v18193_v48 }
0x2674   : > { %21978 = vmatpush3.bf16.msra.mxu1 %v21977_v14  ;;  %v18187_v14 = vld [vmem:[%s27411_s8 + $0x6c0] sm:$0xff] }
0x2675   : > { %22010 = vmatpush3.bf16.msra.mxu0 %v22009_v23  ;;  %22012 = vmatprep.subr.bf16.mxu1 %v22011_v25  ;;  %v18219_v23 = vld [vmem:[%s27411_s8 + $0x7c0] sm:$0xff]  ;;  %v18220_v25 = vld [vmem:[%s27411_s8 + $0x7c8] sm:$0xff]  ;;  %v22027_v32 = vpack.c.bf16 %v18188_v63, %v18187_v14 }
0x2676   : > { %22044 = vmatprep.subr.bf16.mxu0 %v22043_v55  ;;  %v18171_v55 = vld [vmem:[%s27411_s8 + $0x640] sm:$0xff]  ;;  %v22059_v5 = vpack.c.bf16 %v18220_v25, %v18219_v23 }
0x2677   : > { %18579 = vmatmul.mubr.f32.vlgmr.msra.gmra.mrb[42].mxu1 %v17963_v22  ;;  %v22029_v33 = vpack.c.bf16 %v18172_v13, %v18171_v55  ;;  %v22061_v22 = vpack.c.bf16 %v18204_v12, %v18203_v53  ;;  %v19444_v23 = vld [vmem:[%s27413_s9] ss:$0 sm:$0xff]  ;;  %s1006_s9 = scalar_lea.vmem [#allocation2], %s1005_s2 }
0x2678   : > { %18649 = vmatmul.mubr.f32.vlgmr.msra.gmra.mrb[48].mxu0 %v17965_v30  ;;  %22014 = vmatpush3.bf16.msra.mxu1 %v22013_v26  ;;  %v18221_v26 = vld [vmem:[%s27411_s8 + $0x7d0] sm:$0xff] }
0x2679   : > { %18718 = vmatprep.mubr.f32.mxu1 %v17968_v19  ;;  %22046 = vmatpush3.bf16.msra.mxu0 %v22045_v51  ;;  %v22031_v51 = vpack.c.bf16 %v18190_v24, %v18189_v62  ;;  %v22063_v30 = vpack.c.bf16 %v18222_v59, %v18221_v26  ;;  %v18224_v19 = vld [vmem:[%s27411_s8 + $0x7e8] sm:$0xff] }
0x267a   : > { %18788 = vmatprep.mubr.f32.mxu0 %v17970_v17  ;;  %22016 = vmatprep.subr.bf16.mxu1 %v22015_v2  ;;  %v18206_v2 = vld [vmem:[%s27411_s8 + $0x758] sm:$0xff]  ;;  %v18175_v17 = vld [vmem:[%s27411_s8 + $0x660] sm:$0xff] }
0x267b   : > { %22048 = vmatprep.subr.bf16.mxu0 %v22047_v57  ;;  %v22033_v57 = vpack.c.bf16 %v18174_v1, %v18173_v34  ;;  %v22065_v8 = vpack.c.bf16 %v18206_v2, %v18205_v35  ;;  %v18832_v2 = vsel %vm18831_vm5, %v25195_v52, 4294967295 }
0x267c   : > { %22018 = vmatpush3.bf16.msra.mxu1 %v22017_v42  ;;  %v18176_v42 = vld [vmem:[%s27411_s8 + $0x668] sm:$0xff] }
0x267d   : > { %22050 = vmatpush3.bf16.msra.mxu0 %v22049_v47  ;;  %22020 = vmatprep.subr.bf16.mxu1 %v22019_v37  ;;  %v18207_v47 = vld [vmem:[%s27411_s8 + $0x760] sm:$0xff]  ;;  %v22067_v37 = vpack.c.bf16 %v18224_v19, %v18223_v54  ;;  %v22037_v6 = vpack.c.bf16 %v18176_v42, %v18175_v17  ;;  %v18834_v19 = vsel %vm18833_vm11, %v18832_v2, 2147483648 }
0x267e   : > { %22052 = vmatprep.subr.bf16.mxu0 %v22051_v7  ;;  %v18225_v7 = vld [vmem:[%s27411_s8 + $0x7f0] sm:$0xff]  ;;  %v22069_v9 = vpack.c.bf16 %v18208_v45, %v18207_v47  ;;  %v18835_v42 = vrot.slane %v18834_v19, 4 }
0x2680   : > { %22022 = vmatpush3.bf16.msra.mxu1 %v22021_v46  ;;  %v18177_v46 = vld [vmem:[%s27411_s8 + $0x670] sm:$0xff]  ;;  %vm18836_vm7 = vcmp.gt.s32.totalorder %v18834_v19, %v18835_v42 }
0x2681   : > { %22054 = vmatpush3.bf16.msra.mxu0 %v22053_v58  ;;  %22024 = vmatprep.subr.bf16.mxu1 %v22023_v43  ;;  %v18178_v58 = vld [vmem:[%s27411_s8 + $0x678] sm:$0xff]  ;;  %v22071_v43 = vpack.c.bf16 %v18226_v28, %v18225_v7  ;;  %v18837_v31 = vsel %vm18836_vm7, %v18834_v19, %v18835_v42  ;;  %s19005_s8 = scalar_lea.sflag [#allocation3], %s1005_s2 }
0x2682   : > { %22056 = vmatprep.subr.bf16.mxu0 %v22055_v29  ;;  %v22041_v40 = vpack.c.bf16 %v18178_v58, %v18177_v46  ;;  %v17880_v29 = vadd.f32 %v26867_v36, %v17355_v16  ;;  %v18838_v48 = vrot.slane %v18837_v31, 2 }
0x2684   : > { %22026 = vmatpush3.bf16.msra.mxu1 %v22025_v60  ;;  %v17967_v27 = vmax.f32 %v17880_v29, 0.0  ;;  %vm18839_vm6 = vcmp.gt.s32.totalorder %v18837_v31, %v18838_v48 }
0x2685   : > { %22058 = vmatpush3.bf16.msra.mxu0 %v22057_v44  ;;  %22028 = vmatprep.subr.bf16.mxu1 %v22027_v32  ;;  %v18840_v52 = vsel %vm18839_vm6, %v18837_v31, %v18838_v48 }
0x2686   : > { %22060 = vmatprep.subr.bf16.mxu0 %v22059_v5  ;;  %v18841_v3 = vrot.slane %v18840_v52, 1 }
0x2688   : > { %22030 = vmatpush3.bf16.msra.mxu1 %v22029_v33  ;;  %vm18842_vm8 = vcmp.gt.s32.totalorder %v18840_v52, %v18841_v3 }
0x2689   : > { %22062 = vmatpush3.bf16.msra.mxu0 %v22061_v22  ;;  %22032 = vmatprep.subr.bf16.mxu1 %v22031_v51  ;;  %v18843_v7 = vsel %vm18842_vm8, %v18840_v52, %v18841_v3 }
0x268a   : > { %22064 = vmatprep.subr.bf16.mxu0 %v22063_v30 }
0x268c   : > { %22034 = vmatpush3.bf16.msra.mxu1 %v22033_v57 }
0x268d   : > { %22066 = vmatpush3.bf16.msra.mxu0 %v22065_v8  ;;  %22036 = vmatprep.subr.bf16.mxu1 %v22035_v21 }
0x268e   : > { %22068 = vmatprep.subr.bf16.mxu0 %v22067_v37 }
0x2690   : > { %22038 = vmatpush3.bf16.msra.mxu1 %v22037_v6 }
0x2691   : > { %22070 = vmatpush3.bf16.msra.mxu0 %v22069_v9  ;;  %22040 = vmatprep.subr.bf16.mxu1 %v22039_v38 }
0x2692   : > { %22072 = vmatprep.subr.bf16.mxu0 %v22071_v43 }
0x2694   : > { %22042 = vmatpush3.bf16.msra.mxu1 %v22041_v40 }
0x2695   : > { %22074 = vmatpush3.bf16.msra.mxu0 %v22073_v10  ;;  %21370 = vmatprep.subr.mxu1 %v27259_v15 }
0x2697   : > { %18719 = vmatmul.mubr.f32.vlgmr.msra.gmra.mrb[44].mxu1 %v17967_v27 }
0x2698   : > { %18789 = vmatmul.mubr.f32.vlgmr.msra.gmra.mrb[50].mxu0 %v17969_v50  ;;  %21372 = vmatprep.mubr.msk.f32.mxu1 %vm27340_vm15, %v27259_v15 }
0x270a   : > { %v20282_v14 = vpop.f32.mrb[38].mxu1  ;;  %v20317_v63 = vpop.f32.mrb[44].mxu0 }
0x270b   : > { %v20283_v36 = vpop.f32.mrb[39].mxu1  ;;  %v20318_v25 = vpop.f32.mrb[45].mxu0 }
0x270c   : > { %v20284_v60 = vadd.f32 %v20283_v36, %v20282_v14  ;;  %v20319_v44 = vadd.f32 %v20318_v25, %v20317_v63  ;;  %v19445_v14 = vld [vmem:[%s27414_s5] ss:$0 sm:$0xff]  ;;  %v18925_v25 = vld [vmem:[%s22846_s20 + $0x8] sm:$0xff]  ;;  %s19017_s5 = sshll.u32 %s1006_s9, 4  ;;  %s27076_s5 = int_to_ptr.vmem [resolvable:$true] %s19017_s5 }
0x270d   : > { %v18924_v36 = vld [vmem:[%s22846_s20] sm:$0xff]  ;;  %p22557_p0 = scmp.lt.s32.totalorder %s27076_s5, %s22555_s13 }
0x270e   : > { %v18301_v32 = vadd.f32 %v20284_v60, %v19444_v23  ;;  %v19446_v23 = vld [vmem:[%s27415_s12] ss:$0 sm:$0xff]  ;;  %s22550_s12 = scalar_lea.vmem %s27076_s5, 16 }
0x270f   : > { %p22551_p11 = scmp.ne.s32.totalorder %s27076_s5, %s22550_s12  ;;  %p22558_p1 = scmp.lt.s32.totalorder %s22556_s14, %s22550_s12 }
0x2710   : > { %v18371_v55 = vadd.f32 %v20319_v44, %v18301_v32  ;;  %v22076_v32 = vpack.c.bf16 %v18925_v25, %v18924_v36 }
0x2711   : > { %p22552_p12 = pnand %p22551_p11, %p22896_p5  ;;  %p22559_p2 = por %p22558_p1, %p22557_p0 }
0x2713   : > { %p22553_p13 = pneg %p22552_p12 }
0x2715   : > { %p22560_p3 = pnand %p22559_p2, %p22553_p13 }
0x272a   : > { %v20352_v13 = vpop.f32.mrb[40].mxu1  ;;  %v20387_v53 = vpop.f32.mrb[46].mxu0 }
0x272b   : > { %v20353_v5 = vpop.f32.mrb[41].mxu1  ;;  %v20388_v12 = vpop.f32.mrb[47].mxu0 }
0x272c   : > { %v20354_v62 = vadd.f32 %v20353_v5, %v20352_v13  ;;  %v20389_v4 = vadd.f32 %v20388_v12, %v20387_v53  ;;  %v18927_v13 = vld [vmem:[%s22846_s20 + $0x18] sm:$0xff]  ;;  %v18928_v5 = vld [vmem:[%s22851_s27] sm:$0x1] }
0x272e   : > { %v18441_v24 = vadd.f32 %v20354_v62, %v18371_v55  ;;  %v18926_v55 = vld [vmem:[%s22846_s20 + $0x10] sm:$0xff] }
0x272f   : > { %v22079_v39 = vpack.c.bf16 %v18927_v13, %v18926_v55 }
0x2730   : > { %v18511_v26 = vadd.f32 %v20389_v4, %v18441_v24 }
0x274a   : > { %v20422_v59 = vpop.f32.mrb[42].mxu1 }
0x274b   : > { %v20457_v33 = vpop.f32.mrb[48].mxu0  ;;  %v20423_v22 = vpop.f32.mrb[43].mxu1 }
0x274c   : > { %v20424_v51 = vadd.f32 %v20423_v22, %v20422_v59  ;;  %v20458_v34 = vpop.f32.mrb[49].mxu0 }
0x274d   : > { %v20459_v1 = vadd.f32 %v20458_v34, %v20457_v33 }
0x274e   : > { %v18581_v35 = vadd.f32 %v20424_v51, %v18511_v26 }
0x2750   : > { %v18651_v30 = vadd.f32 %v20459_v1, %v18581_v35 }
0x276a   : > { %v20492_v0 = vpop.f32.mrb[44].mxu1 }
0x276b   : > { %v20527_v41 = vpop.f32.mrb[50].mxu0  ;;  %v20493_v54 = vpop.f32.mrb[45].mxu1 }
0x276c   : > { %v20494_v57 = vadd.f32 %v20493_v54, %v20492_v0  ;;  %v20528_v8 = vpop.f32.mrb[51].mxu0 }
0x276d   : > { %v20529_v21 = vadd.f32 %v20528_v8, %v20527_v41 }
0x276e   : > { %v18721_v17 = vadd.f32 %v20494_v57, %v18651_v30 }
0x2770   : > { %v18791_v47 = vadd.f32 %v20529_v21, %v18721_v17 }
0x2772   : > { %v18794_v37 = vadd.f32 %v18791_v47, %v26661_v11 }
0x2774   : > { %v18797_v45 = vsel %vm1162_vm2, %v18794_v37, 0.0 }
0x2775   : > { %18798 = vadd.xlane.f32.xlu0 %v18797_v45 }
0x278b   : > { %18845 = vperm.xlu0 %22189, %v18843_v7  }
0x2802   : > { %v18799_v28 = vpop.xlane.xlu0 %18798 }
0x2803   : > { %v18800_v6 = vmul.f32 0.03125, %v18799_v28 }
0x2805   : > { %v18801_v16 = vsub.f32 %v18794_v37, %v18800_v6 }
0x2807   : > { %v18802_v9 = vmul.f32 %v18801_v16, %v18801_v16 }
0x2809   : > { %v18803_v38 = vsel %vm1162_vm2, %v18802_v9, 0.0 }
0x280a   : > { %18804 = vadd.xlane.f32.xlu1 %v18803_v38  ;;  %v18846_v10 = vpop.permute.xlu0 %18845 }
0x280b   : > { %v18847_v50 = vadd.s32 %v18846_v10, %v15395_v18 }
0x280d   : > { %vm18848_vm12 = vcmp.eq.s32.totalorder %v27326_v49, %v18847_v50 }
0x280e   : > { %v19447_v53 = vsel %vm18848_vm12, 1.0, %v27259_v15 }
0x2897   : > { %v18805_v11 = vpop.xlane.xlu1 %18804 }
0x2898   : > { %v18806_v46 = vmul.f32 0.03125, %v18805_v11 }
0x289a   : > { %v18807_v58 = vadd.f32 1e-05, %v18806_v46 }
0x289c   : > { %22546 = vrsqrt.f32 %v18807_v58  ;;  %vm18810_vm10 = vcmp.eq.f32.partialorder %v18807_v58, inf  ;;  %v18813_v20 = vand.u32 2147483648, %v18807_v58  ;;  %vm18812_vm3 = vcmp.eq.f32.partialorder %v18807_v58, 0.0 }
0x28a6   : > { %v22547_v43 = vpop.eup %22546 }
0x28a7   : > { %v18809_v56 = vmul.f32 %v22547_v43, %v18807_v58 }
0x28a9   : > { %v18811_v40 = vsel %vm18810_vm10, %v18807_v58, %v18809_v56 }
0x28aa   : > { %v18814_v29 = vsel %vm18812_vm3, %v18813_v20, %v18811_v40 }
0x28ab   : > { %22548 = vrcp.f32 %v18814_v29 }
0x28b5   : > { %v22549_v27 = vpop.eup %22548 }
0x28b6   : > { %v18816_v63 = vmul.f32 %v22549_v27, %v18801_v16 }
0x28b8   : > { %v18823_v60 = vmul.f32 %v19445_v14, %v18816_v63 }
0x28ba   : > { %v18830_v44 = vadd.f32 %v19446_v23, %v18823_v60 }
0x28bc   : > { %21371 = vmatpush3.msra.mxu1 %v18830_v44 }
0x28bd   : > { %21373 = vmatmul.mubr.msk.f32.vlgmr.msra.gmra.mrb[46].mxu1 %vm2118_vm13, %v19447_v53  ;;  %22075 = vmatprep.subr.bf16.mxu1 %v22681_v61  ;;  %vm19002_vm13 = vcmask 57344  }
0x28be   : > { %22077 = vmatpush3.bf16.msra.mxu1 %v22076_v32  ;;  %21383 = vmatprep.mubr.msk.f32.mxu1 %vm27340_vm15, %v27259_v15 }
0x28bf   : > { %22078 = vmatprep.subr.bf16.mxu1 %v22681_v61 }
0x28c2   : > { %22080 = vmatpush3.bf16.msra.mxu1 %v22079_v39 }
0x2990   : > { %v18920_v49 = vpop.f32.mrb[46].mxu1 }
0x2991   : > { %v21374_v18 = vpop.f32.mrb[47].mxu1  ;;  %21384 = vmatmul.mubr.msk.f32.vlgmr.msra.gmra.mrb[48].mxu1 %vm1162_vm2, %v18920_v49 }
0x2a64   : > { %v18998_v12 = vpop.f32.mrb[48].mxu1 }
0x2a65   : > { %v18999_v62 = vadd.f32 %v18998_v12, %v18928_v5  ;;  %v21385_v4 = vpop.f32.mrb[49].mxu1 }
0x2a67   : > { %19003 = vst.msk [vmem:[%s1006_s9] sm:$0x1] %vm19002_vm13, %v18999_v62 }
0x2a68   : > { %22563 = shalt.err (!%p22560_p3)
}
0x2a69   : > { %s22564_s2 = scalar_lea.hbm %s27074_s3, 16  ;;  %s22568_s6 = scalar_lea.hbm %s22856_s4, 32 }
0x2a6a   : > { %p22565_p4 = scmp.ne.s32.totalorder %s27074_s3, %s22564_s2  ;;  %p22569_p9 = scmp.lt.u32.totalorder %s27074_s3, %s22856_s4 }
0x2a6b   : > { %p22570_p10 = scmp.lt.u32.totalorder %s22568_s6, %s22564_s2  ;;  %p22572_p12 = scmp.lt.u32.totalorder %s22564_s2, %s27074_s3 }
0x2a6c   : > { %p22566_p7 = pnand %p22565_p4, %p22896_p5 }
0x2a6d   : > { %p22571_p11 = por %p22570_p10, %p22569_p9 }
0x2a6e   : > { %p22567_p8 = pneg %p22566_p7 }
0x2a6f   : > { %p22573_p0 = por %p22572_p12, %p22571_p11 }
0x2a71   : > { %p22574_p13 = pnand %p22573_p0, %p22567_p8 }
0x2a73   : > { %22577 = shalt.err (!%p22574_p13)
}
0x2a74   : > { %22081 = dma.vmem_to_hbm [thread:$0]  (%p22896_p5), %s27076_s5, 16, %s27074_s3, %s19005_s8  }
0x2a75 PF: > { %p22087_p1 = scmp.ge.s32.totalorder %s22612_s15, 2  ;;  %s19029_s14 = sand.u32 1, %s22600_s7  }
0x2a76   : > { %s19030_s12 = scalar_lea.sflag [#allocation3], %s19029_s14 }
0x2a77   : > { %p22084_p2 = pnand %p22087_p1, %p22900_p6 }
0x2a79   : > { %22595 = dma.done.wait (!%p22084_p2), %s19030_s12, 16  }
0x2a7a   : > { %22597 = vsyncadd (!%p22084_p2), %s19030_s12, 4294967280  ;;  %p77_p3 = scmp.ge.s32.totalorder %s22883_s18, 4   ;;  %s27416_s7 = smov %s22604_s10 }
0x2a7b   : > { %s27417_s10 = smov %s22608_s11  ;;  %s27418_s11 = smov %s22894_s26 }
0x2a7c   : > { %s27419_s15 = smov %s22883_s18  ;;  %79 = sbr.rel (!%p77_p3) target bundleno = 71 (0x47), region = 220 }
0x2a83   :  { %19034 = vsyncpa [#allocation3], 1 }
0x2a84   :  { %19036 = vsyncpa [#allocation3 + $0x1], 1 }

</bundles_post_ra>
